<compile_context>
chip_gen: v7x
topology: tpu7x:2x2x1
jax: 0.10.0
libtpu: 0.0.40
codegen_flags: <defaults>
</compile_context>

<pallas_src>
import jax
import jax.numpy as jnp
import numpy as np
from jax.experimental import pallas as pl
from jax.experimental.pallas import tpu as pltpu

D_MODEL = 9
SEQ_LEN = 9
STATE_SIZE = 128
EPS = 1e-5


def _round8(v):
    return ((v + 7) // 8) * 8


def _round16(v):
    return ((v + 15) // 16) * 16


def _row_layout(d_model):
    d2 = 2 * d_model
    r = _round8(d2)                      # 24 : 8-aligned stride between row groups
    front = _round16(3 * r + d2)         # 96 : [d_res | tap0 | tap1 | tap2]
    mid = _round16(3 * r + 1)            # 80 : [xco | delta_pre | Wq@xco | v.xco]
    out = _round16(d_model)              # 16 : out_proj rows (padded)
    return d2, r, front, mid, out


def _sigmoid(x):
    # sigmoid(x) = 0.5*tanh(x/2) + 0.5 : single EUP op, no divide.
    return 0.5 * jnp.tanh(0.5 * x) + 0.5


def _softplus(x):
    # matches F.softplus numerically (stable form)
    return jnp.maximum(x, 0.0) + jnp.log(1.0 + jnp.exp(-jnp.abs(x)))


def _make_kernel(d_model, seq_len):
    d2, r, front, mid_rows, _ = _row_layout(d_model)
    mo = front
    oo = front + mid_rows
    f32 = jnp.float32
    bf16 = jnp.bfloat16

    def kernel(x_ref, w_ref, b_ref, o_ref):
        x = x_ref[...]                                   # (d_model, M) f32
        m = x.shape[1]
        w = w_ref[...]                                   # (R, 2*d_model) bf16 packed
        b = b_ref[...]                                   # (R, 1) f32 packed biases

        # RMSNorm per-token scale (norm weight is folded into the packed rows).
        scale = jax.lax.rsqrt(jnp.mean(x * x, axis=0, keepdims=True) + EPS)   # (1, M)

        # Stage 1: one matmul -> D residual + the three conv-tap projections of
        # inp_proj(norm(x)).  The per-token scale commutes out of the contraction.
        px = jnp.dot(w[0:front, 0:d_model], x.astype(bf16),
                     preferred_element_type=f32)                              # (96, M)
        d_res = px[0:d2] + b[0:d2]
        q0 = px[r:r + d2] * scale + b[r:r + d2]              # tap k=0 (prev token)
        q1 = px[2 * r:2 * r + d2] * scale + b[2 * r:2 * r + d2]   # k=1 (+conv bias)
        q2 = px[3 * r:3 * r + d2] * scale + b[3 * r:3 * r + d2]   # k=2 (next token)

        # Conv1d(k=3, padding=1): lane-roll the tap outputs; zero contributions
        # that cross a sequence boundary.  Mask built in-kernel from an iota
        # (float trick computes t mod seq_len exactly without integer mod/div).
        t = jax.lax.broadcasted_iota(jnp.int32, (1, m), 1).astype(f32)
        pos = t - jnp.floor((t + 0.5) * (1.0 / seq_len)) * seq_len
        prev = jnp.where(pos > 0.5, pltpu.roll(q0, shift=1, axis=1), 0.0)
        nxt = jnp.where(pos < seq_len - 1.5, pltpu.roll(q2, shift=m - 1, axis=1), 0.0)
        xc = prev + q1 + nxt
        xca = xc * _sigmoid(xc)                                               # SiLU

        # Stage 2: one matmul fuses conv_linear with the S6 head (fc1 and the
        # B.C contraction pre-folded to an 18x18 quadratic form at pack time).
        mid = jnp.dot(w[mo:mo + mid_rows, 0:d2], xca.astype(bf16),
                      preferred_element_type=f32)                             # (80, M)
        xco = mid[0:d2] + b[mo:mo + d2]
        delta = _softplus(mid[r:r + d2] + b[mo + r:mo + r + d2])
        qq = mid[2 * r:2 * r + d2] + b[mo + 2 * r:mo + 2 * r + d2]            # Wq @ xco
        lin = mid[3 * r:3 * r + 1] + b[mo + 3 * r:mo + 3 * r + 1]             # v.xco + c0
        cb = jnp.sum(xco * qq, axis=0, keepdims=True) + lin                   # sum_n B*C

        # h starts at zero => dA*h == 0, so y = xco * delta * sum_n(C*B).
        y = xco * delta * cb
        comb = (y * _sigmoid(y)) * (d_res * _sigmoid(d_res))

        o_ref[...] = (jnp.dot(w[oo:oo + d_model, 0:d2], comb.astype(bf16),
                              preferred_element_type=f32)
                      + b[oo:oo + d_model])

    return kernel


def mamba_block(x, packed):
    """x: (batch, seq_len, d_model) float32 -> (batch, seq_len, d_model) float32."""
    b, seq_len, d_model = x.shape

    # Grid shape: 1 step on single-TC chips (v5e/v6e), 2 parallel steps on dual-TC
    # v7x.  Tokens-per-step must be 128-lane aligned (gcd(seq_len,128)==1 -> batch
    # tile multiple of 128); cap it so per-step VMEM stays well under v7x limits.
    try:
        kind = jax.devices()[0].device_kind.lower()
    except Exception:  # pragma: no cover
        kind = ""
    steps = 2 if "v7" in kind else 1
    tb = -(-b // steps)
    tb = max(128, -(-tb // 128) * 128)
    max_tb = max(128, (16384 // seq_len) // 128 * 128)
    tb = min(tb, max_tb)
    bp = -(-b // tb) * tb
    if bp != b:
        x = jnp.pad(x, ((0, bp - b), (0, 0), (0, 0)))
    m = tb * seq_len

    # Feature-major (D, tokens) layout: lane-dense compute, unmasked 128-aligned
    # output store.  These reshapes/transposes are XLA-side and fuse under jit.
    x_t = x.reshape(bp * seq_len, d_model).T

    w_pack, b_pack = packed["w"], packed["b"]

    out_t = pl.pallas_call(
        _make_kernel(d_model, seq_len),
        out_shape=jax.ShapeDtypeStruct((d_model, bp * seq_len), jnp.float32),
        grid_spec=pltpu.PrefetchScalarGridSpec(
            num_scalar_prefetch=0,
            grid=(bp // tb,),
            in_specs=[pl.BlockSpec((d_model, m), lambda g: (0, g)),
                      pl.BlockSpec(w_pack.shape, lambda g: (0, 0)),
                      pl.BlockSpec(b_pack.shape, lambda g: (0, 0))],
            out_specs=pl.BlockSpec((d_model, m), lambda g: (0, g))),
        compiler_params=pltpu.CompilerParams(dimension_semantics=("parallel",)),
    )(x_t, w_pack, b_pack)

    return out_t.T.reshape(bp, seq_len, d_model)[:b]


def init_params(key, d_model=D_MODEL, state_size=STATE_SIZE):
    """Natural (PyTorch-layout) parameters."""
    d2 = 2 * d_model

    def linear(k, out_f, in_f):
        k1, k2 = jax.random.split(k)
        bound = 1.0 / np.sqrt(in_f)
        w = jax.random.uniform(k1, (out_f, in_f), jnp.float32, -bound, bound)
        bvec = jax.random.uniform(k2, (out_f,), jnp.float32, -bound, bound)
        return w, bvec

    keys = jax.random.split(key, 9)
    inp_w, inp_b = linear(keys[0], d2, d_model)
    convlin_w, convlin_b = linear(keys[1], d2, d2)
    fc1_w, fc1_b = linear(keys[2], d2, d2)
    fc2_w, fc2_b = linear(keys[3], state_size, d2)
    fc3_w, fc3_b = linear(keys[4], state_size, d2)
    d_w, d_b = linear(keys[5], d2, d_model)
    out_w, _ = linear(keys[6], d_model, d2)
    out_b = jnp.ones((d_model,), jnp.float32)  # nn.init.constant_(out_proj.bias, 1.0)

    cbound = 1.0 / np.sqrt(d2 * 3)
    conv_w = jax.random.uniform(keys[7], (d2, d2, 3), jnp.float32, -cbound, cbound)
    conv_b = jax.random.uniform(keys[8], (d2,), jnp.float32, -cbound, cbound)

    # S6.A is initialized in the reference but never affects the output
    # (dA multiplies an all-zero h), so it is intentionally omitted.
    return dict(norm_w=jnp.ones((d_model,), jnp.float32),
                inp_w=inp_w, inp_b=inp_b,
                conv_w=conv_w, conv_b=conv_b,
                convlin_w=convlin_w, convlin_b=convlin_b,
                fc1_w=fc1_w, fc1_b=fc1_b,
                fc2_w=fc2_w, fc2_b=fc2_b,
                fc3_w=fc3_w, fc3_b=fc3_b,
                d_w=d_w, d_b=d_b,
                out_w=out_w, out_b=out_b)


def pack_params(p):
    """Fold/fuse all natural params into two packed operands (bf16 W, f32 bias)."""
    d2_chk, d_model = p["inp_w"].shape
    d2, r, front, mid, out_rows = _row_layout(d_model)
    assert d2 == d2_chk
    total = front + mid + out_rows

    def a(v):
        return np.asarray(v, np.float32)

    W = np.zeros((total, d2), np.float32)
    B = np.zeros((total, 1), np.float32)

    # ---- Stage 1: [D residual | conv-tap0 | conv-tap1 | conv-tap2] acting on x.
    w_infold = a(p["inp_w"]) * a(p["norm_w"])[None, :]          # RMSNorm weight folded
    W[0:d2, 0:d_model] = a(p["d_w"])
    B[0:d2, 0] = a(p["d_b"])
    for k in range(3):                                          # k: prev / center / next
        tap = a(p["conv_w"])[:, :, k]                           # (d2, d2)
        W[(k + 1) * r:(k + 1) * r + d2, 0:d_model] = tap @ w_infold
        B[(k + 1) * r:(k + 1) * r + d2, 0] = tap @ a(p["inp_b"])
    B[2 * r:2 * r + d2, 0] += a(p["conv_b"])                    # conv bias rides center tap

    # ---- Stage 2: [conv_linear | fc1 | Wq | v] acting on silu(conv out); the
    # (128,d2) B/C projections are pre-contracted into an 18x18 quadratic form.
    mo = front
    wcl, bcl = a(p["convlin_w"]), a(p["convlin_b"])
    fc1w, fc1b = a(p["fc1_w"]), a(p["fc1_b"])
    fc2w, fc2b = a(p["fc2_w"]), a(p["fc2_b"])
    fc3w, fc3b = a(p["fc3_w"]), a(p["fc3_b"])
    wq = fc2w.T @ fc3w                                          # (d2, d2)
    v = fc3w.T @ fc2b + fc2w.T @ fc3b                           # (d2,)
    c0 = float(fc2b @ fc3b)

    W[mo:mo + d2, 0:d2] = wcl
    B[mo:mo + d2, 0] = bcl
    W[mo + r:mo + r + d2, 0:d2] = fc1w @ wcl
    B[mo + r:mo + r + d2, 0] = fc1w @ bcl + fc1b
    W[mo + 2 * r:mo + 2 * r + d2, 0:d2] = wq @ wcl
    B[mo + 2 * r:mo + 2 * r + d2, 0] = wq @ bcl
    W[mo + 3 * r, 0:d2] = v @ wcl
    B[mo + 3 * r, 0] = v @ bcl + c0

    # ---- Stage 3: out_proj.
    oo = front + mid
    W[oo:oo + d_model, 0:d2] = a(p["out_w"])
    B[oo:oo + d_model, 0] = a(p["out_b"])

    return dict(w=jnp.asarray(W, jnp.bfloat16), b=jnp.asarray(B, jnp.float32))


def reference(x, p):
    """Pure-JAX transcription of the PyTorch forward (for validation)."""
    ms = jnp.mean(x ** 2, -1, keepdims=True)
    xn = x * jax.lax.rsqrt(ms + EPS) * p["norm_w"]
    xp = xn @ p["inp_w"].T + p["inp_b"]
    xpad = jnp.pad(xp, ((0, 0), (1, 1), (0, 0)))
    xc = (xpad[:, :-2] @ p["conv_w"][:, :, 0].T
          + xpad[:, 1:-1] @ p["conv_w"][:, :, 1].T
          + xpad[:, 2:] @ p["conv_w"][:, :, 2].T + p["conv_b"])
    xca = xc * jax.nn.sigmoid(xc)
    xco = xca @ p["convlin_w"].T + p["convlin_b"]
    Bm = xco @ p["fc2_w"].T + p["fc2_b"]
    Cm = xco @ p["fc3_w"].T + p["fc3_b"]
    delta = jax.nn.softplus(xco @ p["fc1_w"].T + p["fc1_b"])
    dB = jnp.einsum("bld,bln->bldn", delta, Bm)
    h = xco[..., None] * dB
    y = jnp.einsum("bln,bldn->bld", Cm, h)
    xact = y * jax.nn.sigmoid(y)
    xres_lin = x @ p["d_w"].T + p["d_b"]
    xres = xres_lin * jax.nn.sigmoid(xres_lin)
    comb = xact * xres
    return comb @ p["out_w"].T + p["out_b"]


if __name__ == "__main__":
    key = jax.random.PRNGKey(0)
    kx, kp = jax.random.split(key)

    batch = 256   # matches the module's batch_size; exercises the tiled/batched path
    x = jax.random.normal(kx, (batch, SEQ_LEN, D_MODEL), jnp.float32)
    params = init_params(kp)
    packed = pack_params(params)

    fwd = jax.jit(lambda xx: mamba_block(xx, packed))
    out = jax.block_until_ready(fwd(x))

    ref = reference(x, params)
    np.testing.assert_allclose(np.asarray(out), np.asarray(ref), rtol=2e-2, atol=2e-2)

    print("KERNEL_OK")
</pallas_src>

<mosaic_0001>
module attributes {stable_mosaic.version = 11 : i64} {
  func.func @kernel(%arg0: i32, %arg1: memref<9x2304xf32, #tpu.memory_space<vmem>>, %arg2: memref<192x18xbf16, #tpu.memory_space<vmem>>, %arg3: memref<192x1xf32, #tpu.memory_space<vmem>>, %arg4: memref<9x2304xf32, #tpu.memory_space<vmem>>) attributes {dimension_semantics = [#tpu.dimension_semantics<parallel>], iteration_bounds = array<i64: 1>, scalar_prefetch = 0 : i64, scratch_operands = 0 : i64, tpu.core_type = #tpu.core_type<tc>, window_params = [{transform_indices = @transform_0, window_bounds = array<i64: 9, 2304>}, {pipeline_mode = #tpu.pipeline_mode<synchronous>, transform_indices = @transform_1, window_bounds = array<i64: 192, 18>}, {pipeline_mode = #tpu.pipeline_mode<synchronous>, transform_indices = @transform_2, window_bounds = array<i64: 192, 1>}, {transform_indices = @transform_3, window_bounds = array<i64: 9, 2304>}]} {
    %c0 = arith.constant 0 : index
    %c0_0 = arith.constant 0 : index
    %0 = vector.load %arg1[%c0, %c0_0] : memref<9x2304xf32, #tpu.memory_space<vmem>>, vector<9x2304xf32>
    %c0_1 = arith.constant 0 : index
    %c0_2 = arith.constant 0 : index
    %1 = vector.load %arg2[%c0_1, %c0_2] : memref<192x18xbf16, #tpu.memory_space<vmem>>, vector<192x18xbf16>
    %c0_3 = arith.constant 0 : index
    %c0_4 = arith.constant 0 : index
    %2 = vector.load %arg3[%c0_3, %c0_4] : memref<192x1xf32, #tpu.memory_space<vmem>>, vector<192x1xf32>
    %3 = arith.mulf %0, %0 : vector<9x2304xf32>
    %cst = arith.constant dense<0.000000e+00> : vector<2304xf32>
    %4 = vector.multi_reduction <add>, %3, %cst [0] : vector<9x2304xf32> to vector<2304xf32>
    %5 = vector.shape_cast %4 : vector<2304xf32> to vector<1x2304xf32>
    %cst_5 = arith.constant 9.000000e+00 : f32
    %6 = vector.broadcast %cst_5 : f32 to vector<1x2304xf32>
    %7 = arith.divf %5, %6 : vector<1x2304xf32>
    %cst_6 = arith.constant 9.99999974E-6 : f32
    %8 = vector.broadcast %cst_6 : f32 to vector<1x2304xf32>
    %9 = arith.addf %7, %8 : vector<1x2304xf32>
    %10 = math.rsqrt %9 : vector<1x2304xf32>
    %11 = vector.extract_strided_slice %1 {offsets = [0, 0], sizes = [96, 9], strides = [1, 1]} : vector<192x18xbf16> to vector<96x9xbf16>
    %12 = arith.truncf %0 : vector<9x2304xf32> to vector<9x2304xbf16>
    %cst_7 = arith.constant dense<0.000000e+00> : vector<96x2304xf32>
    %13 = tpu.matmul %11, %12, %cst_7 {dimension_numbers = #tpu.dot_dimension_numbers<[1], [0], [0], [1], [0, 0, 1, 1], [], []>} : vector<96x9xbf16>, vector<9x2304xbf16>, vector<96x2304xf32> -> vector<96x2304xf32>
    %14 = vector.extract_strided_slice %13 {offsets = [0, 0], sizes = [18, 2304], strides = [1, 1]} : vector<96x2304xf32> to vector<18x2304xf32>
    %15 = vector.extract_strided_slice %2 {offsets = [0, 0], sizes = [18, 1], strides = [1, 1]} : vector<192x1xf32> to vector<18x1xf32>
    %16 = vector.broadcast %15 : vector<18x1xf32> to vector<18x2304xf32>
    %17 = arith.addf %14, %16 : vector<18x2304xf32>
    %18 = vector.extract_strided_slice %13 {offsets = [24, 0], sizes = [18, 2304], strides = [1, 1]} : vector<96x2304xf32> to vector<18x2304xf32>
    %19 = vector.broadcast %10 : vector<1x2304xf32> to vector<18x2304xf32>
    %20 = arith.mulf %18, %19 : vector<18x2304xf32>
    %21 = vector.extract_strided_slice %2 {offsets = [24, 0], sizes = [18, 1], strides = [1, 1]} : vector<192x1xf32> to vector<18x1xf32>
    %22 = vector.broadcast %21 : vector<18x1xf32> to vector<18x2304xf32>
    %23 = arith.addf %20, %22 : vector<18x2304xf32>
    %24 = vector.extract_strided_slice %13 {offsets = [48, 0], sizes = [18, 2304], strides = [1, 1]} : vector<96x2304xf32> to vector<18x2304xf32>
    %25 = vector.broadcast %10 : vector<1x2304xf32> to vector<18x2304xf32>
    %26 = arith.mulf %24, %25 : vector<18x2304xf32>
    %27 = vector.extract_strided_slice %2 {offsets = [48, 0], sizes = [18, 1], strides = [1, 1]} : vector<192x1xf32> to vector<18x1xf32>
    %28 = vector.broadcast %27 : vector<18x1xf32> to vector<18x2304xf32>
    %29 = arith.addf %26, %28 : vector<18x2304xf32>
    %30 = vector.extract_strided_slice %13 {offsets = [72, 0], sizes = [18, 2304], strides = [1, 1]} : vector<96x2304xf32> to vector<18x2304xf32>
    %31 = vector.broadcast %10 : vector<1x2304xf32> to vector<18x2304xf32>
    %32 = arith.mulf %30, %31 : vector<18x2304xf32>
    %33 = vector.extract_strided_slice %2 {offsets = [72, 0], sizes = [18, 1], strides = [1, 1]} : vector<192x1xf32> to vector<18x1xf32>
    %34 = vector.broadcast %33 : vector<18x1xf32> to vector<18x2304xf32>
    %35 = arith.addf %32, %34 : vector<18x2304xf32>
    %36 = tpu.iota {dimensions = array<i32: 1>} : vector<1x2304xi32>
    %37 = arith.sitofp %36 : vector<1x2304xi32> to vector<1x2304xf32>
    %cst_8 = arith.constant 5.000000e-01 : f32
    %38 = vector.broadcast %cst_8 : f32 to vector<1x2304xf32>
    %39 = arith.addf %37, %38 : vector<1x2304xf32>
    %cst_9 = arith.constant 0.111111112 : f32
    %40 = vector.broadcast %cst_9 : f32 to vector<1x2304xf32>
    %41 = arith.mulf %39, %40 : vector<1x2304xf32>
    %42 = math.floor %41 : vector<1x2304xf32>
    %cst_10 = arith.constant 9.000000e+00 : f32
    %43 = vector.broadcast %cst_10 : f32 to vector<1x2304xf32>
    %44 = arith.mulf %42, %43 : vector<1x2304xf32>
    %45 = arith.subf %37, %44 : vector<1x2304xf32>
    %cst_11 = arith.constant 5.000000e-01 : f32
    %46 = vector.broadcast %cst_11 : f32 to vector<1x2304xf32>
    %47 = arith.cmpf ogt, %45, %46 : vector<1x2304xf32>
    %c1_i32 = arith.constant 1 : i32
    %48 = tpu.dynamic_rotate %23 by %c1_i32 dim 1 : vector<18x2304xf32>, i32 -> vector<18x2304xf32>
    %cst_12 = arith.constant 0.000000e+00 : f32
    %49 = vector.shape_cast %47 : vector<1x2304xi1> to vector<1x2304xi1>
    %50 = vector.broadcast %49 : vector<1x2304xi1> to vector<18x2304xi1>
    %51 = vector.broadcast %cst_12 : f32 to vector<18x2304xf32>
    %52 = arith.select %50, %48, %51 : vector<18x2304xi1>, vector<18x2304xf32>
    %cst_13 = arith.constant 7.500000e+00 : f32
    %53 = vector.broadcast %cst_13 : f32 to vector<1x2304xf32>
    %54 = arith.cmpf olt, %45, %53 : vector<1x2304xf32>
    %c2303_i32 = arith.constant 2303 : i32
    %55 = tpu.dynamic_rotate %35 by %c2303_i32 dim 1 : vector<18x2304xf32>, i32 -> vector<18x2304xf32>
    %cst_14 = arith.constant 0.000000e+00 : f32
    %56 = vector.shape_cast %54 : vector<1x2304xi1> to vector<1x2304xi1>
    %57 = vector.broadcast %56 : vector<1x2304xi1> to vector<18x2304xi1>
    %58 = vector.broadcast %cst_14 : f32 to vector<18x2304xf32>
    %59 = arith.select %57, %55, %58 : vector<18x2304xi1>, vector<18x2304xf32>
    %60 = arith.addf %52, %29 : vector<18x2304xf32>
    %61 = arith.addf %60, %59 : vector<18x2304xf32>
    %cst_15 = arith.constant 5.000000e-01 : f32
    %62 = vector.broadcast %cst_15 : f32 to vector<18x2304xf32>
    %63 = arith.mulf %62, %61 : vector<18x2304xf32>
    %64 = math.tanh %63 : vector<18x2304xf32>
    %cst_16 = arith.constant 5.000000e-01 : f32
    %65 = vector.broadcast %cst_16 : f32 to vector<18x2304xf32>
    %66 = arith.mulf %65, %64 : vector<18x2304xf32>
    %cst_17 = arith.constant 5.000000e-01 : f32
    %67 = vector.broadcast %cst_17 : f32 to vector<18x2304xf32>
    %68 = arith.addf %66, %67 : vector<18x2304xf32>
    %69 = arith.mulf %61, %68 : vector<18x2304xf32>
    %70 = vector.extract_strided_slice %1 {offsets = [96, 0], sizes = [80, 18], strides = [1, 1]} : vector<192x18xbf16> to vector<80x18xbf16>
    %71 = arith.truncf %69 : vector<18x2304xf32> to vector<18x2304xbf16>
    %cst_18 = arith.constant dense<0.000000e+00> : vector<80x2304xf32>
    %72 = tpu.matmul %70, %71, %cst_18 {dimension_numbers = #tpu.dot_dimension_numbers<[1], [0], [0], [1], [0, 0, 1, 1], [], []>} : vector<80x18xbf16>, vector<18x2304xbf16>, vector<80x2304xf32> -> vector<80x2304xf32>
    %73 = vector.extract_strided_slice %72 {offsets = [0, 0], sizes = [18, 2304], strides = [1, 1]} : vector<80x2304xf32> to vector<18x2304xf32>
    %74 = vector.extract_strided_slice %2 {offsets = [96, 0], sizes = [18, 1], strides = [1, 1]} : vector<192x1xf32> to vector<18x1xf32>
    %75 = vector.broadcast %74 : vector<18x1xf32> to vector<18x2304xf32>
    %76 = arith.addf %73, %75 : vector<18x2304xf32>
    %77 = vector.extract_strided_slice %72 {offsets = [24, 0], sizes = [18, 2304], strides = [1, 1]} : vector<80x2304xf32> to vector<18x2304xf32>
    %78 = vector.extract_strided_slice %2 {offsets = [120, 0], sizes = [18, 1], strides = [1, 1]} : vector<192x1xf32> to vector<18x1xf32>
    %79 = vector.broadcast %78 : vector<18x1xf32> to vector<18x2304xf32>
    %80 = arith.addf %77, %79 : vector<18x2304xf32>
    %cst_19 = arith.constant 0.000000e+00 : f32
    %81 = vector.broadcast %cst_19 : f32 to vector<18x2304xf32>
    %82 = arith.maximumf %80, %81 : vector<18x2304xf32>
    %83 = math.absf %80 : vector<18x2304xf32>
    %cst_20 = arith.constant 0.000000e+00 : f32
    %84 = vector.broadcast %cst_20 : f32 to vector<18x2304xf32>
    %85 = arith.subf %84, %83 : vector<18x2304xf32>
    %86 = math.exp %85 : vector<18x2304xf32>
    %cst_21 = arith.constant 1.000000e+00 : f32
    %87 = vector.broadcast %cst_21 : f32 to vector<18x2304xf32>
    %88 = arith.addf %87, %86 : vector<18x2304xf32>
    %89 = math.log %88 : vector<18x2304xf32>
    %90 = arith.addf %82, %89 : vector<18x2304xf32>
    %91 = vector.extract_strided_slice %72 {offsets = [48, 0], sizes = [18, 2304], strides = [1, 1]} : vector<80x2304xf32> to vector<18x2304xf32>
    %92 = vector.extract_strided_slice %2 {offsets = [144, 0], sizes = [18, 1], strides = [1, 1]} : vector<192x1xf32> to vector<18x1xf32>
    %93 = vector.broadcast %92 : vector<18x1xf32> to vector<18x2304xf32>
    %94 = arith.addf %91, %93 : vector<18x2304xf32>
    %95 = vector.extract_strided_slice %72 {offsets = [72, 0], sizes = [1, 2304], strides = [1, 1]} : vector<80x2304xf32> to vector<1x2304xf32>
    %96 = vector.extract_strided_slice %2 {offsets = [168, 0], sizes = [1, 1], strides = [1, 1]} : vector<192x1xf32> to vector<1x1xf32>
    %97 = vector.broadcast %96 : vector<1x1xf32> to vector<1x2304xf32>
    %98 = arith.addf %95, %97 : vector<1x2304xf32>
    %99 = arith.mulf %76, %94 : vector<18x2304xf32>
    %cst_22 = arith.constant dense<0.000000e+00> : vector<2304xf32>
    %100 = vector.multi_reduction <add>, %99, %cst_22 [0] : vector<18x2304xf32> to vector<2304xf32>
    %101 = vector.shape_cast %100 : vector<2304xf32> to vector<1x2304xf32>
    %102 = arith.addf %101, %98 : vector<1x2304xf32>
    %103 = arith.mulf %76, %90 : vector<18x2304xf32>
    %104 = vector.broadcast %102 : vector<1x2304xf32> to vector<18x2304xf32>
    %105 = arith.mulf %103, %104 : vector<18x2304xf32>
    %cst_23 = arith.constant 5.000000e-01 : f32
    %106 = vector.broadcast %cst_23 : f32 to vector<18x2304xf32>
    %107 = arith.mulf %106, %105 : vector<18x2304xf32>
    %108 = math.tanh %107 : vector<18x2304xf32>
    %cst_24 = arith.constant 5.000000e-01 : f32
    %109 = vector.broadcast %cst_24 : f32 to vector<18x2304xf32>
    %110 = arith.mulf %109, %108 : vector<18x2304xf32>
    %cst_25 = arith.constant 5.000000e-01 : f32
    %111 = vector.broadcast %cst_25 : f32 to vector<18x2304xf32>
    %112 = arith.addf %110, %111 : vector<18x2304xf32>
    %113 = arith.mulf %105, %112 : vector<18x2304xf32>
    %cst_26 = arith.constant 5.000000e-01 : f32
    %114 = vector.broadcast %cst_26 : f32 to vector<18x2304xf32>
    %115 = arith.mulf %114, %17 : vector<18x2304xf32>
    %116 = math.tanh %115 : vector<18x2304xf32>
    %cst_27 = arith.constant 5.000000e-01 : f32
    %117 = vector.broadcast %cst_27 : f32 to vector<18x2304xf32>
    %118 = arith.mulf %117, %116 : vector<18x2304xf32>
    %cst_28 = arith.constant 5.000000e-01 : f32
    %119 = vector.broadcast %cst_28 : f32 to vector<18x2304xf32>
    %120 = arith.addf %118, %119 : vector<18x2304xf32>
    %121 = arith.mulf %17, %120 : vector<18x2304xf32>
    %122 = arith.mulf %113, %121 : vector<18x2304xf32>
    %123 = vector.extract_strided_slice %1 {offsets = [176, 0], sizes = [9, 18], strides = [1, 1]} : vector<192x18xbf16> to vector<9x18xbf16>
    %124 = arith.truncf %122 : vector<18x2304xf32> to vector<18x2304xbf16>
    %cst_29 = arith.constant dense<0.000000e+00> : vector<9x2304xf32>
    %125 = tpu.matmul %123, %124, %cst_29 {dimension_numbers = #tpu.dot_dimension_numbers<[1], [0], [0], [1], [0, 0, 1, 1], [], []>} : vector<9x18xbf16>, vector<18x2304xbf16>, vector<9x2304xf32> -> vector<9x2304xf32>
    %126 = vector.extract_strided_slice %2 {offsets = [176, 0], sizes = [9, 1], strides = [1, 1]} : vector<192x1xf32> to vector<9x1xf32>
    %127 = vector.broadcast %126 : vector<9x1xf32> to vector<9x2304xf32>
    %128 = arith.addf %125, %127 : vector<9x2304xf32>
    %c0_30 = arith.constant 0 : index
    %c0_31 = arith.constant 0 : index
    %129 = vector.load %arg4[%c0_30, %c0_31] : memref<9x2304xf32, #tpu.memory_space<vmem>>, vector<9x2304xf32>
    tpu.vector_store %arg4[%c0_30, %c0_31], %128 {strides = array<i32>} : memref<9x2304xf32, #tpu.memory_space<vmem>>, vector<9x2304xf32>,
    return
  }
  func.func @transform_0(%arg0: i32) -> (i32, i32) {
    %c0_i32 = arith.constant 0 : i32
    %c0_i32_0 = arith.constant 0 : i32
    return %c0_i32, %arg0 : i32, i32
  }
  func.func @transform_1(%arg0: i32) -> (i32, i32) {
    %c0_i32 = arith.constant 0 : i32
    %c0_i32_0 = arith.constant 0 : i32
    %c0_i32_1 = arith.constant 0 : i32
    return %c0_i32, %c0_i32_0 : i32, i32
  }
  func.func @transform_2(%arg0: i32) -> (i32, i32) {
    %c0_i32 = arith.constant 0 : i32
    %c0_i32_0 = arith.constant 0 : i32
    %c0_i32_1 = arith.constant 0 : i32
    return %c0_i32, %c0_i32_0 : i32, i32
  }
  func.func @transform_3(%arg0: i32) -> (i32, i32) {
    %c0_i32 = arith.constant 0 : i32
    %c0_i32_0 = arith.constant 0 : i32
    return %c0_i32, %arg0 : i32, i32
  }
}

</mosaic_0001>

<bundles_post_ra>
// kernel: _lambda_.1
= control target key start
LH: loop header
LB: loop body
LE: loop exit
PB: predicated region body
PF: predicated region fallthrough
CT: control target
= control target key end

     0   :  { %vm135_vm0 = vcmask 1040384   ;;  %vm402_vm1 = vcmask 1043456   ;;  %vm403_vm2 = vcmask 1044480   ;;  %v6659_v2 = vmov 65535   ;;  %s6662_s6 = smov 127   ;;  %s12040_s0 = inlined_call_operand.vmem [shape: f32[9,2304], index: 0, kind: input, shape index: {}]   ;;  %s12041_s1 = inlined_call_operand.vmem [shape: bf16[192,18], index: 1, kind: input, shape index: {}]   ;;  %s12042_s2 = inlined_call_operand.vmem [shape: f32[192,1], index: 2, kind: input, shape index: {}]   ;;  %s12043_s3 = inlined_call_operand.vmem [shape: f32[9,2304], index: 3, kind: output, shape index: {}]  }
   0x1   :  { %v16_v0 = vld [vmem:[%s12040_s0 + $0x8] sm:$0xff]  ;;  %v34_v1 = vld [vmem:[%s12040_s0 + $0x98] sm:$0x1]  ;;  %v404_v3 = vsel %vm402_vm1, 4294967295, %v6659_v2  ;;  %v15_v10 = vld [vmem:[%s12040_s0] sm:$0xff]  ;;  %v12044_v12 = vmov 0  }
   0x2   :  { %v18_v4 = vld [vmem:[%s12040_s0 + $0x18] sm:$0xff]  ;;  %v100_v5 = vmul.f32 %v16_v0, %v16_v0  ;;  %v118_v6 = vmul.f32 %v34_v1, %v34_v1  ;;  %v336_v7 = vpack.c.bf16 %v34_v1, %v16_v0  ;;  %v6692_v8 = vsel %vm403_vm2, %v404_v3, 0  ;;  %v36_v9 = vld [vmem:[%s12040_s0 + $0xa8] sm:$0x1]  ;;  %v33_v11 = vld [vmem:[%s12040_s0 + $0x90] sm:$0x1]  ;;  %492 = vmatprep.mubr.bf16.mxu0 %v12044_v12  ;;  %585 = vmatprep.mubr.bf16.mxu1 %v12044_v12 }
   0x3   :  { %v102_v13 = vmul.f32 %v18_v4, %v18_v4  ;;  %v120_v14 = vmul.f32 %v36_v9, %v36_v9  ;;  %v338_v15 = vpack.c.bf16 %v36_v9, %v18_v4  ;;  %v99_v16 = vmul.f32 %v15_v10, %v15_v10  ;;  %v35_v17 = vld [vmem:[%s12040_s0 + $0xa0] sm:$0x1]  ;;  %6062 = vset.pattern.permute.xlu0 %v12044_v12  ;;  %v17_v22 = vld [vmem:[%s12040_s0 + $0x10] sm:$0xff]  ;;  %v20_v37 = vld [vmem:[%s12040_s0 + $0x28] sm:$0xff] }
   0x4   :  { %v144_v18 = vsel %vm135_vm0, %v118_v6, 0.0  ;;  %v410_v19 = vand.u32 %v6692_v8, %v336_v7  ;;  %v117_v20 = vmul.f32 %v33_v11, %v33_v11  ;;  %v335_v21 = vpack.c.bf16 %v33_v11, %v15_v10  ;;  %6063 = vset.pattern.permute.xlu1 %v12044_v12  ;;  %v6728_v33 = vld [vmem:[%s12041_s1] sm:$0xff]   ;;  %v38_v38 = vld [vmem:[%s12040_s0 + $0xb8] sm:$0x1]  ;;  %v37_v43 = vld [vmem:[%s12040_s0 + $0xb0] sm:$0x1] }
   0x5   :  { %v6715_v23 = vadd.f32 %v144_v18, %v100_v5  ;;  %v160_v24 = vsel %vm135_vm0, %v120_v14, 0.0  ;;  %v416_v25 = vand.u32 %v6692_v8, %v338_v15  ;;  %v101_v26 = vmul.f32 %v17_v22, %v17_v22  ;;  %v19_v42 = vld [vmem:[%s12040_s0 + $0x20] sm:$0xff]  ;;  %v6758_v49 = vld [vmem:[%s12041_s1 + $0x8] sm:$0xff]   ;;  %v22_v52 = vld [vmem:[%s12040_s0 + $0x38] sm:$0xff] }
   0x6   :  { %460 = vmatprep.subr.bf16.mxu0 %v410_v19  ;;  %v6719_v27 = vadd.f32 %v160_v24, %v102_v13  ;;  %v136_v28 = vsel %vm135_vm0, %v117_v20, 0.0  ;;  %v407_v29 = vand.u32 %v6692_v8, %v335_v21  ;;  %v119_v30 = vmul.f32 %v35_v17, %v35_v17  ;;  %v40_v53 = vld [vmem:[%s12040_s0 + $0xc8] sm:$0x1]  ;;  %v78_v54 = vld [vmem:[%s12042_s2 + $0x18] sm:$0xff]  ;;  %v79_v60 = vld [vmem:[%s12042_s2 + $0x20] sm:$0xff] }
   0x7   :  { %553 = vmatprep.subr.bf16.mxu1 %v416_v25  ;;  %v6723_v31 = vadd.f32 %v136_v28, %v99_v16  ;;  %v337_v32 = vpack.c.bf16 %v35_v17, %v17_v22  ;;  %vm383_vm3 = vcmask 72704   ;;  %v104_v39 = vmul.f32 %v20_v37, %v20_v37  ;;  %1422 = vperm.xlu0 %6062, %v78_v54   ;;  %v84_v59 = vld [vmem:[%s12042_s2 + $0x48] sm:$0xff]  ;;  %v85_v63 = vld [vmem:[%s12042_s2 + $0x50] sm:$0xff]  ;;  %v39_v4 = vld [vmem:[%s12040_s0 + $0xc0] sm:$0x1] }
   0x8   :  { %461 = vmatpush1.bf16.msra.mxu0 %v407_v29  ;;  %v152_v34 = vsel %vm135_vm0, %v119_v30, 0.0  ;;  %v122_v40 = vmul.f32 %v38_v38, %v38_v38  ;;  %v340_v41 = vpack.c.bf16 %v38_v38, %v20_v37  ;;  %v103_v46 = vmul.f32 %v19_v42, %v19_v42  ;;  %1668 = vperm.xlu1 %6063, %v84_v59   ;;  %v80_v2 = vld [vmem:[%s12042_s2 + $0x28] sm:$0xff]  ;;  %v21_v3 = vld [vmem:[%s12040_s0 + $0x30] sm:$0xff]  ;;  %v86_v5 = vld [vmem:[%s12042_s2 + $0x58] sm:$0xff] }
   0x9   :  { %v6731_v35 = vadd.f32 %v152_v34, %v101_v26  ;;  %v413_v36 = vand.u32 %v6692_v8, %v337_v32  ;;  %v121_v47 = vmul.f32 %v37_v43, %v37_v43  ;;  %v339_v51 = vpack.c.bf16 %v37_v43, %v19_v42  ;;  %v6808_v6 = vld [vmem:[%s12041_s1 + $0x10] sm:$0xff]   ;;  %v24_v10 = vld [vmem:[%s12040_s0 + $0x48] sm:$0xff]  ;;  %v42_v13 = vld [vmem:[%s12040_s0 + $0xd8] sm:$0x1] }
   0xa   :  { %v176_v44 = vsel %vm135_vm0, %v122_v40, 0.0  ;;  %v422_v45 = vand.u32 %v6692_v8, %v340_v41  ;;  %v106_v57 = vmul.f32 %v22_v52, %v22_v52  ;;  %v124_v58 = vmul.f32 %v40_v53, %v40_v53  ;;  %v6820_v15 = vld [vmem:[%s12040_s0 + $0x40] sm:$0xff]  ;;  %v6825_v16 = vld [vmem:[%s12040_s0 + $0xd0] sm:$0x1]  ;;  %v82_v21 = vld [vmem:[%s12042_s2 + $0x38] sm:$0xff] }
   0xb   :  { %554 = vmatpush1.bf16.msra.mxu1 %v413_v36  ;;  %5926 = vmatmul.mubr.msk.bf16.vlgmr.msra.gmra.mrb[0].mxu0 %vm383_vm3, %v6728_v33  ;;  %v6751_v48 = vadd.f32 %v176_v44, %v104_v39  ;;  %v168_v50 = vsel %vm135_vm0, %v121_v47, 0.0  ;;  %v419_v56 = vand.u32 %v6692_v8, %v339_v51  ;;  %v342_v62 = vpack.c.bf16 %v40_v53, %v22_v52  ;;  %v81_v17 = vld [vmem:[%s12042_s2 + $0x30] sm:$0xff]  ;;  %v83_v30 = vld [vmem:[%s12042_s2 + $0x40] sm:$0xff]  ;;  %v6854_v32 = vld [vmem:[%s12041_s1 + $0x18] sm:$0xff]  }
   0xc   :  { %502 = vmatprep.mubr.bf16.mxu0 %v12044_v12  ;;  %646 = vmatprep.subr.bf16.mxu0 %v422_v45  ;;  %v6771_v55 = vadd.f32 %v168_v50, %v103_v46  ;;  %v192_v61 = vsel %vm135_vm0, %v124_v58, 0.0  ;;  %v105_v7 = vmul.f32 %v21_v3, %v21_v3  ;;  %v123_v9 = vmul.f32 %v39_v4, %v39_v4  ;;  %v26_v38 = vld [vmem:[%s12040_s0 + $0x58] sm:$0xff]  ;;  %v44_v39 = vld [vmem:[%s12040_s0 + $0xe8] sm:$0x1]  ;;  %v25_v44 = vld [vmem:[%s12040_s0 + $0x50] sm:$0xff] }
   0xd   :  { %647 = vmatpush1.bf16.msra.mxu0 %v419_v56  ;;  %v6787_v0 = vadd.f32 %v192_v61, %v106_v57  ;;  %v428_v1 = vand.u32 %v6692_v8, %v342_v62  ;;  %1427 = vperm.xlu0 %6062, %v79_v60   ;;  %v341_v11 = vpack.c.bf16 %v39_v4, %v21_v3  ;;  %v43_v46 = vld [vmem:[%s12040_s0 + $0xe0] sm:$0x1]  ;;  %v28_v54 = vld [vmem:[%s12040_s0 + $0x68] sm:$0xff]  ;;  %v46_v57 = vld [vmem:[%s12040_s0 + $0xf8] sm:$0x1] }
   0xe   :  { %5932 = vmatmul.mubr.msk.bf16.vlgmr.msra.gmra.mrb[0].mxu1 %vm383_vm3, %v6728_v33  ;;  %1673 = vperm.xlu1 %6063, %v85_v63   ;;  %v184_v14 = vsel %vm135_vm0, %v123_v9, 0.0  ;;  %v108_v20 = vmul.f32 %v24_v10, %v24_v10  ;;  %v126_v22 = vmul.f32 %v42_v13, %v42_v13  ;;  %v344_v24 = vpack.c.bf16 %v42_v13, %v24_v10  ;;  %v6886_v52 = vld [vmem:[%s12041_s1 + $0x20] sm:$0xff]   ;;  %v45_v61 = vld [vmem:[%s12040_s0 + $0xf0] sm:$0x1]  ;;  %v6915_v4 = vld [vmem:[%s12041_s1 + $0x28] sm:$0xff]  }
   0xf   :  { %595 = vmatprep.mubr.bf16.mxu1 %v12044_v12  ;;  %739 = vmatprep.subr.bf16.mxu1 %v428_v1  ;;  %v6832_v18 = vadd.f32 %v184_v14, %v105_v7  ;;  %v425_v19 = vand.u32 %v6692_v8, %v341_v11  ;;  %v107_v25 = vmul.f32 %v6820_v15, %v6820_v15  ;;  %v27_v60 = vld [vmem:[%s12040_s0 + $0x60] sm:$0xff]  ;;  %v30_v9 = vld [vmem:[%s12040_s0 + $0x78] sm:$0xff]  ;;  %v48_v10 = vld [vmem:[%s12040_s0 + $0x108] sm:$0x1] }
  0x10   :  { %v125_v26 = vmul.f32 %v6825_v16, %v6825_v16  ;;  %v208_v28 = vsel %vm135_vm0, %v126_v22, 0.0  ;;  %v434_v29 = vand.u32 %v6692_v8, %v344_v24  ;;  %v110_v40 = vmul.f32 %v26_v38, %v26_v38 }
  0x11   :  { %1432 = vperm.xlu0 %6062, %v80_v2   ;;  %740 = vmatpush1.bf16.msra.mxu1 %v425_v19  ;;  %v6856_v34 = vadd.f32 %v208_v28, %v108_v20  ;;  %v128_v41 = vmul.f32 %v44_v39, %v44_v39  ;;  %v346_v43 = vpack.c.bf16 %v44_v39, %v26_v38  ;;  %v47_v19 = vld [vmem:[%s12040_s0 + $0x100] sm:$0x1] }
  0x12   :  { %1678 = vperm.xlu1 %6063, %v86_v5   ;;  %v200_v36 = vsel %vm135_vm0, %v125_v26, 0.0  ;;  %832 = vmatprep.subr.bf16.mxu0 %v434_v29  ;;  %v109_v47 = vmul.f32 %v25_v44, %v25_v44  ;;  %v127_v51 = vmul.f32 %v43_v46, %v43_v46  ;;  %v112_v58 = vmul.f32 %v28_v54, %v28_v54 }
  0x13   :  { %5927 = vmatmul.mubr.msk.bf16.gmra.mrb[4].mxu0 %vm383_vm3, %v6758_v49  ;;  %v6859_v37 = vadd.f32 %v200_v36, %v107_v25  ;;  %v224_v42 = vsel %vm135_vm0, %v128_v41, 0.0  ;;  %v440_v50 = vand.u32 %v6692_v8, %v346_v43  ;;  %v130_v59 = vmul.f32 %v46_v57, %v46_v57  ;;  %v50_v43 = vld [vmem:[%s12040_s0 + $0x118] sm:$0x1] }
  0x14   :  { %512 = vmatprep.mubr.bf16.mxu0 %v12044_v12  ;;  %v6874_v45 = vadd.f32 %v224_v42, %v110_v40  ;;  %v216_v53 = vsel %vm135_vm0, %v127_v51, 0.0  ;;  %v111_v1 = vmul.f32 %v27_v60, %v27_v60  ;;  %v129_v2 = vmul.f32 %v45_v61, %v45_v61  ;;  %v32_v42 = vld [vmem:[%s12040_s0 + $0x88] sm:$0xff]  ;;  %v49_v51 = vld [vmem:[%s12040_s0 + $0x110] sm:$0x1] }
  0x15   :  { %1545 = vperm.xlu0 %6062, %v81_v17   ;;  %925 = vmatprep.subr.bf16.mxu1 %v440_v50  ;;  %v6892_v56 = vadd.f32 %v216_v53, %v109_v47  ;;  %v240_v62 = vsel %vm135_vm0, %v130_v59, 0.0  ;;  %v347_v3 = vpack.c.bf16 %v45_v61, %v27_v60  ;;  %v114_v11 = vmul.f32 %v30_v9, %v30_v9  ;;  %v29_v17 = vld [vmem:[%s12040_s0 + $0x70] sm:$0xff] }
  0x16   :  { %5933 = vmatmul.mubr.msk.bf16.gmra.mrb[4].mxu1 %vm383_vm3, %v6758_v49  ;;  %1550 = vperm.xlu1 %6063, %v82_v21   ;;  %v6907_v63 = vadd.f32 %v240_v62, %v112_v58  ;;  %v232_v5 = vsel %vm135_vm0, %v129_v2, 0.0  ;;  %v132_v14 = vmul.f32 %v48_v10, %v48_v10  ;;  %v343_v21 = vpack.c.bf16 %v6825_v16, %v6820_v15 }
  0x17   :  { %605 = vmatprep.mubr.bf16.mxu1 %v12044_v12  ;;  %v6919_v7 = vand.u32 %v6692_v8, %v347_v3  ;;  %v6927_v13 = vadd.f32 %v232_v5, %v111_v1  ;;  %v113_v24 = vmul.f32 %v29_v17, %v29_v17  ;;  %v348_v25 = vpack.c.bf16 %v46_v57, %v28_v54 }
  0x18   :  { %v256_v20 = vsel %vm135_vm0, %v132_v14, 0.0  ;;  %v131_v26 = vmul.f32 %v47_v19, %v47_v19  ;;  %v349_v28 = vpack.c.bf16 %v47_v19, %v29_v17  ;;  %v345_v29 = vpack.c.bf16 %v43_v46, %v25_v44  ;;  %v31_v44 = vld [vmem:[%s12040_s0 + $0x80] sm:$0xff]  ;;  %s6661_s0 = smov 1  }
  0x19   :  { %1555 = vperm.xlu0 %6062, %v83_v30   ;;  %v6941_v22 = vadd.f32 %v256_v20, %v114_v11  ;;  %v431_v38 = vand.u32 %v6692_v8, %v343_v21  ;;  %v350_v39 = vpack.c.bf16 %v48_v10, %v30_v9  ;;  %v446_v16 = vand.u32 %v6692_v8, %v348_v25 }
  0x1a   :  { %v248_v30 = vsel %vm135_vm0, %v131_v26, 0.0  ;;  %v449_v36 = vand.u32 %v6692_v8, %v349_v28  ;;  %v437_v40 = vand.u32 %v6692_v8, %v345_v29  ;;  %v116_v46 = vmul.f32 %v32_v42, %v32_v42 }
  0x1b   :  { %5928 = vmatmul.mubr.msk.bf16.gmra.mrb[8].mxu0 %vm383_vm3, %v6808_v6  ;;  %v6949_v15 = vadd.f32 %v248_v30, %v113_v24  ;;  %v452_v41 = vand.u32 %v6692_v8, %v350_v39  ;;  %v134_v47 = vmul.f32 %v50_v43, %v50_v43  ;;  %v352_v50 = vpack.c.bf16 %v50_v43, %v32_v42 }
  0x1c   :  { %522 = vmatprep.mubr.bf16.mxu0 %v12044_v12  ;;  %v115_v53 = vmul.f32 %v31_v44, %v31_v44  ;;  %v133_v54 = vmul.f32 %v49_v51, %v49_v51  ;;  %v351_v59 = vpack.c.bf16 %v49_v51, %v31_v44  ;;  %v146_v2 = vrot.slane %v6715_v23, 4 }
  0x1d   :  { %v272_v57 = vsel %vm135_vm0, %v134_v47, 0.0  ;;  %v458_v58 = vand.u32 %v6692_v8, %v352_v50  ;;  %v154_v3 = vrot.slane %v6731_v35, 4  ;;  %v162_v5 = vrot.slane %v6719_v27, 4 }
  0x1e   :  { %5934 = vmatmul.mubr.msk.bf16.gmra.mrb[8].mxu1 %vm383_vm3, %v6808_v6  ;;  %v6974_v60 = vadd.f32 %v272_v57, %v116_v46  ;;  %v264_v61 = vsel %vm135_vm0, %v133_v54, 0.0  ;;  %v455_v1 = vand.u32 %v6692_v8, %v351_v59  ;;  %v138_v8 = vrot.slane %v6723_v31, 4 }
  0x1f   :  { %615 = vmatprep.mubr.bf16.mxu1 %v12044_v12  ;;  %v6979_v62 = vadd.f32 %v264_v61, %v115_v53  ;;  %v147_v9 = vadd.f32 %v146_v2, %v6715_v23  ;;  %v155_v10 = vadd.f32 %v154_v3, %v6731_v35  ;;  %v163_v11 = vadd.f32 %v162_v5, %v6719_v27 }
  0x21   :  { %v148_v17 = vrot.slane %v147_v9, 2  ;;  %v156_v19 = vrot.slane %v155_v10, 2 }
  0x23   :  { %5929 = vmatmul.mubr.msk.bf16.gmra.mrb[12].mxu0 %vm383_vm3, %v6854_v32  ;;  %v149_v23 = vadd.f32 %v148_v17, %v147_v9  ;;  %v157_v21 = vadd.f32 %v156_v19, %v155_v10 }
  0x24   :  { %532 = vmatprep.mubr.bf16.mxu0 %v12044_v12 }
  0x25   :  { %v150_v27 = vrot.slane %v149_v23, 1  ;;  %v158_v25 = vrot.slane %v157_v21, 1 }
  0x26   :  { %5935 = vmatmul.mubr.msk.bf16.gmra.mrb[12].mxu1 %vm383_vm3, %v6854_v32 }
  0x27   :  { %625 = vmatprep.mubr.bf16.mxu1 %v12044_v12  ;;  %v151_v29 = vadd.f32 %v150_v27, %v149_v23  ;;  %v159_v30 = vadd.f32 %v158_v25, %v157_v21  ;;  %v186_v21 = vrot.slane %v6832_v18, 4  ;;  %v194_v25 = vrot.slane %v6787_v0, 4 }
  0x29   :  { %v282_v39 = vmul.f32 0.11111111, %v151_v29 }
  0x2b   :  { %5930 = vmatmul.mubr.msk.bf16.gmra.mrb[16].mxu0 %vm383_vm3, %v6886_v52 }
  0x2c   :  { %542 = vmatprep.mubr.bf16.mxu0 %v12044_v12 }
  0x2e   :  { %5936 = vmatmul.mubr.msk.bf16.gmra.mrb[16].mxu1 %vm383_vm3, %v6886_v52 }
  0x2f   :  { %635 = vmatprep.mubr.bf16.mxu1 %v12044_v12 }
  0x33   :  { %5931 = vmatmul.mubr.msk.bf16.gmra.mrb[20].mxu0 %vm383_vm3, %v6915_v4 }
  0x34   :  { %678 = vmatprep.mubr.bf16.mxu0 %v12044_v12 }
  0x36   :  { %5937 = vmatmul.mubr.msk.bf16.gmra.mrb[20].mxu1 %vm383_vm3, %v6915_v4 }
  0x37   :  { %771 = vmatprep.mubr.bf16.mxu1 %v12044_v12 }
  0x3b   :  { %5938 = vmatmul.mubr.msk.bf16.vlgmr.msra.gmra.mrb[24].mxu0 %vm383_vm3, %v6728_v33 }
  0x3c   :  { %688 = vmatprep.mubr.bf16.mxu0 %v12044_v12  ;;  %833 = vmatpush1.bf16.msra.mxu0 %v431_v38 }
  0x3d   :  { %1018 = vmatprep.subr.bf16.mxu0 %v446_v16  ;;  %v283_v16 = vmul.f32 0.11111111, %v159_v30 }
  0x3e   :  { %5944 = vmatmul.mubr.msk.bf16.vlgmr.msra.gmra.mrb[24].mxu1 %vm383_vm3, %v6728_v33 }
  0x3f   :  { %781 = vmatprep.mubr.bf16.mxu1 %v12044_v12  ;;  %926 = vmatpush1.bf16.msra.mxu1 %v437_v40  ;;  %v301_v42 = vadd.f32 1e-05, %v283_v16 }
  0x40   :  { %1111 = vmatprep.subr.bf16.mxu1 %v452_v41  ;;  %v300_v41 = vadd.f32 1e-05, %v282_v39 }
  0x43   :  { %5939 = vmatmul.mubr.msk.bf16.gmra.mrb[28].mxu0 %vm383_vm3, %v6758_v49 }
  0x44   :  { %698 = vmatprep.mubr.bf16.mxu0 %v12044_v12 }
  0x46   :  { %5945 = vmatmul.mubr.msk.bf16.gmra.mrb[28].mxu1 %vm383_vm3, %v6758_v49 }
  0x47   :  { %791 = vmatprep.mubr.bf16.mxu1 %v12044_v12 }
  0x4b   :  { %5940 = vmatmul.mubr.msk.bf16.gmra.mrb[32].mxu0 %vm383_vm3, %v6808_v6 }
  0x4c   :  { %708 = vmatprep.mubr.bf16.mxu0 %v12044_v12 }
  0x4e   :  { %5946 = vmatmul.mubr.msk.bf16.gmra.mrb[32].mxu1 %vm383_vm3, %v6808_v6 }
  0x4f   :  { %801 = vmatprep.mubr.bf16.mxu1 %v12044_v12 }
  0x53   :  { %5941 = vmatmul.mubr.msk.bf16.gmra.mrb[36].mxu0 %vm383_vm3, %v6854_v32 }
  0x54   :  { %718 = vmatprep.mubr.bf16.mxu0 %v12044_v12 }
  0x56   :  { %5947 = vmatmul.mubr.msk.bf16.gmra.mrb[36].mxu1 %vm383_vm3, %v6854_v32 }
  0x57   :  { %811 = vmatprep.mubr.bf16.mxu1 %v12044_v12 }
  0x5b   :  { %5942 = vmatmul.mubr.msk.bf16.gmra.mrb[40].mxu0 %vm383_vm3, %v6886_v52 }
  0x5c   :  { %728 = vmatprep.mubr.bf16.mxu0 %v12044_v12 }
  0x5e   :  { %5948 = vmatmul.mubr.msk.bf16.gmra.mrb[40].mxu1 %vm383_vm3, %v6886_v52 }
  0x5f   :  { %821 = vmatprep.mubr.bf16.mxu1 %v12044_v12 }
  0x63   :  { %5943 = vmatmul.mubr.msk.bf16.gmra.mrb[44].mxu0 %vm383_vm3, %v6915_v4 }
  0x64   :  { %864 = vmatprep.mubr.bf16.mxu0 %v12044_v12 }
  0x66   :  { %5949 = vmatmul.mubr.msk.bf16.gmra.mrb[44].mxu1 %vm383_vm3, %v6915_v4 }
  0x67   :  { %957 = vmatprep.mubr.bf16.mxu1 %v12044_v12 }
  0x6b   :  { %5950 = vmatmul.mubr.msk.bf16.vlgmr.msra.gmra.mrb[48].mxu0 %vm383_vm3, %v6728_v33 }
  0x6c   :  { %874 = vmatprep.mubr.bf16.mxu0 %v12044_v12  ;;  %1019 = vmatpush1.bf16.msra.mxu0 %v6919_v7  ;;  %v139_v7 = vadd.f32 %v138_v8, %v6723_v31  ;;  %v164_v31 = vrot.slane %v163_v11, 2 }
  0x6d   :  { %1204 = vmatprep.subr.bf16.mxu0 %v458_v58 }
  0x6e   :  { %5956 = vmatmul.mubr.msk.bf16.vlgmr.msra.gmra.mrb[48].mxu1 %vm383_vm3, %v6728_v33  ;;  %v140_v14 = vrot.slane %v139_v7, 2  ;;  %v165_v35 = vadd.f32 %v164_v31, %v163_v11  ;;  %v178_v31 = vrot.slane %v6751_v48, 4 }
  0x6f   :  { %967 = vmatprep.mubr.bf16.mxu1 %v12044_v12  ;;  %1112 = vmatpush1.bf16.msra.mxu1 %v449_v36 }
  0x70   :  { %v141_v20 = vadd.f32 %v140_v14, %v139_v7  ;;  %v166_v26 = vrot.slane %v165_v35, 1  ;;  %v170_v14 = vrot.slane %v6771_v55, 4  ;;  %v179_v30 = vadd.f32 %v178_v31, %v6751_v48 }
  0x72   :  { %v142_v24 = vrot.slane %v141_v20, 1  ;;  %v167_v36 = vadd.f32 %v166_v26, %v165_v35  ;;  %v171_v27 = vadd.f32 %v170_v14, %v6771_v55 }
  0x73   :  { %5951 = vmatmul.mubr.msk.bf16.gmra.mrb[52].mxu0 %vm383_vm3, %v6758_v49 }
  0x74   :  { %884 = vmatprep.mubr.bf16.mxu0 %v12044_v12  ;;  %v143_v28 = vadd.f32 %v142_v24, %v141_v20 }
  0x76   :  { %5957 = vmatmul.mubr.msk.bf16.gmra.mrb[52].mxu1 %vm383_vm3, %v6758_v49  ;;  %v281_v38 = vmul.f32 0.11111111, %v143_v28 }
  0x77   :  { %977 = vmatprep.mubr.bf16.mxu1 %v12044_v12 }
  0x78   :  { %v299_v40 = vadd.f32 1e-05, %v281_v38 }
  0x7a   :  { %6076 = vrsqrt.f32 %v299_v40 }
  0x7b   :  { %5952 = vmatmul.mubr.msk.bf16.gmra.mrb[56].mxu0 %vm383_vm3, %v6808_v6  ;;  %6078 = vrsqrt.f32 %v300_v41  ;;  %v187_v41 = vadd.f32 %v186_v21, %v6832_v18  ;;  %v180_v18 = vrot.slane %v179_v30, 2 }
  0x7c   :  { %894 = vmatprep.mubr.bf16.mxu0 %v12044_v12  ;;  %6080 = vrsqrt.f32 %v301_v42 }
  0x7e   :  { %5958 = vmatmul.mubr.msk.bf16.gmra.mrb[56].mxu1 %vm383_vm3, %v6808_v6 }
  0x7f   :  { %987 = vmatprep.mubr.bf16.mxu1 %v12044_v12 }
  0x83   :  { %5953 = vmatmul.mubr.msk.bf16.gmra.mrb[60].mxu0 %vm383_vm3, %v6854_v32 }
  0x84   :  { %904 = vmatprep.mubr.bf16.mxu0 %v12044_v12  ;;  %v7119_v54 = vpop.eup %6076 }
  0x85   :  { %v7123_v58 = vpop.eup %6078 }
  0x86   :  { %5959 = vmatmul.mubr.msk.bf16.gmra.mrb[60].mxu1 %vm383_vm3, %v6854_v32  ;;  %v7129_v8 = vpop.eup %6080 }
  0x87   :  { %997 = vmatprep.mubr.bf16.mxu1 %v12044_v12 }
  0x8b   :  { %5954 = vmatmul.mubr.msk.bf16.gmra.mrb[64].mxu0 %vm383_vm3, %v6886_v52 }
  0x8c   :  { %914 = vmatprep.mubr.bf16.mxu0 %v12044_v12 }
  0x8e   :  { %5960 = vmatmul.mubr.msk.bf16.gmra.mrb[64].mxu1 %vm383_vm3, %v6886_v52 }
  0x8f   :  { %1007 = vmatprep.mubr.bf16.mxu1 %v12044_v12 }
  0x93   :  { %5955 = vmatmul.mubr.msk.bf16.gmra.mrb[68].mxu0 %vm383_vm3, %v6915_v4 }
  0x94   :  { %1050 = vmatprep.mubr.bf16.mxu0 %v12044_v12 }
  0x96   :  { %5961 = vmatmul.mubr.msk.bf16.gmra.mrb[68].mxu1 %vm383_vm3, %v6915_v4 }
  0x97   :  { %1143 = vmatprep.mubr.bf16.mxu1 %v12044_v12 }
  0x9b   :  { %5962 = vmatmul.mubr.msk.bf16.vlgmr.msra.gmra.mrb[72].mxu0 %vm383_vm3, %v6728_v33 }
  0x9c   :  { %1060 = vmatprep.mubr.bf16.mxu0 %v12044_v12  ;;  %1205 = vmatpush1.bf16.msra.mxu0 %v455_v1  ;;  %v7127_v1 = vpop.permute.xlu0 %1422 }
  0x9e   :  { %5968 = vmatmul.mubr.msk.bf16.vlgmr.msra.gmra.mrb[72].mxu1 %vm383_vm3, %v6728_v33 }
  0x9f   :  { %1153 = vmatprep.mubr.bf16.mxu1 %v12044_v12 }
  0xa0   :  { %v7153_v26 = vpop.permute.xlu0 %1427 }
  0xa3   :  { %5963 = vmatmul.mubr.msk.bf16.gmra.mrb[76].mxu0 %vm383_vm3, %v6758_v49 }
  0xa4   :  { %1070 = vmatprep.mubr.bf16.mxu0 %v12044_v12 }
  0xa6   :  { %5969 = vmatmul.mubr.msk.bf16.gmra.mrb[76].mxu1 %vm383_vm3, %v6758_v49 }
  0xa7   :  { %1163 = vmatprep.mubr.bf16.mxu1 %v12044_v12 }
  0xab   :  { %5964 = vmatmul.mubr.msk.bf16.gmra.mrb[80].mxu0 %vm383_vm3, %v6808_v6 }
  0xac   :  { %1080 = vmatprep.mubr.bf16.mxu0 %v12044_v12 }
  0xae   :  { %5970 = vmatmul.mubr.msk.bf16.gmra.mrb[80].mxu1 %vm383_vm3, %v6808_v6 }
  0xaf   :  { %1173 = vmatprep.mubr.bf16.mxu1 %v12044_v12 }
  0xb3   :  { %5965 = vmatmul.mubr.msk.bf16.gmra.mrb[84].mxu0 %vm383_vm3, %v6854_v32 }
  0xb4   :  { %1090 = vmatprep.mubr.bf16.mxu0 %v12044_v12 }
  0xb6   :  { %5971 = vmatmul.mubr.msk.bf16.gmra.mrb[84].mxu1 %vm383_vm3, %v6854_v32 }
  0xb7   :  { %1183 = vmatprep.mubr.bf16.mxu1 %v12044_v12 }
  0xbb   :  { %5966 = vmatmul.mubr.msk.bf16.gmra.mrb[88].mxu0 %vm383_vm3, %v6886_v52 }
  0xbc   :  { %1100 = vmatprep.mubr.bf16.mxu0 %v12044_v12 }
  0xbe   :  { %5972 = vmatmul.mubr.msk.bf16.gmra.mrb[88].mxu1 %vm383_vm3, %v6886_v52 }
  0xbf   :  { %1193 = vmatprep.mubr.bf16.mxu1 %v12044_v12 }
  0xc3   :  { %5967 = vmatmul.mubr.msk.bf16.gmra.mrb[92].mxu0 %vm383_vm3, %v6915_v4 }
  0xc4   :  { %1236 = vmatprep.mubr.bf16.mxu0 %v12044_v12 }
  0xc6   :  { %5973 = vmatmul.mubr.msk.bf16.gmra.mrb[92].mxu1 %vm383_vm3, %v6915_v4 }
  0xc7   :  { %2945 = vmatprep.mubr.bf16.mxu1 %v12044_v12 }
  0xcb   :  { %5974 = vmatmul.mubr.msk.bf16.vlgmr.msra.gmra.mrb[96].mxu0 %vm383_vm3, %v6728_v33  ;;  %v284_v33 = vmul.f32 0.11111111, %v167_v36 }
  0xcc   :  { %1246 = vmatprep.mubr.bf16.mxu0 %v12044_v12 }
  0xcd   :  { %v302_v43 = vadd.f32 1e-05, %v284_v33 }
  0xcf   :  { %6082 = vrsqrt.f32 %v302_v43 }
  0xd3   :  { %5975 = vmatmul.mubr.msk.bf16.gmra.mrb[100].mxu0 %vm383_vm3, %v6758_v49 }
  0xd4   :  { %1256 = vmatprep.mubr.bf16.mxu0 %v12044_v12 }
  0xd9   :  { %v7134_v5 = vpop.eup %6082 }
  0xdb   :  { %5976 = vmatmul.mubr.msk.bf16.gmra.mrb[104].mxu0 %vm383_vm3, %v6808_v6 }
  0xdc   :  { %1266 = vmatprep.mubr.bf16.mxu0 %v12044_v12 }
  0xde   :  { %v7100_v44 = vpop.f32.mrb[0].mxu0 }
  0xdf   :  { %12160 = vst [vmem:[#allocation2_spill] sm:$0xff] %v7100_v44  ;;  %v7102_v49 = vpop.f32.mrb[1].mxu0 }
  0xe0   :  { %12161 = vst [vmem:[#allocation3_spill] sm:$0xff] %v7102_v49  ;;  %v7104_v46 = vpop.f32.mrb[2].mxu0 }
  0xe1   :  { %12162 = vst [vmem:[#allocation4_spill] sm:$0xff] %v7104_v46  ;;  %v7106_v47 = vpop.f32.mrb[3].mxu0  ;;  %v7108_v50 = vpop.f32.mrb[0].mxu1 }
  0xe2   :  { %12163 = vst [vmem:[#allocation5_spill] sm:$0xff] %v7106_v47  ;;  %12164 = vst [vmem:[#allocation6_spill] sm:$0xff] %v7108_v50  ;;  %v7110_v51 = vpop.f32.mrb[1].mxu1  ;;  %v226_v50 = vrot.slane %v6874_v45, 4 }
  0xe3   :  { %12165 = vst [vmem:[#allocation7_spill] sm:$0xff] %v7110_v51  ;;  %5977 = vmatmul.mubr.msk.bf16.gmra.mrb[108].mxu0 %vm383_vm3, %v6854_v32  ;;  %v7114_v6 = vpop.f32.mrb[2].mxu1 }
  0xe4   :  { %12166 = vst [vmem:[#allocation8_spill] sm:$0xff] %v7114_v6  ;;  %v7116_v53 = vpop.f32.mrb[3].mxu1  ;;  %1276 = vmatprep.mubr.bf16.mxu0 %v12044_v12 }
  0xe5   :  { %12167 = vst [vmem:[#allocation9_spill] sm:$0xff] %v7116_v53 }
  0xe6   :  { %v7121_v57 = vpop.f32.mrb[4].mxu0 }
  0xe7   :  { %12168 = vst [vmem:[#allocation10_spill] sm:$0xff] %v7121_v57  ;;  %v7125_v59 = vpop.f32.mrb[5].mxu0 }
  0xe8   :  { %12169 = vst [vmem:[#allocation11_spill] sm:$0xff] %v7125_v59  ;;  %v508_v61 = vpop.f32.mrb[6].mxu0 }
  0xe9   :  { %v1366_v32 = vmul.f32 %v7119_v54, %v508_v61  ;;  %v510_v2 = vpop.f32.mrb[7].mxu0  ;;  %v7132_v3 = vpop.f32.mrb[4].mxu1  ;;  %v172_v61 = vrot.slane %v171_v27, 2 }
  0xea   :  { %12170 = vst [vmem:[#allocation12_spill] sm:$0xff] %v7132_v3  ;;  %v1367_v7 = vmul.f32 %v7123_v58, %v510_v2  ;;  %v7137_v9 = vpop.f32.mrb[5].mxu1 }
  0xeb   :  { %12171 = vst [vmem:[#allocation13_spill] sm:$0xff] %v7137_v9  ;;  %5978 = vmatmul.mubr.msk.bf16.gmra.mrb[112].mxu0 %vm383_vm3, %v6886_v52  ;;  %v601_v10 = vpop.f32.mrb[6].mxu1  ;;  %v1435_v11 = vadd.f32 %v7127_v1, %v1366_v32  ;;  %v195_v32 = vadd.f32 %v194_v25, %v6787_v0  ;;  %v173_v31 = vadd.f32 %v172_v61, %v171_v27 }
  0xec   :  { %v1368_v17 = vmul.f32 %v7129_v8, %v601_v10  ;;  %v603_v19 = vpop.f32.mrb[7].mxu1  ;;  %1286 = vmatprep.mubr.bf16.mxu0 %v12044_v12  ;;  %v1436_v48 = vadd.f32 %v7127_v1, %v1367_v7 }
  0xed   :  { %1880 = vrot.lane.b32.xlu1 %v1435_v11, %s6661_s0  ;;  %v1369_v20 = vmul.f32 %v7134_v5, %v603_v19 }
  0xee   :  { %v1437_v23 = vadd.f32 %v7127_v1, %v1368_v17  ;;  %v514_v52 = vpop.f32.mrb[8].mxu0  ;;  %v188_v17 = vrot.slane %v187_v41, 2 }
  0xef   :  { %v1384_v35 = vmul.f32 %v7119_v54, %v514_v52  ;;  %v516_v24 = vpop.f32.mrb[9].mxu0  ;;  %v7185_v52 = vpop.permute.xlu0 %1432 }
  0xf0   :  { %v1385_v28 = vmul.f32 %v7123_v58, %v516_v24  ;;  %v518_v29 = vpop.f32.mrb[10].mxu0 }
  0xf1   :  { %v1453_v36 = vadd.f32 %v7153_v26, %v1384_v35  ;;  %v1402_v38 = vmul.f32 %v7119_v54, %v518_v29  ;;  %v520_v39 = vpop.f32.mrb[11].mxu0  ;;  %1892 = vrot.lane.b32.xlu1 %v1437_v23, %s6661_s0  ;;  %v607_v16 = vpop.f32.mrb[8].mxu1  ;;  %v196_v23 = vrot.slane %v195_v32, 2  ;;  %v181_v35 = vadd.f32 %v180_v18, %v179_v30 }
  0xf2   :  { %v7161_v33 = vmul.f32 %v7123_v58, %v520_v39  ;;  %v1386_v55 = vmul.f32 %v7129_v8, %v607_v16  ;;  %v609_v40 = vpop.f32.mrb[9].mxu1  ;;  %v1454_v24 = vadd.f32 %v7153_v26, %v1385_v28 }
  0xf3   :  { %5979 = vmatmul.mubr.msk.bf16.gmra.mrb[116].mxu0 %vm383_vm3, %v6915_v4  ;;  %1882 = vrot.lane.b32.xlu0 %v1453_v36, %s6661_s0  ;;  %v1387_v42 = vmul.f32 %v7134_v5, %v609_v40  ;;  %v611_v43 = vpop.f32.mrb[10].mxu1  ;;  %v1438_v4 = vadd.f32 %v7127_v1, %v1369_v20  ;;  %v197_v61 = vadd.f32 %v196_v23, %v195_v32  ;;  %v182_v18 = vrot.slane %v181_v35, 1 }
  0xf4   :  { %v1455_v2 = vadd.f32 %v7153_v26, %v1386_v55  ;;  %v7173_v10 = vmul.f32 %v7129_v8, %v611_v43  ;;  %v613_v11 = vpop.f32.mrb[11].mxu1  ;;  %3111 = vmatprep.mubr.bf16.mxu0 %v12044_v12  ;;  %v189_v55 = vadd.f32 %v188_v17, %v187_v41  ;;  %v174_v43 = vrot.slane %v173_v31, 1 }
  0xf5   :  { %1886 = vrot.lane.b32.xlu1 %v1436_v48, %s6661_s0  ;;  %v7179_v7 = vmul.f32 %v7134_v5, %v613_v11  ;;  %v1456_v40 = vadd.f32 %v7153_v26, %v1387_v42  ;;  %v1471_v48 = vadd.f32 %v7185_v52, %v1402_v38  ;;  %v198_v32 = vrot.slane %v197_v61, 1 }
  0xf6   :  { %v524_v14 = vpop.f32.mrb[12].mxu0  ;;  %v190_v42 = vrot.slane %v189_v55, 1  ;;  %v175_v38 = vadd.f32 %v174_v43, %v173_v31  ;;  %vm2843_vm3 = vcmask 146432  }
  0xf7   :  { %v7182_v0 = vmul.f32 %v7119_v54, %v524_v14  ;;  %v526_v19 = vpop.f32.mrb[13].mxu0  ;;  %1894 = vrot.lane.b32.xlu0 %v1455_v2, %s6661_s0 }
  0xf8   :  { %v7188_v21 = vmul.f32 %v7123_v58, %v526_v19  ;;  %v528_v20 = vpop.f32.mrb[14].mxu0  ;;  %v191_v31 = vadd.f32 %v190_v42, %v189_v55 }
  0xf9   :  { %12172 = vst [vmem:[#allocation14_spill] sm:$0xff] %v7182_v0  ;;  %v7192_v25 = vmul.f32 %v7119_v54, %v528_v20  ;;  %v530_v29 = vpop.f32.mrb[15].mxu0  ;;  %1898 = vrot.lane.b32.xlu1 %v1438_v4, %s6661_s0  ;;  %v617_v36 = vpop.f32.mrb[12].mxu1  ;;  %v183_v20 = vadd.f32 %v182_v18, %v181_v35  ;;  %v285_v35 = vmul.f32 0.11111111, %v175_v38  ;;  %v199_v18 = vadd.f32 %v198_v32, %v197_v61 }
  0xfa   :  { %v7196_v39 = vmul.f32 %v7123_v58, %v530_v29  ;;  %v7199_v27 = vmul.f32 %v7129_v8, %v617_v36  ;;  %v619_v16 = vpop.f32.mrb[13].mxu1  ;;  %v287_v55 = vmul.f32 0.11111111, %v191_v31 }
  0xfb   :  { %12173 = vst [vmem:[#allocation15_spill] sm:$0xff] %v7192_v25  ;;  %v7203_v30 = vmul.f32 %v7134_v5, %v619_v16  ;;  %1888 = vrot.lane.b32.xlu0 %v1454_v24, %s6661_s0  ;;  %v621_v28 = vpop.f32.mrb[14].mxu1  ;;  %v1472_v16 = vadd.f32 %v7185_v52, %v7161_v33  ;;  %v7233_v33 = vpop.permute.xlu1 %1668  ;;  %v303_v3 = vadd.f32 1e-05, %v285_v35  ;;  %v288_v9 = vmul.f32 0.11111111, %v199_v18 }
  0xfc   :  { %12174 = vst [vmem:[#allocation16_spill] sm:$0xff] %v7199_v27  ;;  %v7208_v2 = vmul.f32 %v7129_v8, %v621_v28  ;;  %v623_v11 = vpop.f32.mrb[15].mxu1  ;;  %v305_v35 = vadd.f32 1e-05, %v287_v55 }
  0xfd   :  { %12175 = vst [vmem:[#allocation17_spill] sm:$0xff] %v7203_v30  ;;  %v7211_v4 = vmul.f32 %v7134_v5, %v623_v11  ;;  %1884 = vrot.lane.b32.xlu1 %v1471_v48, %s6661_s0  ;;  %6084 = vrsqrt.f32 %v303_v3 }
  0xfe   :  { %12176 = vst [vmem:[#allocation18_spill] sm:$0xff] %v7208_v2  ;;  %v534_v41 = vpop.f32.mrb[16].mxu0 }
  0xff   :  { %12177 = vst [vmem:[#allocation19_spill] sm:$0xff] %v7211_v4  ;;  %v7215_v14 = vmul.f32 %v7119_v54, %v534_v41  ;;  %v536_v17 = vpop.f32.mrb[17].mxu0  ;;  %1900 = vrot.lane.b32.xlu0 %v1456_v40, %s6661_s0  ;;  %v7244_v18 = vpop.permute.xlu1 %1673 }
 0x100   :  { %v7219_v19 = vmul.f32 %v7123_v58, %v536_v17  ;;  %v538_v23 = vpop.f32.mrb[18].mxu0 }
 0x101   :  { %12178 = vst [vmem:[#allocation20_spill] sm:$0xff] %v7215_v14  ;;  %v627_v24 = vpop.f32.mrb[16].mxu1  ;;  %v1612_v29 = vmul.f32 %v7119_v54, %v538_v23  ;;  %v540_v36 = vpop.f32.mrb[19].mxu0  ;;  %v286_v23 = vmul.f32 0.11111111, %v183_v20 }
 0x102   :  { %v7225_v28 = vmul.f32 %v7129_v8, %v627_v24  ;;  %v629_v48 = vpop.f32.mrb[17].mxu1  ;;  %v1613_v40 = vmul.f32 %v7123_v58, %v540_v36 }
 0x103   :  { %v7229_v43 = vmul.f32 %v7134_v5, %v629_v48  ;;  %v631_v11 = vpop.f32.mrb[18].mxu1  ;;  %1890 = vrot.lane.b32.xlu0 %v1472_v16, %s6661_s0  ;;  %v304_v32 = vadd.f32 1e-05, %v286_v23  ;;  %v306_v23 = vadd.f32 1e-05, %v288_v9 }
 0x104   :  { %12179 = vst [vmem:[#allocation21_spill] sm:$0xff] %v7225_v28  ;;  %v1614_v41 = vmul.f32 %v7129_v8, %v631_v11  ;;  %v633_v17 = vpop.f32.mrb[19].mxu1  ;;  %v1682_v55 = vadd.f32 %v7233_v33, %v1613_v40  ;;  %v258_v28 = vrot.slane %v6941_v22, 4 }
 0x105   :  { %12180 = vst [vmem:[#allocation22_spill] sm:$0xff] %v7229_v43  ;;  %v1615_v24 = vmul.f32 %v7134_v5, %v633_v17  ;;  %6086 = vrsqrt.f32 %v304_v32 }
 0x106   :  { %v1683_v12 = vadd.f32 %v7233_v33, %v1614_v41  ;;  %v544_v36 = vpop.f32.mrb[20].mxu0  ;;  %v1681_v41 = vadd.f32 %v7233_v33, %v1612_v29  ;;  %6088 = vrsqrt.f32 %v305_v35 }
 0x107   :  { %v1630_v42 = vmul.f32 %v7119_v54, %v544_v36  ;;  %v546_v48 = vpop.f32.mrb[21].mxu0  ;;  %6090 = vrsqrt.f32 %v306_v23  ;;  %v1684_v9 = vadd.f32 %v7233_v33, %v1615_v24 }
 0x108   :  { %2163 = vrot.lane.b32.xlu1 %v1683_v12, %s6662_s6  ;;  %v1631_v61 = vmul.f32 %v7123_v58, %v546_v48  ;;  %v548_v38 = vpop.f32.mrb[22].mxu0 }
 0x109   :  { %v637_v20 = vpop.f32.mrb[20].mxu1  ;;  %v1648_v16 = vmul.f32 %v7119_v54, %v548_v38  ;;  %v550_v11 = vpop.f32.mrb[23].mxu0 }
 0x10a   :  { %v1632_v31 = vmul.f32 %v7129_v8, %v637_v20  ;;  %v1649_v17 = vmul.f32 %v7123_v58, %v550_v11  ;;  %v639_v36 = vpop.f32.mrb[21].mxu1  ;;  %v1699_v20 = vadd.f32 %v7244_v18, %v1630_v42  ;;  %v1700_v11 = vadd.f32 %v7244_v18, %v1631_v61  ;;  %v7279_v42 = vpop.permute.xlu1 %1678 }
 0x10b   :  { %v7247_v12 = vmul.f32 %v7134_v5, %v639_v36  ;;  %v641_v48 = vpop.f32.mrb[22].mxu1  ;;  %v1717_v61 = vadd.f32 %v7279_v42, %v1648_v16 }
 0x10c   :  { %v1701_v6 = vadd.f32 %v7244_v18, %v1632_v31  ;;  %2151 = vrot.lane.b32.xlu1 %v1681_v41, %s6662_s6  ;;  %v1650_v54 = vmul.f32 %v7129_v8, %v641_v48  ;;  %v643_v29 = vpop.f32.mrb[23].mxu1  ;;  %v7281_v41 = vpop.eup %6084  ;;  %v1718_v31 = vadd.f32 %v7279_v42, %v1649_v17 }
 0x10d   :  { %v7253_v58 = vmul.f32 %v7134_v5, %v643_v29 }
 0x10e   :  { %2165 = vrot.lane.b32.xlu0 %v1701_v6, %s6662_s6  ;;  %v7257_v38 = vpop.f32.mrb[24].mxu0 }
 0x10f   :  { %12181 = vst [vmem:[#allocation23_spill] sm:$0xff] %v7257_v38  ;;  %v7259_v3 = vpop.f32.mrb[25].mxu0  ;;  %v7287_v35 = vpop.eup %6086 }
 0x110   :  { %12182 = vst [vmem:[#allocation24_spill] sm:$0xff] %v7259_v3  ;;  %2157 = vrot.lane.b32.xlu1 %v1682_v55, %s6662_s6  ;;  %v7264_v8 = vpop.f32.mrb[26].mxu0  ;;  %v7293_v29 = vpop.eup %6088 }
 0x111   :  { %12183 = vst [vmem:[#allocation25_spill] sm:$0xff] %v7264_v8  ;;  %v7266_v5 = vpop.f32.mrb[27].mxu0  ;;  %v7268_v32 = vpop.f32.mrb[24].mxu1 }
 0x112   :  { %12184 = vst [vmem:[#allocation26_spill] sm:$0xff] %v7266_v5  ;;  %12185 = vst [vmem:[#allocation27_spill] sm:$0xff] %v7268_v32  ;;  %2153 = vrot.lane.b32.xlu0 %v1699_v20, %s6662_s6  ;;  %v7271_v6 = vpop.f32.mrb[25].mxu1  ;;  %v7298_v17 = vpop.eup %6090 }
 0x113   :  { %12186 = vst [vmem:[#allocation28_spill] sm:$0xff] %v7271_v6  ;;  %v7273_v40 = vpop.f32.mrb[26].mxu1 }
 0x114   :  { %12187 = vst [vmem:[#allocation29_spill] sm:$0xff] %v7273_v40  ;;  %2169 = vrot.lane.b32.xlu1 %v1684_v9, %s6662_s6  ;;  %v7277_v24 = vpop.f32.mrb[27].mxu1 }
 0x115   :  { %12188 = vst [vmem:[#allocation30_spill] sm:$0xff] %v7277_v24  ;;  %v202_v24 = vrot.slane %v6859_v37, 4 }
 0x116   :  { %2159 = vrot.lane.b32.xlu0 %v1700_v11, %s6662_s6  ;;  %v7285_v36 = vpop.f32.mrb[28].mxu0  ;;  %v1719_v11 = vadd.f32 %v7279_v42, %v1650_v54 }
 0x117   :  { %12189 = vst [vmem:[#allocation31_spill] sm:$0xff] %v7285_v36  ;;  %v7289_v48 = vpop.f32.mrb[29].mxu0 }
 0x118   :  { %12190 = vst [vmem:[#allocation32_spill] sm:$0xff] %v7289_v48  ;;  %2161 = vrot.lane.b32.xlu1 %v1718_v31, %s6662_s6  ;;  %v694_v23 = vpop.f32.mrb[30].mxu0 }
 0x119   :  { %v1370_v55 = vmul.f32 %v7281_v41, %v694_v23  ;;  %v696_v9 = vpop.f32.mrb[31].mxu0  ;;  %v7296_v20 = vpop.f32.mrb[28].mxu1 }
 0x11a   :  { %12191 = vst [vmem:[#allocation33_spill] sm:$0xff] %v7296_v20  ;;  %2155 = vrot.lane.b32.xlu0 %v1717_v61, %s6662_s6  ;;  %v1371_v40 = vmul.f32 %v7287_v35, %v696_v9  ;;  %v7303_v32 = vpop.f32.mrb[29].mxu1  ;;  %v210_v20 = vrot.slane %v6856_v34, 4  ;;  %v218_v9 = vrot.slane %v6892_v56, 4 }
 0x11b   :  { %12192 = vst [vmem:[#allocation34_spill] sm:$0xff] %v7303_v32  ;;  %v1439_v16 = vadd.f32 %v7127_v1, %v1370_v55  ;;  %v787_v31 = vpop.f32.mrb[30].mxu1 }
 0x11c   :  { %v7308_v23 = vmul.f32 %v7293_v29, %v787_v31  ;;  %v789_v6 = vpop.f32.mrb[31].mxu1  ;;  %v1440_v55 = vadd.f32 %v7127_v1, %v1371_v40  ;;  %v203_v31 = vadd.f32 %v202_v24, %v6859_v37 }
 0x11d   :  { %1904 = vrot.lane.b32.xlu1 %v1439_v16, %s6661_s0  ;;  %v7313_v54 = vmul.f32 %v7298_v17, %v789_v6  ;;  %v211_v6 = vadd.f32 %v210_v20, %v6856_v34 }
 0x11e   :  { %2167 = vrot.lane.b32.xlu0 %v1719_v11, %s6662_s6  ;;  %v700_v61 = vpop.f32.mrb[32].mxu0  ;;  %v204_v20 = vrot.slane %v203_v31, 2 }
 0x11f   :  { %v1388_v32 = vmul.f32 %v7281_v41, %v700_v61  ;;  %v702_v53 = vpop.f32.mrb[33].mxu0  ;;  %v212_v8 = vrot.slane %v211_v6, 2 }
 0x120   :  { %v1389_v51 = vmul.f32 %v7287_v35, %v702_v53  ;;  %v704_v16 = vpop.f32.mrb[34].mxu0  ;;  %v219_v53 = vadd.f32 %v218_v9, %v6892_v56  ;;  %v205_v59 = vadd.f32 %v204_v20, %v203_v31 }
 0x121   :  { %v1457_v36 = vadd.f32 %v7153_v26, %v1388_v32  ;;  %v7325_v11 = vmul.f32 %v7281_v41, %v704_v16  ;;  %v706_v48 = vpop.f32.mrb[35].mxu0  ;;  %1910 = vrot.lane.b32.xlu1 %v1440_v55, %s6661_s0  ;;  %v793_v40 = vpop.f32.mrb[32].mxu1  ;;  %v227_v16 = vadd.f32 %v226_v50, %v6874_v45  ;;  %v213_v38 = vadd.f32 %v212_v8, %v211_v6 }
 0x122   :  { %v7329_v61 = vmul.f32 %v7287_v35, %v706_v48  ;;  %v7332_v37 = vmul.f32 %v7293_v29, %v793_v40  ;;  %v795_v24 = vpop.f32.mrb[33].mxu1  ;;  %v1458_v40 = vadd.f32 %v7153_v26, %v1389_v51  ;;  %v220_v9 = vrot.slane %v219_v53, 2 }
 0x123   :  { %1906 = vrot.lane.b32.xlu0 %v1457_v36, %s6661_s0  ;;  %v7337_v34 = vmul.f32 %v7298_v17, %v795_v24  ;;  %v797_v32 = vpop.f32.mrb[34].mxu1  ;;  %v228_v45 = vrot.slane %v227_v16, 2 }
 0x124   :  { %v7341_v55 = vmul.f32 %v7293_v29, %v797_v32  ;;  %v799_v48 = vpop.f32.mrb[35].mxu1 }
 0x125   :  { %v7345_v57 = vmul.f32 %v7298_v17, %v799_v48  ;;  %v229_v3 = vadd.f32 %v228_v45, %v227_v16 }
 0x126   :  { %12193 = vst [vmem:[#allocation35_spill] sm:$0xff] %v7341_v55  ;;  %v710_v56 = vpop.f32.mrb[36].mxu0 }
 0x127   :  { %12194 = vst [vmem:[#allocation36_spill] sm:$0xff] %v7345_v57  ;;  %v7348_v36 = vmul.f32 %v7281_v41, %v710_v56  ;;  %v712_v24 = vpop.f32.mrb[37].mxu0  ;;  %1912 = vrot.lane.b32.xlu0 %v1458_v40, %s6661_s0  ;;  %v221_v40 = vadd.f32 %v220_v9, %v219_v53 }
 0x128   :  { %v7352_v50 = vmul.f32 %v7287_v35, %v712_v24  ;;  %v714_v32 = vpop.f32.mrb[38].mxu0  ;;  %v206_v24 = vrot.slane %v205_v59, 1 }
 0x129   :  { %12195 = vst [vmem:[#allocation37_spill] sm:$0xff] %v7348_v36  ;;  %v7355_v51 = vmul.f32 %v7281_v41, %v714_v32  ;;  %v716_v48 = vpop.f32.mrb[39].mxu0  ;;  %v803_v5 = vpop.f32.mrb[36].mxu1  ;;  %v214_v32 = vrot.slane %v213_v38, 1  ;;  %v222_v49 = vrot.slane %v221_v40, 1  ;;  %v250_v36 = vrot.slane %v6949_v15, 4 }
 0x12a   :  { %12196 = vst [vmem:[#allocation38_spill] sm:$0xff] %v7352_v50  ;;  %v7358_v46 = vmul.f32 %v7287_v35, %v716_v48  ;;  %v7361_v56 = vmul.f32 %v7293_v29, %v803_v5  ;;  %v805_v47 = vpop.f32.mrb[37].mxu1  ;;  %v207_v9 = vadd.f32 %v206_v24, %v205_v59 }
 0x12b   :  { %12197 = vst [vmem:[#allocation39_spill] sm:$0xff] %v7355_v51  ;;  %v7364_v31 = vmul.f32 %v7298_v17, %v805_v47  ;;  %v807_v20 = vpop.f32.mrb[38].mxu1  ;;  %v230_v47 = vrot.slane %v229_v3, 1  ;;  %v215_v45 = vadd.f32 %v214_v32, %v213_v38  ;;  %v251_v0 = vadd.f32 %v250_v36, %v6949_v15 }
 0x12c   :  { %12198 = vst [vmem:[#allocation40_spill] sm:$0xff] %v7358_v46  ;;  %12199 = vst [vmem:[#allocation41_spill] sm:$0xff] %v7361_v56  ;;  %v7367_v8 = vmul.f32 %v7293_v29, %v807_v20  ;;  %v809_v6 = vpop.f32.mrb[39].mxu1 }
 0x12d   :  { %12200 = vst [vmem:[#allocation42_spill] sm:$0xff] %v7364_v31  ;;  %v7370_v44 = vmul.f32 %v7298_v17, %v809_v6  ;;  %v252_v15 = vrot.slane %v251_v0, 2 }
 0x12e   :  { %12201 = vst [vmem:[#allocation43_spill] sm:$0xff] %v7367_v8  ;;  %v720_v48 = vpop.f32.mrb[40].mxu0 }
 0x12f   :  { %12202 = vst [vmem:[#allocation44_spill] sm:$0xff] %v7370_v44  ;;  %v7373_v5 = vmul.f32 %v7281_v41, %v720_v48  ;;  %v722_v53 = vpop.f32.mrb[41].mxu0 }
 0x130   :  { %v7376_v31 = vmul.f32 %v7287_v35, %v722_v53  ;;  %v724_v16 = vpop.f32.mrb[42].mxu0  ;;  %v289_v53 = vmul.f32 0.11111111, %v207_v9 }
 0x131   :  { %12203 = vst [vmem:[#allocation45_spill] sm:$0xff] %v7373_v5  ;;  %v7379_v20 = vmul.f32 %v7281_v41, %v724_v16  ;;  %v726_v8 = vpop.f32.mrb[43].mxu0  ;;  %v813_v56 = vpop.f32.mrb[40].mxu1  ;;  %v223_v5 = vadd.f32 %v222_v49, %v221_v40  ;;  %v290_v16 = vmul.f32 0.11111111, %v215_v45 }
 0x132   :  { %12204 = vst [vmem:[#allocation46_spill] sm:$0xff] %v7376_v31  ;;  %v7382_v6 = vmul.f32 %v7287_v35, %v726_v8  ;;  %v7385_v44 = vmul.f32 %v7293_v29, %v813_v56  ;;  %v815_v48 = vpop.f32.mrb[41].mxu1  ;;  %v231_v31 = vadd.f32 %v230_v47, %v229_v3  ;;  %v307_v40 = vadd.f32 1e-05, %v289_v53 }
 0x133   :  { %v7388_v59 = vmul.f32 %v7298_v17, %v815_v48  ;;  %v817_v24 = vpop.f32.mrb[42].mxu1  ;;  %v291_v51 = vmul.f32 0.11111111, %v223_v5  ;;  %v308_v9 = vadd.f32 1e-05, %v290_v16 }
 0x134   :  { %12205 = vst [vmem:[#allocation47_spill] sm:$0xff] %v7385_v44  ;;  %v7391_v38 = vmul.f32 %v7293_v29, %v817_v24  ;;  %v819_v32 = vpop.f32.mrb[43].mxu1  ;;  %v292_v48 = vmul.f32 0.11111111, %v231_v31  ;;  %6092 = vrsqrt.f32 %v307_v40 }
 0x135   :  { %12206 = vst [vmem:[#allocation48_spill] sm:$0xff] %v7388_v59  ;;  %v7394_v46 = vmul.f32 %v7298_v17, %v819_v32  ;;  %v309_v44 = vadd.f32 1e-05, %v291_v51  ;;  %6094 = vrsqrt.f32 %v308_v9 }
 0x136   :  { %v730_v8 = vpop.f32.mrb[44].mxu0 }
 0x137   :  { %12207 = vst [vmem:[#allocation49_spill] sm:$0xff] %v7394_v46  ;;  %v7397_v56 = vmul.f32 %v7281_v41, %v730_v8  ;;  %v732_v49 = vpop.f32.mrb[45].mxu0  ;;  %6096 = vrsqrt.f32 %v309_v44 }
 0x138   :  { %v7400_v59 = vmul.f32 %v7287_v35, %v732_v49  ;;  %v734_v3 = vpop.f32.mrb[46].mxu0  ;;  %v310_v49 = vadd.f32 1e-05, %v292_v48 }
 0x139   :  { %v7403_v47 = vmul.f32 %v7281_v41, %v734_v3  ;;  %v736_v45 = vpop.f32.mrb[47].mxu0  ;;  %v823_v24 = vpop.f32.mrb[44].mxu1 }
 0x13a   :  { %v7406_v32 = vmul.f32 %v7287_v35, %v736_v45  ;;  %v7409_v5 = vmul.f32 %v7293_v29, %v823_v24  ;;  %v825_v8 = vpop.f32.mrb[45].mxu1  ;;  %6098 = vrsqrt.f32 %v310_v49 }
 0x13b   :  { %v7412_v31 = vmul.f32 %v7298_v17, %v825_v8  ;;  %v827_v53 = vpop.f32.mrb[46].mxu1 }
 0x13c   :  { %v7415_v16 = vmul.f32 %v7293_v29, %v827_v53  ;;  %v829_v41 = vpop.f32.mrb[47].mxu1 }
 0x13d   :  { %12208 = vst [vmem:[#allocation50_spill] sm:$0xff] %v7412_v31  ;;  %v7418_v3 = vmul.f32 %v7298_v17, %v829_v41 }
 0x13e   :  { %v7420_v35 = vpop.f32.mrb[48].mxu0  ;;  %v7436_v17 = vpop.eup %6092 }
 0x13f   :  { %12209 = vst [vmem:[#allocation51_spill] sm:$0xff] %v7418_v3  ;;  %12210 = vst [vmem:[#allocation52_spill] sm:$0xff] %v7420_v35  ;;  %v7422_v45 = vpop.f32.mrb[49].mxu0  ;;  %v7440_v44 = vpop.eup %6094 }
 0x140   :  { %12211 = vst [vmem:[#allocation53_spill] sm:$0xff] %v7422_v45  ;;  %v7424_v51 = vpop.f32.mrb[50].mxu0 }
 0x141   :  { %12212 = vst [vmem:[#allocation54_spill] sm:$0xff] %v7424_v51  ;;  %v7426_v24 = vpop.f32.mrb[51].mxu0  ;;  %v7428_v40 = vpop.f32.mrb[48].mxu1 }
 0x142   :  { %12213 = vst [vmem:[#allocation55_spill] sm:$0xff] %v7426_v24  ;;  %12214 = vst [vmem:[#allocation56_spill] sm:$0xff] %v7428_v40  ;;  %v7430_v48 = vpop.f32.mrb[49].mxu1  ;;  %v7444_v41 = vpop.eup %6096  ;;  %v234_v24 = vrot.slane %v6927_v13, 4 }
 0x143   :  { %12215 = vst [vmem:[#allocation57_spill] sm:$0xff] %v7430_v48  ;;  %v7432_v29 = vpop.f32.mrb[50].mxu1 }
 0x144   :  { %12216 = vst [vmem:[#allocation58_spill] sm:$0xff] %v7432_v29  ;;  %v7434_v9 = vpop.f32.mrb[51].mxu1  ;;  %v7451_v29 = vpop.eup %6098 }
 0x145   :  { %12217 = vst [vmem:[#allocation59_spill] sm:$0xff] %v7434_v9 }
 0x146   :  { %v7438_v8 = vpop.f32.mrb[52].mxu0 }
 0x147   :  { %12218 = vst [vmem:[#allocation60_spill] sm:$0xff] %v7438_v8  ;;  %v7442_v53 = vpop.f32.mrb[53].mxu0 }
 0x148   :  { %12219 = vst [vmem:[#allocation61_spill] sm:$0xff] %v7442_v53  ;;  %v880_v49 = vpop.f32.mrb[54].mxu0 }
 0x149   :  { %v7447_v51 = vmul.f32 %v7436_v17, %v880_v49  ;;  %v882_v40 = vpop.f32.mrb[55].mxu0  ;;  %v7449_v48 = vpop.f32.mrb[52].mxu1  ;;  %v242_v49 = vrot.slane %v6907_v63, 4 }
 0x14a   :  { %12220 = vst [vmem:[#allocation62_spill] sm:$0xff] %v7449_v48  ;;  %v7454_v9 = vmul.f32 %v7440_v44, %v882_v40  ;;  %v7456_v35 = vpop.f32.mrb[53].mxu1 }
 0x14b   :  { %12221 = vst [vmem:[#allocation63_spill] sm:$0xff] %v7456_v35  ;;  %v973_v8 = vpop.f32.mrb[54].mxu1  ;;  %v235_v35 = vadd.f32 %v234_v24, %v6927_v13  ;;  %v243_v4 = vadd.f32 %v242_v49, %v6907_v63  ;;  %v12046_v24 = vlaneseq }
 0x14c   :  { %v7460_v53 = vmul.f32 %v7444_v41, %v973_v8  ;;  %v975_v45 = vpop.f32.mrb[55].mxu1 }
 0x14d   :  { %v7464_v50 = vmul.f32 %v7451_v29, %v975_v45  ;;  %v236_v63 = vrot.slane %v235_v35, 2 }
 0x14e   :  { %12222 = vst [vmem:[#allocation64_spill] sm:$0xff] %v7460_v53  ;;  %v886_v48 = vpop.f32.mrb[56].mxu0 }
 0x14f   :  { %12223 = vst [vmem:[#allocation65_spill] sm:$0xff] %v7464_v50  ;;  %v7468_v40 = vmul.f32 %v7436_v17, %v886_v48  ;;  %v888_v43 = vpop.f32.mrb[57].mxu0 }
 0x150   :  { %v7473_v8 = vmul.f32 %v7440_v44, %v888_v43  ;;  %v890_v14 = vpop.f32.mrb[58].mxu0 }
 0x151   :  { %v7477_v45 = vmul.f32 %v7436_v17, %v890_v14  ;;  %v892_v25 = vpop.f32.mrb[59].mxu0  ;;  %v979_v2 = vpop.f32.mrb[56].mxu1  ;;  %v259_v14 = vadd.f32 %v258_v28, %v6941_v22 }
 0x152   :  { %12224 = vst [vmem:[#allocation66_spill] sm:$0xff] %v7473_v8  ;;  %v7480_v30 = vmul.f32 %v7440_v44, %v892_v25  ;;  %v7483_v48 = vmul.f32 %v7444_v41, %v979_v2  ;;  %v981_v13 = vpop.f32.mrb[57].mxu1  ;;  %v244_v25 = vrot.slane %v243_v4, 2 }
 0x153   :  { %12225 = vst [vmem:[#allocation67_spill] sm:$0xff] %v7477_v45  ;;  %v7487_v43 = vmul.f32 %v7451_v29, %v981_v13  ;;  %v983_v50 = vpop.f32.mrb[58].mxu1  ;;  %v260_v3 = vrot.slane %v259_v14, 2 }
 0x154   :  { %12226 = vst [vmem:[#allocation68_spill] sm:$0xff] %v7480_v30  ;;  %12227 = vst [vmem:[#allocation69_spill] sm:$0xff] %v7483_v48  ;;  %v7491_v49 = vmul.f32 %v7444_v41, %v983_v50  ;;  %v985_v53 = vpop.f32.mrb[59].mxu1  ;;  %v7497_v48 = vand.u32 127, %v12046_v24  ;;  %v245_v50 = vadd.f32 %v244_v25, %v243_v4 }
 0x155   :  { %12228 = vst [vmem:[#allocation70_spill] sm:$0xff] %v7487_v43  ;;  %v7494_v27 = vmul.f32 %v7451_v29, %v985_v53  ;;  %v237_v43 = vadd.f32 %v236_v63, %v235_v35  ;;  %v253_v63 = vadd.f32 %v252_v15, %v251_v0 }
 0x156   :  { %12229 = vst [vmem:[#allocation71_spill] sm:$0xff] %v7491_v49  ;;  %v896_v2 = vpop.f32.mrb[60].mxu0  ;;  %v7512_v30 = vadd.s32 128, %v7497_v48  ;;  %vm1988_vm4 = vcmp.lt.s32.totalorder %v7497_v48, 1  ;;  %vm2259_vm6 = vcmp.lt.s32.totalorder %v7497_v48, 127 }
 0x157   :  { %12230 = vst [vmem:[#allocation72_spill] sm:$0xff] %v7494_v27  ;;  %v7500_v36 = vmul.f32 %v7436_v17, %v896_v2  ;;  %v898_v13 = vpop.f32.mrb[61].mxu0  ;;  %v254_v15 = vrot.slane %v253_v63, 1 }
 0x158   :  { %v7503_v22 = vmul.f32 %v7440_v44, %v898_v13  ;;  %v900_v28 = vpop.f32.mrb[62].mxu0  ;;  %v7517_v13 = vpop.permute.xlu1 %1550 }
 0x159   :  { %12231 = vst [vmem:[#allocation73_spill] sm:$0xff] %v7500_v36  ;;  %v7506_v49 = vmul.f32 %v7436_v17, %v900_v28  ;;  %v902_v53 = vpop.f32.mrb[63].mxu0  ;;  %v989_v27 = vpop.f32.mrb[60].mxu1  ;;  %12236 = vst [vmem:[#allocation78_spill] sm:$0xff] %v7517_v13  ;;  %v238_v28 = vrot.slane %v237_v43, 1  ;;  %v246_v36 = vrot.slane %v245_v50, 1  ;;  %v255_v46 = vadd.f32 %v254_v15, %v253_v63 }
 0x15a   :  { %12232 = vst [vmem:[#allocation74_spill] sm:$0xff] %v7503_v22  ;;  %v7509_v24 = vmul.f32 %v7440_v44, %v902_v53  ;;  %v7515_v2 = vmul.f32 %v7444_v41, %v989_v27  ;;  %v991_v35 = vpop.f32.mrb[61].mxu1  ;;  %v7522_v22 = vpop.permute.xlu0 %1545 }
 0x15b   :  { %12233 = vst [vmem:[#allocation75_spill] sm:$0xff] %v7506_v49  ;;  %v7520_v4 = vmul.f32 %v7451_v29, %v991_v35  ;;  %v993_v25 = vpop.f32.mrb[62].mxu1  ;;  %v261_v49 = vadd.f32 %v260_v3, %v259_v14  ;;  %12238 = vst [vmem:[#allocation80_spill] sm:$0xff] %v7522_v22  ;;  %v239_v3 = vadd.f32 %v238_v28, %v237_v43  ;;  %v295_v15 = vmul.f32 0.11111111, %v255_v46 }
 0x15c   :  { %12234 = vst [vmem:[#allocation76_spill] sm:$0xff] %v7509_v24  ;;  %12235 = vst [vmem:[#allocation77_spill] sm:$0xff] %v7515_v2  ;;  %v7525_v53 = vmul.f32 %v7444_v41, %v993_v25  ;;  %v995_v24 = vpop.f32.mrb[63].mxu1 }
 0x15d   :  { %12237 = vst [vmem:[#allocation79_spill] sm:$0xff] %v7520_v4  ;;  %v7528_v27 = vmul.f32 %v7451_v29, %v995_v24  ;;  %v262_v14 = vrot.slane %v261_v49, 1  ;;  %v247_v24 = vadd.f32 %v246_v36, %v245_v50 }
 0x15e   :  { %12239 = vst [vmem:[#allocation81_spill] sm:$0xff] %v7525_v53  ;;  %v906_v2 = vpop.f32.mrb[64].mxu0  ;;  %v7536_v57 = vpop.permute.xlu0 %1555 }
 0x15f   :  { %12240 = vst [vmem:[#allocation82_spill] sm:$0xff] %v7528_v27  ;;  %v7532_v35 = vmul.f32 %v7436_v17, %v906_v2  ;;  %v908_v4 = vpop.f32.mrb[65].mxu0  ;;  %v7534_v45 = vpop.permute.xlu1 %1880  ;;  %12243 = vst [vmem:[#allocation85_spill] sm:$0xff] %v7536_v57 }
 0x160   :  { %12242 = vst [vmem:[#allocation84_spill] sm:$0xff] %v7534_v45  ;;  %v7539_v25 = vmul.f32 %v7440_v44, %v908_v4  ;;  %v910_v53 = vpop.f32.mrb[66].mxu0 }
 0x161   :  { %12241 = vst [vmem:[#allocation83_spill] sm:$0xff] %v7532_v35  ;;  %v7542_v27 = vmul.f32 %v7436_v17, %v910_v53  ;;  %v912_v0 = vpop.f32.mrb[67].mxu0  ;;  %v999_v55 = vpop.f32.mrb[64].mxu1  ;;  %v12247_v35 = vcvt.s32.f32 %v7512_v30  ;;  %v293_v53 = vmul.f32 0.11111111, %v239_v3 }
 0x162   :  { %12244 = vst [vmem:[#allocation86_spill] sm:$0xff] %v7539_v25  ;;  %v7545_v2 = vmul.f32 %v7440_v44, %v912_v0  ;;  %v7550_v43 = vmul.f32 %v7444_v41, %v999_v55  ;;  %v1001_v28 = vpop.f32.mrb[65].mxu1  ;;  %v263_v25 = vadd.f32 %v262_v14, %v261_v49 }
 0x163   :  { %12245 = vst [vmem:[#allocation87_spill] sm:$0xff] %v7542_v27  ;;  %v1773_v31 = vadd.f32 0.5, %v12247_v35  ;;  %v7552_v4 = vpop.permute.xlu1 %1892  ;;  %v7555_v36 = vmul.f32 %v7451_v29, %v1001_v28  ;;  %v1003_v50 = vpop.f32.mrb[66].mxu1 }
 0x164   :  { %12246 = vst [vmem:[#allocation88_spill] sm:$0xff] %v7545_v2  ;;  %12248 = vst [vmem:[#allocation89_spill] sm:$0xff] %v7550_v43  ;;  %v7558_v27 = vmul.f32 %v7444_v41, %v1003_v50  ;;  %v1005_v0 = vpop.f32.mrb[67].mxu1  ;;  %v294_v2 = vmul.f32 0.11111111, %v247_v24 }
 0x165   :  { %12249 = vst [vmem:[#allocation90_spill] sm:$0xff] %v7552_v4  ;;  %12250 = vst [vmem:[#allocation91_spill] sm:$0xff] %v7555_v36  ;;  %v7560_v8 = vpop.permute.xlu0 %1882  ;;  %v7563_v55 = vmul.f32 %v7451_v29, %v1005_v0  ;;  %v1791_v63 = vmul.f32 0.11111111, %v1773_v31  ;;  %v311_v36 = vadd.f32 1e-05, %v293_v53 }
 0x166   :  { %12251 = vst [vmem:[#allocation92_spill] sm:$0xff] %v7558_v27  ;;  %12252 = vst [vmem:[#allocation93_spill] sm:$0xff] %v7560_v8  ;;  %v916_v35 = vpop.f32.mrb[68].mxu0  ;;  %v296_v3 = vmul.f32 0.11111111, %v263_v25 }
 0x167   :  { %12253 = vst [vmem:[#allocation94_spill] sm:$0xff] %v7563_v55  ;;  %v7566_v43 = vmul.f32 %v7436_v17, %v916_v35  ;;  %v918_v28 = vpop.f32.mrb[69].mxu0  ;;  %v7571_v14 = vpop.permute.xlu1 %1886  ;;  %v312_v50 = vadd.f32 1e-05, %v294_v2  ;;  %v1809_v46 = vfloor.f32 %v1791_v63  ;;  %v313_v53 = vadd.f32 1e-05, %v295_v15 }
 0x168   :  { %v7569_v49 = vmul.f32 %v7440_v44, %v918_v28  ;;  %v920_v24 = vpop.f32.mrb[70].mxu0  ;;  %6100 = vrsqrt.f32 %v311_v36  ;;  %v314_v27 = vadd.f32 1e-05, %v296_v3 }
 0x169   :  { %v7574_v4 = vmul.f32 %v7436_v17, %v920_v24  ;;  %v922_v0 = vpop.f32.mrb[71].mxu0  ;;  %v7576_v55 = vpop.permute.xlu0 %1894  ;;  %6102 = vrsqrt.f32 %v312_v50 }
 0x16a   :  { %12254 = vst [vmem:[#allocation95_spill] sm:$0xff] %v7576_v55  ;;  %v7579_v31 = vmul.f32 %v7440_v44, %v922_v0  ;;  %v1009_v35 = vpop.f32.mrb[68].mxu1  ;;  %v1827_v0 = vmul.f32 9.0, %v1809_v46  ;;  %6104 = vrsqrt.f32 %v313_v53 }
 0x16b   :  { %v7582_v25 = vmul.f32 %v7444_v41, %v1009_v35  ;;  %v1011_v28 = vpop.f32.mrb[69].mxu1  ;;  %v7592_v55 = vpop.permute.xlu1 %1898  ;;  %6106 = vrsqrt.f32 %v314_v27 }
 0x16c   :  { %v7585_v2 = vmul.f32 %v7451_v29, %v1011_v28  ;;  %v1013_v17 = vpop.f32.mrb[70].mxu1  ;;  %12258 = vst [vmem:[#allocation99_spill] sm:$0xff] %v7592_v55 }
 0x16d   :  { %v7587_v24 = vpop.permute.xlu0 %1888  ;;  %v7590_v63 = vmul.f32 %v7444_v41, %v1013_v17  ;;  %v1015_v44 = vpop.f32.mrb[71].mxu1  ;;  %v12265_v41 = vcvt.s32.f32 %v7512_v30  ;;  %v1595_v30 = vadd.f32 %v7536_v57, %v7219_v19 }
 0x16e   :  { %12255 = vst [vmem:[#allocation96_spill] sm:$0xff] %v7585_v2  ;;  %12256 = vst [vmem:[#allocation97_spill] sm:$0xff] %v7587_v24  ;;  %v7594_v15 = vpop.f32.mrb[72].mxu0  ;;  %v7599_v36 = vmul.f32 %v7451_v29, %v1015_v44 }
 0x16f   :  { %12257 = vst [vmem:[#allocation98_spill] sm:$0xff] %v7590_v63  ;;  %12259 = vst [vmem:[#allocation100_spill] sm:$0xff] %v7594_v15  ;;  %v7596_v35 = vpop.f32.mrb[73].mxu0  ;;  %v7609_v46 = vsub.f32 %v12265_v41, %v1827_v0  ;;  %v7615_v53 = vpop.permute.xlu1 %1884 }
 0x170   :  { %12260 = vst [vmem:[#allocation101_spill] sm:$0xff] %v7596_v35  ;;  %12261 = vst [vmem:[#allocation102_spill] sm:$0xff] %v7599_v36  ;;  %v7601_v3 = vpop.f32.mrb[74].mxu0 }
 0x171   :  { %12262 = vst [vmem:[#allocation103_spill] sm:$0xff] %v7601_v3  ;;  %v7603_v50 = vpop.f32.mrb[75].mxu0  ;;  %v7605_v28 = vpop.permute.xlu0 %1900  ;;  %12268 = vst [vmem:[#allocation108_spill] sm:$0xff] %v7615_v53  ;;  %vm1863_vm5 = vcmp.gt.f32.partialorder %v7609_v46, 0.5  ;;  %vm2134_vm7 = vcmp.lt.f32.partialorder %v7609_v46, 7.5 }
 0x172   :  { %12263 = vst [vmem:[#allocation104_spill] sm:$0xff] %v7603_v50  ;;  %12264 = vst [vmem:[#allocation105_spill] sm:$0xff] %v7605_v28  ;;  %v7611_v17 = vpop.f32.mrb[72].mxu1  ;;  %v7624_v44 = vpop.eup %6100  ;;  %v274_v28 = vrot.slane %v6974_v60, 4 }
 0x173   :  { %12266 = vst [vmem:[#allocation106_spill] sm:$0xff] %v7611_v17  ;;  %v7613_v15 = vpop.f32.mrb[73].mxu1 }
 0x174   :  { %12267 = vst [vmem:[#allocation107_spill] sm:$0xff] %v7613_v15  ;;  %v7617_v35 = vpop.f32.mrb[74].mxu1 }
 0x175   :  { %12269 = vst [vmem:[#allocation109_spill] sm:$0xff] %v7617_v35  ;;  %v7620_v29 = vpop.permute.xlu0 %1890  ;;  %v7622_v27 = vpop.f32.mrb[75].mxu1 }
 0x176   :  { %12270 = vst [vmem:[#allocation110_spill] sm:$0xff] %v7620_v29  ;;  %12271 = vst [vmem:[#allocation111_spill] sm:$0xff] %v7622_v27  ;;  %v2039_v0 = vsel %vm1988_vm4, %v7615_v53, %v7620_v29  ;;  %v7633_v41 = vpop.f32.mrb[76].mxu0  ;;  %v7635_v35 = vpop.eup %6102 }
 0x177   :  { %12272 = vst [vmem:[#allocation112_spill] sm:$0xff] %v7633_v41  ;;  %v2116_v17 = vsel %vm1863_vm5, %v2039_v0, 0.0  ;;  %v7639_v27 = vpop.f32.mrb[77].mxu0  ;;  %v7643_v50 = vpop.eup %6104 }
 0x178   :  { %12273 = vst [vmem:[#allocation113_spill] sm:$0xff] %v7639_v27  ;;  %v7641_v15 = vadd.f32 %v2116_v17, %v1595_v30  ;;  %v1066_v3 = vpop.f32.mrb[78].mxu0  ;;  %v7650_v53 = vpop.eup %6106  ;;  %v266_v30 = vrot.slane %v6979_v62, 4 }
 0x179   :  { %v7646_v19 = vmul.f32 %v7624_v44, %v1066_v3  ;;  %v7648_v36 = vpop.f32.mrb[76].mxu1  ;;  %v1068_v29 = vpop.f32.mrb[79].mxu0 }
 0x17a   :  { %12275 = vst [vmem:[#allocation115_spill] sm:$0xff] %v7648_v36  ;;  %v7652_v41 = vpop.permute.xlu1 %2163  ;;  %v7655_v2 = vmul.f32 %v7635_v35, %v1068_v29  ;;  %v7657_v0 = vpop.f32.mrb[77].mxu1  ;;  %v2037_v36 = vsel %vm1988_vm4, %v7534_v45, %v7571_v14  ;;  %v275_v45 = vadd.f32 %v274_v28, %v6974_v60 }
 0x17b   :  { %12274 = vst [vmem:[#allocation114_spill] sm:$0xff] %v7646_v19  ;;  %12276 = vst [vmem:[#allocation116_spill] sm:$0xff] %v7652_v41  ;;  %v1159_v17 = vpop.f32.mrb[78].mxu1 }
 0x17c   :  { %12277 = vst [vmem:[#allocation117_spill] sm:$0xff] %v7655_v2  ;;  %12278 = vst [vmem:[#allocation118_spill] sm:$0xff] %v7657_v0  ;;  %v7661_v27 = vmul.f32 %v7643_v50, %v1159_v17  ;;  %v1161_v3 = vpop.f32.mrb[79].mxu1  ;;  %v267_v17 = vadd.f32 %v266_v30, %v6979_v62 }
 0x17d   :  { %v7669_v55 = vmul.f32 %v7650_v53, %v1161_v3 }
 0x17e   :  { %12279 = vst [vmem:[#allocation119_spill] sm:$0xff] %v7661_v27  ;;  %v7671_v29 = vpop.permute.xlu1 %2151  ;;  %v1072_v0 = vpop.f32.mrb[80].mxu0  ;;  %v2080_v27 = vsel %vm1863_vm5, %v2037_v36, 0.0 }
 0x17f   :  { %12280 = vst [vmem:[#allocation120_spill] sm:$0xff] %v7669_v55  ;;  %12281 = vst [vmem:[#allocation121_spill] sm:$0xff] %v7671_v29  ;;  %v7674_v57 = vmul.f32 %v7624_v44, %v1072_v0  ;;  %v1074_v2 = vpop.f32.mrb[81].mxu0  ;;  %v1559_v0 = vadd.f32 %v7522_v22, %v7188_v21  ;;  %v2038_v21 = vsel %vm1988_vm4, %v7560_v8, %v7587_v24  ;;  %v276_v8 = vrot.slane %v275_v45, 2 }
 0x180   :  { %v7679_v19 = vpop.permute.xlu0 %2165  ;;  %v7682_v63 = vmul.f32 %v7635_v35, %v1074_v2  ;;  %v1076_v3 = vpop.f32.mrb[82].mxu0  ;;  %v1577_v24 = vadd.f32 %v7517_v13, %v7196_v39 }
 0x181   :  { %12282 = vst [vmem:[#allocation122_spill] sm:$0xff] %v7674_v57  ;;  %12283 = vst [vmem:[#allocation123_spill] sm:$0xff] %v7679_v19  ;;  %v1165_v29 = vpop.f32.mrb[80].mxu1  ;;  %v7690_v62 = vmul.f32 %v7624_v44, %v1076_v3  ;;  %v1078_v36 = vpop.f32.mrb[83].mxu0  ;;  %v2405_v60 = vadd.f32 %v2080_v27, %v1559_v0 }
 0x182   :  { %12284 = vst [vmem:[#allocation124_spill] sm:$0xff] %v7682_v63  ;;  %v7693_v30 = vmul.f32 %v7643_v50, %v1165_v29  ;;  %v1167_v2 = vpop.f32.mrb[81].mxu1  ;;  %v7695_v55 = vpop.permute.xlu1 %2157  ;;  %v7698_v63 = vmul.f32 %v7635_v35, %v1078_v36 }
 0x183   :  { %12285 = vst [vmem:[#allocation125_spill] sm:$0xff] %v7690_v62  ;;  %12287 = vst [vmem:[#allocation127_spill] sm:$0xff] %v7695_v55  ;;  %v7705_v28 = vmul.f32 %v7650_v53, %v1167_v2  ;;  %v2305_v29 = vsel %vm2259_vm6, %v7695_v55, %v7652_v41  ;;  %v1169_v3 = vpop.f32.mrb[82].mxu1  ;;  %v268_v62 = vrot.slane %v267_v17, 2 }
 0x184   :  { %12286 = vst [vmem:[#allocation126_spill] sm:$0xff] %v7693_v30  ;;  %12288 = vst [vmem:[#allocation128_spill] sm:$0xff] %v7698_v63  ;;  %v2351_v36 = vsel %vm2134_vm7, %v2305_v29, 0.0  ;;  %v7714_v27 = vmul.f32 %v7643_v50, %v1169_v3  ;;  %v1171_v0 = vpop.f32.mrb[83].mxu1  ;;  %v7716_v63 = vpop.permute.xlu0 %2153 }
 0x185   :  { %12289 = vst [vmem:[#allocation129_spill] sm:$0xff] %v7705_v28  ;;  %12291 = vst [vmem:[#allocation131_spill] sm:$0xff] %v7716_v63  ;;  %v7718_v30 = vadd.f32 %v2405_v60, %v2351_v36  ;;  %v7721_v2 = vmul.f32 %v7650_v53, %v1171_v0  ;;  %v2098_v28 = vsel %vm1863_vm5, %v2038_v21, 0.0  ;;  %v269_v60 = vadd.f32 %v268_v62, %v267_v17 }
 0x186   :  { %12290 = vst [vmem:[#allocation130_spill] sm:$0xff] %v7714_v27  ;;  %v1082_v55 = vpop.f32.mrb[84].mxu0  ;;  %v7728_v3 = vpop.permute.xlu1 %2169  ;;  %v277_v21 = vadd.f32 %v276_v8, %v275_v45  ;;  %v2423_v57 = vadd.f32 %v2098_v28, %v1577_v24 }
 0x187   :  { %12292 = vst [vmem:[#allocation132_spill] sm:$0xff] %v7721_v2  ;;  %v2513_v29 = vmul.f32 0.5, %v7718_v30  ;;  %v7731_v27 = vmul.f32 %v7624_v44, %v1082_v55  ;;  %v1084_v63 = vpop.f32.mrb[85].mxu0  ;;  %v270_v24 = vrot.slane %v269_v60, 1 }
 0x188   :  { %v7733_v36 = vpop.permute.xlu0 %2159  ;;  %v7736_v0 = vmul.f32 %v7635_v35, %v1084_v63  ;;  %v1086_v2 = vpop.f32.mrb[86].mxu0 }
 0x189   :  { %12293 = vst [vmem:[#allocation133_spill] sm:$0xff] %v7731_v27  ;;  %12294 = vst [vmem:[#allocation134_spill] sm:$0xff] %v7733_v36  ;;  %v2306_v39 = vsel %vm2259_vm6, %v7733_v36, %v7679_v19  ;;  %v1175_v13 = vpop.f32.mrb[84].mxu1  ;;  %v1088_v41 = vpop.f32.mrb[87].mxu0  ;;  %6108 = vtanh.f32 %v2513_v29  ;;  %v7753_v28 = vmul.f32 %v7624_v44, %v1086_v2 }
 0x18a   :  { %12295 = vst [vmem:[#allocation135_spill] sm:$0xff] %v7736_v0  ;;  %v2369_v55 = vsel %vm2134_vm7, %v2306_v39, 0.0  ;;  %v7745_v17 = vmul.f32 %v7643_v50, %v1175_v13  ;;  %v1177_v62 = vpop.f32.mrb[85].mxu1  ;;  %v7756_v0 = vmul.f32 %v7635_v35, %v1088_v41 }
 0x18b   :  { %v7747_v63 = vadd.f32 %v2423_v57, %v2369_v55  ;;  %v7750_v8 = vmul.f32 %v7650_v53, %v1177_v62  ;;  %v1179_v45 = vpop.f32.mrb[86].mxu1  ;;  %12298 = vst [vmem:[#allocation138_spill] sm:$0xff] %v7753_v28  ;;  %v7764_v62 = vpop.permute.xlu1 %2161 }
 0x18c   :  { %12296 = vst [vmem:[#allocation136_spill] sm:$0xff] %v7745_v17  ;;  %12299 = vst [vmem:[#allocation139_spill] sm:$0xff] %v7756_v0  ;;  %v7758_v29 = vpop.permute.xlu0 %2155  ;;  %v7761_v39 = vmul.f32 %v7643_v50, %v1179_v45  ;;  %v1181_v13 = vpop.f32.mrb[87].mxu1  ;;  %v278_v17 = vrot.slane %v277_v21, 1  ;;  %v271_v0 = vadd.f32 %v270_v24, %v269_v60 }
 0x18d   :  { %12297 = vst [vmem:[#allocation137_spill] sm:$0xff] %v7750_v8  ;;  %12300 = vst [vmem:[#allocation140_spill] sm:$0xff] %v7758_v29  ;;  %v2531_v57 = vmul.f32 0.5, %v7747_v63  ;;  %v7767_v8 = vmul.f32 %v7650_v53, %v1181_v13 }
 0x18e   :  { %12301 = vst [vmem:[#allocation141_spill] sm:$0xff] %v7761_v39  ;;  %v1092_v55 = vpop.f32.mrb[88].mxu0  ;;  %12302 = vst [vmem:[#allocation142_spill] sm:$0xff] %v7764_v62  ;;  %v279_v27 = vadd.f32 %v278_v17, %v277_v21  ;;  %v297_v46 = vmul.f32 0.11111111, %v271_v0 }
 0x18f   :  { %6110 = vtanh.f32 %v2531_v57  ;;  %12303 = vst [vmem:[#allocation143_spill] sm:$0xff] %v7767_v8  ;;  %v7770_v2 = vmul.f32 %v7624_v44, %v1092_v55  ;;  %v1094_v41 = vpop.f32.mrb[89].mxu0 }
 0x190   :  { %v7772_v28 = vpop.permute.xlu0 %2167  ;;  %v7775_v45 = vmul.f32 %v7635_v35, %v1094_v41  ;;  %v1096_v39 = vpop.f32.mrb[90].mxu0 }
 0x191   :  { %12304 = vst [vmem:[#allocation144_spill] sm:$0xff] %v7770_v2  ;;  %12305 = vst [vmem:[#allocation145_spill] sm:$0xff] %v7772_v28  ;;  %v2307_v57 = vsel %vm2259_vm6, %v7764_v62, %v7772_v28  ;;  %v1185_v19 = vpop.f32.mrb[88].mxu1  ;;  %v1098_v13 = vpop.f32.mrb[91].mxu0  ;;  %v7793_v21 = vmul.f32 %v7624_v44, %v1096_v39  ;;  %v315_v28 = vadd.f32 1e-05, %v297_v46 }
 0x192   :  { %12306 = vst [vmem:[#allocation146_spill] sm:$0xff] %v7775_v45  ;;  %v2387_v55 = vsel %vm2134_vm7, %v2307_v57, 0.0  ;;  %v7784_v8 = vmul.f32 %v7643_v50, %v1185_v19  ;;  %v1187_v60 = vpop.f32.mrb[89].mxu1  ;;  %v7796_v45 = vmul.f32 %v7635_v35, %v1098_v13 }
 0x193   :  { %v7787_v24 = vadd.f32 %v7641_v15, %v2387_v55  ;;  %v7790_v41 = vmul.f32 %v7650_v53, %v1187_v60  ;;  %v1189_v17 = vpop.f32.mrb[90].mxu1  ;;  %v6109_v2 = vpop.eup %6108  ;;  %6112 = vrsqrt.f32 %v315_v28 }
 0x194   :  { %12307 = vst [vmem:[#allocation147_spill] sm:$0xff] %v7784_v8  ;;  %v7799_v57 = vmul.f32 %v7643_v50, %v1189_v17  ;;  %v1191_v19 = vpop.f32.mrb[91].mxu1  ;;  %v298_v8 = vmul.f32 0.11111111, %v279_v27 }
 0x195   :  { %12308 = vst [vmem:[#allocation148_spill] sm:$0xff] %v7790_v41  ;;  %v7802_v15 = vmul.f32 %v7650_v53, %v1191_v19  ;;  %v2621_v41 = vmul.f32 0.5, %v6109_v2 }
 0x196   :  { %12309 = vst [vmem:[#allocation149_spill] sm:$0xff] %v7799_v57  ;;  %v1102_v55 = vpop.f32.mrb[92].mxu0  ;;  %v316_v62 = vadd.f32 1e-05, %v298_v8 }
 0x197   :  { %12310 = vst [vmem:[#allocation150_spill] sm:$0xff] %v7802_v15  ;;  %v7805_v60 = vmul.f32 %v7624_v44, %v1102_v55  ;;  %v1104_v39 = vpop.f32.mrb[93].mxu0  ;;  %v2675_v36 = vadd.f32 0.5, %v2621_v41 }
 0x198   :  { %v7808_v13 = vmul.f32 %v7635_v35, %v1104_v39  ;;  %v1106_v29 = vpop.f32.mrb[94].mxu0  ;;  %6114 = vrsqrt.f32 %v316_v62 }
 0x199   :  { %v6111_v0 = vpop.eup %6110  ;;  %v1195_v17 = vpop.f32.mrb[92].mxu1  ;;  %v7811_v57 = vmul.f32 %v7624_v44, %v1106_v29 }
 0x19a   :  { %v1108_v27 = vpop.f32.mrb[95].mxu0  ;;  %v7814_v19 = vmul.f32 %v7643_v50, %v1195_v17  ;;  %v1197_v15 = vpop.f32.mrb[93].mxu1  ;;  %v2639_v39 = vmul.f32 0.5, %v6111_v0 }
 0x19b   :  { %12311 = vst [vmem:[#allocation151_spill] sm:$0xff] %v7811_v57  ;;  %v7817_v55 = vmul.f32 %v7635_v35, %v1108_v27  ;;  %v7820_v2 = vmul.f32 %v7650_v53, %v1197_v15  ;;  %v1199_v46 = vpop.f32.mrb[94].mxu1  ;;  %v2729_v15 = vmul.f32 %v2675_v36, %v7718_v30 }
 0x19c   :  { %v7823_v8 = vmul.f32 %v7643_v50, %v1199_v46  ;;  %v1201_v44 = vpop.f32.mrb[95].mxu1  ;;  %v2693_v17 = vadd.f32 0.5, %v2639_v39 }
 0x19d   :  { %v7826_v29 = vmul.f32 %v7650_v53, %v1201_v44  ;;  %v6113_v50 = vpop.eup %6112 }
 0x19e   :  { %v7828_v57 = vpop.f32.mrb[96].mxu0  ;;  %v2747_v27 = vmul.f32 %v2693_v17, %v7747_v63 }
 0x19f   :  { %12312 = vst [vmem:[#allocation152_spill] sm:$0xff] %v7826_v29  ;;  %12313 = vst [vmem:[#allocation153_spill] sm:$0xff] %v7828_v57  ;;  %v7830_v35 = vpop.f32.mrb[97].mxu0 }
 0x1a0   :  { %12314 = vst [vmem:[#allocation154_spill] sm:$0xff] %v7830_v35  ;;  %v7834_v0 = vpop.f32.mrb[98].mxu0  ;;  %v2783_v28 = vpack.c.bf16 %v2747_v27, %v2729_v15  ;;  %v12371_v35 = vld [vmem:[#allocation38_spill] sm:$0xff] }
 0x1a1   :  { %12315 = vst [vmem:[#allocation155_spill] sm:$0xff] %v7834_v0  ;;  %v7836_v41 = vpop.f32.mrb[99].mxu0 }
 0x1a2   :  { %12316 = vst [vmem:[#allocation156_spill] sm:$0xff] %v7836_v41  ;;  %2913 = vmatprep.subr.bf16.mxu1 %v2783_v28  ;;  %v7840_v53 = vpop.eup %6114  ;;  %v12370_v41 = vld [vmem:[#allocation37_spill] sm:$0xff] }
 0x1a6   :  { %v7838_v62 = vpop.f32.mrb[100].mxu0 }
 0x1a7   :  { %12317 = vst [vmem:[#allocation157_spill] sm:$0xff] %v7838_v62  ;;  %v7842_v46 = vpop.f32.mrb[101].mxu0 }
 0x1a8   :  { %12318 = vst [vmem:[#allocation158_spill] sm:$0xff] %v7842_v46  ;;  %v1252_v39 = vpop.f32.mrb[102].mxu0 }
 0x1a9   :  { %v7844_v44 = vmul.f32 %v6113_v50, %v1252_v39  ;;  %v1254_v57 = vpop.f32.mrb[103].mxu0 }
 0x1aa   :  { %v1383_v30 = vmul.f32 %v7840_v53, %v1254_v57 }
 0x1ac   :  { %v1452_v36 = vadd.f32 %v7127_v1, %v1383_v30  ;;  %v1702_v30 = vadd.f32 %v7244_v18, %v7247_v12  ;;  %v1703_v12 = vadd.f32 %v7244_v18, %v7397_v56  ;;  %v1687_v56 = vadd.f32 %v7233_v33, %v7391_v38 }
 0x1ad   :  { %v1473_v38 = vadd.f32 %v7185_v52, %v7173_v10 }
 0x1ae   :  { %v1258_v63 = vpop.f32.mrb[104].mxu0  ;;  %1982 = vrot.lane.b32.xlu1 %v1452_v36, %s6661_s0 }
 0x1af   :  { %v7849_v17 = vmul.f32 %v6113_v50, %v1258_v63  ;;  %v1260_v15 = vpop.f32.mrb[105].mxu0 }
 0x1b0   :  { %v1401_v27 = vmul.f32 %v7840_v53, %v1260_v15  ;;  %v1262_v28 = vpop.f32.mrb[106].mxu0 }
 0x1b1   :  { %v7852_v62 = vmul.f32 %v6113_v50, %v1262_v28  ;;  %v1264_v46 = vpop.f32.mrb[107].mxu0  ;;  %v1685_v28 = vadd.f32 %v7233_v33, %v7379_v20  ;;  %v1686_v20 = vadd.f32 %v7233_v33, %v7382_v6 }
 0x1b2   :  { %v1470_v39 = vadd.f32 %v7153_v26, %v1401_v27  ;;  %v1419_v0 = vmul.f32 %v7840_v53, %v1264_v46 }
 0x1b4   :  { %v1488_v57 = vadd.f32 %v7185_v52, %v1419_v0  ;;  %1984 = vrot.lane.b32.xlu0 %v1470_v39, %s6661_s0 }
 0x1b6   :  { %v1268_v36 = vpop.f32.mrb[108].mxu0  ;;  %1986 = vrot.lane.b32.xlu1 %v1488_v57, %s6661_s0 }
 0x1b7   :  { %v7861_v63 = vmul.f32 %v6113_v50, %v1268_v36  ;;  %v1270_v15 = vpop.f32.mrb[109].mxu0  ;;  %v1704_v36 = vadd.f32 %v7244_v18, %v7400_v59  ;;  %v1705_v59 = vadd.f32 %v7244_v18, %v7409_v5  ;;  %v1475_v5 = vadd.f32 %v7185_v52, %v7325_v11 }
 0x1b8   :  { %v7866_v27 = vmul.f32 %v7840_v53, %v1270_v15  ;;  %v1272_v46 = vpop.f32.mrb[110].mxu0  ;;  %2171 = vrot.lane.b32.xlu0 %v1702_v30, %s6662_s6  ;;  %v1720_v11 = vadd.f32 %v7279_v42, %v7253_v58  ;;  %v1441_v58 = vadd.f32 %v7127_v1, %v7308_v23  ;;  %v1443_v23 = vadd.f32 %v7127_v1, %v7447_v51 }
 0x1b9   :  { %12319 = vst [vmem:[#allocation159_spill] sm:$0xff] %v7861_v63  ;;  %v7869_v0 = vmul.f32 %v6113_v50, %v1272_v46  ;;  %v1274_v39 = vpop.f32.mrb[111].mxu0 }
 0x1ba   :  { %12320 = vst [vmem:[#allocation160_spill] sm:$0xff] %v7866_v27  ;;  %v7874_v57 = vmul.f32 %v7840_v53, %v1274_v39  ;;  %2175 = vrot.lane.b32.xlu1 %v1685_v28, %s6662_s6 }
 0x1bb   :  { %12321 = vst [vmem:[#allocation161_spill] sm:$0xff] %v7869_v0 }
 0x1bc   :  { %12322 = vst [vmem:[#allocation162_spill] sm:$0xff] %v7874_v57  ;;  %2177 = vrot.lane.b32.xlu0 %v1703_v12, %s6662_s6 }
 0x1be   :  { %v1278_v30 = vpop.f32.mrb[112].mxu0  ;;  %2181 = vrot.lane.b32.xlu1 %v1686_v20, %s6662_s6 }
 0x1bf   :  { %v7883_v15 = vmul.f32 %v6113_v50, %v1278_v30  ;;  %v1280_v46 = vpop.f32.mrb[113].mxu0  ;;  %v1474_v30 = vadd.f32 %v7185_v52, %v7179_v7  ;;  %v1476_v7 = vadd.f32 %v7185_v52, %v7329_v61  ;;  %v1723_v61 = vadd.f32 %v7279_v42, %v7415_v16 }
 0x1c0   :  { %v7888_v39 = vmul.f32 %v7840_v53, %v1280_v46  ;;  %v1282_v28 = vpop.f32.mrb[114].mxu0  ;;  %2183 = vrot.lane.b32.xlu0 %v1704_v36, %s6662_s6  ;;  %v1460_v16 = vadd.f32 %v7153_v26, %v7337_v34 }
 0x1c1   :  { %12323 = vst [vmem:[#allocation163_spill] sm:$0xff] %v7883_v15  ;;  %v7891_v6 = vmul.f32 %v6113_v50, %v1282_v28  ;;  %v1284_v12 = vpop.f32.mrb[115].mxu0  ;;  %v12373_v15 = vld [vmem:[#allocation40_spill] sm:$0xff] }
 0x1c2   :  { %12324 = vst [vmem:[#allocation164_spill] sm:$0xff] %v7888_v39  ;;  %v7896_v20 = vmul.f32 %v7840_v53, %v1284_v12  ;;  %2187 = vrot.lane.b32.xlu1 %v1687_v56, %s6662_s6  ;;  %v12372_v39 = vld [vmem:[#allocation39_spill] sm:$0xff] }
 0x1c3   :  { %12325 = vst [vmem:[#allocation165_spill] sm:$0xff] %v7891_v6 }
 0x1c4   :  { %12326 = vst [vmem:[#allocation166_spill] sm:$0xff] %v7896_v20  ;;  %2189 = vrot.lane.b32.xlu0 %v1705_v59, %s6662_s6 }
 0x1c6   :  { %v1288_v36 = vpop.f32.mrb[116].mxu0  ;;  %1896 = vrot.lane.b32.xlu1 %v1473_v38, %s6661_s0 }
 0x1c7   :  { %v7905_v46 = vmul.f32 %v6113_v50, %v1288_v36  ;;  %v1290_v28 = vpop.f32.mrb[117].mxu0  ;;  %v1721_v36 = vadd.f32 %v7279_v42, %v7403_v47  ;;  %v1459_v47 = vadd.f32 %v7153_v26, %v7332_v37  ;;  %v1461_v37 = vadd.f32 %v7153_v26, %v7468_v40  ;;  %v12333_v40 = vld [vmem:[#allocation50_spill] sm:$0xff] }
 0x1c8   :  { %v7910_v12 = vmul.f32 %v7840_v53, %v1290_v28  ;;  %v1292_v56 = vpop.f32.mrb[118].mxu0  ;;  %1902 = vrot.lane.b32.xlu0 %v1474_v30, %s6661_s0  ;;  %v12332_v30 = vld [vmem:[#allocation49_spill] sm:$0xff]  ;;  %v1738_v28 = vadd.s32 256, %v7497_v48 }
 0x1c9   :  { %12327 = vst [vmem:[#allocation167_spill] sm:$0xff] %v7905_v46  ;;  %v7913_v10 = vmul.f32 %v6113_v50, %v1292_v56  ;;  %v1294_v59 = vpop.f32.mrb[119].mxu0  ;;  %v1722_v50 = vadd.f32 %v7279_v42, %v7406_v32  ;;  %v1442_v32 = vadd.f32 %v7127_v1, %v7313_v54  ;;  %v1444_v54 = vadd.f32 %v7127_v1, %v7454_v9  ;;  %v12334_v9 = vld [vmem:[#allocation87_spill] sm:$0xff] }
 0x1ca   :  { %12328 = vst [vmem:[#allocation168_spill] sm:$0xff] %v7910_v12  ;;  %v7918_v38 = vmul.f32 %v7840_v53, %v1294_v59  ;;  %1908 = vrot.lane.b32.xlu1 %v1475_v5, %s6661_s0  ;;  %v12331_v53 = vld [vmem:[#allocation66_spill] sm:$0xff]  ;;  %v1688_v51 = vadd.f32 %v7233_v33, %v12332_v30  ;;  %v1706_v5 = vadd.f32 %v7244_v18, %v12333_v40  ;;  %v1756_v59 = vcvt.s32.f32 %v1738_v28  ;;  %v12385_v12 = vld [vmem:[#allocation72_spill] sm:$0xff] }
 0x1cb   :  { %12329 = vst [vmem:[#allocation169_spill] sm:$0xff] %v7913_v10  ;;  %v1462_v34 = vadd.f32 %v7153_v26, %v12331_v53  ;;  %v1689_v56 = vadd.f32 %v7233_v33, %v12334_v9  ;;  %v1739_v53 = vadd.s32 384, %v7497_v48  ;;  %v7995_v40 = vadd.s32 512, %v7497_v48  ;;  %v12384_v10 = vld [vmem:[#allocation71_spill] sm:$0xff] }
 0x1cc   :  { %12330 = vst [vmem:[#allocation170_spill] sm:$0xff] %v7918_v38  ;;  %1914 = vrot.lane.b32.xlu0 %v1476_v7, %s6661_s0  ;;  %v1707_v7 = vadd.f32 %v7244_v18, %v7566_v43  ;;  %v1709_v43 = vadd.f32 %v7244_v18, %v7582_v25  ;;  %v12340_v25 = vld [vmem:[#allocation68_spill] sm:$0xff] }
 0x1cd   :  { %v1480_v28 = vadd.f32 %v7185_v52, %v12340_v25  ;;  %v1757_v9 = vcvt.s32.f32 %v1739_v53 }
 0x1ce   :  { %2173 = vrot.lane.b32.xlu1 %v1720_v11, %s6662_s6  ;;  %v12335_v11 = vld [vmem:[#allocation88_spill] sm:$0xff] }
 0x1d0   :  { %2179 = vrot.lane.b32.xlu0 %v1721_v36, %s6662_s6  ;;  %v1690_v36 = vadd.f32 %v7233_v33, %v12335_v11 }
 0x1d2   :  { %2185 = vrot.lane.b32.xlu1 %v1722_v50, %s6662_s6  ;;  %v1774_v50 = vadd.f32 0.5, %v1756_v59 }
 0x1d4   :  { %2191 = vrot.lane.b32.xlu0 %v1723_v61, %s6662_s6  ;;  %v1708_v61 = vadd.f32 %v7244_v18, %v7569_v49  ;;  %v12338_v49 = vld [vmem:[#allocation36_spill] sm:$0xff] }
 0x1d6   :  { %1916 = vrot.lane.b32.xlu1 %v1441_v58, %s6661_s0  ;;  %v1792_v58 = vmul.f32 0.11111111, %v1774_v50  ;;  %v1725_v50 = vadd.f32 %v7279_v42, %v7574_v4  ;;  %v12343_v4 = vld [vmem:[#allocation16_spill] sm:$0xff] }
 0x1d8   :  { %1918 = vrot.lane.b32.xlu0 %v1459_v47, %s6661_s0  ;;  %v12336_v47 = vld [vmem:[#allocation92_spill] sm:$0xff] }
 0x1da   :  { %1922 = vrot.lane.b32.xlu1 %v1442_v32, %s6661_s0  ;;  %v1691_v32 = vadd.f32 %v7233_v33, %v12336_v47  ;;  %v1775_v47 = vadd.f32 0.5, %v1757_v9 }
 0x1dc   :  { %1924 = vrot.lane.b32.xlu0 %v1460_v16, %s6661_s0  ;;  %v12337_v16 = vld [vmem:[#allocation35_spill] sm:$0xff] }
 0x1de   :  { %1928 = vrot.lane.b32.xlu1 %v1443_v23, %s6661_s0  ;;  %v1477_v23 = vadd.f32 %v7185_v52, %v12337_v16 }
 0x1e0   :  { %1930 = vrot.lane.b32.xlu0 %v1461_v37, %s6661_s0  ;;  %v1810_v37 = vfloor.f32 %v1792_v58 }
 0x1e2   :  { %1934 = vrot.lane.b32.xlu1 %v1444_v54, %s6661_s0  ;;  %v1478_v54 = vadd.f32 %v7185_v52, %v12338_v49 }
 0x1e4   :  { %1936 = vrot.lane.b32.xlu0 %v1462_v34, %s6661_s0  ;;  %v12339_v34 = vld [vmem:[#allocation67_spill] sm:$0xff] }
 0x1e5   :  { %v1479_v30 = vadd.f32 %v7185_v52, %v12339_v34 }
 0x1e6   :  { %2193 = vrot.lane.b32.xlu1 %v1688_v51, %s6662_s6  ;;  %v1828_v51 = vmul.f32 9.0, %v1810_v37  ;;  %v12344_v37 = vld [vmem:[#allocation98_spill] sm:$0xff] }
 0x1e7   :  { %v1727_v49 = vadd.f32 %v7279_v42, %v12344_v37 }
 0x1e8   :  { %2195 = vrot.lane.b32.xlu0 %v1706_v5, %s6662_s6  ;;  %v7998_v5 = vadd.s32 640, %v7497_v48  ;;  %v8003_v11 = vsub.f32 %v1756_v59, %v1828_v51  ;;  %v12346_v51 = vld [vmem:[#allocation64_spill] sm:$0xff] }
 0x1e9   :  { %v1445_v25 = vadd.f32 %v7127_v1, %v12346_v51 }
 0x1ea   :  { %2199 = vrot.lane.b32.xlu1 %v1689_v56, %s6662_s6  ;;  %v12341_v56 = vld [vmem:[#allocation51_spill] sm:$0xff]  ;;  %v1759_v58 = vcvt.s32.f32 %v7998_v5  ;;  %vm1864_vm8 = vcmp.gt.f32.partialorder %v8003_v11, 0.5  ;;  %vm2135_vm9 = vcmp.lt.f32.partialorder %v8003_v11, 7.5  ;;  %v12347_v5 = vld [vmem:[#allocation69_spill] sm:$0xff] }
 0x1ec   :  { %2201 = vrot.lane.b32.xlu0 %v1707_v7, %s6662_s6  ;;  %v1724_v7 = vadd.f32 %v7279_v42, %v12341_v56  ;;  %v1777_v34 = vadd.f32 0.5, %v1759_v58  ;;  %v1463_v56 = vadd.f32 %v7153_v26, %v12347_v5 }
 0x1ee   :  { %2205 = vrot.lane.b32.xlu1 %v1690_v36, %s6662_s6  ;;  %v1754_v36 = vcvt.s32.f32 %v7497_v48 }
 0x1f0   :  { %2207 = vrot.lane.b32.xlu0 %v1708_v61, %s6662_s6  ;;  %v1758_v61 = vcvt.s32.f32 %v7995_v40  ;;  %v1772_v16 = vadd.f32 0.5, %v1754_v36 }
 0x1f2   :  { %2211 = vrot.lane.b32.xlu1 %v1691_v32, %s6662_s6  ;;  %v12342_v32 = vld [vmem:[#allocation90_spill] sm:$0xff] }
 0x1f3   :  { %v2034_v59 = vsel %vm1988_vm4, %v7571_v14, %v12342_v32  ;;  %v1776_v14 = vadd.f32 0.5, %v1758_v61 }
 0x1f4   :  { %2213 = vrot.lane.b32.xlu0 %v1709_v43, %s6662_s6  ;;  %v1726_v43 = vadd.f32 %v7279_v42, %v7579_v31  ;;  %v2081_v31 = vsel %vm1864_vm8, %v2034_v59, 0.0  ;;  %v12348_v59 = vld [vmem:[#allocation65_spill] sm:$0xff] }
 0x1f6   :  { %1920 = vrot.lane.b32.xlu1 %v1477_v23, %s6661_s0  ;;  %v1560_v23 = vadd.f32 %v7522_v22, %v12343_v4  ;;  %v1795_v4 = vmul.f32 0.11111111, %v1777_v34 }
 0x1f8   :  { %1926 = vrot.lane.b32.xlu0 %v1478_v54, %s6661_s0  ;;  %v12345_v54 = vld [vmem:[#allocation116_spill] sm:$0xff]  ;;  %v1813_v51 = vfloor.f32 %v1795_v4 }
 0x1f9   :  { %v2302_v53 = vsel %vm2259_vm6, %v12345_v54, %v7728_v3 }
 0x1fa   :  { %1932 = vrot.lane.b32.xlu1 %v1479_v30, %s6661_s0  ;;  %v1793_v30 = vmul.f32 0.11111111, %v1775_v47  ;;  %v2352_v40 = vsel %vm2135_vm9, %v2302_v53, 0.0  ;;  %v1446_v47 = vadd.f32 %v7127_v1, %v12348_v59  ;;  %v12353_v59 = vld [vmem:[#allocation124_spill] sm:$0xff] }
 0x1fc   :  { %1938 = vrot.lane.b32.xlu0 %v1480_v28, %s6661_s0  ;;  %v1790_v28 = vmul.f32 0.11111111, %v1772_v16  ;;  %v12349_v16 = vld [vmem:[#allocation70_spill] sm:$0xff] }
 0x1fe   :  { %2197 = vrot.lane.b32.xlu1 %v1724_v7, %s6662_s6  ;;  %v2406_v7 = vadd.f32 %v2081_v31, %v1560_v23  ;;  %v1808_v37 = vfloor.f32 %v1790_v28  ;;  %v12351_v28 = vld [vmem:[#allocation122_spill] sm:$0xff] }
 0x200   :  { %2203 = vrot.lane.b32.xlu0 %v1725_v50, %s6662_s6  ;;  %v1794_v50 = vmul.f32 0.11111111, %v1776_v14  ;;  %v8042_v54 = vadd.f32 %v2406_v7, %v2352_v40  ;;  %v12350_v14 = vld [vmem:[#allocation114_spill] sm:$0xff]  ;;  %v1826_v31 = vmul.f32 9.0, %v1808_v37  ;;  %v1465_v40 = vadd.f32 %v7153_v26, %v12351_v28  ;;  %v1905_v28 = vpop.permute.xlu1 %1904 }
 0x201   :  { %v1447_v34 = vadd.f32 %v7127_v1, %v12350_v14 }
 0x202   :  { %2209 = vrot.lane.b32.xlu1 %v1726_v43, %s6662_s6  ;;  %v1811_v43 = vfloor.f32 %v1793_v30  ;;  %v1812_v53 = vfloor.f32 %v1794_v50  ;;  %v2514_v30 = vmul.f32 0.5, %v8042_v54  ;;  %v12352_v50 = vld [vmem:[#allocation117_spill] sm:$0xff] }
 0x203   :  { %v1448_v4 = vadd.f32 %v7127_v1, %v12352_v50  ;;  %v12363_v50 = vld [vmem:[#allocation99_spill] sm:$0xff] }
 0x204   :  { %2215 = vrot.lane.b32.xlu0 %v1727_v49, %s6662_s6  ;;  %v1464_v49 = vadd.f32 %v7153_v26, %v12349_v16  ;;  %v1829_v23 = vmul.f32 9.0, %v1811_v43  ;;  %v1830_v5 = vmul.f32 9.0, %v1812_v53  ;;  %v8060_v43 = vsub.f32 %v1754_v36, %v1826_v31  ;;  %v12355_v53 = vld [vmem:[#allocation17_spill] sm:$0xff] }
 0x205   :  { %6116 = vtanh.f32 %v2514_v30  ;;  %v1561_v36 = vadd.f32 %v7522_v22, %v12355_v53  ;;  %v12360_v30 = vld [vmem:[#allocation94_spill] sm:$0xff] }
 0x206   :  { %1940 = vrot.lane.b32.xlu1 %v1445_v25, %s6661_s0  ;;  %v2549_v25 = vmul.f32 0.5, %v7787_v24  ;;  %v8056_v7 = vsub.f32 %v1757_v9, %v1829_v23  ;;  %v8065_v37 = vsub.f32 %v1758_v61, %v1830_v5  ;;  %v12354_v9 = vld [vmem:[#allocation14_spill] sm:$0xff]  ;;  %vm2133_vm11 = vcmp.lt.f32.partialorder %v8060_v43, 7.5  ;;  %v12362_v5 = vld [vmem:[#allocation85_spill] sm:$0xff] }
 0x207   :  { %v12357_v23 = vld [vmem:[#allocation78_spill] sm:$0xff]  ;;  %vm1862_vm14 = vcmp.gt.f32.partialorder %v8060_v43, 0.5 }
 0x208   :  { %1942 = vrot.lane.b32.xlu0 %v1463_v56, %s6661_s0  ;;  %v1831_v56 = vmul.f32 9.0, %v1813_v51  ;;  %6118 = vtanh.f32 %v2549_v25  ;;  %v12356_v51 = vld [vmem:[#allocation18_spill] sm:$0xff]  ;;  %vm1865_vm10 = vcmp.gt.f32.partialorder %v8056_v7, 0.5  ;;  %v1692_v25 = vadd.f32 %v7233_v33, %v12360_v30  ;;  %v12368_v30 = vld [vmem:[#allocation96_spill] sm:$0xff] }
 0x209   :  { %v1578_v14 = vadd.f32 %v12357_v23, %v12356_v51  ;;  %v12366_v51 = vld [vmem:[#allocation105_spill] sm:$0xff]  ;;  %vm1866_vm12 = vcmp.gt.f32.partialorder %v8065_v37, 0.5  ;;  %v8132_v57 = vadd.f32 %v12357_v23, %v12373_v15  ;;  %vm2136_vm15 = vcmp.lt.f32.partialorder %v8056_v7, 7.5  ;;  %v8540_v7 = vld [vmem:[%s12041_s1 + $0x30] sm:$0xff]  }
 0x20a   :  { %1946 = vrot.lane.b32.xlu1 %v1446_v47, %s6661_s0  ;;  %v1466_v47 = vadd.f32 %v7153_v26, %v12353_v59  ;;  %v8067_v16 = vsub.f32 %v1759_v58, %v1831_v56  ;;  %v12359_v58 = vld [vmem:[#allocation19_spill] sm:$0xff]  ;;  %v12376_v15 = vld [vmem:[#allocation41_spill] sm:$0xff]  ;;  %vm2137_vm1 = vcmp.lt.f32.partialorder %v8065_v37, 7.5 }
 0x20b   :  { %v1579_v31 = vadd.f32 %v12357_v23, %v12359_v58  ;;  %v12364_v59 = vld [vmem:[#allocation95_spill] sm:$0xff]  ;;  %v8149_v27 = vadd.f32 %v7522_v22, %v12376_v15  ;;  %v8167_v15 = vadd.f32 %v7185_v52, %v12385_v12 }
 0x20c   :  { %1948 = vrot.lane.b32.xlu0 %v1464_v49, %s6661_s0  ;;  %v8072_v49 = vadd.f32 %v7522_v22, %v12354_v9  ;;  %v12365_v9 = vld [vmem:[#allocation97_spill] sm:$0xff]  ;;  %vm1867_vm13 = vcmp.gt.f32.partialorder %v8067_v16, 0.5  ;;  %v12388_v12 = vld [vmem:[#allocation119_spill] sm:$0xff]  ;;  %vm2138_vm2 = vcmp.lt.f32.partialorder %v8067_v16, 7.5 }
 0x20d   :  { %v2035_v53 = vsel %vm1988_vm4, %v12365_v9, %v12364_v59  ;;  %12377 = vst [vmem:[#allocation49_spill] sm:$0xff] %v8149_v27  ;;  %v8169_v27 = vpop.permute.xlu1 %1910  ;;  %v8186_v46 = vadd.f32 %v7127_v1, %v12388_v12 }
 0x20e   :  { %1952 = vrot.lane.b32.xlu1 %v1447_v34, %s6661_s0  ;;  %v12358_v34 = vld [vmem:[#allocation15_spill] sm:$0xff]  ;;  %12386 = vst [vmem:[#allocation92_spill] sm:$0xff] %v8169_v27 }
 0x20f   :  { %v8081_v61 = vadd.f32 %v12357_v23, %v12358_v34  ;;  %v2032_v34 = vsel %vm1988_vm4, %v12364_v59, %v12366_v51  ;;  %v8120_v59 = vadd.f32 %v7522_v22, %v12370_v41  ;;  %v6117_v38 = vpop.eup %6116 }
 0x210   :  { %1954 = vrot.lane.b32.xlu0 %v1465_v40, %s6661_s0  ;;  %v12361_v40 = vld [vmem:[#allocation20_spill] sm:$0xff]  ;;  %v2100_v41 = vsel %vm1865_vm10, %v2032_v34, 0.0  ;;  %v2622_v12 = vmul.f32 0.5, %v6117_v38 }
 0x211   :  { %v8091_v56 = vadd.f32 %v12362_v5, %v12361_v40  ;;  %v1710_v40 = vadd.f32 %v7244_v18, %v12368_v30  ;;  %v8128_v30 = vadd.f32 %v12357_v23, %v12372_v39  ;;  %v12374_v39 = vld [vmem:[#allocation45_spill] sm:$0xff] }
 0x212   :  { %1958 = vrot.lane.b32.xlu1 %v1448_v4, %s6661_s0  ;;  %v2031_v4 = vsel %vm1988_vm4, %v12342_v32, %v12363_v50  ;;  %v12369_v32 = vld [vmem:[#allocation22_spill] sm:$0xff]  ;;  %v8145_v0 = vadd.f32 %v12362_v5, %v12374_v39  ;;  %v1481_v39 = vadd.f32 %v7185_v52, %v12384_v10 }
 0x213   :  { %v8116_v9 = vadd.f32 %v12362_v5, %v12369_v32  ;;  %v2099_v32 = vsel %vm1864_vm8, %v2035_v53, 0.0  ;;  %v12380_v53 = vld [vmem:[#allocation43_spill] sm:$0xff]  ;;  %v12387_v10 = vld [vmem:[#allocation102_spill] sm:$0xff] }
 0x214   :  { %1960 = vrot.lane.b32.xlu0 %v1466_v47, %s6661_s0  ;;  %v12367_v47 = vld [vmem:[#allocation21_spill] sm:$0xff]  ;;  %12375 = vst [vmem:[#allocation66_spill] sm:$0xff] %v8145_v0  ;;  %v8157_v34 = vadd.f32 %v12357_v23, %v12380_v53  ;;  %v6119_v53 = vpop.eup %6118  ;;  %v8182_v20 = vadd.f32 %v7279_v42, %v12387_v10  ;;  %v2025_v10 = vsel %vm1988_vm4, %v1905_v28, %v8169_v27  ;;  %v12400_v27 = vld [vmem:[#allocation142_spill] sm:$0xff] }
 0x215   :  { %v8107_v58 = vadd.f32 %v12362_v5, %v12367_v47  ;;  %v8124_v47 = vadd.f32 %v7522_v22, %v12371_v35  ;;  %v1693_v35 = vadd.f32 %v7233_v33, %v7793_v21  ;;  %v12382_v21 = vld [vmem:[#allocation46_spill] sm:$0xff]  ;;  %v12391_v23 = vld [vmem:[#allocation121_spill] sm:$0xff] }
 0x216   :  { %2217 = vrot.lane.b32.xlu1 %v1692_v25, %s6662_s6  ;;  %v2082_v25 = vsel %vm1865_vm10, %v2031_v4, 0.0  ;;  %v12378_v4 = vld [vmem:[#allocation42_spill] sm:$0xff]  ;;  %12381 = vst [vmem:[#allocation87_spill] sm:$0xff] %v8157_v34 }
 0x217   :  { %v8153_v63 = vadd.f32 %v7522_v22, %v12378_v4  ;;  %v1907_v4 = vpop.permute.xlu0 %1906  ;;  %v8174_v34 = vadd.f32 %v2082_v25, %v1561_v36  ;;  %v12389_v22 = vld [vmem:[#allocation120_spill] sm:$0xff] }
 0x218   :  { %2219 = vrot.lane.b32.xlu0 %v1710_v40, %s6662_s6  ;;  %v8161_v40 = vadd.f32 %v12362_v5, %v12382_v21  ;;  %v8176_v21 = vadd.f32 %v2099_v32, %v1578_v14  ;;  %v8178_v5 = vadd.f32 %v2100_v41, %v1579_v31  ;;  %v1694_v14 = vadd.f32 %v7233_v33, %v7796_v45  ;;  %v12392_v31 = vld [vmem:[#allocation126_spill] sm:$0xff]  ;;  %v12393_v32 = vld [vmem:[#allocation125_spill] sm:$0xff] }
 0x219   :  { %12379 = vst [vmem:[#allocation50_spill] sm:$0xff] %v8153_v63  ;;  %v1711_v63 = vadd.f32 %v7244_v18, %v7805_v60  ;;  %v8190_v60 = vadd.f32 %v7127_v1, %v12389_v22  ;;  %v8201_v25 = vadd.f32 %v7153_v26, %v12392_v31  ;;  %v8205_v41 = vadd.f32 %v7185_v52, %v12393_v32  ;;  %v12394_v31 = vld [vmem:[#allocation129_spill] sm:$0xff] }
 0x21a   :  { %12383 = vst [vmem:[#allocation88_spill] sm:$0xff] %v8161_v40  ;;  %2223 = vrot.lane.b32.xlu1 %v1693_v35, %s6662_s6  ;;  %v12390_v35 = vld [vmem:[#allocation127_spill] sm:$0xff]  ;;  %v2028_v22 = vsel %vm1988_vm4, %v12363_v50, %v1905_v28  ;;  %v2657_v45 = vmul.f32 0.5, %v6119_v53  ;;  %v8221_v32 = vadd.f32 %v7153_v26, %v12394_v31  ;;  %v12396_v28 = vld [vmem:[#allocation130_spill] sm:$0xff]  ;;  %v12401_v31 = vld [vmem:[#allocation140_spill] sm:$0xff] }
 0x21b   :  { %v2308_v36 = vsel %vm2259_vm6, %v12391_v23, %v12390_v35  ;;  %v1712_v35 = vadd.f32 %v7244_v18, %v7808_v13  ;;  %v12395_v23 = vld [vmem:[#allocation128_spill] sm:$0xff]  ;;  %v12398_v53 = vld [vmem:[#allocation134_spill] sm:$0xff]  ;;  %v12399_v13 = vld [vmem:[#allocation131_spill] sm:$0xff]  ;;  %v2310_v6 = vsel %vm2259_vm6, %v12401_v31, %v12400_v27 }
 0x21c   :  { %2225 = vrot.lane.b32.xlu0 %v1711_v63, %s6662_s6  ;;  %v2029_v63 = vsel %vm1988_vm4, %v12366_v51, %v1907_v4  ;;  %v2350_v50 = vsel %vm2133_vm11, %v2308_v36, 0.0  ;;  %v1484_v38 = vadd.f32 %v7185_v52, %v12395_v23  ;;  %v8230_v51 = vadd.f32 %v7185_v52, %v12396_v28  ;;  %v12402_v36 = vld [vmem:[#allocation149_spill] sm:$0xff]  ;;  %v8242_v23 = vpop.permute.xlu0 %1912 }
 0x21d   :  { %v1695_v29 = vadd.f32 %v7233_v33, %v12402_v36  ;;  %v2083_v28 = vsel %vm1866_vm12, %v2028_v22, 0.0  ;;  %v2676_v36 = vadd.f32 0.5, %v2622_v12  ;;  %v2711_v31 = vadd.f32 0.5, %v2657_v45  ;;  %v12404_v22 = vld [vmem:[#allocation132_spill] sm:$0xff] }
 0x21e   :  { %2229 = vrot.lane.b32.xlu1 %v1694_v14, %s6662_s6  ;;  %12397 = vst [vmem:[#allocation35_spill] sm:$0xff] %v8230_v51  ;;  %v2309_v14 = vsel %vm2259_vm6, %v12399_v13, %v12398_v53  ;;  %v2084_v53 = vsel %vm1867_vm13, %v2025_v10, 0.0  ;;  %v2101_v13 = vsel %vm1866_vm12, %v2029_v63, 0.0  ;;  %v12403_v51 = vld [vmem:[#allocation84_spill] sm:$0xff]  ;;  %v8264_v10 = vadd.f32 %v7185_v52, %v12404_v22 }
 0x21f   :  { %v2368_v63 = vsel %vm2133_vm11, %v2309_v14, 0.0  ;;  %v2026_v12 = vsel %vm1988_vm4, %v1907_v4, %v8242_v23  ;;  %v12405_v14 = vld [vmem:[#allocation150_spill] sm:$0xff]  ;;  %v8299_v4 = vmul.f32 %v2711_v31, %v7787_v24  ;;  %v8332_v31 = vadd.s32 1024, %v7497_v48 }
 0x220   :  { %2231 = vrot.lane.b32.xlu0 %v1712_v35, %s6662_s6  ;;  %v8245_v40 = vpop.permute.xlu1 %1982  ;;  %v1713_v35 = vadd.f32 %v7244_v18, %v7814_v19  ;;  %v2386_v19 = vsel %vm2133_vm11, %v2310_v6, 0.0  ;;  %v8286_v22 = vadd.f32 %v7233_v33, %v12405_v14  ;;  %v8344_v14 = vadd.f32 %v7127_v1, %v7844_v44 }
 0x221   :  { %v2040_v27 = vsel %vm1988_vm4, %v8245_v40, %v12403_v51  ;;  %v8275_v51 = vadd.f32 %v2083_v28, %v8120_v59  ;;  %v1730_v28 = vadd.f32 %v7279_v42, %v7817_v55 }
 0x222   :  { %v2079_v0 = vsel %vm1862_vm14, %v2040_v27, 0.0  ;;  %2235 = vrot.lane.b32.xlu1 %v1695_v29, %s6662_s6  ;;  %v8278_v29 = vadd.f32 %v2084_v53, %v8124_v47  ;;  %v8282_v27 = vadd.s32 768, %v7497_v48  ;;  %v8296_v47 = vmul.f32 %v2676_v36, %v8042_v54 }
 0x223   :  { %v2404_v45 = vadd.f32 %v2079_v0, %v8072_v49  ;;  %v8289_v0 = vadd.f32 %v2101_v13, %v8128_v30  ;;  %v12406_v49 = vld [vmem:[#allocation151_spill] sm:$0xff]  ;;  %v2102_v53 = vsel %vm1867_vm13, %v2026_v12, 0.0  ;;  %v8310_v30 = vadd.f32 %v7244_v18, %v7820_v2 }
 0x224   :  { %2237 = vrot.lane.b32.xlu0 %v1713_v35, %s6662_s6  ;;  %v1729_v6 = vadd.f32 %v7279_v42, %v12406_v49  ;;  %v8314_v54 = vadd.f32 %v7279_v42, %v7823_v8  ;;  %v12077_v2 = vcvt.s32.f32 %v8282_v27  ;;  %v8329_v8 = vadd.s32 896, %v7497_v48 }
 0x225   :  { %v8293_v59 = vadd.f32 %v2404_v45, %v2350_v50  ;;  %v12407_v50 = vld [vmem:[#allocation93_spill] sm:$0xff]  ;;  %v8335_v36 = vadd.f32 %v2102_v53, %v8132_v57  ;;  %v12408_v45 = vld [vmem:[#allocation108_spill] sm:$0xff]  ;;  %v2801_v57 = vpack.c.bf16 %v8299_v4, %v8299_v4 }
 0x226   :  { %v8305_v35 = vpop.permute.xlu0 %1984  ;;  %1944 = vrot.lane.b32.xlu1 %v1481_v39, %s6661_s0 }
 0x227   :  { %v2512_v24 = vmul.f32 0.5, %v8293_v59  ;;  %v2041_v55 = vsel %vm1988_vm4, %v8305_v35, %v12407_v50 }
 0x228   :  { %v2097_v13 = vsel %vm1862_vm14, %v2041_v55, 0.0  ;;  %1950 = vrot.lane.b32.xlu0 %v8167_v15, %s6661_s0  ;;  %v8325_v39 = vpop.permute.xlu1 %1986  ;;  %v12409_v55 = vld [vmem:[#allocation123_spill] sm:$0xff] }
 0x229   :  { %6120 = vtanh.f32 %v2512_v24  ;;  %v2422_v12 = vadd.f32 %v2097_v13, %v8081_v61  ;;  %v2042_v15 = vsel %vm1988_vm4, %v8325_v39, %v12408_v45  ;;  %v8353_v61 = vadd.s32 1152, %v7497_v48 }
 0x22a   :  { %v2115_v49 = vsel %vm1862_vm14, %v2042_v15, 0.0  ;;  %v2172_v50 = vpop.permute.xlu0 %2171  ;;  %1956 = vrot.lane.b32.xlu1 %v8205_v41, %s6661_s0  ;;  %v1778_v41 = vadd.f32 0.5, %v12077_v2  ;;  %v12075_v13 = vcvt.s32.f32 %v8332_v31 }
 0x22b   :  { %v8355_v53 = vadd.f32 %v2422_v12, %v2368_v63  ;;  %v2440_v24 = vadd.f32 %v2115_v49, %v8091_v56  ;;  %v2303_v1 = vsel %vm2259_vm6, %v12409_v55, %v2172_v50  ;;  %v12076_v63 = vcvt.s32.f32 %v8329_v8 }
 0x22c   :  { %v2370_v44 = vsel %vm2135_vm9, %v2303_v1, 0.0  ;;  %1962 = vrot.lane.b32.xlu0 %v1484_v38, %s6661_s0  ;;  %v2176_v43 = vpop.permute.xlu1 %2175  ;;  %v8380_v38 = vadd.f32 %v7153_v26, %v7849_v17  ;;  %v1796_v1 = vmul.f32 0.11111111, %v1778_v41 }
 0x22d   :  { %v2530_v56 = vmul.f32 0.5, %v8355_v53  ;;  %v8370_v12 = vadd.f32 %v2440_v24, %v2386_v19  ;;  %v8373_v45 = vadd.f32 %v8176_v21, %v2370_v44  ;;  %v2299_v15 = vsel %vm2259_vm6, %v7728_v3, %v2176_v43 }
 0x22e   :  { %v2353_v49 = vsel %vm2136_vm15, %v2299_v15, 0.0  ;;  %v2178_v55 = vpop.permute.xlu0 %2177  ;;  %2221 = vrot.lane.b32.xlu1 %v8182_v20, %s6662_s6  ;;  %v12074_v21 = vcvt.s32.f32 %v8353_v61  ;;  %v1779_v20 = vadd.f32 0.5, %v12076_v63  ;;  %v1780_v44 = vadd.f32 0.5, %v12075_v13 }
 0x22f   :  { %6122 = vtanh.f32 %v2530_v56  ;;  %v2548_v19 = vmul.f32 0.5, %v8370_v12  ;;  %v2532_v3 = vmul.f32 0.5, %v8373_v45  ;;  %v8391_v24 = vadd.f32 %v8174_v34, %v2353_v49 }
 0x230   :  { %v2300_v26 = vsel %vm2259_vm6, %v2172_v50, %v2178_v55  ;;  %2227 = vrot.lane.b32.xlu0 %v1729_v6, %s6662_s6  ;;  %v2182_v17 = vpop.permute.xlu1 %2181  ;;  %v1781_v49 = vadd.f32 0.5, %v12074_v21 }
 0x231   :  { %6124 = vtanh.f32 %v2548_v19  ;;  %v2515_v56 = vmul.f32 0.5, %v8391_v24  ;;  %v2371_v34 = vsel %vm2136_vm15, %v2300_v26, 0.0  ;;  %v2296_v15 = vsel %vm2259_vm6, %v2176_v43, %v2182_v17 }
 0x232   :  { %6126 = vtanh.f32 %v2532_v3  ;;  %v8406_v6 = vadd.f32 %v8178_v5, %v2371_v34  ;;  %v2354_v50 = vsel %vm2137_vm1, %v2296_v15, 0.0  ;;  %v2184_v41 = vpop.permute.xlu0 %2183  ;;  %2233 = vrot.lane.b32.xlu1 %v1730_v28, %s6662_s6 }
 0x233   :  { %v6121_v19 = vpop.eup %6120  ;;  %6128 = vtanh.f32 %v2515_v56  ;;  %v8414_v26 = vadd.f32 %v8275_v51, %v2354_v50  ;;  %v2297_v43 = vsel %vm2259_vm6, %v2178_v55, %v2184_v41  ;;  %v1814_v56 = vfloor.f32 %v1796_v1 }
 0x234   :  { %v2533_v5 = vmul.f32 0.5, %v8406_v6  ;;  %v2372_v3 = vsel %vm2137_vm1, %v2297_v43, 0.0  ;;  %2239 = vrot.lane.b32.xlu0 %v8314_v54, %s6662_s6  ;;  %v8424_v28 = vpop.permute.xlu1 %2187  ;;  %v2620_v34 = vmul.f32 0.5, %v6121_v19  ;;  %v8433_v50 = vmul.f32 0.11111111, %v1779_v20 }
 0x235   :  { %v2516_v51 = vmul.f32 0.5, %v8414_v26  ;;  %v8428_v15 = vadd.f32 %v8289_v0, %v2372_v3  ;;  %v2293_v55 = vsel %vm2259_vm6, %v2182_v17, %v8424_v28  ;;  %v8441_v1 = vmul.f32 0.11111111, %v1780_v44 }
 0x236   :  { %6130 = vtanh.f32 %v2533_v5  ;;  %v2355_v43 = vsel %vm2138_vm2, %v2293_v55, 0.0  ;;  %v8437_v54 = vpop.permute.xlu0 %2189  ;;  %1964 = vrot.lane.b32.xlu1 %v8186_v46, %s6661_s0  ;;  %v8443_v19 = vmul.f32 0.11111111, %v1781_v49  ;;  %v8454_v5 = vadd.f32 %v7185_v52, %v7852_v62  ;;  %v12410_v55 = vld [vmem:[#allocation110_spill] sm:$0xff] }
 0x237   :  { %6132 = vtanh.f32 %v2516_v51  ;;  %v2534_v0 = vmul.f32 0.5, %v8428_v15  ;;  %v8447_v17 = vadd.f32 %v8278_v29, %v2355_v43  ;;  %v2294_v20 = vsel %vm2259_vm6, %v2184_v41, %v8437_v54 }
 0x238   :  { %v2373_v46 = vsel %vm2138_vm2, %v2294_v20, 0.0  ;;  %1966 = vrot.lane.b32.xlu0 %v8201_v25, %s6661_s0  ;;  %v1897_v44 = vpop.permute.xlu1 %1896  ;;  %v2674_v49 = vadd.f32 0.5, %v2620_v34  ;;  %v8460_v3 = vmul.f32 9.0, %v1814_v56  ;;  %v1815_v34 = vfloor.f32 %v8433_v50 }
 0x239   :  { %v6123_v29 = vpop.eup %6122  ;;  %6134 = vtanh.f32 %v2534_v0  ;;  %v2517_v51 = vmul.f32 0.5, %v8447_v17  ;;  %v8464_v41 = vadd.f32 %v8335_v36, %v2373_v46  ;;  %v2036_v52 = vsel %vm1988_vm4, %v12410_v55, %v1897_v44 }
 0x23a   :  { %v2638_v62 = vmul.f32 0.5, %v6123_v29  ;;  %v2117_v43 = vsel %vm1864_vm8, %v2036_v52, 0.0  ;;  %v1903_v25 = vpop.permute.xlu0 %1902  ;;  %1970 = vrot.lane.b32.xlu1 %v8190_v60, %s6661_s0  ;;  %v2728_v21 = vmul.f32 %v2674_v49, %v8293_v59  ;;  %v1833_v16 = vmul.f32 9.0, %v1815_v34 }
 0x23b   :  { %v6125_v0 = vpop.eup %6124  ;;  %6136 = vtanh.f32 %v2517_v51  ;;  %v2535_v36 = vmul.f32 0.5, %v8464_v41  ;;  %v2033_v20 = vsel %vm1988_vm4, %v1897_v44, %v1903_v25  ;;  %v2442_v2 = vadd.f32 %v2117_v43, %v8107_v58  ;;  %v12411_v58 = vld [vmem:[#allocation66_spill] sm:$0xff] }
 0x23c   :  { %v6127_v29 = vpop.eup %6126  ;;  %v2692_v55 = vadd.f32 0.5, %v2638_v62  ;;  %v2118_v52 = vsel %vm1865_vm10, %v2033_v20, 0.0  ;;  %1972 = vrot.lane.b32.xlu0 %v8221_v32, %s6661_s0  ;;  %v1909_v60 = vpop.permute.xlu1 %1908  ;;  %v2656_v13 = vmul.f32 0.5, %v6125_v0  ;;  %v12419_v50 = vcvt.s32.f32 %v8282_v27  ;;  %v8603_v27 = vld [vmem:[%s12041_s1 + $0x38] sm:$0xff]  }
 0x23d   :  { %v6129_v51 = vpop.eup %6128  ;;  %v2640_v63 = vmul.f32 0.5, %v6127_v29  ;;  %6138 = vtanh.f32 %v2535_v36  ;;  %v2030_v44 = vsel %vm1988_vm4, %v1903_v25, %v1909_v60  ;;  %v2443_v49 = vadd.f32 %v2118_v52, %v8116_v9  ;;  %v12412_v52 = vld [vmem:[#allocation88_spill] sm:$0xff] }
 0x23e   :  { %v2746_v62 = vmul.f32 %v2692_v55, %v8355_v53  ;;  %v2623_v46 = vmul.f32 0.5, %v6129_v51  ;;  %v2119_v20 = vsel %vm1866_vm12, %v2030_v44, 0.0  ;;  %v8490_v56 = vpop.permute.xlu0 %1914  ;;  %1976 = vrot.lane.b32.xlu1 %v8344_v14, %s6661_s0  ;;  %v2710_v32 = vadd.f32 0.5, %v2656_v13 }
 0x23f   :  { %v2694_v59 = vadd.f32 0.5, %v2640_v63  ;;  %v2444_v43 = vadd.f32 %v2119_v20, %v12411_v58  ;;  %v2027_v53 = vsel %vm1988_vm4, %v1909_v60, %v8490_v56  ;;  %v12413_v60 = vld [vmem:[#allocation145_spill] sm:$0xff]  ;;  %v8585_v34 = vsub.f32 %v12419_v50, %v8460_v3 }
 0x240   :  { %v6131_v25 = vpop.eup %6130  ;;  %v2677_v0 = vadd.f32 0.5, %v2623_v46  ;;  %v2120_v36 = vsel %vm1867_vm13, %v2027_v53, 0.0  ;;  %1978 = vrot.lane.b32.xlu0 %v8380_v38, %s6661_s0  ;;  %v2174_v14 = vpop.permute.xlu1 %2173  ;;  %v2782_v13 = vpack.c.bf16 %v2746_v62, %v2728_v21  ;;  %v2764_v63 = vmul.f32 %v2710_v32, %v8370_v12 }
 0x241   :  { %v6133_v29 = vpop.eup %6132  ;;  %v8505_v9 = vmul.f32 %v2694_v59, %v8373_v45  ;;  %v2641_v55 = vmul.f32 0.5, %v6131_v25  ;;  %v2445_v51 = vadd.f32 %v2120_v36, %v12412_v52  ;;  %v2304_v46 = vsel %vm2259_vm6, %v12413_v60, %v2174_v14 }
 0x242   :  { %v2731_v44 = vmul.f32 %v2677_v0, %v8391_v24  ;;  %v2624_v20 = vmul.f32 0.5, %v6133_v29  ;;  %v2388_v38 = vsel %vm2135_vm9, %v2304_v46, 0.0  ;;  %v2180_v21 = vpop.permute.xlu0 %2179  ;;  %2241 = vrot.lane.b32.xlu1 %v8286_v22, %s6662_s6  ;;  %2914 = vmatpush1.bf16.msra.mxu1 %v2782_v13  ;;  %v2800_v12 = vpack.c.bf16 %v2764_v63, %v2764_v63 }
 0x243   :  { %v6135_v45 = vpop.eup %6134  ;;  %v2695_v62 = vadd.f32 0.5, %v2641_v55  ;;  %v8516_v32 = vadd.f32 %v2442_v2, %v2388_v38  ;;  %v2301_v59 = vsel %vm2259_vm6, %v2174_v14, %v2180_v21  ;;  %5985 = vmatprep.subr.msk.bf16.mxu1 %vm135_vm0, %v2801_v57  ;;  %v2784_v11 = vpack.c.bf16 %v8505_v9, %v8296_v47 }
 0x244   :  { %v2678_v24 = vadd.f32 0.5, %v2624_v20  ;;  %v2642_v58 = vmul.f32 0.5, %v6135_v45  ;;  %v2389_v22 = vsel %vm2136_vm15, %v2301_v59, 0.0  ;;  %2243 = vrot.lane.b32.xlu0 %v8310_v30, %s6662_s6  ;;  %v2186_v2 = vpop.permute.xlu1 %2185  ;;  %v2860_v53 = vsel %vm135_vm0, %v2800_v12, 0 }
 0x245   :  { %v6137_v25 = vpop.eup %6136  ;;  %v2749_v0 = vmul.f32 %v2695_v62, %v8406_v6  ;;  %v2550_v4 = vmul.f32 0.5, %v8516_v32  ;;  %v8533_v57 = vadd.f32 %v2443_v49, %v2389_v22  ;;  %v2298_v47 = vsel %vm2259_vm6, %v2180_v21, %v2186_v2  ;;  %v12414_v49 = vld [vmem:[#allocation35_spill] sm:$0xff]  ;;  %v12415_v21 = vld [vmem:[#allocation152_spill] sm:$0xff]  ;;  %v12417_v62 = vld [vmem:[#allocation165_spill] sm:$0xff] }
 0x246   :  { %v8543_v30 = vmul.f32 %v2678_v24, %v8414_v26  ;;  %v2696_v36 = vadd.f32 0.5, %v2642_v58  ;;  %v2625_v14 = vmul.f32 0.5, %v6137_v25  ;;  %v2390_v6 = vsel %vm2137_vm1, %v2298_v47, 0.0  ;;  %v8547_v13 = vpop.permute.xlu0 %2191  ;;  %1968 = vrot.lane.b32.xlu1 %v12414_v49, %s6661_s0  ;;  %2916 = vmatpush1.bf16.msra.mxu1 %v2860_v53  ;;  %v12424_v47 = vld [vmem:[#allocation80_spill] sm:$0xff] }
 0x247   :  { %v6139_v63 = vpop.eup %6138  ;;  %6140 = vtanh.f32 %v2550_v4  ;;  %v2551_v29 = vmul.f32 0.5, %v8533_v57  ;;  %v8552_v9 = vadd.f32 %v2444_v43, %v2390_v6  ;;  %v2295_v26 = vsel %vm2259_vm6, %v2186_v2, %v8547_v13 }
 0x248   :  { %v2750_v55 = vmul.f32 %v2696_v36, %v8428_v15  ;;  %v2679_v37 = vadd.f32 0.5, %v2625_v14  ;;  %v2643_v52 = vmul.f32 0.5, %v6139_v63  ;;  %v2391_v60 = vsel %vm2138_vm2, %v2295_v26, 0.0  ;;  %1974 = vrot.lane.b32.xlu0 %v8264_v10, %s6661_s0  ;;  %v1917_v46 = vpop.permute.xlu1 %1916 }
 0x249   :  { %6142 = vtanh.f32 %v2551_v29  ;;  %v2552_v20 = vmul.f32 0.5, %v8552_v9  ;;  %v8563_v43 = vadd.f32 %v2445_v51, %v2391_v60  ;;  %v2785_v38 = vpack.c.bf16 %v2749_v0, %v2731_v44  ;;  %5986 = vmatmul.mubr.msk.bf16.vlgmr.msra.gmra.mrb[96].mxu1 %vm2843_vm3, %v8540_v7  ;;  %v12421_v0 = vld [vmem:[#allocation44_spill] sm:$0xff]  ;;  %v12428_v29 = vld [vmem:[#allocation75_spill] sm:$0xff] }
 0x24a   :  { %v1732_v15 = vadd.f32 %v7279_v42, %v12415_v21  ;;  %v2697_v12 = vadd.f32 0.5, %v2643_v52  ;;  %v1919_v45 = vpop.permute.xlu0 %1918  ;;  %1980 = vrot.lane.b32.xlu1 %v8454_v5, %s6661_s0  ;;  %v12416_v10 = vmov 0   ;;  %v2786_v51 = vpack.c.bf16 %v2750_v55, %v8543_v30  ;;  %v12426_v30 = vld [vmem:[#allocation167_spill] sm:$0xff]  ;;  %v12429_v55 = vld [vmem:[#allocation76_spill] sm:$0xff]  ;;  %v12430_v52 = vld [vmem:[#allocation166_spill] sm:$0xff] }
 0x24b   :  { %2955 = vmatprep.mubr.bf16.mxu1 %v12416_v10  ;;  %v1697_v44 = vadd.f32 %v7233_v33, %v12417_v62  ;;  %6144 = vtanh.f32 %v2552_v20  ;;  %v2553_v59 = vmul.f32 0.5, %v8563_v43  ;;  %2996 = vmatprep.subr.bf16.mxu1 %v2785_v38  ;;  %v12418_v24 = vfloor.f32 %v8441_v1  ;;  %v12422_v1 = vld [vmem:[#allocation78_spill] sm:$0xff]  ;;  %v12432_v38 = vld [vmem:[#allocation168_spill] sm:$0xff] }
 0x24c   :  { %v2733_v22 = vmul.f32 %v2679_v37, %v8447_v17  ;;  %v2751_v5 = vmul.f32 %v2697_v12, %v8464_v41  ;;  %2997 = vmatpush1.bf16.msra.mxu1 %v2784_v11  ;;  %2245 = vrot.lane.b32.xlu0 %v1732_v15, %s6662_s6  ;;  %v8588_v2 = vpop.permute.xlu1 %1922  ;;  %v12420_v53 = vfloor.f32 %v8443_v19  ;;  %v8594_v4 = vadd.f32 %v12422_v1, %v12421_v0  ;;  %v12423_v17 = vld [vmem:[#allocation73_spill] sm:$0xff]  ;;  %v12425_v11 = vld [vmem:[#allocation74_spill] sm:$0xff] }
 0x24d   :  { %v1834_v58 = vmul.f32 9.0, %v12418_v24  ;;  %v8598_v41 = vadd.f32 %v12424_v47, %v12423_v17  ;;  %6146 = vtanh.f32 %v2553_v59  ;;  %v8606_v3 = vadd.s32 1280, %v7497_v48  ;;  %v12433_v15 = vld [vmem:[#allocation169_spill] sm:$0xff] }
 0x24e   :  { %v1835_v25 = vmul.f32 9.0, %v12420_v53  ;;  %v8610_v19 = vadd.f32 %v12424_v47, %v12425_v11  ;;  %v1715_v36 = vadd.f32 %v7244_v18, %v12426_v30  ;;  %v12427_v14 = vcvt.s32.f32 %v8329_v8  ;;  %v8618_v49 = vpop.permute.xlu0 %1924  ;;  %2247 = vrot.lane.b32.xlu1 %v1697_v44, %s6662_s6  ;;  %v12435_v44 = vld [vmem:[#allocation92_spill] sm:$0xff] }
 0x24f   :  { %v2787_v63 = vpack.c.bf16 %v2751_v5, %v2733_v22  ;;  %v8623_v26 = vadd.f32 %v12422_v1, %v12428_v29  ;;  %v8627_v37 = vadd.f32 %v12422_v1, %v12429_v55  ;;  %v1698_v60 = vadd.f32 %v7233_v33, %v12430_v52 }
 0x250   :  { %v8616_v6 = vsub.f32 %v12427_v14, %v1833_v16  ;;  %v12431_v8 = vcvt.s32.f32 %v8332_v31  ;;  %v1716_v21 = vadd.f32 %v7244_v18, %v12432_v38  ;;  %v1733_v12 = vadd.f32 %v7279_v42, %v12433_v15  ;;  %2249 = vrot.lane.b32.xlu0 %v1715_v36, %s6662_s6  ;;  %v8641_v16 = vpop.permute.xlu1 %1928  ;;  %v8690_v36 = vld [vmem:[%s12041_s1 + $0x40] sm:$0xff]  }
 0x251   :  { %vm1868_vm5 = vcmp.gt.f32.partialorder %v8585_v34, 0.5  ;;  %3079 = vmatprep.subr.bf16.mxu0 %v2787_v63  ;;  %v12434_v62 = vcvt.s32.f32 %v8353_v61  ;;  %v6141_v31 = vpop.eup %6140  ;;  %v2022_v59 = vsel %vm1988_vm4, %v12435_v44, %v1917_v46  ;;  %v2023_v18 = vsel %vm1988_vm4, %v8242_v23, %v1919_v45  ;;  %5987 = vmatmul.mubr.msk.bf16.gmra.mrb[100].mxu1 %vm2843_vm3, %v8603_v27  ;;  %v12436_v61 = vld [vmem:[#allocation170_spill] sm:$0xff]  ;;  %v90_v44 = vld [vmem:[%s12042_s2 + $0x78] sm:$0xff] }
 0x252   :  { %v8633_v20 = vsub.f32 %v12431_v8, %v1834_v58  ;;  %3080 = vmatpush1.bf16.msra.mxu0 %v2786_v51  ;;  %v12081_v24 = vcvt.s32.f32 %v8606_v3  ;;  %v8657_v58 = vadd.s32 1408, %v7497_v48  ;;  %v1734_v22 = vadd.f32 %v7279_v42, %v12436_v61  ;;  %v8665_v23 = vpop.permute.xlu0 %1930  ;;  %2253 = vrot.lane.b32.xlu1 %v1698_v60, %s6662_s6 }
 0x253   :  { %v8645_v33 = vsub.f32 %v12434_v62, %v1835_v25  ;;  %v2658_v5 = vmul.f32 0.5, %v6141_v31  ;;  %vm1869_vm7 = vcmp.gt.f32.partialorder %v8616_v6, 0.5  ;;  %v2019_v50 = vsel %vm1988_vm4, %v1917_v46, %v8588_v2  ;;  %2965 = vmatprep.mubr.bf16.mxu1 %v12416_v10  ;;  %v6143_v51 = vpop.eup %6142  ;;  %v12438_v62 = vld [vmem:[#allocation87_spill] sm:$0xff] }
 0x254   :  { %v2020_v53 = vsel %vm1988_vm4, %v1919_v45, %v8618_v49  ;;  %vm1870_vm8 = vcmp.gt.f32.partialorder %v8633_v20, 0.5  ;;  %vm2139_vm9 = vcmp.lt.f32.partialorder %v8585_v34, 7.5  ;;  %v8675_v42 = vadd.s32 1536, %v7497_v48  ;;  %2255 = vrot.lane.b32.xlu0 %v1716_v21, %s6662_s6  ;;  %v8682_v11 = vpop.permute.xlu1 %1934  ;;  %v12437_v21 = vld [vmem:[#allocation49_spill] sm:$0xff] }
 0x255   :  { %v2712_v25 = vadd.f32 0.5, %v2658_v5  ;;  %v2659_v46 = vmul.f32 0.5, %v6143_v51  ;;  %v2085_v0 = vsel %vm1868_vm5, %v2022_v59, 0.0  ;;  %v2103_v17 = vsel %vm1868_vm5, %v2023_v18, 0.0  ;;  %v6145_v45 = vpop.eup %6144  ;;  %v12439_v51 = vld [vmem:[#allocation50_spill] sm:$0xff] }
 0x256   :  { %v2086_v30 = vsel %vm1869_vm7, %v2019_v50, 0.0  ;;  %vm1871_vm10 = vcmp.gt.f32.partialorder %v8645_v33, 0.5  ;;  %vm2140_vm11 = vcmp.lt.f32.partialorder %v8616_v6, 7.5  ;;  %v8695_v14 = vadd.f32 0.5, %v12081_v24  ;;  %v8701_v8 = vpop.permute.xlu0 %1936  ;;  %2251 = vrot.lane.b32.xlu1 %v1733_v12, %s6662_s6 }
 0x257   :  { %v12080_v63 = vcvt.s32.f32 %v8657_v58  ;;  %v2766_v29 = vmul.f32 %v2712_v25, %v8516_v32  ;;  %v2713_v55 = vadd.f32 0.5, %v2659_v46  ;;  %v2660_v52 = vmul.f32 0.5, %v6145_v45  ;;  %v6147_v38 = vpop.eup %6146 }
 0x258   :  { %v2104_v60 = vsel %vm1869_vm7, %v2020_v53, 0.0  ;;  %v2410_v15 = vadd.f32 %v2085_v0, %v12437_v21  ;;  %v2428_v31 = vadd.f32 %v2103_v17, %v12438_v62  ;;  %vm2141_vm12 = vcmp.lt.f32.partialorder %v8633_v20, 7.5  ;;  %2257 = vrot.lane.b32.xlu0 %v1734_v22, %s6662_s6  ;;  %v2194_v50 = vpop.permute.xlu1 %2193 }
 0x259   :  { %v12079_v32 = vcvt.s32.f32 %v8675_v42  ;;  %v8712_v59 = vadd.s32 1664, %v7497_v48  ;;  %v2767_v18 = vmul.f32 %v2713_v55, %v8533_v57  ;;  %v2714_v61 = vadd.f32 0.5, %v2660_v52  ;;  %5988 = vmatmul.mubr.msk.bf16.gmra.mrb[104].mxu1 %vm2843_vm3, %v8690_v36  ;;  %v91_v57 = vld [vmem:[%s12042_s2 + $0x80] sm:$0xff]  ;;  %v92_v55 = vld [vmem:[%s12042_s2 + $0x88] sm:$0xff] }
 0x25a   :  { %v2661_v12 = vmul.f32 0.5, %v6147_v38  ;;  %v2016_v5 = vsel %vm1988_vm4, %v8588_v2, %v8641_v16  ;;  %v2411_v53 = vadd.f32 %v2086_v30, %v12439_v51  ;;  %v2429_v25 = vadd.f32 %v2104_v60, %v8594_v4  ;;  %v2196_v4 = vpop.permute.xlu0 %2195  ;;  %3731 = vperm.xlu1 %6063, %v90_v44   ;;  %2975 = vmatprep.mubr.bf16.mxu1 %v12416_v10  ;;  %v87_v44 = vld [vmem:[%s12042_s2 + $0x60] sm:$0xff] }
 0x25b   :  { %v2290_v46 = vsel %vm2259_vm6, %v8424_v28, %v2194_v50  ;;  %v2802_v0 = vpack.c.bf16 %v2766_v29, %v2766_v29  ;;  %v2803_v2 = vpack.c.bf16 %v2767_v18, %v2767_v18  ;;  %v2768_v22 = vmul.f32 %v2714_v61, %v8552_v9  ;;  %v8769_v18 = vld [vmem:[%s12041_s1 + $0x48] sm:$0xff]  }
 0x25c   :  { %v2715_v17 = vadd.f32 0.5, %v2661_v12  ;;  %v2356_v45 = vsel %vm2139_vm9, %v2290_v46, 0.0  ;;  %v2087_v28 = vsel %vm1870_vm8, %v2016_v5, 0.0  ;;  %v2017_v30 = vsel %vm1988_vm4, %v8618_v49, %v8665_v23  ;;  %3736 = vperm.xlu0 %6062, %v91_v57   ;;  %v2200_v49 = vpop.permute.xlu1 %2199  ;;  %v88_v57 = vld [vmem:[%s12042_s2 + $0x68] sm:$0xff] }
 0x25d   :  { %v8740_v29 = vadd.f32 %v2410_v15, %v2356_v45  ;;  %v2291_v9 = vsel %vm2259_vm6, %v8437_v54, %v2196_v4  ;;  %vm2142_vm13 = vcmp.lt.f32.partialorder %v8645_v33, 7.5  ;;  %5991 = vmatprep.subr.msk.bf16.mxu1 %vm135_vm0, %v2803_v2  ;;  %v2866_v38 = vsel %vm135_vm0, %v2802_v0, 0 }
 0x25e   :  { %v2769_v52 = vmul.f32 %v2715_v17, %v8563_v43  ;;  %v2374_v60 = vsel %vm2139_vm9, %v2291_v9, 0.0  ;;  %v2804_v21 = vpack.c.bf16 %v2768_v22, %v2768_v22  ;;  %v2013_v54 = vsel %vm1988_vm4, %v8641_v16, %v8682_v11  ;;  %2999 = vmatpush1.bf16.msra.mxu1 %v2866_v38  ;;  %v2202_v5 = vpop.permute.xlu0 %2201  ;;  %3741 = vperm.xlu1 %6063, %v92_v55  }
 0x25f   :  { %v2518_v15 = vmul.f32 0.5, %v8740_v29  ;;  %v8759_v62 = vadd.f32 %v2428_v31, %v2374_v60  ;;  %v2287_v43 = vsel %vm2259_vm6, %v2194_v50, %v2200_v49  ;;  %v2105_v16 = vsel %vm1870_vm8, %v2017_v30, 0.0 }
 0x260   :  { %v2805_v61 = vpack.c.bf16 %v2769_v52, %v2769_v52  ;;  %v2014_v31 = vsel %vm1988_vm4, %v8665_v23, %v8701_v8  ;;  %v2357_v12 = vsel %vm2140_vm11, %v2287_v43, 0.0  ;;  %v2288_v46 = vsel %vm2259_vm6, %v2196_v4, %v2202_v5  ;;  %3662 = vperm.xlu0 %6062, %v87_v44   ;;  %v93_v4 = vld [vmem:[%s12042_s2 + $0x90] sm:$0xff] }
 0x261   :  { %6148 = vtanh.f32 %v2518_v15  ;;  %v2536_v50 = vmul.f32 0.5, %v8759_v62  ;;  %v8780_v51 = vadd.f32 %v2411_v53, %v2357_v12  ;;  %v2412_v0 = vadd.f32 %v2087_v28, %v8598_v41  ;;  %v2206_v53 = vpop.permute.xlu1 %2205  ;;  %5989 = vmatmul.mubr.msk.bf16.gmra.mrb[108].mxu1 %vm2843_vm3, %v8769_v18 }
 0x262   :  { %v2088_v23 = vsel %vm1871_vm10, %v2013_v54, 0.0  ;;  %v2375_v2 = vsel %vm2140_vm11, %v2288_v46, 0.0  ;;  %5997 = vmatprep.subr.msk.bf16.mxu0 %vm135_vm0, %v2805_v61  ;;  %v2872_v22 = vsel %vm135_vm0, %v2804_v21, 0  ;;  %v2284_v41 = vsel %vm2259_vm6, %v2200_v49, %v2206_v53  ;;  %v2208_v9 = vpop.permute.xlu0 %2207  ;;  %3667 = vperm.xlu1 %6063, %v88_v57   ;;  %v94_v49 = vld [vmem:[%s12042_s2 + $0x98] sm:$0xff] }
 0x263   :  { %6150 = vtanh.f32 %v2536_v50  ;;  %v2519_v17 = vmul.f32 0.5, %v8780_v51  ;;  %v8795_v45 = vadd.f32 %v2429_v25, %v2375_v2  ;;  %3082 = vmatpush1.bf16.msra.mxu0 %v2872_v22  ;;  %v2430_v28 = vadd.f32 %v2105_v16, %v8623_v26  ;;  %2985 = vmatprep.mubr.bf16.mxu1 %v12416_v10  ;;  %v89_v16 = vld [vmem:[%s12042_s2 + $0x70] sm:$0xff]  ;;  %v12440_v2 = vld [vmem:[#allocation47_spill] sm:$0xff] }
 0x264   :  { %v2106_v30 = vsel %vm1871_vm10, %v2014_v31, 0.0  ;;  %v2358_v25 = vsel %vm2141_vm12, %v2284_v41, 0.0  ;;  %v12078_v55 = vcvt.s32.f32 %v8712_v59  ;;  %v2285_v26 = vsel %vm2259_vm6, %v2202_v5, %v2208_v9  ;;  %4286 = vperm.xlu0 %6062, %v93_v4  }
 0x265   :  { %6152 = vtanh.f32 %v2519_v17  ;;  %v2537_v52 = vmul.f32 0.5, %v8795_v45  ;;  %v8812_v60 = vadd.f32 %v2412_v0, %v2358_v25  ;;  %v2413_v38 = vadd.f32 %v2088_v23, %v8610_v19  ;;  %v8824_v54 = vpop.permute.xlu1 %2211  ;;  %v95_v23 = vld [vmem:[%s12042_s2 + $0xa0] sm:$0xff] }
 0x266   :  { %v2376_v21 = vsel %vm2141_vm12, %v2285_v26, 0.0  ;;  %5998 = vmatmul.mubr.msk.bf16.vlgmr.msra.gmra.mrb[120].mxu0 %vm2843_vm3, %v8540_v7  ;;  %v1800_v15 = vmul.f32 0.11111111, %v8695_v14  ;;  %v1783_v43 = vadd.f32 0.5, %v12080_v63  ;;  %v2281_v19 = vsel %vm2259_vm6, %v2206_v53, %v8824_v54  ;;  %v8841_v14 = vld [vmem:[%s12041_s1 + $0x50] sm:$0xff]   ;;  %v8847_v5 = vpop.permute.xlu0 %2213  ;;  %4291 = vperm.xlu1 %6063, %v94_v49   ;;  %v12441_v53 = vld [vmem:[#allocation85_spill] sm:$0xff] }
 0x267   :  { %6154 = vtanh.f32 %v2537_v52  ;;  %v2520_v44 = vmul.f32 0.5, %v8812_v60  ;;  %v8830_v61 = vadd.f32 %v2430_v28, %v2376_v21  ;;  %3121 = vmatprep.mubr.bf16.mxu0 %v12416_v10  ;;  %v2431_v31 = vadd.f32 %v2106_v30, %v8627_v37  ;;  %v12442_v26 = vld [vmem:[#allocation48_spill] sm:$0xff] }
 0x268   :  { %v2359_v12 = vsel %vm2142_vm13, %v2281_v19, 0.0  ;;  %v1784_v50 = vadd.f32 0.5, %v12079_v32  ;;  %v1785_v46 = vadd.f32 0.5, %v12078_v55  ;;  %v2282_v37 = vsel %vm2259_vm6, %v2208_v9, %v8847_v5  ;;  %3672 = vperm.xlu0 %6062, %v89_v16   ;;  %v96_v9 = vld [vmem:[%s12042_s2 + $0xa8] sm:$0xff] }
 0x269   :  { %6156 = vtanh.f32 %v2520_v44  ;;  %v2538_v57 = vmul.f32 0.5, %v8830_v61  ;;  %v8854_v0 = vadd.f32 %v2413_v38, %v2359_v12  ;;  %v1600_v22 = vadd.f32 %v12441_v53, %v12440_v2  ;;  %v1921_v41 = vpop.permute.xlu1 %1920  ;;  %5990 = vmatmul.mubr.msk.bf16.gmra.mrb[112].mxu1 %vm2843_vm3, %v8841_v14  ;;  %v75_v12 = vld [vmem:[%s12042_s2] sm:$0xff] }
 0x26a   :  { %v2377_v17 = vsel %vm2142_vm13, %v2282_v37, 0.0  ;;  %v1818_v4 = vfloor.f32 %v1800_v15  ;;  %v8874_v52 = vmul.f32 0.11111111, %v1783_v43  ;;  %v1601_v49 = vadd.f32 %v12441_v53, %v12442_v26  ;;  %v1927_v21 = vpop.permute.xlu0 %1926  ;;  %4296 = vperm.xlu1 %6063, %v95_v23   ;;  %3028 = vmatprep.mubr.bf16.mxu1 %v12416_v10 }
 0x26b   :  { %v6149_v28 = vpop.eup %6148  ;;  %6158 = vtanh.f32 %v2538_v57  ;;  %v2521_v30 = vmul.f32 0.5, %v8854_v0  ;;  %v8867_v25 = vadd.f32 %v2431_v31, %v2377_v17  ;;  %v8879_v15 = vmul.f32 0.11111111, %v1784_v50  ;;  %v12443_v57 = vld [vmem:[#allocation83_spill] sm:$0xff] }
 0x26c   :  { %v2626_v38 = vmul.f32 0.5, %v6149_v28  ;;  %v8881_v44 = vmul.f32 0.11111111, %v1785_v46  ;;  %v2024_v43 = vsel %vm1988_vm4, %v8490_v56, %v1921_v41  ;;  %v2021_v31 = vsel %vm1988_vm4, %v1921_v41, %v1927_v21  ;;  %v12444_v46 = vld [vmem:[#allocation86_spill] sm:$0xff]  ;;  %4355 = vperm.xlu0 %6062, %v96_v9  }
 0x26d   :  { %v6151_v19 = vpop.eup %6150  ;;  %6160 = vtanh.f32 %v2521_v30  ;;  %v2539_v16 = vmul.f32 0.5, %v8867_v25  ;;  %v1602_v50 = vadd.f32 %v12441_v53, %v12443_v57  ;;  %v1603_v37 = vadd.f32 %v12441_v53, %v12444_v46  ;;  %v1933_v2 = vpop.permute.xlu1 %1932  ;;  %v76_v30 = vld [vmem:[%s12042_s2 + $0x8] sm:$0xff] }
 0x26e   :  { %v2644_v23 = vmul.f32 0.5, %v6151_v19  ;;  %5999 = vmatmul.mubr.msk.bf16.gmra.mrb[124].mxu0 %vm2843_vm3, %v8603_v27  ;;  %v8898_v56 = vmul.f32 9.0, %v1818_v4  ;;  %v2680_v41 = vadd.f32 0.5, %v2626_v38  ;;  %v2018_v28 = vsel %vm1988_vm4, %v1927_v21, %v1933_v2  ;;  %1299 = vperm.xlu1 %6063, %v75_v12  }
 0x26f   :  { %v6153_v17 = vpop.eup %6152  ;;  %6162 = vtanh.f32 %v2539_v16  ;;  %3131 = vmatprep.mubr.bf16.mxu0 %v12416_v10  ;;  %v2121_v4 = vsel %vm1868_vm5, %v2024_v43, 0.0  ;;  %v2122_v38 = vsel %vm1869_vm7, %v2021_v31, 0.0  ;;  %v8911_v16 = vpop.permute.xlu0 %1938  ;;  %v2123_v57 = vsel %vm1870_vm8, %v2018_v28, 0.0 }
 0x270   :  { %v2698_v26 = vadd.f32 0.5, %v2644_v23  ;;  %v2627_v19 = vmul.f32 0.5, %v6153_v17  ;;  %v2015_v46 = vsel %vm1988_vm4, %v1933_v2, %v8911_v16  ;;  %v77_v23 = vld [vmem:[%s12042_s2 + $0x10] sm:$0xff]  ;;  %v1820_v43 = vfloor.f32 %v8879_v15  ;;  %1304 = vperm.xlu0 %6062, %v76_v30  }
 0x271   :  { %v6155_v21 = vpop.eup %6154  ;;  %v2124_v28 = vsel %vm1871_vm10, %v2015_v46, 0.0  ;;  %v2198_v32 = vpop.permute.xlu1 %2197  ;;  %v8929_v2 = vmul.f32 %v2680_v41, %v8740_v29  ;;  %v2446_v24 = vadd.f32 %v2121_v4, %v1600_v22  ;;  %v2447_v9 = vadd.f32 %v2122_v38, %v1601_v49  ;;  %5992 = vmatmul.mubr.msk.bf16.vlgmr.msra.gmra.mrb[116].mxu1 %vm2843_vm3, %v8540_v7 }
 0x272   :  { %v8924_v31 = vmul.f32 %v2698_v26, %v8759_v62  ;;  %v2681_v12 = vadd.f32 0.5, %v2627_v19  ;;  %v2645_v55 = vmul.f32 0.5, %v6155_v21  ;;  %v2292_v17 = vsel %vm2259_vm6, %v8547_v13, %v2198_v32  ;;  %v97_v62 = vld [vmem:[%s12042_s2 + $0xb0] sm:$0xff]  ;;  %1309 = vperm.xlu1 %6063, %v77_v23   ;;  %3038 = vmatprep.mubr.bf16.mxu1 %v12416_v10 }
 0x273   :  { %v6157_v63 = vpop.eup %6156  ;;  %v2448_v19 = vadd.f32 %v2123_v57, %v1602_v50  ;;  %v2392_v29 = vsel %vm2139_vm9, %v2292_v17, 0.0  ;;  %v2204_v41 = vpop.permute.xlu0 %2203  ;;  %v2449_v49 = vadd.f32 %v2124_v28, %v1603_v37 }
 0x274   :  { %v2699_v26 = vadd.f32 0.5, %v2645_v55  ;;  %v2628_v30 = vmul.f32 0.5, %v6157_v63  ;;  %v8942_v13 = vadd.f32 %v2446_v24, %v2392_v29  ;;  %v2289_v4 = vsel %vm2259_vm6, %v2198_v32, %v2204_v41  ;;  %v98_v55 = vld [vmem:[%s12042_s2 + $0xb8] sm:$0xff]  ;;  %5423 = vperm.xlu0 %6062, %v97_v62  }
 0x275   :  { %v6159_v22 = vpop.eup %6158  ;;  %v2788_v63 = vpack.c.bf16 %v8924_v31, %v8929_v2  ;;  %v2735_v34 = vmul.f32 %v2681_v12, %v8780_v51  ;;  %v2393_v21 = vsel %vm2140_vm11, %v2289_v4, 0.0  ;;  %v2210_v24 = vpop.permute.xlu1 %2209 }
 0x276   :  { %v2682_v50 = vadd.f32 0.5, %v2628_v30  ;;  %v2646_v38 = vmul.f32 0.5, %v6159_v22  ;;  %6000 = vmatmul.mubr.msk.bf16.gmra.mrb[128].mxu0 %vm2843_vm3, %v8690_v36  ;;  %v2753_v37 = vmul.f32 %v2699_v26, %v8795_v45  ;;  %v2554_v57 = vmul.f32 0.5, %v8942_v13  ;;  %5428 = vperm.xlu1 %6063, %v98_v55  }
 0x277   :  { %v6161_v32 = vpop.eup %6160  ;;  %v8958_v46 = vadd.f32 %v2447_v9, %v2393_v21  ;;  %v2286_v51 = vsel %vm2259_vm6, %v2204_v41, %v2210_v24  ;;  %3141 = vmatprep.mubr.bf16.mxu0 %v12416_v10  ;;  %v8966_v12 = vpop.permute.xlu0 %2215  ;;  %v12445_v55 = vfloor.f32 %v8874_v52  ;;  %v12446_v21 = vcvt.s32.f32 %v8606_v3  ;;  %v12448_v3 = vld [vmem:[#allocation77_spill] sm:$0xff] }
 0x278   :  { %v2736_v6 = vmul.f32 %v2682_v50, %v8812_v60  ;;  %v2700_v23 = vadd.f32 0.5, %v2646_v38  ;;  %v2629_v17 = vmul.f32 0.5, %v6161_v32  ;;  %v2394_v31 = vsel %vm2141_vm12, %v2286_v51, 0.0 }
 0x279   :  { %v6163_v45 = vpop.eup %6162  ;;  %6164 = vtanh.f32 %v2554_v57  ;;  %v2555_v9 = vmul.f32 0.5, %v8958_v46  ;;  %v8969_v28 = vadd.f32 %v2448_v19, %v2394_v31  ;;  %v2283_v2 = vsel %vm2259_vm6, %v2210_v24, %v8966_v12  ;;  %v1941_v30 = vpop.permute.xlu1 %1940  ;;  %5993 = vmatmul.mubr.msk.bf16.gmra.mrb[120].mxu1 %vm2843_vm3, %v8603_v27 }
 0x27a   :  { %v2754_v60 = vmul.f32 %v2700_v23, %v8830_v61  ;;  %v2683_v62 = vadd.f32 0.5, %v2629_v17  ;;  %v2647_v26 = vmul.f32 0.5, %v6163_v45  ;;  %v2395_v20 = vsel %vm2142_vm13, %v2283_v2, 0.0  ;;  %3048 = vmatprep.mubr.bf16.mxu1 %v12416_v10  ;;  %v12452_v17 = vld [vmem:[#allocation82_spill] sm:$0xff]  ;;  %v12453_v45 = vld [vmem:[#allocation133_spill] sm:$0xff] }
 0x27b   :  { %6166 = vtanh.f32 %v2555_v9  ;;  %v2556_v29 = vmul.f32 0.5, %v8969_v28  ;;  %v8978_v41 = vadd.f32 %v2449_v49, %v2395_v20  ;;  %v2789_v22 = vpack.c.bf16 %v2753_v37, %v2735_v34  ;;  %v1943_v4 = vpop.permute.xlu0 %1942 }
 0x27c   :  { %v2701_v19 = vadd.f32 0.5, %v2647_v26  ;;  %v1837_v61 = vmul.f32 9.0, %v12445_v55  ;;  %v2790_v50 = vpack.c.bf16 %v2754_v60, %v2736_v6  ;;  %v1838_v49 = vmul.f32 9.0, %v1820_v43  ;;  %v12451_v6 = vld [vmem:[#allocation81_spill] sm:$0xff]  ;;  %v12456_v26 = vld [vmem:[#allocation138_spill] sm:$0xff] }
 0x27d   :  { %6168 = vtanh.f32 %v2556_v29  ;;  %v2557_v33 = vmul.f32 0.5, %v8978_v41  ;;  %3162 = vmatprep.subr.bf16.mxu1 %v2789_v22  ;;  %v2737_v34 = vmul.f32 %v2683_v62, %v8854_v0  ;;  %v8993_v24 = vsub.f32 %v12446_v21, %v8898_v56  ;;  %v8997_v52 = vpop.permute.xlu1 %1946  ;;  %v12449_v56 = vld [vmem:[#allocation79_spill] sm:$0xff] }
 0x27e   :  { %v2755_v38 = vmul.f32 %v2701_v19, %v8867_v25  ;;  %3163 = vmatpush1.bf16.msra.mxu1 %v2788_v63  ;;  %6001 = vmatmul.mubr.msk.bf16.gmra.mrb[132].mxu0 %vm2843_vm3, %v8769_v18  ;;  %v12447_v32 = vfloor.f32 %v8881_v44  ;;  %v9003_v0 = vadd.s32 1792, %v7497_v48  ;;  %v9006_v25 = vadd.s32 1920, %v7497_v48 }
 0x27f   :  { %6170 = vtanh.f32 %v2557_v33  ;;  %3151 = vmatprep.mubr.bf16.mxu0 %v12416_v10  ;;  %v1568_v15 = vadd.f32 %v12424_v47, %v12448_v3  ;;  %v1569_v43 = vadd.f32 %v12424_v47, %v12449_v56  ;;  %v12450_v63 = vcvt.s32.f32 %v8657_v58  ;;  %v9016_v44 = vpop.permute.xlu0 %1948  ;;  %v12455_v58 = vld [vmem:[#allocation135_spill] sm:$0xff] }
 0x280   :  { %v1839_v37 = vmul.f32 9.0, %v12447_v32  ;;  %v2791_v51 = vpack.c.bf16 %v2755_v38, %v2737_v34  ;;  %v1586_v23 = vadd.f32 %v12422_v1, %v12451_v6  ;;  %v1587_v31 = vadd.f32 %v12422_v1, %v12452_v17 }
 0x281   :  { %v9014_v57 = vsub.f32 %v12450_v63, %v1837_v61  ;;  %v9024_v9 = vadd.f32 %v12424_v47, %v12453_v45  ;;  %v12454_v2 = vcvt.s32.f32 %v8675_v42  ;;  %v9032_v62 = vadd.f32 %v12424_v47, %v12455_v58  ;;  %v9039_v29 = vpop.permute.xlu1 %1952  ;;  %5994 = vmatmul.mubr.msk.bf16.gmra.mrb[124].mxu1 %vm2843_vm3, %v8690_v36 }
 0x282   :  { %v9036_v20 = vadd.f32 %v12422_v1, %v12456_v26  ;;  %vm1872_vm14 = vcmp.gt.f32.partialorder %v8993_v24, 0.5  ;;  %3245 = vmatprep.subr.bf16.mxu0 %v2791_v51  ;;  %v12457_v22 = vcvt.s32.f32 %v8712_v59  ;;  %v2010_v55 = vsel %vm1988_vm4, %v8682_v11, %v1941_v30  ;;  %v12458_v59 = vld [vmem:[#allocation139_spill] sm:$0xff]  ;;  %3058 = vmatprep.mubr.bf16.mxu1 %v12416_v10 }
 0x283   :  { %v9028_v60 = vsub.f32 %v12454_v2, %v1838_v49  ;;  %v6165_v42 = vpop.eup %6164  ;;  %v2011_v61 = vsel %vm1988_vm4, %v8701_v8, %v1943_v4  ;;  %3246 = vmatpush1.bf16.msra.mxu0 %v2790_v50  ;;  %v1768_v33 = vcvt.s32.f32 %v9003_v0  ;;  %v1769_v49 = vcvt.s32.f32 %v9006_v25  ;;  %v9063_v8 = vpop.permute.xlu0 %1954  ;;  %v12467_v25 = vld [vmem:[#allocation143_spill] sm:$0xff] }
 0x284   :  { %v9043_v19 = vsub.f32 %v12457_v22, %v1839_v37  ;;  %v9057_v34 = vadd.f32 %v12422_v1, %v12458_v59  ;;  %v2662_v38 = vmul.f32 0.5, %v6165_v42  ;;  %vm1873_vm15 = vcmp.gt.f32.partialorder %v9014_v57, 0.5 }
 0x285   :  { %v2007_v11 = vsel %vm1988_vm4, %v1941_v30, %v8997_v52  ;;  %v6167_v50 = vpop.eup %6166  ;;  %v2008_v21 = vsel %vm1988_vm4, %v1943_v4, %v9016_v44  ;;  %vm1874_vm1 = vcmp.gt.f32.partialorder %v9028_v60, 0.5  ;;  %vm2143_vm2 = vcmp.lt.f32.partialorder %v8993_v24, 7.5  ;;  %v9080_v63 = vpop.permute.xlu1 %1958 }
 0x286   :  { %v9072_v32 = vadd.s32 2048, %v7497_v48  ;;  %v2716_v37 = vadd.f32 0.5, %v2662_v38  ;;  %v2663_v3 = vmul.f32 0.5, %v6167_v50  ;;  %v2089_v30 = vsel %vm1872_vm14, %v2010_v55, 0.0  ;;  %6002 = vmatmul.mubr.msk.bf16.gmra.mrb[136].mxu0 %vm2843_vm3, %v8841_v14 }
 0x287   :  { %v2107_v56 = vsel %vm1872_vm14, %v2011_v61, 0.0  ;;  %v6169_v4 = vpop.eup %6168  ;;  %v2090_v51 = vsel %vm1873_vm15, %v2007_v11, 0.0  ;;  %vm1875_vm5 = vcmp.gt.f32.partialorder %v9043_v19, 0.5  ;;  %vm2144_vm7 = vcmp.lt.f32.partialorder %v9014_v57, 7.5  ;;  %3277 = vmatprep.mubr.bf16.mxu0 %v12416_v10  ;;  %v9098_v22 = vpop.permute.xlu0 %1960 }
 0x288   :  { %v9089_v6 = vadd.f32 0.5, %v1768_v33  ;;  %v9093_v17 = vadd.f32 0.5, %v1769_v49  ;;  %v2770_v45 = vmul.f32 %v2716_v37, %v8942_v13  ;;  %v2717_v2 = vadd.f32 0.5, %v2663_v3 }
 0x289   :  { %v2664_v58 = vmul.f32 0.5, %v6169_v4  ;;  %v2108_v26 = vsel %vm1873_vm15, %v2008_v21, 0.0  ;;  %v6171_v42 = vpop.eup %6170  ;;  %v2414_v55 = vadd.f32 %v2089_v30, %v1568_v15  ;;  %v2432_v61 = vadd.f32 %v2107_v56, %v1586_v23  ;;  %v2218_v37 = vpop.permute.xlu1 %2217  ;;  %5995 = vmatmul.mubr.msk.bf16.gmra.mrb[128].mxu1 %vm2843_vm3, %v8769_v18 }
 0x28a   :  { %vm2145_vm8 = vcmp.lt.f32.partialorder %v9028_v60, 7.5  ;;  %v9102_v59 = vadd.s32 2176, %v7497_v48  ;;  %v12083_v38 = vcvt.s32.f32 %v9072_v32  ;;  %v2771_v11 = vmul.f32 %v2717_v2, %v8958_v46  ;;  %3068 = vmatprep.mubr.bf16.mxu1 %v12416_v10 }
 0x28b   :  { %v2718_v13 = vadd.f32 0.5, %v2664_v58  ;;  %v2665_v50 = vmul.f32 0.5, %v6171_v42  ;;  %v2004_v21 = vsel %vm1988_vm4, %v8997_v52, %v9039_v29  ;;  %v2415_v3 = vadd.f32 %v2090_v51, %v1569_v43  ;;  %v2220_v58 = vpop.permute.xlu0 %2219 }
 0x28c   :  { %v2433_v15 = vadd.f32 %v2108_v26, %v1587_v31  ;;  %v2278_v23 = vsel %vm2259_vm6, %v8824_v54, %v2218_v37  ;;  %v2806_v30 = vpack.c.bf16 %v2770_v45, %v2770_v45  ;;  %v2807_v56 = vpack.c.bf16 %v2771_v11, %v2771_v11 }
 0x28d   :  { %v2772_v46 = vmul.f32 %v2718_v13, %v8969_v28  ;;  %v2719_v4 = vadd.f32 0.5, %v2665_v50  ;;  %v2360_v2 = vsel %vm2143_vm2, %v2278_v23, 0.0  ;;  %v2091_v52 = vsel %vm1874_vm1, %v2004_v21, 0.0  ;;  %v2224_v45 = vpop.permute.xlu1 %2223 }
 0x28e   :  { %v2005_v54 = vsel %vm1988_vm4, %v9016_v44, %v9063_v8  ;;  %v9125_v43 = vadd.f32 %v2414_v55, %v2360_v2  ;;  %v2279_v28 = vsel %vm2259_vm6, %v8847_v5, %v2220_v58  ;;  %vm2146_vm9 = vcmp.lt.f32.partialorder %v9043_v19, 7.5  ;;  %6003 = vmatprep.subr.msk.bf16.mxu1 %vm135_vm0, %v2807_v56 }
 0x28f   :  { %v2773_v31 = vmul.f32 %v2719_v4, %v8978_v41  ;;  %v2378_v51 = vsel %vm2143_vm2, %v2279_v28, 0.0  ;;  %v2878_v26 = vsel %vm135_vm0, %v2806_v30, 0  ;;  %v2808_v42 = vpack.c.bf16 %v2772_v46, %v2772_v46  ;;  %v2226_v21 = vpop.permute.xlu0 %2225 }
 0x290   :  { %v2001_v44 = vsel %vm1988_vm4, %v9039_v29, %v9080_v63  ;;  %v2522_v5 = vmul.f32 0.5, %v9125_v43  ;;  %v9141_v55 = vadd.f32 %v2432_v61, %v2378_v51  ;;  %v2275_v41 = vsel %vm2259_vm6, %v2218_v37, %v2224_v45  ;;  %3165 = vmatpush1.bf16.msra.mxu1 %v2878_v26 }
 0x291   :  { %v2809_v11 = vpack.c.bf16 %v2773_v31, %v2773_v31  ;;  %v2109_v13 = vsel %vm1874_vm1, %v2005_v54, 0.0  ;;  %v2002_v50 = vsel %vm1988_vm4, %v9063_v8, %v9098_v22  ;;  %v2361_v29 = vsel %vm2144_vm7, %v2275_v41, 0.0  ;;  %v2230_v46 = vpop.permute.xlu1 %2229  ;;  %5996 = vmatmul.mubr.msk.bf16.gmra.mrb[132].mxu1 %vm2843_vm3, %v8841_v14 }
 0x292   :  { %6172 = vtanh.f32 %v2522_v5  ;;  %v2540_v61 = vmul.f32 0.5, %v9141_v55  ;;  %v9154_v23 = vadd.f32 %v2415_v3, %v2361_v29  ;;  %v2276_v37 = vsel %vm2259_vm6, %v2220_v58, %v2226_v21  ;;  %3194 = vmatprep.mubr.bf16.mxu1 %v12416_v10 }
 0x293   :  { %v2416_v30 = vadd.f32 %v2091_v52, %v9024_v9  ;;  %v2092_v56 = vsel %vm1875_vm5, %v2001_v44, 0.0  ;;  %v2379_v8 = vsel %vm2144_vm7, %v2276_v37, 0.0  ;;  %6009 = vmatprep.subr.msk.bf16.mxu0 %vm135_vm0, %v2809_v11  ;;  %v2884_v4 = vsel %vm135_vm0, %v2808_v42, 0  ;;  %v2232_v28 = vpop.permute.xlu0 %2231  ;;  %v12459_v37 = vld [vmem:[#allocation89_spill] sm:$0xff] }
 0x294   :  { %6174 = vtanh.f32 %v2540_v61  ;;  %v2523_v3 = vmul.f32 0.5, %v9154_v23  ;;  %v9166_v2 = vadd.f32 %v2433_v15, %v2379_v8  ;;  %v2272_v58 = vsel %vm2259_vm6, %v2224_v45, %v2230_v46  ;;  %3248 = vmatpush1.bf16.msra.mxu0 %v2884_v4 }
 0x295   :  { %v2434_v9 = vadd.f32 %v2109_v13, %v9036_v20  ;;  %v2110_v52 = vsel %vm1875_vm5, %v2002_v50, 0.0  ;;  %v2362_v54 = vsel %vm2145_vm8, %v2272_v58, 0.0  ;;  %v12082_v15 = vcvt.s32.f32 %v9102_v59  ;;  %v9189_v42 = vpop.permute.xlu1 %2235 }
 0x296   :  { %6176 = vtanh.f32 %v2523_v3  ;;  %v2541_v31 = vmul.f32 0.5, %v9166_v2  ;;  %v9180_v51 = vadd.f32 %v2416_v30, %v2362_v54  ;;  %v2273_v45 = vsel %vm2259_vm6, %v2226_v21, %v2232_v28 }
 0x297   :  { %v2417_v20 = vadd.f32 %v2092_v56, %v9032_v62  ;;  %v2380_v26 = vsel %vm2145_vm8, %v2273_v45, 0.0  ;;  %6010 = vmatmul.mubr.msk.bf16.vlgmr.msra.gmra.mrb[140].mxu0 %vm2843_vm3, %v8540_v7  ;;  %v1804_v44 = vmul.f32 0.11111111, %v9089_v6  ;;  %v1805_v5 = vmul.f32 0.11111111, %v9093_v17  ;;  %v9203_v29 = vpop.permute.xlu0 %2237 }
 0x298   :  { %6178 = vtanh.f32 %v2541_v31  ;;  %v2524_v41 = vmul.f32 0.5, %v9180_v51  ;;  %v9194_v11 = vadd.f32 %v2434_v9, %v2380_v26  ;;  %v2269_v62 = vsel %vm2259_vm6, %v2230_v46, %v9189_v42  ;;  %3287 = vmatprep.mubr.bf16.mxu0 %v12416_v10 }
 0x299   :  { %v2435_v13 = vadd.f32 %v2110_v52, %v9057_v34  ;;  %v2363_v50 = vsel %vm2146_vm9, %v2269_v62, 0.0  ;;  %v1788_v6 = vadd.f32 0.5, %v12083_v38  ;;  %v1789_v17 = vadd.f32 0.5, %v12082_v15  ;;  %v1945_v8 = vpop.permute.xlu1 %1944  ;;  %6004 = vmatmul.mubr.msk.bf16.vlgmr.msra.gmra.mrb[136].mxu1 %vm2843_vm3, %v8540_v7  ;;  %v12460_v52 = vld [vmem:[#allocation91_spill] sm:$0xff] }
 0x29a   :  { %6180 = vtanh.f32 %v2524_v41  ;;  %v2542_v21 = vmul.f32 0.5, %v9194_v11  ;;  %v9210_v61 = vadd.f32 %v2417_v20, %v2363_v50  ;;  %v2270_v34 = vsel %vm2259_vm6, %v2232_v28, %v9203_v29  ;;  %3204 = vmatprep.mubr.bf16.mxu1 %v12416_v10  ;;  %v12461_v41 = vld [vmem:[#allocation144_spill] sm:$0xff] }
 0x29b   :  { %v1604_v30 = vadd.f32 %v12441_v53, %v12459_v37  ;;  %v2381_v56 = vsel %vm2146_vm9, %v2270_v34, 0.0  ;;  %v1822_v46 = vfloor.f32 %v1804_v44  ;;  %v1823_v9 = vfloor.f32 %v1805_v5  ;;  %v1951_v31 = vpop.permute.xlu0 %1950 }
 0x29c   :  { %v6173_v4 = vpop.eup %6172  ;;  %6182 = vtanh.f32 %v2542_v21  ;;  %v2525_v3 = vmul.f32 0.5, %v9210_v61  ;;  %v9220_v58 = vadd.f32 %v2435_v13, %v2381_v56  ;;  %v1605_v54 = vadd.f32 %v12441_v53, %v12460_v52  ;;  %v12462_v13 = vld [vmem:[#allocation146_spill] sm:$0xff] }
 0x29d   :  { %v2630_v28 = vmul.f32 0.5, %v6173_v4  ;;  %v9227_v45 = vmul.f32 0.11111111, %v1788_v6  ;;  %v9229_v20 = vmul.f32 0.11111111, %v1789_v17  ;;  %v2012_v7 = vsel %vm1988_vm4, %v8911_v16, %v1945_v8  ;;  %v1957_v17 = vpop.permute.xlu1 %1956 }
 0x29e   :  { %v6175_v26 = vpop.eup %6174  ;;  %6184 = vtanh.f32 %v2525_v3  ;;  %v2543_v44 = vmul.f32 0.5, %v9220_v58  ;;  %v2009_v5 = vsel %vm1988_vm4, %v1945_v8, %v1951_v31  ;;  %v1606_v62 = vadd.f32 %v12441_v53, %v12461_v41 }
 0x29f   :  { %v1607_v50 = vadd.f32 %v12441_v53, %v12462_v13  ;;  %v2648_v6 = vmul.f32 0.5, %v6175_v26  ;;  %6011 = vmatmul.mubr.msk.bf16.gmra.mrb[144].mxu0 %vm2843_vm3, %v8603_v27  ;;  %v9243_v21 = vmul.f32 9.0, %v1822_v46  ;;  %v2684_v37 = vadd.f32 0.5, %v2630_v28  ;;  %v9254_v46 = vpop.permute.xlu0 %1962 }
 0x2a0   :  { %v6177_v34 = vpop.eup %6176  ;;  %6186 = vtanh.f32 %v2543_v44  ;;  %v2006_v16 = vsel %vm1988_vm4, %v1951_v31, %v1957_v17  ;;  %3297 = vmatprep.mubr.bf16.mxu0 %v12416_v10  ;;  %v9248_v56 = vmul.f32 9.0, %v1823_v9  ;;  %v2125_v3 = vsel %vm1872_vm14, %v2012_v7, 0.0 }
 0x2a1   :  { %v2702_v8 = vadd.f32 0.5, %v2648_v6  ;;  %v2631_v4 = vmul.f32 0.5, %v6177_v34  ;;  %v2126_v52 = vsel %vm1873_vm15, %v2009_v5, 0.0  ;;  %v2127_v28 = vsel %vm1874_vm1, %v2006_v16, 0.0  ;;  %v2222_v6 = vpop.permute.xlu1 %2221  ;;  %6005 = vmatmul.mubr.msk.bf16.gmra.mrb[140].mxu1 %vm2843_vm3, %v8603_v27 }
 0x2a2   :  { %v6179_v26 = vpop.eup %6178  ;;  %v2003_v31 = vsel %vm1988_vm4, %v1957_v17, %v9254_v46  ;;  %v1824_v9 = vfloor.f32 %v9227_v45  ;;  %v2738_v16 = vmul.f32 %v2684_v37, %v9125_v43  ;;  %v2450_v15 = vadd.f32 %v2125_v3, %v1604_v30  ;;  %3214 = vmatprep.mubr.bf16.mxu1 %v12416_v10 }
 0x2a3   :  { %v9264_v41 = vmul.f32 %v2702_v8, %v9141_v55  ;;  %v2685_v7 = vadd.f32 0.5, %v2631_v4  ;;  %v2649_v13 = vmul.f32 0.5, %v6179_v26  ;;  %v2128_v5 = vsel %vm1875_vm5, %v2003_v31, 0.0  ;;  %v2228_v31 = vpop.permute.xlu0 %2227 }
 0x2a4   :  { %v6181_v34 = vpop.eup %6180  ;;  %v2451_v38 = vadd.f32 %v2126_v52, %v1605_v54  ;;  %v2280_v17 = vsel %vm2259_vm6, %v8966_v12, %v2222_v6  ;;  %v2452_v4 = vadd.f32 %v2127_v28, %v1606_v62  ;;  %v2453_v43 = vadd.f32 %v2128_v5, %v1607_v50 }
 0x2a5   :  { %v2703_v55 = vadd.f32 0.5, %v2649_v13  ;;  %v2632_v8 = vmul.f32 0.5, %v6181_v34  ;;  %v2396_v26 = vsel %vm2143_vm2, %v2280_v17, 0.0  ;;  %v2277_v54 = vsel %vm2259_vm6, %v2222_v6, %v2228_v31  ;;  %v2234_v62 = vpop.permute.xlu1 %2233 }
 0x2a6   :  { %v6183_v44 = vpop.eup %6182  ;;  %v9277_v30 = vadd.f32 %v2450_v15, %v2396_v26  ;;  %v2792_v12 = vpack.c.bf16 %v9264_v41, %v2738_v16  ;;  %v2739_v27 = vmul.f32 %v2685_v7, %v9154_v23  ;;  %v2397_v24 = vsel %vm2144_vm7, %v2277_v54, 0.0 }
 0x2a7   :  { %v2686_v37 = vadd.f32 0.5, %v2632_v8  ;;  %v2650_v3 = vmul.f32 0.5, %v6183_v44  ;;  %6012 = vmatmul.mubr.msk.bf16.gmra.mrb[148].mxu0 %vm2843_vm3, %v8690_v36  ;;  %v2757_v15 = vmul.f32 %v2703_v55, %v9166_v2  ;;  %v9289_v28 = vadd.f32 %v2451_v38, %v2397_v24  ;;  %v9297_v13 = vpop.permute.xlu0 %2239  ;;  %v12466_v24 = vld [vmem:[#allocation141_spill] sm:$0xff] }
 0x2a8   :  { %v6185_v52 = vpop.eup %6184  ;;  %v2558_v50 = vmul.f32 0.5, %v9277_v30  ;;  %v2274_v41 = vsel %vm2259_vm6, %v2228_v31, %v2234_v62  ;;  %3307 = vmatprep.mubr.bf16.mxu0 %v12416_v10  ;;  %v2271_v6 = vsel %vm2259_vm6, %v2234_v62, %v9297_v13  ;;  %v9320_v54 = vsub.f32 %v1768_v33, %v9243_v21 }
 0x2a9   :  { %v2740_v23 = vmul.f32 %v2686_v37, %v9180_v51  ;;  %v2704_v57 = vadd.f32 0.5, %v2650_v3  ;;  %v2633_v44 = vmul.f32 0.5, %v6185_v52  ;;  %v2398_v7 = vsel %vm2145_vm8, %v2274_v41, 0.0  ;;  %v1965_v17 = vpop.permute.xlu1 %1964  ;;  %6006 = vmatmul.mubr.msk.bf16.gmra.mrb[144].mxu1 %vm2843_vm3, %v8690_v36  ;;  %v12468_v52 = vld [vmem:[#allocation147_spill] sm:$0xff] }
 0x2aa   :  { %v6187_v5 = vpop.eup %6186  ;;  %6188 = vtanh.f32 %v2558_v50  ;;  %v2559_v2 = vmul.f32 0.5, %v9289_v28  ;;  %v9300_v38 = vadd.f32 %v2452_v4, %v2398_v7  ;;  %v2399_v60 = vsel %vm2146_vm9, %v2271_v6, 0.0  ;;  %3224 = vmatprep.mubr.bf16.mxu1 %v12416_v10  ;;  %v12469_v50 = vld [vmem:[#allocation148_spill] sm:$0xff] }
 0x2ab   :  { %v2758_v34 = vmul.f32 %v2704_v57, %v9194_v11  ;;  %v2687_v51 = vadd.f32 0.5, %v2633_v44  ;;  %v2651_v16 = vmul.f32 0.5, %v6187_v5  ;;  %v9309_v8 = vadd.f32 %v2453_v43, %v2399_v60  ;;  %v9313_v31 = vpop.permute.xlu0 %1966 }
 0x2ac   :  { %6190 = vtanh.f32 %v2559_v2  ;;  %v2560_v55 = vmul.f32 0.5, %v9300_v38  ;;  %v2793_v26 = vpack.c.bf16 %v2757_v15, %v2739_v27  ;;  %v1842_v37 = vmul.f32 9.0, %v1824_v9 }
 0x2ad   :  { %v2705_v4 = vadd.f32 0.5, %v2651_v16  ;;  %v2794_v11 = vpack.c.bf16 %v2758_v34, %v2740_v23  ;;  %v2561_v19 = vmul.f32 0.5, %v9309_v8  ;;  %v2741_v43 = vmul.f32 %v2687_v51, %v9210_v61  ;;  %v9326_v36 = vpop.permute.xlu1 %1970  ;;  %v12470_v23 = vld [vmem:[#allocation159_spill] sm:$0xff] }
 0x2ae   :  { %6192 = vtanh.f32 %v2560_v55  ;;  %3328 = vmatprep.subr.bf16.mxu1 %v2793_v26  ;;  %v9333_v0 = vsub.f32 %v1769_v49, %v9248_v56  ;;  %v12463_v33 = vfloor.f32 %v9229_v20  ;;  %v1590_v45 = vadd.f32 %v12422_v1, %v12466_v24  ;;  %v12475_v26 = vld [vmem:[#allocation162_spill] sm:$0xff] }
 0x2af   :  { %v2759_v27 = vmul.f32 %v2705_v4, %v9220_v58  ;;  %3329 = vmatpush1.bf16.msra.mxu1 %v2792_v12  ;;  %6013 = vmatmul.mubr.msk.bf16.gmra.mrb[152].mxu0 %vm2843_vm3, %v8769_v18  ;;  %6194 = vtanh.f32 %v2561_v19  ;;  %v12464_v58 = vld [vmem:[#allocation136_spill] sm:$0xff]  ;;  %v12465_v12 = vld [vmem:[#allocation137_spill] sm:$0xff]  ;;  %v9344_v9 = vpop.permute.xlu0 %1972  ;;  %v9348_v49 = vadd.f32 %v12422_v1, %v12467_v25  ;;  %vm1876_vm10 = vcmp.gt.f32.partialorder %v9320_v54, 0.5 }
 0x2b0   :  { %v1843_v61 = vmul.f32 9.0, %v12463_v33  ;;  %3317 = vmatprep.mubr.bf16.mxu0 %v12416_v10  ;;  %v1572_v21 = vadd.f32 %v12424_v47, %v12464_v58  ;;  %v1573_v3 = vadd.f32 %v12424_v47, %v12465_v12  ;;  %v1998_v20 = vsel %vm1988_vm4, %v9080_v63, %v1965_v17  ;;  %v12477_v19 = vld [vmem:[#allocation164_spill] sm:$0xff] }
 0x2b1   :  { %v2795_v62 = vpack.c.bf16 %v2759_v27, %v2741_v43  ;;  %v1999_v56 = vsel %vm1988_vm4, %v9098_v22, %v9313_v31  ;;  %v9360_v15 = vadd.f32 %v12441_v53, %v12468_v52  ;;  %v9364_v41 = vadd.f32 %v12441_v53, %v12469_v50  ;;  %v1977_v7 = vpop.permute.xlu1 %1976  ;;  %v12472_v22 = vld [vmem:[#allocation160_spill] sm:$0xff]  ;;  %6007 = vmatmul.mubr.msk.bf16.gmra.mrb[148].mxu1 %vm2843_vm3, %v8769_v18  ;;  %v12476_v18 = vld [vmem:[#allocation163_spill] sm:$0xff] }
 0x2b2   :  { %v9368_v57 = vadd.f32 %v12424_v47, %v12470_v23  ;;  %v12471_v63 = vcvt.s32.f32 %v9072_v32  ;;  %v9376_v2 = vadd.f32 %v12424_v47, %v12472_v22  ;;  %vm1877_vm11 = vcmp.gt.f32.partialorder %v9333_v0, 0.5  ;;  %v12474_v32 = vld [vmem:[#allocation161_spill] sm:$0xff]  ;;  %3234 = vmatprep.mubr.bf16.mxu1 %v12416_v10 }
 0x2b3   :  { %3411 = vmatprep.subr.bf16.mxu0 %v2795_v62  ;;  %v1995_v6 = vsel %vm1988_vm4, %v1965_v17, %v9326_v36  ;;  %v12473_v34 = vcvt.s32.f32 %v9102_v59  ;;  %v9390_v16 = vadd.f32 %v12422_v1, %v12474_v32  ;;  %v2093_v60 = vsel %vm1876_vm10, %v1998_v20, 0.0  ;;  %v1979_v17 = vpop.permute.xlu0 %1978 }
 0x2b4   :  { %v9372_v44 = vsub.f32 %v12471_v63, %v1842_v37  ;;  %v6189_v5 = vpop.eup %6188  ;;  %3412 = vmatpush1.bf16.msra.mxu0 %v2794_v11  ;;  %v2111_v55 = vsel %vm1876_vm10, %v1999_v56, 0.0  ;;  %v9399_v4 = vadd.f32 %v12422_v1, %v12475_v26  ;;  %v9403_v11 = vadd.f32 %v12441_v53, %v12476_v18 }
 0x2b5   :  { %v9384_v51 = vsub.f32 %v12473_v34, %v1843_v61  ;;  %v2666_v47 = vmul.f32 0.5, %v6189_v5  ;;  %v9407_v43 = vadd.f32 %v12441_v53, %v12477_v19  ;;  %vm2147_vm12 = vcmp.lt.f32.partialorder %v9320_v54, 7.5  ;;  %v9415_v1 = vpop.permute.xlu1 %2241  ;;  %v9515_v54 = vld [vmem:[%s12041_s1 + $0x30] sm:$0xff]  }
 0x2b6   :  { %v6191_v59 = vpop.eup %6190  ;;  %v2094_v33 = vsel %vm1877_vm11, %v1995_v6, 0.0  ;;  %vm1878_vm13 = vcmp.gt.f32.partialorder %v9372_v44, 0.5  ;;  %v2418_v58 = vadd.f32 %v2093_v60, %v1572_v21  ;;  %v2436_v12 = vadd.f32 %v2111_v55, %v1590_v45 }
 0x2b7   :  { %v2720_v27 = vadd.f32 0.5, %v2666_v47  ;;  %v2667_v37 = vmul.f32 0.5, %v6191_v59  ;;  %6014 = vmatmul.mubr.msk.bf16.gmra.mrb[156].mxu0 %vm2843_vm3, %v8841_v14  ;;  %vm1879_vm14 = vcmp.gt.f32.partialorder %v9384_v51, 0.5  ;;  %v2266_v53 = vsel %vm2259_vm6, %v9189_v42, %v9415_v1  ;;  %v9426_v56 = vpop.permute.xlu0 %2243 }
 0x2b8   :  { %v6193_v61 = vpop.eup %6192  ;;  %3443 = vmatprep.mubr.bf16.mxu0 %v12416_v10  ;;  %v2364_v20 = vsel %vm2147_vm12, %v2266_v53, 0.0  ;;  %v9428_v45 = vadd.f32 %v2094_v33, %v1573_v3  ;;  %v1996_v52 = vsel %vm1988_vm4, %v9313_v31, %v9344_v9  ;;  %vm2148_vm15 = vcmp.lt.f32.partialorder %v9333_v0, 7.5 }
 0x2b9   :  { %v2774_v24 = vmul.f32 %v2720_v27, %v9277_v30  ;;  %v2721_v62 = vadd.f32 0.5, %v2667_v37  ;;  %v2668_v25 = vmul.f32 0.5, %v6193_v61  ;;  %v6195_v21 = vpop.eup %6194  ;;  %v9434_v42 = vadd.f32 %v2418_v58, %v2364_v20  ;;  %v1969_v5 = vpop.permute.xlu1 %1968  ;;  %6008 = vmatmul.mubr.msk.bf16.gmra.mrb[152].mxu1 %vm2843_vm3, %v8841_v14 }
 0x2ba   :  { %v2267_v30 = vsel %vm2259_vm6, %v9203_v29, %v9426_v56  ;;  %v2669_v63 = vmul.f32 0.5, %v6195_v21  ;;  %v2000_v6 = vsel %vm1988_vm4, %v9254_v46, %v1969_v5  ;;  %v2112_v47 = vsel %vm1877_vm11, %v1996_v52, 0.0  ;;  %3360 = vmatprep.mubr.bf16.mxu1 %v12416_v10 }
 0x2bb   :  { %v2775_v50 = vmul.f32 %v2721_v62, %v9289_v28  ;;  %v2722_v23 = vadd.f32 0.5, %v2668_v25  ;;  %v2382_v3 = vsel %vm2147_vm12, %v2267_v30, 0.0  ;;  %v2526_v22 = vmul.f32 0.5, %v9434_v42  ;;  %v1975_v60 = vpop.permute.xlu0 %1974 }
 0x2bc   :  { %v9445_v31 = vadd.f32 %v2436_v12, %v2382_v3  ;;  %v2810_v29 = vpack.c.bf16 %v2774_v24, %v2774_v24  ;;  %v2723_v32 = vadd.f32 0.5, %v2669_v63  ;;  %v1989_v55 = vsel %vm1988_vm4, %v1977_v7, %v8245_v40 }
 0x2bd   :  { %v2811_v34 = vpack.c.bf16 %v2775_v50, %v2775_v50  ;;  %v2776_v28 = vmul.f32 %v2722_v23, %v9300_v38  ;;  %v1992_v46 = vsel %vm1988_vm4, %v9326_v36, %v1977_v7  ;;  %6196 = vtanh.f32 %v2526_v22  ;;  %v1981_v26 = vpop.permute.xlu1 %1980 }
 0x2be   :  { %v2544_v14 = vmul.f32 0.5, %v9445_v31  ;;  %vm2149_vm1 = vcmp.lt.f32.partialorder %v9372_v44, 7.5  ;;  %v2777_v38 = vmul.f32 %v2723_v32, %v9309_v8  ;;  %v2129_v59 = vsel %vm1876_vm10, %v2000_v6, 0.0 }
 0x2bf   :  { %6015 = vmatprep.subr.msk.bf16.mxu1 %vm135_vm0, %v2811_v34  ;;  %v2890_v18 = vsel %vm135_vm0, %v2810_v29, 0  ;;  %v2812_v40 = vpack.c.bf16 %v2776_v28, %v2776_v28  ;;  %vm2150_vm2 = vcmp.lt.f32.partialorder %v9384_v51, 7.5  ;;  %v2437_v36 = vadd.f32 %v2112_v47, %v9348_v49  ;;  %v9483_v33 = vpop.permute.xlu0 %2245  ;;  %v9622_v51 = vld [vmem:[%s12041_s1 + $0x40] sm:$0xff]  }
 0x2c0   :  { %v1990_v7 = vsel %vm1988_vm4, %v1979_v17, %v8305_v35  ;;  %v1993_v8 = vsel %vm1988_vm4, %v9344_v9, %v1979_v17  ;;  %6198 = vtanh.f32 %v2544_v14  ;;  %3331 = vmatpush1.bf16.msra.mxu1 %v2890_v18  ;;  %v2813_v19 = vpack.c.bf16 %v2777_v38, %v2777_v38 }
 0x2c1   :  { %v2095_v27 = vsel %vm1878_vm13, %v1992_v46, 0.0  ;;  %v1997_v37 = vsel %vm1988_vm4, %v1969_v5, %v1975_v60  ;;  %v1994_v49 = vsel %vm1988_vm4, %v1975_v60, %v1981_v26  ;;  %v2096_v35 = vsel %vm1879_vm14, %v1989_v55, 0.0 }
 0x2c2   :  { %v2454_v61 = vadd.f32 %v2129_v59, %v9360_v15  ;;  %v1991_v9 = vsel %vm1988_vm4, %v1981_v26, %v8325_v39  ;;  %v2268_v17 = vsel %vm2259_vm6, %v9297_v13, %v9483_v33  ;;  %v2113_v58 = vsel %vm1878_vm13, %v1993_v8, 0.0  ;;  %6021 = vmatprep.subr.msk.bf16.mxu0 %vm135_vm0, %v2813_v19  ;;  %v2248_v15 = vpop.permute.xlu1 %2247  ;;  %v9571_v8 = vld [vmem:[%s12041_s1 + $0x38] sm:$0xff]  }
 0x2c3   :  { %v2114_v12 = vsel %vm1879_vm14, %v1990_v7, 0.0  ;;  %v2400_v53 = vsel %vm2147_vm12, %v2268_v17, 0.0  ;;  %v2896_v24 = vsel %vm135_vm0, %v2812_v40, 0  ;;  %v2130_v39 = vsel %vm1877_vm11, %v1997_v37, 0.0  ;;  %6016 = vmatmul.mubr.msk.bf16.vlgmr.msra.gmra.mrb[156].mxu1 %vm2843_vm3, %v9515_v54  ;;  %v12479_v40 = vld [vmem:[#allocation131_spill] sm:$0xff] }
 0x2c4   :  { %v2131_v13 = vsel %vm1878_vm13, %v1994_v49, 0.0  ;;  %v9507_v62 = vadd.f32 %v2454_v61, %v2400_v53  ;;  %v2263_v25 = vsel %vm2259_vm6, %v9415_v1, %v2248_v15  ;;  %3414 = vmatpush1.bf16.msra.mxu0 %v2896_v24  ;;  %v2420_v20 = vadd.f32 %v2095_v27, %v9368_v57  ;;  %v2250_v1 = vpop.permute.xlu0 %2249  ;;  %3370 = vmatprep.mubr.bf16.mxu1 %v12416_v10 }
 0x2c5   :  { %v2421_v21 = vadd.f32 %v2096_v35, %v9376_v2  ;;  %v2132_v52 = vsel %vm1879_vm14, %v1991_v9, 0.0  ;;  %v2365_v30 = vsel %vm2148_vm15, %v2263_v25, 0.0  ;;  %v2438_v50 = vadd.f32 %v2113_v58, %v9390_v16 }
 0x2c6   :  { %v2562_v23 = vmul.f32 0.5, %v9507_v62  ;;  %v9529_v63 = vadd.f32 %v9428_v45, %v2365_v30  ;;  %v2264_v57 = vsel %vm2259_vm6, %v9426_v56, %v2250_v1  ;;  %v2439_v2 = vadd.f32 %v2114_v12, %v9399_v4  ;;  %v2254_v16 = vpop.permute.xlu1 %2253 }
 0x2c7   :  { %v2455_v3 = vadd.f32 %v2130_v39, %v9364_v41  ;;  %v2456_v5 = vadd.f32 %v2131_v13, %v9403_v11  ;;  %v2383_v22 = vsel %vm2148_vm15, %v2264_v57, 0.0  ;;  %6022 = vmatmul.mubr.msk.bf16.vlgmr.msra.gmra.mrb[160].mxu0 %vm2843_vm3, %v9515_v54  ;;  %v6197_v6 = vpop.eup %6196  ;;  %v2457_v45 = vadd.f32 %v2132_v52, %v9407_v43  ;;  %v12478_v11 = vld [vmem:[#allocation121_spill] sm:$0xff] }
 0x2c8   :  { %v2527_v29 = vmul.f32 0.5, %v9529_v63  ;;  %v9543_v34 = vadd.f32 %v2437_v36, %v2383_v22  ;;  %v2260_v4 = vsel %vm2259_vm6, %v2248_v15, %v2254_v16  ;;  %3453 = vmatprep.mubr.bf16.mxu0 %v12416_v10  ;;  %v2634_v41 = vmul.f32 0.5, %v6197_v6  ;;  %v2256_v32 = vpop.permute.xlu0 %2255 }
 0x2c9   :  { %6200 = vtanh.f32 %v2562_v23  ;;  %v2311_v56 = vsel %vm2259_vm6, %v2254_v16, %v12478_v11  ;;  %v2366_v28 = vsel %vm2149_vm1, %v2260_v4, 0.0  ;;  %v2261_v59 = vsel %vm2259_vm6, %v2250_v1, %v2256_v32  ;;  %v9635_v11 = vld [vmem:[%s12041_s1 + $0x48] sm:$0xff]  }
 0x2ca   :  { %v6199_v43 = vpop.eup %6198  ;;  %6202 = vtanh.f32 %v2527_v29  ;;  %v2545_v47 = vmul.f32 0.5, %v9543_v34  ;;  %v2367_v60 = vsel %vm2150_vm2, %v2311_v56, 0.0  ;;  %v9556_v55 = vadd.f32 %v2420_v20, %v2366_v28  ;;  %v2252_v26 = vpop.permute.xlu1 %2251 }
 0x2cb   :  { %v2688_v46 = vadd.f32 0.5, %v2634_v41  ;;  %v2652_v14 = vmul.f32 0.5, %v6199_v43  ;;  %v9558_v38 = vadd.f32 %v2421_v21, %v2367_v60  ;;  %v2312_v36 = vsel %vm2259_vm6, %v2256_v32, %v12479_v40  ;;  %6017 = vmatmul.mubr.msk.bf16.gmra.mrb[160].mxu1 %vm2843_vm3, %v9571_v8 }
 0x2cc   :  { %6204 = vtanh.f32 %v2545_v47  ;;  %v2528_v18 = vmul.f32 0.5, %v9556_v55  ;;  %v2384_v7 = vsel %vm2149_vm1, %v2261_v59, 0.0  ;;  %v2385_v49 = vsel %vm2150_vm2, %v2312_v36, 0.0  ;;  %v2258_v35 = vpop.permute.xlu0 %2257  ;;  %3380 = vmatprep.mubr.bf16.mxu1 %v12416_v10 }
 0x2cd   :  { %v9576_v19 = vmul.f32 %v2688_v46, %v9434_v42  ;;  %v2706_v27 = vadd.f32 0.5, %v2652_v14  ;;  %v2529_v37 = vmul.f32 0.5, %v9558_v38  ;;  %v9582_v61 = vadd.f32 %v2438_v50, %v2384_v7 }
 0x2ce   :  { %6206 = vtanh.f32 %v2528_v18  ;;  %v9584_v9 = vadd.f32 %v2439_v2, %v2385_v49  ;;  %v2265_v17 = vsel %vm2259_vm6, %v9483_v33, %v2252_v26  ;;  %v2262_v12 = vsel %vm2259_vm6, %v2252_v26, %v2258_v35  ;;  %v12480_v33 = vld [vmem:[#allocation140_spill] sm:$0xff] }
 0x2cf   :  { %v9590_v42 = vmul.f32 %v2706_v27, %v9445_v31  ;;  %6208 = vtanh.f32 %v2529_v37  ;;  %v2401_v58 = vsel %vm2148_vm15, %v2265_v17, 0.0  ;;  %6023 = vmatmul.mubr.msk.bf16.gmra.mrb[164].mxu0 %vm2843_vm3, %v9571_v8  ;;  %v2546_v53 = vmul.f32 0.5, %v9582_v61 }
 0x2d0   :  { %v2547_v15 = vmul.f32 0.5, %v9584_v9  ;;  %v9600_v24 = vadd.f32 %v2455_v3, %v2401_v58  ;;  %v2313_v31 = vsel %vm2259_vm6, %v2258_v35, %v12480_v33  ;;  %3463 = vmatprep.mubr.bf16.mxu0 %v12416_v10  ;;  %v2402_v0 = vsel %vm2149_vm1, %v2262_v12, 0.0 }
 0x2d1   :  { %v2403_v39 = vsel %vm2150_vm2, %v2313_v31, 0.0  ;;  %v2796_v13 = vpack.c.bf16 %v9590_v42, %v9576_v19  ;;  %6210 = vtanh.f32 %v2546_v53  ;;  %v9613_v20 = vadd.f32 %v2456_v5, %v2402_v0 }
 0x2d2   :  { %v2563_v25 = vmul.f32 0.5, %v9600_v24  ;;  %v9615_v21 = vadd.f32 %v2457_v45, %v2403_v39  ;;  %6212 = vtanh.f32 %v2547_v15  ;;  %vm4431_vm4 = vcmask 1041408  }
 0x2d3   :  { %v6201_v48 = vpop.eup %6200  ;;  %v2564_v44 = vmul.f32 0.5, %v9613_v20  ;;  %6018 = vmatmul.mubr.msk.bf16.gmra.mrb[164].mxu1 %vm2843_vm3, %v9622_v51 }
 0x2d4   :  { %v6203_v52 = vpop.eup %6202  ;;  %6214 = vtanh.f32 %v2563_v25  ;;  %v2565_v30 = vmul.f32 0.5, %v9615_v21  ;;  %3390 = vmatprep.mubr.bf16.mxu1 %v12416_v10  ;;  %v2670_v23 = vmul.f32 0.5, %v6201_v48 }
 0x2d5   :  { %v2635_v1 = vmul.f32 0.5, %v6203_v52  ;;  %6216 = vtanh.f32 %v2564_v44 }
 0x2d6   :  { %v6205_v50 = vpop.eup %6204  ;;  %6218 = vtanh.f32 %v2565_v30  ;;  %v2724_v45 = vadd.f32 0.5, %v2670_v23  ;;  %v12493_v23 = vld [vmem:[#allocation2_spill] sm:$0xff] }
 0x2d7   :  { %v2689_v57 = vadd.f32 0.5, %v2635_v1  ;;  %v2653_v2 = vmul.f32 0.5, %v6205_v50  ;;  %6024 = vmatmul.mubr.msk.bf16.gmra.mrb[168].mxu0 %vm2843_vm3, %v9622_v51  ;;  %v12492_v1 = vld [vmem:[#allocation3_spill] sm:$0xff] }
 0x2d8   :  { %v6207_v3 = vpop.eup %6206  ;;  %3473 = vmatprep.mubr.bf16.mxu0 %v12416_v10  ;;  %v2778_v14 = vmul.f32 %v2724_v45, %v9507_v62 }
 0x2d9   :  { %v6209_v5 = vpop.eup %6208  ;;  %v2707_v22 = vadd.f32 0.5, %v2653_v2  ;;  %v2636_v16 = vmul.f32 0.5, %v6207_v3  ;;  %v2743_v29 = vmul.f32 %v2689_v57, %v9529_v63  ;;  %v9639_v56 = vpop.permute.xlu1 %3731  ;;  %v12495_v3 = vld [vmem:[#allocation24_spill] sm:$0xff] }
 0x2da   :  { %v2637_v6 = vmul.f32 0.5, %v6209_v5  ;;  %12481 = vst [vmem:[#allocation36_spill] sm:$0xff] %v9639_v56  ;;  %v2814_v15 = vpack.c.bf16 %v2778_v14, %v2778_v14  ;;  %v12502_v14 = vlaneseq }
 0x2db   :  { %v2761_v4 = vmul.f32 %v2707_v22, %v9543_v34  ;;  %v6211_v41 = vpop.eup %6210  ;;  %6019 = vmatmul.mubr.msk.bf16.gmra.mrb[168].mxu1 %vm2843_vm3, %v9635_v11  ;;  %v2690_v32 = vadd.f32 0.5, %v2636_v16  ;;  %v9642_v46 = vpop.permute.xlu0 %3736  ;;  %v12496_v22 = vld [vmem:[#allocation5_spill] sm:$0xff] }
 0x2dc   :  { %v6213_v28 = vpop.eup %6212  ;;  %v2654_v43 = vmul.f32 0.5, %v6211_v41  ;;  %3400 = vmatprep.mubr.bf16.mxu1 %v12416_v10  ;;  %v2691_v60 = vadd.f32 0.5, %v2637_v6  ;;  %12482 = vst [vmem:[#allocation67_spill] sm:$0xff] %v9642_v46  ;;  %v2902_v39 = vsel %vm135_vm0, %v2814_v15, 0  ;;  %v12497_v6 = vld [vmem:[#allocation4_spill] sm:$0xff]  ;;  %v12499_v41 = vld [vmem:[#allocation26_spill] sm:$0xff] }
 0x2dd   :  { %v2797_v47 = vpack.c.bf16 %v2761_v4, %v2743_v29  ;;  %v2655_v34 = vmul.f32 0.5, %v6213_v28  ;;  %v9647_v36 = vpop.permute.xlu1 %3741  ;;  %v2744_v19 = vmul.f32 %v2690_v32, %v9556_v55  ;;  %v9660_v55 = vld [vmem:[%s12041_s1 + $0x50] sm:$0xff]   ;;  %v12500_v32 = vld [vmem:[#allocation23_spill] sm:$0xff] }
 0x2de   :  { %v6215_v63 = vpop.eup %6214  ;;  %v2708_v59 = vadd.f32 0.5, %v2654_v43  ;;  %12483 = vst [vmem:[#allocation68_spill] sm:$0xff] %v9647_v36  ;;  %v2745_v49 = vmul.f32 %v2691_v60, %v9558_v38  ;;  %v12501_v60 = vld [vmem:[#allocation11_spill] sm:$0xff] }
 0x2df   :  { %v2671_v26 = vmul.f32 0.5, %v6215_v63  ;;  %6025 = vmatmul.mubr.msk.bf16.gmra.mrb[172].mxu0 %vm2843_vm3, %v9635_v11  ;;  %3494 = vmatprep.subr.bf16.mxu1 %v2797_v47  ;;  %v6217_v18 = vpop.eup %6216  ;;  %v2709_v40 = vadd.f32 0.5, %v2655_v34  ;;  %v9654_v42 = vpop.permute.xlu0 %3662 }
 0x2e0   :  { %3495 = vmatpush1.bf16.msra.mxu1 %v2796_v13  ;;  %3483 = vmatprep.mubr.bf16.mxu0 %v12416_v10  ;;  %v6219_v7 = vpop.eup %6218  ;;  %v2762_v27 = vmul.f32 %v2708_v59, %v9582_v61  ;;  %v2672_v62 = vmul.f32 0.5, %v6217_v18  ;;  %12484 = vst [vmem:[#allocation51_spill] sm:$0xff] %v9654_v42  ;;  %v4666_v59 = vshrl.u32 %v12502_v14, 7 }
 0x2e1   :  { %v2725_v37 = vadd.f32 0.5, %v2671_v26  ;;  %v2763_v35 = vmul.f32 %v2709_v40, %v9584_v9  ;;  %v2673_v17 = vmul.f32 0.5, %v6219_v7  ;;  %v9664_v38 = vpop.permute.xlu1 %3667  ;;  %v12503_v26 = vld [vmem:[#allocation10_spill] sm:$0xff]  ;;  %v12504_v40 = vld [vmem:[#allocation25_spill] sm:$0xff] }
 0x2e2   :  { %v2726_v12 = vadd.f32 0.5, %v2672_v62  ;;  %v2798_v53 = vpack.c.bf16 %v2762_v27, %v2744_v19  ;;  %12485 = vst [vmem:[#allocation90_spill] sm:$0xff] %v9664_v38 }
 0x2e3   :  { %v2779_v58 = vmul.f32 %v2725_v37, %v9600_v24  ;;  %v2727_v33 = vadd.f32 0.5, %v2673_v17  ;;  %v2799_v31 = vpack.c.bf16 %v2763_v35, %v2745_v49  ;;  %6020 = vmatmul.mubr.msk.bf16.gmra.mrb[172].mxu1 %vm2843_vm3, %v9660_v55  ;;  %v9669_v0 = vpop.permute.xlu0 %4286  ;;  %v12505_v37 = vld [vmem:[#allocation32_spill] sm:$0xff]  ;;  %v12506_v17 = vld [vmem:[#allocation31_spill] sm:$0xff] }
 0x2e4   :  { %v2780_v9 = vmul.f32 %v2726_v12, %v9613_v20  ;;  %3526 = vmatprep.mubr.bf16.mxu1 %v12416_v10  ;;  %12486 = vst [vmem:[#allocation16_spill] sm:$0xff] %v9669_v0 }
 0x2e5   :  { %v2815_v61 = vpack.c.bf16 %v2779_v58, %v2779_v58  ;;  %v2781_v24 = vmul.f32 %v2727_v33, %v9615_v21  ;;  %3577 = vmatprep.subr.bf16.mxu0 %v2799_v31  ;;  %v9675_v48 = vpop.permute.xlu1 %4291  ;;  %v12508_v33 = vld [vmem:[#allocation6_spill] sm:$0xff] }
 0x2e6   :  { %3578 = vmatpush1.bf16.msra.mxu0 %v2798_v53  ;;  %v2816_v13 = vpack.c.bf16 %v2780_v9, %v2780_v9  ;;  %12487 = vst [vmem:[#allocation98_spill] sm:$0xff] %v9675_v48  ;;  %v12507_v53 = vld [vmem:[#allocation7_spill] sm:$0xff] }
 0x2e7   :  { %6027 = vmatprep.subr.msk.bf16.mxu1 %vm135_vm0, %v2815_v61  ;;  %v2817_v25 = vpack.c.bf16 %v2781_v24, %v2781_v24  ;;  %6026 = vmatmul.mubr.msk.bf16.gmra.mrb[176].mxu0 %vm2843_vm3, %v9660_v55  ;;  %v9680_v21 = vpop.permute.xlu0 %3672  ;;  %v12509_v61 = vld [vmem:[#allocation9_spill] sm:$0xff] }
 0x2e8   :  { %3497 = vmatpush1.bf16.msra.mxu1 %v2902_v39  ;;  %v2908_v20 = vsel %vm135_vm0, %v2816_v13, 0  ;;  %3609 = vmatprep.mubr.bf16.mxu0 %v12416_v10  ;;  %12488 = vst [vmem:[#allocation116_spill] sm:$0xff] %v9680_v21  ;;  %v12510_v24 = vld [vmem:[#allocation53_spill] sm:$0xff] }
 0x2e9   :  { %6033 = vmatprep.subr.msk.bf16.mxu0 %vm135_vm0, %v2817_v25  ;;  %v9684_v52 = vpop.permute.xlu1 %4296  ;;  %v12511_v25 = vld [vmem:[#allocation8_spill] sm:$0xff] }
 0x2ea   :  { %3580 = vmatpush1.bf16.msra.mxu0 %v2908_v20  ;;  %12489 = vst [vmem:[#allocation64_spill] sm:$0xff] %v9684_v52 }
 0x2eb   :  { %6028 = vmatmul.mubr.msk.bf16.vlgmr.msra.gmra.mrb[176].mxu1 %vm2843_vm3, %v9515_v54  ;;  %v9687_v44 = vpop.permute.xlu0 %4355 }
 0x2ec   :  { %3536 = vmatprep.mubr.bf16.mxu1 %v12416_v10  ;;  %12490 = vst [vmem:[#allocation69_spill] sm:$0xff] %v9687_v44 }
 0x2ed   :  { %v9691_v30 = vpop.permute.xlu1 %1299 }
 0x2ee   :  { %12491 = vst [vmem:[#allocation65_spill] sm:$0xff] %v9691_v30  ;;  %v9696_v50 = vadd.f32 %v9691_v30, %v12492_v1  ;;  %v9700_v57 = vadd.f32 %v9691_v30, %v12493_v23  ;;  %v9706_v5 = vadd.f32 %v9691_v30, %v12495_v3  ;;  %v9728_v43 = vadd.f32 %v9691_v30, %v12500_v32  ;;  %v12512_v1 = vld [vmem:[#allocation13_spill] sm:$0xff] }
 0x2ef   :  { %6034 = vmatmul.mubr.msk.bf16.vlgmr.msra.gmra.mrb[180].mxu0 %vm2843_vm3, %v9515_v54  ;;  %v9702_v2 = vpop.permute.xlu0 %1304  ;;  %v9764_v15 = vadd.f32 %v9691_v30, %v12507_v53  ;;  %v9777_v39 = vadd.f32 %v9691_v30, %v12510_v24 }
 0x2f0   :  { %3619 = vmatprep.mubr.bf16.mxu0 %v12416_v10  ;;  %12494 = vst [vmem:[#allocation70_spill] sm:$0xff] %v9702_v2  ;;  %v9710_v54 = vadd.f32 %v9702_v2, %v12496_v22  ;;  %v5062_v16 = vmul.f32 0.5, %v9696_v50  ;;  %v9715_v45 = vadd.f32 %v9702_v2, %v12497_v6  ;;  %v5061_v29 = vmul.f32 0.5, %v9700_v57  ;;  %v12513_v22 = vld [vmem:[#allocation12_spill] sm:$0xff]  ;;  %v12514_v6 = vld [vmem:[#allocation55_spill] sm:$0xff] }
 0x2f1   :  { %v9720_v4 = vpop.permute.xlu1 %1309  ;;  %v9724_v28 = vadd.f32 %v9702_v2, %v12499_v41  ;;  %v9744_v7 = vadd.f32 %v9702_v2, %v12504_v40  ;;  %v5066_v27 = vmul.f32 0.5, %v9706_v5  ;;  %v5065_v12 = vmul.f32 0.5, %v9728_v43 }
 0x2f2   :  { %12498 = vst [vmem:[#allocation114_spill] sm:$0xff] %v9720_v4  ;;  %v5080_v47 = vmul.f32 0.5, %v9710_v54  ;;  %6220 = vtanh.f32 %v5062_v16  ;;  %v5079_v63 = vmul.f32 0.5, %v9715_v45  ;;  %v9735_v34 = vadd.f32 %v9720_v4, %v12501_v60 }
 0x2f3   :  { %6029 = vmatmul.mubr.msk.bf16.gmra.mrb[180].mxu1 %vm2843_vm3, %v9571_v8  ;;  %6222 = vtanh.f32 %v5061_v29  ;;  %v9740_v18 = vadd.f32 %v9720_v4, %v12503_v26  ;;  %v9750_v62 = vadd.f32 %v9720_v4, %v12505_v37  ;;  %v5084_v35 = vmul.f32 0.5, %v9724_v28  ;;  %v12517_v26 = vld [vmem:[#allocation54_spill] sm:$0xff] }
 0x2f4   :  { %3546 = vmatprep.mubr.bf16.mxu1 %v12416_v10  ;;  %6224 = vtanh.f32 %v5080_v47  ;;  %v5098_v19 = vmul.f32 0.5, %v9735_v34  ;;  %v9758_v58 = vadd.f32 %v9720_v4, %v12506_v17  ;;  %v5083_v31 = vmul.f32 0.5, %v9744_v7  ;;  %v12516_v47 = vld [vmem:[#allocation52_spill] sm:$0xff] }
 0x2f5   :  { %6226 = vtanh.f32 %v5079_v63  ;;  %v5097_v49 = vmul.f32 0.5, %v9740_v18  ;;  %v9773_v9 = vadd.f32 %v9702_v2, %v12509_v61  ;;  %v5102_v13 = vmul.f32 0.5, %v9750_v62  ;;  %v12519_v61 = vld [vmem:[#allocation28_spill] sm:$0xff] }
 0x2f6   :  { %6228 = vtanh.f32 %v5098_v19  ;;  %v9782_v20 = vadd.f32 %v9702_v2, %v12511_v25  ;;  %v9786_v23 = vadd.f32 %v9720_v4, %v12512_v1  ;;  %v5101_v3 = vmul.f32 0.5, %v9758_v58 }
 0x2f7   :  { %6035 = vmatmul.mubr.msk.bf16.gmra.mrb[184].mxu0 %vm2843_vm3, %v9571_v8  ;;  %v9768_v8 = vadd.f32 %v9691_v30, %v12508_v33  ;;  %6230 = vtanh.f32 %v5097_v49  ;;  %v9793_v16 = vadd.f32 %v9720_v4, %v12513_v22  ;;  %v9797_v29 = vadd.f32 %v9702_v2, %v12514_v6  ;;  %v12521_v22 = vld [vmem:[#allocation60_spill] sm:$0xff] }
 0x2f8   :  { %3629 = vmatprep.mubr.bf16.mxu0 %v12416_v10  ;;  %6232 = vtanh.f32 %v5066_v27  ;;  %v9800_v41 = vsub.s32 0, %v4666_v59  ;;  %v5064_v32 = vmul.f32 0.5, %v9764_v15  ;;  %v9805_v63 = vadd.f32 %v9691_v30, %v12516_v47 }
 0x2f9   :  { %6234 = vtanh.f32 %v5084_v35  ;;  %v5082_v60 = vmul.f32 0.5, %v9773_v9  ;;  %v5063_v14 = vmul.f32 0.5, %v9768_v8  ;;  %v9811_v40 = vadd.f32 %v9702_v2, %v12517_v26 }
 0x2fa   :  { %12515 = vst [vmem:[#allocation122_spill] sm:$0xff] %v9800_v41  ;;  %6236 = vtanh.f32 %v5065_v12  ;;  %v5081_v59 = vmul.f32 0.5, %v9782_v20  ;;  %v5100_v27 = vmul.f32 0.5, %v9786_v23  ;;  %v5070_v37 = vmul.f32 0.5, %v9777_v39  ;;  %v12518_v12 = vld [vmem:[#allocation61_spill] sm:$0xff] }
 0x2fb   :  { %6030 = vmatmul.mubr.msk.bf16.gmra.mrb[184].mxu1 %vm2843_vm3, %v9622_v51  ;;  %6238 = vtanh.f32 %v5083_v31  ;;  %v5099_v35 = vmul.f32 0.5, %v9793_v16  ;;  %v5088_v17 = vmul.f32 0.5, %v9797_v29  ;;  %v9822_v53 = vadd.f32 %v9720_v4, %v12518_v12  ;;  %v12522_v12 = vld [vmem:[#allocation27_spill] sm:$0xff] }
 0x2fc   :  { %3556 = vmatprep.mubr.bf16.mxu1 %v12416_v10  ;;  %v6221_v19 = vpop.eup %6220  ;;  %6240 = vtanh.f32 %v5102_v13  ;;  %v5069_v31 = vmul.f32 0.5, %v9805_v63  ;;  %v9828_v24 = vadd.f32 %v9691_v30, %v12519_v61  ;;  %v9837_v6 = vadd.f32 %v9720_v4, %v12521_v22 }
 0x2fd   :  { %v6223_v49 = vpop.eup %6222  ;;  %6242 = vtanh.f32 %v5101_v3  ;;  %v5170_v1 = vmul.f32 0.5, %v6221_v19  ;;  %v5087_v3 = vmul.f32 0.5, %v9811_v40  ;;  %v9841_v61 = vadd.f32 %v9691_v30, %v12522_v12 }
 0x2fe   :  { %v6225_v33 = vpop.eup %6224  ;;  %6244 = vtanh.f32 %v5064_v32  ;;  %v5169_v26 = vmul.f32 0.5, %v6223_v49  ;;  %v5105_v48 = vmul.f32 0.5, %v9837_v6 }
 0x2ff   :  { %6036 = vmatmul.mubr.msk.bf16.gmra.mrb[188].mxu0 %vm2843_vm3, %v9622_v51  ;;  %v12520_v51 = vld [vmem:[#allocation30_spill] sm:$0xff]  ;;  %v6227_v25 = vpop.eup %6226  ;;  %6246 = vtanh.f32 %v5082_v60  ;;  %v5188_v47 = vmul.f32 0.5, %v6225_v33  ;;  %v5224_v12 = vadd.f32 0.5, %v5170_v1  ;;  %v12523_v1 = vld [vmem:[#allocation29_spill] sm:$0xff] }
 0x300   :  { %3639 = vmatprep.mubr.bf16.mxu0 %v12416_v10  ;;  %v9832_v13 = vadd.f32 %v9702_v2, %v12520_v51  ;;  %v6229_v32 = vpop.eup %6228  ;;  %6248 = vtanh.f32 %v5063_v14  ;;  %v5187_v19 = vmul.f32 0.5, %v6227_v25  ;;  %v5106_v51 = vmul.f32 0.5, %v9822_v53 }
 0x301   :  { %v6231_v41 = vpop.eup %6230  ;;  %v5206_v60 = vmul.f32 0.5, %v6229_v32  ;;  %6250 = vtanh.f32 %v5081_v59  ;;  %v5068_v14 = vmul.f32 0.5, %v9828_v24  ;;  %v5242_v32 = vadd.f32 0.5, %v5188_v47 }
 0x302   :  { %v6233_v44 = vpop.eup %6232  ;;  %v5205_v22 = vmul.f32 0.5, %v6231_v41  ;;  %6252 = vtanh.f32 %v5100_v27  ;;  %v5086_v49 = vmul.f32 0.5, %v9832_v13  ;;  %v5223_v59 = vadd.f32 0.5, %v5169_v26 }
 0x303   :  { %6031 = vmatmul.mubr.msk.bf16.gmra.mrb[188].mxu1 %vm2843_vm3, %v9635_v11  ;;  %v6235_v33 = vpop.eup %6234  ;;  %v5174_v52 = vmul.f32 0.5, %v6233_v44  ;;  %6254 = vtanh.f32 %v5099_v35  ;;  %v5241_v41 = vadd.f32 0.5, %v5187_v19  ;;  %v5260_v27 = vadd.f32 0.5, %v5206_v60 }
 0x304   :  { %3566 = vmatprep.mubr.bf16.mxu1 %v12416_v10  ;;  %v6237_v25 = vpop.eup %6236  ;;  %v5192_v0 = vmul.f32 0.5, %v6235_v33  ;;  %6256 = vtanh.f32 %v5070_v37  ;;  %v5259_v44 = vadd.f32 0.5, %v5205_v22  ;;  %v9855_v47 = vadd.f32 %v9702_v2, %v12523_v1 }
 0x305   :  { %v6239_v36 = vpop.eup %6238  ;;  %v5173_v46 = vmul.f32 0.5, %v6237_v25  ;;  %6258 = vtanh.f32 %v5088_v17  ;;  %v9858_v37 = vmul.f32 %v5224_v12, %v9696_v50  ;;  %v5228_v33 = vadd.f32 0.5, %v5174_v52 }
 0x306   :  { %v6241_v21 = vpop.eup %6240  ;;  %v5191_v35 = vmul.f32 0.5, %v6239_v36  ;;  %6260 = vtanh.f32 %v5069_v31  ;;  %v9862_v17 = vmul.f32 %v5242_v32, %v9710_v54  ;;  %v9865_v60 = vmul.f32 %v5223_v59, %v9700_v57 }
 0x307   :  { %6037 = vmatmul.mubr.msk.bf16.gmra.mrb[192].mxu0 %vm2843_vm3, %v9635_v11  ;;  %v6243_v26 = vpop.eup %6242  ;;  %12524 = vst [vmem:[#allocation117_spill] sm:$0xff] %v9858_v37  ;;  %6262 = vtanh.f32 %v5087_v3  ;;  %v5067_v11 = vmul.f32 0.5, %v9841_v61  ;;  %v5246_v36 = vadd.f32 0.5, %v5192_v0  ;;  %v9870_v50 = vmul.f32 %v5241_v41, %v9715_v45 }
 0x308   :  { %3649 = vmatprep.mubr.bf16.mxu0 %v12416_v10  ;;  %v6245_v19 = vpop.eup %6244  ;;  %12525 = vst [vmem:[#allocation124_spill] sm:$0xff] %v9862_v17  ;;  %12526 = vst [vmem:[#allocation14_spill] sm:$0xff] %v9865_v60  ;;  %6264 = vtanh.f32 %v5106_v51  ;;  %v9873_v52 = vmul.f32 %v5260_v27, %v9735_v34  ;;  %v5227_v3 = vadd.f32 0.5, %v5173_v46  ;;  %v9876_v54 = vmul.f32 %v5259_v44, %v9740_v18 }
 0x309   :  { %v6247_v31 = vpop.eup %6246  ;;  %12527 = vst [vmem:[#allocation17_spill] sm:$0xff] %v9870_v50  ;;  %6266 = vtanh.f32 %v5068_v14  ;;  %v5245_v0 = vadd.f32 0.5, %v5191_v35  ;;  %v5210_v57 = vmul.f32 0.5, %v6241_v21  ;;  %v9880_v12 = vmul.f32 %v5228_v33, %v9706_v5 }
 0x30a   :  { %12528 = vst [vmem:[#allocation18_spill] sm:$0xff] %v9873_v52  ;;  %v6249_v22 = vpop.eup %6248  ;;  %12529 = vst [vmem:[#allocation15_spill] sm:$0xff] %v9876_v54  ;;  %6268 = vtanh.f32 %v5086_v49  ;;  %v5209_v45 = vmul.f32 0.5, %v6243_v26  ;;  %v5172_v25 = vmul.f32 0.5, %v6245_v19  ;;  %v9883_v46 = vmul.f32 %v5246_v36, %v9724_v28 }
 0x30b   :  { %6032 = vmatmul.mubr.msk.bf16.gmra.mrb[192].mxu1 %vm2843_vm3, %v9660_v55  ;;  %v6251_v51 = vpop.eup %6250  ;;  %12530 = vst [vmem:[#allocation19_spill] sm:$0xff] %v9880_v12  ;;  %6270 = vtanh.f32 %v5105_v48  ;;  %v5190_v14 = vmul.f32 0.5, %v6247_v31  ;;  %v5171_v32 = vmul.f32 0.5, %v6249_v22  ;;  %v5085_v18 = vmul.f32 0.5, %v9855_v47  ;;  %v12535_v31 = vld [vmem:[#allocation33_spill] sm:$0xff] }
 0x30c   :  { %5525 = vmatprep.mubr.bf16.mxu1 %v12416_v10  ;;  %v6253_v34 = vpop.eup %6252  ;;  %12531 = vst [vmem:[#allocation94_spill] sm:$0xff] %v9883_v46  ;;  %v9889_v21 = vmul.f32 %v5227_v3, %v9728_v43  ;;  %v5189_v5 = vmul.f32 0.5, %v6251_v51  ;;  %6272 = vtanh.f32 %v5067_v11  ;;  %v9892_v48 = vmul.f32 %v5245_v0, %v9744_v7 }
 0x30d   :  { %v6255_v59 = vpop.eup %6254  ;;  %v5208_v49 = vmul.f32 0.5, %v6253_v34  ;;  %v5264_v28 = vadd.f32 0.5, %v5210_v57  ;;  %6274 = vtanh.f32 %v5085_v18  ;;  %v5263_v35 = vadd.f32 0.5, %v5209_v45 }
 0x30e   :  { %12532 = vst [vmem:[#allocation20_spill] sm:$0xff] %v9889_v21  ;;  %v6257_v41 = vpop.eup %6256  ;;  %12533 = vst [vmem:[#allocation99_spill] sm:$0xff] %v9892_v48  ;;  %v5207_v27 = vmul.f32 0.5, %v6255_v59  ;;  %v5226_v1 = vadd.f32 0.5, %v5172_v25  ;;  %v5244_v19 = vadd.f32 0.5, %v5190_v14  ;;  %v5225_v11 = vadd.f32 0.5, %v5171_v32 }
 0x30f   :  { %6038 = vmatmul.mubr.msk.bf16.gmra.mrb[196].mxu0 %vm2843_vm3, %v9660_v55  ;;  %v6259_v44 = vpop.eup %6258  ;;  %v5178_v26 = vmul.f32 0.5, %v6257_v41  ;;  %v12534_v55 = vld [vmem:[#allocation34_spill] sm:$0xff]  ;;  %v9901_v7 = vadd.f32 %v9720_v4, %v12535_v31  ;;  %v5243_v22 = vadd.f32 0.5, %v5189_v5  ;;  %v5262_v0 = vadd.f32 0.5, %v5208_v49  ;;  %v12548_v31 = vld [vmem:[#allocation56_spill] sm:$0xff] }
 0x310   :  { %5568 = vmatprep.mubr.bf16.mxu0 %v12416_v10  ;;  %v9897_v43 = vadd.f32 %v9720_v4, %v12534_v55  ;;  %v6261_v33 = vpop.eup %6260  ;;  %v5196_v36 = vmul.f32 0.5, %v6259_v44  ;;  %v9905_v25 = vmul.f32 %v5264_v28, %v9750_v62  ;;  %v5261_v34 = vadd.f32 0.5, %v5207_v27 }
 0x311   :  { %v6263_v3 = vpop.eup %6262  ;;  %v5177_v57 = vmul.f32 0.5, %v6261_v33  ;;  %v5232_v18 = vadd.f32 0.5, %v5178_v26  ;;  %v5103_v14 = vmul.f32 0.5, %v9901_v7  ;;  %v9909_v59 = vmul.f32 %v5263_v35, %v9758_v58  ;;  %v12543_v35 = vld [vmem:[#allocation57_spill] sm:$0xff]  ;;  %v12546_v33 = vld [vmem:[#allocation59_spill] sm:$0xff] }
 0x312   :  { %v5104_v51 = vmul.f32 0.5, %v9897_v43  ;;  %v6265_v45 = vpop.eup %6264  ;;  %12536 = vst [vmem:[#allocation95_spill] sm:$0xff] %v9905_v25  ;;  %v9912_v41 = vmul.f32 %v5226_v1, %v9764_v15  ;;  %v5250_v5 = vadd.f32 0.5, %v5196_v36  ;;  %v9915_v44 = vmul.f32 %v5244_v19, %v9773_v9 }
 0x313   :  { %v6267_v32 = vpop.eup %6266  ;;  %12537 = vst [vmem:[#allocation97_spill] sm:$0xff] %v9909_v59  ;;  %v9918_v62 = vmul.f32 %v5225_v11, %v9768_v8  ;;  %v5195_v28 = vmul.f32 0.5, %v6263_v3  ;;  %v9921_v26 = vmul.f32 %v5243_v22, %v9782_v20  ;;  %v9924_v58 = vmul.f32 %v5262_v0, %v9786_v23 }
 0x314   :  { %12538 = vst [vmem:[#allocation105_spill] sm:$0xff] %v9912_v41  ;;  %6276 = vtanh.f32 %v5104_v51  ;;  %v6269_v49 = vpop.eup %6268  ;;  %12539 = vst [vmem:[#allocation21_spill] sm:$0xff] %v9915_v44  ;;  %v5231_v15 = vadd.f32 0.5, %v5177_v57  ;;  %v9928_v1 = vadd.f32 %v9691_v30, %v12543_v35  ;;  %v9931_v9 = vmul.f32 %v5261_v34, %v9793_v16 }
 0x315   :  { %12540 = vst [vmem:[#allocation96_spill] sm:$0xff] %v9918_v62  ;;  %6278 = vtanh.f32 %v5103_v14  ;;  %v6271_v27 = vpop.eup %6270  ;;  %12541 = vst [vmem:[#allocation22_spill] sm:$0xff] %v9921_v26  ;;  %v9934_v8 = vmul.f32 %v5232_v18, %v9777_v39  ;;  %v5214_v55 = vmul.f32 0.5, %v6265_v45  ;;  %v9938_v19 = vadd.f32 %v9702_v2, %v12546_v33 }
 0x316   :  { %12542 = vst [vmem:[#allocation37_spill] sm:$0xff] %v9924_v58  ;;  %12544 = vst [vmem:[#allocation38_spill] sm:$0xff] %v9931_v9  ;;  %v6273_v20 = vpop.eup %6272  ;;  %v9941_v23 = vmul.f32 %v5250_v5, %v9797_v29  ;;  %v5176_v11 = vmul.f32 0.5, %v6267_v32  ;;  %v5072_v36 = vmul.f32 0.5, %v9928_v1  ;;  %v9946_v3 = vadd.f32 %v9691_v30, %v12548_v31  ;;  %v12550_v29 = vld [vmem:[#allocation58_spill] sm:$0xff] }
 0x317   :  { %12545 = vst [vmem:[#allocation39_spill] sm:$0xff] %v9934_v8  ;;  %v6275_v16 = vpop.eup %6274  ;;  %v5249_v22 = vadd.f32 0.5, %v5195_v28  ;;  %v5194_v39 = vmul.f32 0.5, %v6269_v49  ;;  %v5213_v0 = vmul.f32 0.5, %v6271_v27  ;;  %v5090_v57 = vmul.f32 0.5, %v9938_v19  ;;  %v12551_v28 = vld [vmem:[#allocation63_spill] sm:$0xff] }
 0x318   :  { %12547 = vst [vmem:[#allocation40_spill] sm:$0xff] %v9941_v23  ;;  %v9950_v51 = vmul.f32 %v5231_v15, %v9805_v63  ;;  %v5175_v45 = vmul.f32 0.5, %v6273_v20  ;;  %6280 = vtanh.f32 %v5072_v36  ;;  %v9954_v34 = vadd.f32 %v9702_v2, %v12550_v29  ;;  %v12552_v63 = vld [vmem:[#allocation101_spill] sm:$0xff] }
 0x319   :  { %v5268_v18 = vadd.f32 0.5, %v5214_v55  ;;  %v5193_v14 = vmul.f32 0.5, %v6275_v16  ;;  %6282 = vtanh.f32 %v5090_v57  ;;  %v5071_v32 = vmul.f32 0.5, %v9946_v3  ;;  %v12553_v55 = vld [vmem:[#allocation104_spill] sm:$0xff] }
 0x31a   :  { %12549 = vst [vmem:[#allocation45_spill] sm:$0xff] %v9950_v51  ;;  %v5230_v5 = vadd.f32 0.5, %v5176_v11  ;;  %v5089_v49 = vmul.f32 0.5, %v9954_v34  ;;  %v9960_v27 = vadd.f32 %v9720_v4, %v12551_v28  ;;  %v9964_v15 = vadd.f32 %v9691_v30, %v12552_v63 }
 0x31b   :  { %v5248_v33 = vadd.f32 0.5, %v5194_v39  ;;  %v5267_v20 = vadd.f32 0.5, %v5213_v0  ;;  %6284 = vtanh.f32 %v5071_v32  ;;  %v9968_v36 = vadd.f32 %v9702_v2, %v12553_v55  ;;  %v12555_v0 = vld [vmem:[#allocation100_spill] sm:$0xff] }
 0x31c   :  { %v2947_v35 = vpop.f32.mrb[96].mxu1  ;;  %v9971_v16 = vmul.f32 %v5249_v22, %v9811_v40  ;;  %v5229_v57 = vadd.f32 0.5, %v5175_v45  ;;  %6286 = vtanh.f32 %v5089_v49  ;;  %v5108_v29 = vmul.f32 0.5, %v9960_v27  ;;  %v12556_v22 = vld [vmem:[#allocation103_spill] sm:$0xff] }
 0x31d   :  { %v2949_v11 = vpop.f32.mrb[97].mxu1  ;;  %v5247_v51 = vadd.f32 0.5, %v5193_v14  ;;  %v5074_v39 = vmul.f32 0.5, %v9964_v15  ;;  %v9977_v32 = vadd.f32 %v9691_v30, %v12555_v0  ;;  %v5092_v40 = vmul.f32 0.5, %v9968_v36 }
 0x31e   :  { %v6277_v31 = vpop.eup %6276  ;;  %12554 = vst [vmem:[#allocation41_spill] sm:$0xff] %v9971_v16  ;;  %v2951_v63 = vpop.f32.mrb[98].mxu1  ;;  %6288 = vtanh.f32 %v5108_v29  ;;  %v9982_v45 = vadd.f32 %v9702_v2, %v12556_v22  ;;  %v9985_v49 = vmul.f32 %v5268_v18, %v9822_v53  ;;  %v9988_v14 = vmul.f32 %v5230_v5, %v9828_v24  ;;  %v12562_v16 = vld [vmem:[#allocation62_spill] sm:$0xff] }
 0x31f   :  { %v6279_v28 = vpop.eup %6278  ;;  %v5212_v23 = vmul.f32 0.5, %v6277_v31  ;;  %v2953_v55 = vpop.f32.mrb[99].mxu1  ;;  %v9991_v31 = vmul.f32 %v5248_v33, %v9832_v13  ;;  %v9994_v0 = vmul.f32 %v5267_v20, %v9837_v6  ;;  %v9997_v29 = vmul.f32 %v5229_v57, %v9841_v61  ;;  %v12563_v13 = vld [vmem:[#allocation113_spill] sm:$0xff]  ;;  %v12565_v33 = vld [vmem:[#allocation112_spill] sm:$0xff] }
 0x320   :  { %v5211_v8 = vmul.f32 0.5, %v6279_v28  ;;  %12557 = vst [vmem:[#allocation42_spill] sm:$0xff] %v9985_v49  ;;  %12558 = vst [vmem:[#allocation43_spill] sm:$0xff] %v9988_v14  ;;  %6290 = vtanh.f32 %v5074_v39  ;;  %v10001_v22 = vadd.f32 %v9720_v4, %v12562_v16  ;;  %v10004_v53 = vadd.f32 %v9654_v42, %v2947_v35 }
 0x321   :  { %12559 = vst [vmem:[#allocation46_spill] sm:$0xff] %v9991_v31  ;;  %12560 = vst [vmem:[#allocation71_spill] sm:$0xff] %v9994_v0  ;;  %v5266_v28 = vadd.f32 0.5, %v5212_v23  ;;  %v5073_v18 = vmul.f32 0.5, %v9977_v32  ;;  %v10009_v5 = vadd.f32 %v9720_v4, %v12563_v13  ;;  %v10012_v61 = vmul.f32 %v5247_v51, %v9855_v47  ;;  %v12566_v13 = vld [vmem:[#allocation107_spill] sm:$0xff] }
 0x322   :  { %12561 = vst [vmem:[#allocation72_spill] sm:$0xff] %v9997_v29  ;;  %v5265_v24 = vadd.f32 0.5, %v5211_v8  ;;  %v6281_v6 = vpop.eup %6280  ;;  %6292 = vtanh.f32 %v5092_v40  ;;  %v5091_v23 = vmul.f32 0.5, %v9982_v45  ;;  %v10017_v20 = vadd.f32 %v9720_v4, %v12565_v33 }
 0x323   :  { %12564 = vst [vmem:[#allocation102_spill] sm:$0xff] %v10012_v61  ;;  %v6283_v35 = vpop.eup %6282  ;;  %v10020_v8 = vadd.f32 %v9654_v42, %v2949_v11  ;;  %v10023_v16 = vadd.f32 %v9664_v38, %v2951_v63  ;;  %v5180_v39 = vmul.f32 0.5, %v6281_v6  ;;  %v10027_v47 = vadd.f32 %v9691_v30, %v12566_v13  ;;  %v12570_v13 = vld [vmem:[#allocation111_spill] sm:$0xff] }
 0x324   :  { %v2957_v57 = vpop.f32.mrb[100].mxu1  ;;  %v10030_v51 = vadd.f32 %v9664_v38, %v2953_v55  ;;  %v10033_v33 = vmul.f32 %v5266_v28, %v9897_v43  ;;  %v5198_v4 = vmul.f32 0.5, %v6283_v35  ;;  %v5107_v11 = vmul.f32 0.5, %v10001_v22 }
 0x325   :  { %12567 = vst [vmem:[#allocation119_spill] sm:$0xff] %v10027_v47  ;;  %v2959_v40 = vpop.f32.mrb[101].mxu1  ;;  %v6285_v61 = vpop.eup %6284  ;;  %v10037_v63 = vmul.f32 %v5265_v24, %v9901_v7  ;;  %6294 = vtanh.f32 %v5073_v18  ;;  %v5110_v6 = vmul.f32 0.5, %v10009_v5  ;;  %v10042_v30 = vadd.f32 %v9702_v2, %v12570_v13 }
 0x326   :  { %12568 = vst [vmem:[#allocation120_spill] sm:$0xff] %v10033_v33  ;;  %v2961_v29 = vpop.f32.mrb[102].mxu1  ;;  %v6287_v55 = vpop.eup %6286  ;;  %v5234_v28 = vadd.f32 0.5, %v5180_v39  ;;  %6296 = vtanh.f32 %v5091_v23  ;;  %v5109_v35 = vmul.f32 0.5, %v10017_v20  ;;  %v12572_v33 = vld [vmem:[#allocation116_spill] sm:$0xff]  ;;  %v5252_v24 = vadd.f32 0.5, %v5198_v4 }
 0x327   :  { %12569 = vst [vmem:[#allocation127_spill] sm:$0xff] %v10037_v63  ;;  %12571 = vst [vmem:[#allocation126_spill] sm:$0xff] %v10042_v30  ;;  %v10045_v0 = vadd.f32 %v9639_v56, %v2961_v29  ;;  %v2963_v43 = vpop.f32.mrb[103].mxu1  ;;  %v10049_v31 = vadd.f32 %v12572_v33, %v2957_v57  ;;  %v5076_v18 = vmul.f32 0.5, %v10027_v47  ;;  %v10056_v2 = vadd.f32 %v12572_v33, %v2959_v40 }
 0x328   :  { %v10052_v7 = vadd.f32 %v9639_v56, %v2963_v43  ;;  %v6289_v13 = vpop.eup %6288  ;;  %v5179_v63 = vmul.f32 0.5, %v6285_v61  ;;  %6298 = vtanh.f32 %v5107_v11  ;;  %v5197_v39 = vmul.f32 0.5, %v6287_v55 }
 0x329   :  { %v3852_v29 = vand.u32 2147483647, %v10045_v0  ;;  %6300 = vtanh.f32 %v5110_v6  ;;  %v5094_v57 = vmul.f32 0.5, %v10042_v30  ;;  %v10062_v4 = vmul.f32 %v5234_v28, %v9928_v1  ;;  %v12575_v30 = vld [vmem:[#allocation67_spill] sm:$0xff] }
 0x32a   :  { %v3853_v23 = vand.u32 2147483647, %v10052_v7  ;;  %v6291_v14 = vpop.eup %6290  ;;  %v5216_v47 = vmul.f32 0.5, %v6289_v13  ;;  %6302 = vtanh.f32 %v5109_v35  ;;  %v10066_v61 = vmul.f32 %v5252_v24, %v9938_v19  ;;  %v12576_v24 = vld [vmem:[#allocation68_spill] sm:$0xff] }
 0x32b   :  { %v3906_v43 = vsub.f32 0.0, %v3852_v29  ;;  %12573 = vst [vmem:[#allocation125_spill] sm:$0xff] %v10062_v4  ;;  %6304 = vtanh.f32 %v5076_v18  ;;  %v5233_v1 = vadd.f32 0.5, %v5179_v63  ;;  %v5182_v40 = vmul.f32 0.5, %v6291_v14 }
 0x32c   :  { %v3907_v49 = vsub.f32 0.0, %v3853_v23  ;;  %v2967_v9 = vpop.f32.mrb[104].mxu1  ;;  %12574 = vst [vmem:[#allocation129_spill] sm:$0xff] %v10066_v61  ;;  %v6293_v11 = vpop.eup %6292  ;;  %v5251_v23 = vadd.f32 0.5, %v5197_v39  ;;  %v5270_v6 = vadd.f32 0.5, %v5216_v47 }
 0x32d   :  { %v3960_v55 = vmul.f32 1.442695, %v3906_v43  ;;  %v10070_v58 = vadd.f32 %v12575_v30, %v2967_v9  ;;  %v2969_v29 = vpop.f32.mrb[105].mxu1  ;;  %v5200_v63 = vmul.f32 0.5, %v6293_v11  ;;  %v10085_v39 = vmul.f32 %v5233_v1, %v9946_v3 }
 0x32e   :  { %v3962_v28 = vmul.f32 1.442695, %v3907_v49  ;;  %v10073_v35 = vadd.f32 %v12575_v30, %v2969_v29  ;;  %v2971_v13 = vpop.f32.mrb[106].mxu1  ;;  %v10089_v47 = vmul.f32 %v5251_v23, %v9954_v34  ;;  %v10092_v11 = vmul.f32 %v5270_v6, %v9960_v27 }
 0x32f   :  { %6306 = vpow2.f32 %v3960_v55  ;;  %v3870_v19 = vand.u32 2147483647, %v10070_v58  ;;  %v10077_v18 = vadd.f32 %v12576_v24, %v2971_v13  ;;  %v2973_v43 = vpop.f32.mrb[107].mxu1  ;;  %v6295_v61 = vpop.eup %6294  ;;  %12577 = vst [vmem:[#allocation128_spill] sm:$0xff] %v10085_v39 }
 0x330   :  { %6308 = vpow2.f32 %v3962_v28  ;;  %v3871_v9 = vand.u32 2147483647, %v10073_v35  ;;  %v10081_v49 = vadd.f32 %v12576_v24, %v2973_v43  ;;  %v6297_v29 = vpop.eup %6296  ;;  %12578 = vst [vmem:[#allocation130_spill] sm:$0xff] %v10089_v47  ;;  %v5236_v28 = vadd.f32 0.5, %v5182_v40  ;;  %12579 = vst [vmem:[#allocation134_spill] sm:$0xff] %v10092_v11  ;;  %v12580_v40 = vld [vmem:[#allocation16_spill] sm:$0xff] }
 0x331   :  { %v3924_v4 = vsub.f32 0.0, %v3870_v19  ;;  %v3888_v14 = vand.u32 2147483647, %v10077_v18  ;;  %6310 = vtanh.f32 %v5094_v57  ;;  %v5181_v19 = vmul.f32 0.5, %v6295_v61 }
 0x332   :  { %v3925_v55 = vsub.f32 0.0, %v3871_v9  ;;  %v3889_v13 = vand.u32 2147483647, %v10081_v49  ;;  %v6299_v44 = vpop.eup %6298  ;;  %v5254_v9 = vadd.f32 0.5, %v5200_v63  ;;  %v5199_v62 = vmul.f32 0.5, %v6297_v29  ;;  %v12581_v63 = vld [vmem:[#allocation98_spill] sm:$0xff] }
 0x333   :  { %v3996_v41 = vmul.f32 1.442695, %v3924_v4  ;;  %v3942_v43 = vsub.f32 0.0, %v3888_v14  ;;  %v6301_v26 = vpop.eup %6300  ;;  %v5215_v34 = vmul.f32 0.5, %v6299_v44 }
 0x334   :  { %v3998_v3 = vmul.f32 1.442695, %v3925_v55  ;;  %v3943_v1 = vsub.f32 0.0, %v3889_v13  ;;  %v2977_v57 = vpop.f32.mrb[108].mxu1  ;;  %v6303_v39 = vpop.eup %6302 }
 0x335   :  { %6312 = vpow2.f32 %v3996_v41  ;;  %v4032_v23 = vmul.f32 1.442695, %v3942_v43  ;;  %v4299_v47 = vadd.f32 %v12580_v40, %v2977_v57  ;;  %v2979_v4 = vpop.f32.mrb[109].mxu1  ;;  %v6305_v14 = vpop.eup %6304  ;;  %v5217_v21 = vmul.f32 0.5, %v6303_v39 }
 0x336   :  { %6314 = vpow2.f32 %v3998_v3  ;;  %v4034_v27 = vmul.f32 1.442695, %v3943_v1  ;;  %v4300_v61 = vadd.f32 %v12580_v40, %v2979_v4  ;;  %v2981_v6 = vpop.f32.mrb[110].mxu1  ;;  %v5218_v1 = vmul.f32 0.5, %v6301_v26 }
 0x337   :  { %6316 = vpow2.f32 %v4032_v23  ;;  %v4376_v55 = vmul.f32 %v4299_v47, %v10004_v53  ;;  %v4317_v13 = vadd.f32 %v12581_v63, %v2981_v6  ;;  %v2983_v41 = vpop.f32.mrb[111].mxu1  ;;  %v10105_v47 = vmul.f32 %v5236_v28, %v9964_v15 }
 0x338   :  { %6318 = vpow2.f32 %v4034_v27  ;;  %v4377_v43 = vmul.f32 %v4300_v61, %v10020_v8  ;;  %v4318_v57 = vadd.f32 %v12581_v63, %v2983_v41  ;;  %v5235_v6 = vadd.f32 0.5, %v5181_v19 }
 0x339   :  { %v3113_v11 = vpop.f32.mrb[120].mxu0  ;;  %v6307_v59 = vpop.eup %6306  ;;  %v4394_v29 = vmul.f32 %v4317_v13, %v10023_v16  ;;  %12582 = vst [vmem:[#allocation142_spill] sm:$0xff] %v10105_v47  ;;  %v5253_v61 = vadd.f32 0.5, %v5199_v62  ;;  %v5269_v4 = vadd.f32 0.5, %v5215_v34  ;;  %v10110_v15 = vmul.f32 %v5254_v9, %v9968_v36 }
 0x33a   :  { %v3115_v3 = vpop.f32.mrb[121].mxu0  ;;  %v6309_v25 = vpop.eup %6308  ;;  %v4068_v48 = vadd.f32 1.0, %v6307_v59  ;;  %v4395_v44 = vmul.f32 %v4318_v57, %v10030_v51  ;;  %v5272_v28 = vadd.f32 0.5, %v5218_v1  ;;  %v12584_v59 = vld [vmem:[#allocation64_spill] sm:$0xff]  ;;  %v10114_v62 = vmul.f32 %v5235_v6, %v9977_v32 }
 0x33b   :  { %v3117_v23 = vpop.f32.mrb[122].mxu0  ;;  %v6311_v41 = vpop.eup %6310  ;;  %v4069_v46 = vadd.f32 1.0, %v6309_v25  ;;  %v4430_v12 = vadd.f32 %v4394_v29, %v4376_v55  ;;  %12583 = vst [vmem:[#allocation149_spill] sm:$0xff] %v10110_v15  ;;  %v5271_v39 = vadd.f32 0.5, %v5217_v21  ;;  %v10117_v25 = vadd.f32 %v9654_v42, %v3113_v11 }
 0x33c   :  { %v3119_v27 = vpop.f32.mrb[123].mxu0  ;;  %6320 = vlog2.f32 %v4068_v48  ;;  %v4440_v13 = vadd.f32 %v4395_v44, %v4377_v43  ;;  %v2987_v10 = vpop.f32.mrb[112].mxu1  ;;  %12585 = vst [vmem:[#allocation84_spill] sm:$0xff] %v10114_v62  ;;  %v10120_v34 = vadd.f32 %v9654_v42, %v3115_v3  ;;  %v10124_v36 = vmul.f32 %v5253_v61, %v9982_v45 }
 0x33d   :  { %6322 = vlog2.f32 %v4069_v46  ;;  %v4335_v19 = vadd.f32 %v12584_v59, %v2987_v10  ;;  %v2989_v57 = vpop.f32.mrb[113].mxu1  ;;  %v10127_v10 = vadd.f32 %v9664_v38, %v3117_v23  ;;  %v10130_v32 = vadd.f32 %v9664_v38, %v3119_v27 }
 0x33e   :  { %v4336_v48 = vadd.f32 %v12584_v59, %v2989_v57  ;;  %v2991_v55 = vpop.f32.mrb[114].mxu1  ;;  %12586 = vst [vmem:[#allocation132_spill] sm:$0xff] %v10124_v36  ;;  %v10134_v43 = vmul.f32 %v5269_v4, %v10001_v22  ;;  %v10138_v6 = vmul.f32 %v5272_v28, %v10009_v5  ;;  %v5184_v23 = vmul.f32 0.5, %v6305_v14 }
 0x33f   :  { %v6313_v46 = vpop.eup %6312  ;;  %v4412_v21 = vmul.f32 %v4335_v19, %v10049_v31  ;;  %v2993_v11 = vpop.f32.mrb[115].mxu1  ;;  %v10142_v19 = vmul.f32 %v5271_v39, %v10017_v20  ;;  %v10144_v26 = vmul.f32 0.5, %v6311_v41 }
 0x340   :  { %12587 = vst [vmem:[#allocation150_spill] sm:$0xff] %v10134_v43  ;;  %v6315_v3 = vpop.eup %6314  ;;  %v4086_v1 = vadd.f32 1.0, %v6313_v46  ;;  %v4413_v29 = vmul.f32 %v4336_v48, %v10056_v2  ;;  %12588 = vst [vmem:[#allocation151_spill] sm:$0xff] %v10138_v6 }
 0x341   :  { %v3123_v9 = vpop.f32.mrb[124].mxu0  ;;  %v6317_v44 = vpop.eup %6316  ;;  %v4087_v61 = vadd.f32 1.0, %v6315_v3  ;;  %v4432_v27 = vsel %vm4431_vm4, %v4412_v21, 0.0  ;;  %12589 = vst [vmem:[#allocation93_spill] sm:$0xff] %v10142_v19  ;;  %12590 = vst [vmem:[#allocation108_spill] sm:$0xff] %v10144_v26  ;;  %v12591_v3 = vld [vmem:[#allocation69_spill] sm:$0xff] }
 0x342   :  { %v3125_v45 = vpop.f32.mrb[125].mxu0  ;;  %v6319_v22 = vpop.eup %6318  ;;  %6324 = vlog2.f32 %v4086_v1  ;;  %v4104_v4 = vadd.f32 1.0, %v6317_v44  ;;  %v4433_v46 = vadd.f32 %v4432_v27, %v4430_v12  ;;  %v4441_v48 = vsel %vm4431_vm4, %v4413_v29, 0.0 }
 0x343   :  { %v3127_v57 = vpop.f32.mrb[126].mxu0  ;;  %6326 = vlog2.f32 %v4087_v61  ;;  %v4105_v5 = vadd.f32 1.0, %v6319_v22  ;;  %v4442_v14 = vadd.f32 %v4441_v48, %v4440_v13  ;;  %v10151_v20 = vadd.f32 %v12591_v3, %v2991_v55 }
 0x344   :  { %v3129_v43 = vpop.f32.mrb[127].mxu0  ;;  %v10148_v28 = vadd.f32 %v9639_v56, %v3127_v57  ;;  %6328 = vlog2.f32 %v4104_v4  ;;  %v4434_v21 = vrot.slane %v4433_v46, 4  ;;  %v3030_v39 = vpop.f32.mrb[116].mxu1  ;;  %v10157_v44 = vadd.f32 0.5, %v5184_v23 }
 0x345   :  { %v10154_v41 = vadd.f32 %v9639_v56, %v3129_v43  ;;  %6330 = vlog2.f32 %v4105_v5  ;;  %v4443_v12 = vrot.slane %v4442_v14, 4  ;;  %v3032_v29 = vpop.f32.mrb[117].mxu1  ;;  %v4359_v27 = vadd.f32 %v12591_v3, %v2993_v11 }
 0x346   :  { %v3856_v1 = vand.u32 2147483647, %v10148_v28  ;;  %12592 = vst [vmem:[#allocation123_spill] sm:$0xff] %v10157_v44  ;;  %v6321_v13 = vpop.eup %6320  ;;  %v4435_v61 = vadd.f32 %v4434_v21, %v4433_v46  ;;  %v10161_v57 = vadd.f32 %v12572_v33, %v3123_v9  ;;  %v10164_v22 = vpop.f32.mrb[118].mxu1  ;;  %v10167_v5 = vadd.f32 %v12572_v33, %v3125_v45 }
 0x347   :  { %v3857_v55 = vand.u32 2147483647, %v10154_v41  ;;  %v6323_v43 = vpop.eup %6322  ;;  %v4123_v4 = vmul.f32 0.6931472, %v6321_v13  ;;  %v4444_v48 = vadd.f32 %v4443_v12, %v4442_v14  ;;  %v10169_v23 = vpop.f32.mrb[119].mxu1  ;;  %v12593_v44 = vmax.f32 %v10045_v0, 0.0 }
 0x348   :  { %v3910_v19 = vsub.f32 0.0, %v3856_v1  ;;  %v4125_v46 = vmul.f32 0.6931472, %v6323_v43  ;;  %v4436_v21 = vrot.slane %v4435_v61, 2  ;;  %v12594_v45 = vmax.f32 %v10052_v7, 0.0 }
 0x349   :  { %v3133_v6 = vpop.f32.mrb[128].mxu0  ;;  %v3911_v9 = vsub.f32 0.0, %v3857_v55  ;;  %v4230_v47 = vadd.f32 %v4123_v4, %v12593_v44  ;;  %v4445_v26 = vrot.slane %v4444_v48, 2  ;;  %v10184_v0 = vadd.f32 %v9654_v42, %v3030_v39 }
 0x34a   :  { %v3135_v15 = vpop.f32.mrb[129].mxu0  ;;  %v3968_v36 = vmul.f32 1.442695, %v3910_v19  ;;  %v4231_v1 = vadd.f32 %v4125_v46, %v12594_v45  ;;  %v4437_v13 = vadd.f32 %v4436_v21, %v4435_v61  ;;  %v10178_v43 = vadd.f32 %v12575_v30, %v3133_v6 }
 0x34b   :  { %v3137_v12 = vpop.f32.mrb[130].mxu0  ;;  %v3970_v62 = vmul.f32 1.442695, %v3911_v9  ;;  %v4611_v55 = vmul.f32 %v4230_v47, %v10004_v53  ;;  %v4446_v11 = vadd.f32 %v4445_v26, %v4444_v48  ;;  %v10187_v19 = vadd.f32 %v12575_v30, %v3135_v15 }
 0x34c   :  { %v10180_v54 = vpop.f32.mrb[131].mxu0  ;;  %v6325_v44 = vpop.eup %6324  ;;  %v4612_v7 = vmul.f32 %v4231_v1, %v10020_v8  ;;  %v4438_v4 = vrot.slane %v4437_v13, 1  ;;  %6332 = vpow2.f32 %v3968_v36  ;;  %v10191_v61 = vadd.f32 %v9654_v42, %v3032_v29 }
 0x34d   :  { %v10193_v6 = vpop.f32.mrb[120].mxu1  ;;  %v6327_v46 = vpop.eup %6326  ;;  %v4159_v21 = vmul.f32 0.6931472, %v6325_v44  ;;  %v4447_v53 = vrot.slane %v4446_v11, 1  ;;  %6334 = vpow2.f32 %v3970_v62  ;;  %v3874_v47 = vand.u32 2147483647, %v10178_v43 }
 0x34e   :  { %v6329_v26 = vpop.eup %6328  ;;  %v4161_v39 = vmul.f32 0.6931472, %v6327_v46  ;;  %v4439_v15 = vadd.f32 %v4438_v4, %v4437_v13  ;;  %v3875_v48 = vand.u32 2147483647, %v10187_v19  ;;  %v10198_v8 = vadd.f32 %v12576_v24, %v3137_v12  ;;  %v10200_v36 = vpop.f32.mrb[121].mxu1 }
 0x34f   :  { %v6331_v29 = vpop.eup %6330  ;;  %v12595_v9 = vmax.f32 %v10070_v58, 0.0  ;;  %v4195_v1 = vmul.f32 0.6931472, %v6329_v26  ;;  %v4448_v44 = vadd.f32 %v4447_v53, %v4446_v11  ;;  %v3928_v14 = vsub.f32 0.0, %v3874_v47  ;;  %v3044_v62 = vpop.f32.mrb[122].mxu1 }
 0x350   :  { %v12596_v46 = vmax.f32 %v10073_v35, 0.0  ;;  %v4197_v4 = vmul.f32 0.6931472, %v6331_v29  ;;  %v4593_v17 = vadd.f32 %v4439_v15, %v10151_v20  ;;  %v3929_v12 = vsub.f32 0.0, %v3875_v48  ;;  %v3046_v37 = vpop.f32.mrb[123].mxu1  ;;  %v12599_v29 = vld [vmem:[#allocation122_spill] sm:$0xff] }
 0x351   :  { %v4248_v45 = vadd.f32 %v4159_v21, %v12595_v9  ;;  %v10204_v52 = vpop.f32.mrb[132].mxu0  ;;  %v12597_v58 = vmax.f32 %v10077_v18, 0.0  ;;  %v4594_v26 = vadd.f32 %v4448_v44, %v4359_v27  ;;  %v4004_v11 = vmul.f32 1.442695, %v3928_v14 }
 0x352   :  { %v4249_v13 = vadd.f32 %v4161_v39, %v12596_v46  ;;  %v3145_v50 = vpop.f32.mrb[133].mxu0  ;;  %v12598_v35 = vmax.f32 %v10081_v49, 0.0  ;;  %v4668_v9 = vrot.slane %v4593_v17, %v12599_v29  ;;  %v4006_v20 = vmul.f32 1.442695, %v3929_v12 }
 0x353   :  { %v4629_v60 = vmul.f32 %v4248_v45, %v10023_v16  ;;  %v4266_v21 = vadd.f32 %v4195_v1, %v12597_v58  ;;  %v10212_v53 = vpop.f32.mrb[134].mxu0  ;;  %v4672_v16 = vrot.slane %v4594_v26, %v12599_v29  ;;  %v10224_v18 = vadd.f32 %v9664_v38, %v10164_v22 }
 0x354   :  { %v4630_v47 = vmul.f32 %v4249_v13, %v10030_v51  ;;  %v4267_v39 = vadd.f32 %v4197_v4, %v12598_v35  ;;  %v10218_v15 = vpop.f32.mrb[135].mxu0  ;;  %6336 = vpow2.f32 %v4004_v11  ;;  %v10227_v51 = vmul.f32 %v4668_v9, %v4611_v55  ;;  %v10231_v17 = vpop.f32.mrb[124].mxu1 }
 0x355   :  { %v4647_v48 = vmul.f32 %v4266_v21, %v10049_v31  ;;  %v10229_v49 = vmul.f32 %v4668_v9, %v4629_v60  ;;  %6338 = vpow2.f32 %v4006_v20  ;;  %v10235_v45 = vmul.f32 %v4672_v16, %v4612_v7  ;;  %v3052_v22 = vpop.f32.mrb[125].mxu1 }
 0x356   :  { %v4648_v27 = vmul.f32 %v4267_v39, %v10056_v2  ;;  %v10237_v31 = vmul.f32 %v4672_v16, %v4630_v47  ;;  %v3892_v1 = vand.u32 2147483647, %v10198_v8  ;;  %v6333_v44 = vpop.eup %6332  ;;  %v4791_v46 = vmul.f32 0.5, %v10227_v51  ;;  %v3054_v13 = vpop.f32.mrb[126].mxu1 }
 0x357   :  { %v10233_v14 = vmul.f32 %v4668_v9, %v4647_v48  ;;  %12601 = vst [vmem:[#allocation66_spill] sm:$0xff] %v10235_v45  ;;  %v4809_v2 = vmul.f32 0.5, %v10229_v49  ;;  %v10246_v60 = vadd.f32 %v9664_v38, %v10169_v23  ;;  %v6335_v4 = vpop.eup %6334  ;;  %v4792_v12 = vmul.f32 0.5, %v10235_v45  ;;  %v10252_v26 = vpop.f32.mrb[127].mxu1 }
 0x358   :  { %12602 = vst [vmem:[#allocation88_spill] sm:$0xff] %v10237_v31  ;;  %v10242_v55 = vmul.f32 %v4672_v16, %v4648_v27  ;;  %6340 = vtanh.f32 %v4791_v46  ;;  %v4810_v47 = vmul.f32 0.5, %v10237_v31  ;;  %v10260_v35 = vadd.f32 %v12576_v24, %v10180_v54 }
 0x359   :  { %12600 = vst [vmem:[#allocation110_spill] sm:$0xff] %v10233_v14  ;;  %v4827_v7 = vmul.f32 0.5, %v10233_v14  ;;  %v10254_v11 = vpop.f32.mrb[136].mxu0  ;;  %6342 = vtanh.f32 %v4809_v2  ;;  %v3946_v20 = vsub.f32 0.0, %v3892_v1  ;;  %v10266_v48 = vadd.f32 %v9639_v56, %v3044_v62 }
 0x35a   :  { %12603 = vst [vmem:[#allocation145_spill] sm:$0xff] %v10242_v55  ;;  %v10262_v39 = vpop.f32.mrb[137].mxu0  ;;  %v4828_v9 = vmul.f32 0.5, %v10242_v55  ;;  %v4072_v27 = vadd.f32 1.0, %v6333_v44  ;;  %v4073_v46 = vadd.f32 1.0, %v6335_v4  ;;  %v10275_v54 = vadd.f32 %v12572_v33, %v10193_v6 }
 0x35b   :  { %v10268_v16 = vpop.f32.mrb[138].mxu0  ;;  %6344 = vtanh.f32 %v4827_v7  ;;  %v3893_v23 = vand.u32 2147483647, %v10260_v35  ;;  %v3854_v2 = vand.u32 2147483647, %v10266_v48  ;;  %v10279_v1 = vadd.f32 %v9639_v56, %v3046_v37 }
 0x35c   :  { %v10271_v21 = vpop.f32.mrb[139].mxu0  ;;  %6346 = vtanh.f32 %v4792_v12  ;;  %v4303_v44 = vadd.f32 %v12580_v40, %v10204_v52  ;;  %v4304_v4 = vadd.f32 %v12580_v40, %v3145_v50  ;;  %v10284_v7 = vpop.f32.mrb[128].mxu1  ;;  %v4040_v12 = vmul.f32 1.442695, %v3946_v20 }
 0x35d   :  { %6348 = vtanh.f32 %v4810_v47  ;;  %v3947_v62 = vsub.f32 0.0, %v3893_v23  ;;  %v3908_v14 = vsub.f32 0.0, %v3854_v2  ;;  %v3855_v6 = vand.u32 2147483647, %v10279_v1  ;;  %v10287_v55 = vpop.f32.mrb[129].mxu1 }
 0x35e   :  { %v6337_v58 = vpop.eup %6336  ;;  %6350 = vtanh.f32 %v4828_v9  ;;  %v4380_v23 = vmul.f32 %v4303_v44, %v10117_v25  ;;  %v10290_v56 = vpop.f32.mrb[130].mxu1  ;;  %v4381_v9 = vmul.f32 %v4304_v4, %v10120_v34  ;;  %v4321_v20 = vadd.f32 %v12581_v63, %v10212_v53 }
 0x35f   :  { %v6339_v31 = vpop.eup %6338  ;;  %6352 = vlog2.f32 %v4072_v27  ;;  %v4090_v37 = vadd.f32 1.0, %v6337_v58  ;;  %v4042_v47 = vmul.f32 1.442695, %v3947_v62  ;;  %v3964_v52 = vmul.f32 1.442695, %v3908_v14  ;;  %v10292_v38 = vpop.f32.mrb[131].mxu1 }
 0x360   :  { %6354 = vlog2.f32 %v4073_v46  ;;  %v4091_v50 = vadd.f32 1.0, %v6339_v31  ;;  %v3909_v45 = vsub.f32 0.0, %v3855_v6  ;;  %v4322_v58 = vadd.f32 %v12581_v63, %v10218_v15 }
 0x361   :  { %6356 = vlog2.f32 %v4090_v37  ;;  %v10301_v2 = vadd.f32 %v12575_v30, %v10231_v17  ;;  %v10304_v14 = vadd.f32 %v12575_v30, %v3052_v22  ;;  %v4398_v46 = vmul.f32 %v4321_v20, %v10127_v10 }
 0x362   :  { %6358 = vlog2.f32 %v4091_v50  ;;  %v3966_v27 = vmul.f32 1.442695, %v3909_v45  ;;  %v6341_v31 = vpop.eup %6340  ;;  %v4399_v62 = vmul.f32 %v4322_v58, %v10130_v32  ;;  %v10309_v53 = vadd.f32 %v12576_v24, %v3054_v13 }
 0x363   :  { %12604 = vst [vmem:[#allocation35_spill] sm:$0xff] %v10301_v2  ;;  %12605 = vst [vmem:[#allocation152_spill] sm:$0xff] %v10304_v14  ;;  %6360 = vpow2.f32 %v4040_v12  ;;  %v6343_v44 = vpop.eup %6342  ;;  %v4899_v15 = vmul.f32 0.5, %v6341_v31  ;;  %v10313_v45 = vadd.f32 %v12572_v33, %v10200_v36  ;;  %v3872_v17 = vand.u32 2147483647, %v10301_v2 }
 0x364   :  { %6362 = vpow2.f32 %v4042_v47  ;;  %v10319_v12 = vadd.f32 %v4398_v46, %v4380_v23  ;;  %v10321_v6 = vadd.f32 %v4399_v62, %v4381_v9  ;;  %v10323_v13 = vpop.f32.mrb[132].mxu1  ;;  %v4917_v47 = vmul.f32 0.5, %v6343_v44 }
 0x365   :  { %v10316_v22 = vpop.eup %6344  ;;  %6364 = vpow2.f32 %v3964_v52  ;;  %v3926_v36 = vsub.f32 0.0, %v3872_v17  ;;  %v10328_v20 = vpop.f32.mrb[133].mxu1  ;;  %v3873_v52 = vand.u32 2147483647, %v10304_v14  ;;  %v3890_v9 = vand.u32 2147483647, %v10309_v53 }
 0x366   :  { %12606 = vst [vmem:[#allocation165_spill] sm:$0xff] %v10316_v22  ;;  %v10325_v37 = vpop.eup %6346  ;;  %6366 = vpow2.f32 %v3966_v27  ;;  %v10338_v62 = vadd.f32 0.5, %v4899_v15  ;;  %v10342_v27 = vadd.f32 %v12576_v24, %v10252_v26  ;;  %v4339_v17 = vadd.f32 %v12584_v59, %v10254_v11  ;;  %v10346_v50 = vpop.f32.mrb[134].mxu1 }
 0x367   :  { %12607 = vst [vmem:[#allocation44_spill] sm:$0xff] %v10325_v37  ;;  %v10330_v58 = vpop.eup %6348  ;;  %v4000_v44 = vmul.f32 1.442695, %v3926_v36  ;;  %12610 = vst [vmem:[#allocation80_spill] sm:$0xff] %v10346_v50  ;;  %v3927_v30 = vsub.f32 0.0, %v3873_v52  ;;  %v3944_v22 = vsub.f32 0.0, %v3890_v9  ;;  %v4340_v15 = vadd.f32 %v12584_v59, %v10262_v39 }
 0x368   :  { %12608 = vst [vmem:[#allocation78_spill] sm:$0xff] %v10330_v58  ;;  %v10336_v46 = vpop.eup %6350  ;;  %v10353_v36 = vpop.f32.mrb[135].mxu1  ;;  %v10357_v24 = vadd.f32 0.5, %v4917_v47  ;;  %v4416_v42 = vmul.f32 %v4339_v17, %v10161_v57  ;;  %v12616_v14 = vmax.f32 %v10154_v41, 0.0 }
 0x369   :  { %12609 = vst [vmem:[#allocation73_spill] sm:$0xff] %v10336_v46  ;;  %v6353_v23 = vpop.eup %6352  ;;  %12612 = vst [vmem:[#allocation167_spill] sm:$0xff] %v10353_v36  ;;  %6368 = vpow2.f32 %v4000_v44  ;;  %v3891_v46 = vand.u32 2147483647, %v10342_v27  ;;  %v4002_v52 = vmul.f32 1.442695, %v3927_v30  ;;  %v4417_v47 = vmul.f32 %v4340_v15, %v10167_v5 }
 0x36a   :  { %v10348_v31 = vpop.f32.mrb[140].mxu0  ;;  %v6355_v26 = vpop.eup %6354  ;;  %v4131_v11 = vmul.f32 0.6931472, %v6353_v23  ;;  %v4036_v9 = vmul.f32 1.442695, %v3944_v22  ;;  %v4468_v30 = vsel %vm4431_vm4, %v4416_v42, 0.0 }
 0x36b   :  { %12611 = vst [vmem:[#allocation74_spill] sm:$0xff] %v10348_v31  ;;  %v10355_v33 = vpop.f32.mrb[141].mxu0  ;;  %v6357_v37 = vpop.eup %6356  ;;  %v4133_v4 = vmul.f32 0.6931472, %v6355_v26  ;;  %v12615_v31 = vmax.f32 %v10148_v28, 0.0  ;;  %v3945_v50 = vsub.f32 0.0, %v3891_v46  ;;  %6370 = vpow2.f32 %v4002_v52 }
 0x36c   :  { %12613 = vst [vmem:[#allocation75_spill] sm:$0xff] %v10355_v33  ;;  %v10360_v58 = vpop.f32.mrb[142].mxu0  ;;  %v6359_v39 = vpop.eup %6358  ;;  %v4167_v33 = vmul.f32 0.6931472, %v6357_v37  ;;  %v12617_v37 = vmax.f32 %v10178_v43, 0.0  ;;  %6372 = vpow2.f32 %v4036_v9  ;;  %v4469_v43 = vadd.f32 %v4468_v30, %v10319_v12 }
 0x36d   :  { %12614 = vst [vmem:[#allocation76_spill] sm:$0xff] %v10360_v58  ;;  %v4234_v36 = vadd.f32 %v4131_v11, %v12615_v31  ;;  %v10366_v23 = vpop.f32.mrb[143].mxu0  ;;  %v6361_v44 = vpop.eup %6360  ;;  %v4235_v58 = vadd.f32 %v4133_v4, %v12616_v14  ;;  %v4169_v2 = vmul.f32 0.6931472, %v6359_v39  ;;  %v12618_v14 = vmax.f32 %v10187_v19, 0.0 }
 0x36e   :  { %v10371_v22 = vpop.f32.mrb[136].mxu1  ;;  %v6363_v17 = vpop.eup %6362  ;;  %v4252_v31 = vadd.f32 %v4167_v33, %v12617_v37  ;;  %v4108_v46 = vadd.f32 1.0, %v6361_v44  ;;  %v4038_v11 = vmul.f32 1.442695, %v3945_v50  ;;  %v10407_v30 = vmul.f32 %v10338_v62, %v10227_v51 }
 0x36f   :  { %v10374_v28 = vmul.f32 %v4234_v36, %v10117_v25  ;;  %v10378_v15 = vpop.f32.mrb[137].mxu1  ;;  %v6365_v26 = vpop.eup %6364  ;;  %v10381_v41 = vmul.f32 %v4235_v58, %v10120_v34  ;;  %v4253_v42 = vadd.f32 %v4169_v2, %v12618_v14  ;;  %v4109_v4 = vadd.f32 1.0, %v6363_v17 }
 0x370   :  { %v10385_v52 = vpop.f32.mrb[138].mxu1  ;;  %v6367_v25 = vpop.eup %6366  ;;  %v10388_v36 = vmul.f32 %v4252_v31, %v10127_v10  ;;  %6374 = vlog2.f32 %v4108_v46  ;;  %v4070_v33 = vadd.f32 1.0, %v6365_v26  ;;  %v4477_v2 = vsel %vm4431_vm4, %v4417_v47, 0.0 }
 0x371   :  { %v10391_v9 = vpop.f32.mrb[139].mxu1  ;;  %v10396_v34 = vmul.f32 %v4253_v42, %v10130_v32  ;;  %6376 = vlog2.f32 %v4109_v4  ;;  %v4071_v19 = vadd.f32 1.0, %v6367_v25  ;;  %v4470_v58 = vrot.slane %v4469_v43, 4 }
 0x372   :  { %v10393_v39 = vpop.f32.mrb[144].mxu0  ;;  %6378 = vlog2.f32 %v4070_v33  ;;  %v4478_v44 = vadd.f32 %v4477_v2, %v10321_v6  ;;  %v4301_v32 = vadd.f32 %v12580_v40, %v10284_v7  ;;  %v4302_v47 = vadd.f32 %v12580_v40, %v10287_v55 }
 0x373   :  { %v10399_v50 = vpop.f32.mrb[145].mxu0  ;;  %6380 = vlog2.f32 %v4071_v19  ;;  %v6369_v37 = vpop.eup %6368  ;;  %v4471_v31 = vadd.f32 %v4470_v58, %v4469_v43  ;;  %v4319_v6 = vadd.f32 %v12581_v63, %v10290_v56  ;;  %v4320_v7 = vadd.f32 %v12581_v63, %v10292_v38 }
 0x374   :  { %v10403_v12 = vpop.f32.mrb[146].mxu0  ;;  %6382 = vpow2.f32 %v4038_v11  ;;  %v4479_v46 = vrot.slane %v4478_v44, 4  ;;  %v4088_v26 = vadd.f32 1.0, %v6369_v37  ;;  %v4378_v51 = vmul.f32 %v4301_v32, %v10184_v0  ;;  %v10421_v14 = vpop.f32.mrb[140].mxu1 }
 0x375   :  { %v10413_v17 = vpop.f32.mrb[147].mxu0  ;;  %v4379_v62 = vmul.f32 %v4302_v47, %v10191_v61  ;;  %v4472_v42 = vrot.slane %v4471_v31, 2  ;;  %v4396_v4 = vmul.f32 %v4319_v6, %v10224_v18  ;;  %v4337_v11 = vadd.f32 %v12584_v59, %v10323_v13  ;;  %v10426_v25 = vpop.f32.mrb[141].mxu1 }
 0x376   :  { %v4480_v55 = vadd.f32 %v4479_v46, %v4478_v44  ;;  %v6371_v56 = vpop.eup %6370  ;;  %v10430_v33 = vmul.f32 %v10357_v24, %v10229_v49  ;;  %6384 = vlog2.f32 %v4088_v26  ;;  %v4397_v43 = vmul.f32 %v4320_v7, %v10246_v60  ;;  %v10435_v19 = vpop.f32.mrb[142].mxu1 }
 0x377   :  { %v4338_v38 = vadd.f32 %v12584_v59, %v10328_v20  ;;  %v6373_v2 = vpop.eup %6372  ;;  %v4089_v58 = vadd.f32 1.0, %v6371_v56  ;;  %v4473_v44 = vadd.f32 %v4472_v42, %v4471_v31  ;;  %v4449_v13 = vadd.f32 %v4396_v4, %v4378_v51  ;;  %v10437_v47 = vpop.f32.mrb[143].mxu1 }
 0x378   :  { %v4481_v32 = vrot.slane %v4480_v55, 2  ;;  %v4106_v46 = vadd.f32 1.0, %v6373_v2  ;;  %v4458_v24 = vadd.f32 %v4397_v43, %v4379_v62  ;;  %v4414_v49 = vmul.f32 %v4337_v11, %v10275_v54 }
 0x379   :  { %v4415_v6 = vmul.f32 %v4338_v38, %v10313_v45  ;;  %6386 = vlog2.f32 %v4089_v58  ;;  %v4362_v7 = vadd.f32 %v12591_v3, %v10268_v16  ;;  %v4474_v31 = vrot.slane %v4473_v44, 1 }
 0x37a   :  { %v10439_v37 = vpop.f32.mrb[148].mxu0  ;;  %v6375_v20 = vpop.eup %6374  ;;  %v4482_v42 = vadd.f32 %v4481_v32, %v4480_v55  ;;  %6388 = vlog2.f32 %v4106_v46  ;;  %v4450_v62 = vsel %vm4431_vm4, %v4414_v49, 0.0  ;;  %v12621_v16 = vmax.f32 %v10198_v8, 0.0 }
 0x37b   :  { %v10443_v26 = vpop.f32.mrb[149].mxu0  ;;  %v6377_v4 = vpop.eup %6376  ;;  %v4203_v56 = vmul.f32 0.6931472, %v6375_v20  ;;  %v4459_v11 = vsel %vm4431_vm4, %v4415_v6, 0.0  ;;  %v4475_v10 = vadd.f32 %v4474_v31, %v4473_v44  ;;  %v4451_v59 = vadd.f32 %v4450_v62, %v4449_v13 }
 0x37c   :  { %v10447_v51 = vpop.f32.mrb[150].mxu0  ;;  %v6379_v38 = vpop.eup %6378  ;;  %v4205_v2 = vmul.f32 0.6931472, %v6377_v4  ;;  %v4483_v58 = vrot.slane %v4482_v42, 1  ;;  %v4363_v20 = vadd.f32 %v12591_v3, %v10271_v21  ;;  %v4460_v46 = vadd.f32 %v4459_v11, %v4458_v24 }
 0x37d   :  { %12619 = vst [vmem:[#allocation166_spill] sm:$0xff] %v10447_v51  ;;  %v10451_v43 = vpop.f32.mrb[151].mxu0  ;;  %v6381_v63 = vpop.eup %6380  ;;  %v4270_v55 = vadd.f32 %v4203_v56, %v12621_v16  ;;  %v4127_v32 = vmul.f32 0.6931472, %v6379_v38  ;;  %v12622_v6 = vmax.f32 %v10260_v35, 0.0  ;;  %v4597_v4 = vadd.f32 %v4475_v10, %v4362_v7 }
 0x37e   :  { %12620 = vst [vmem:[#allocation168_spill] sm:$0xff] %v10451_v43  ;;  %v10457_v40 = vpop.f32.mrb[144].mxu1  ;;  %v6383_v49 = vpop.eup %6382  ;;  %v4129_v51 = vmul.f32 0.6931472, %v6381_v63  ;;  %v4484_v44 = vadd.f32 %v4483_v58, %v4482_v42  ;;  %v12623_v8 = vmax.f32 %v10266_v48, 0.0  ;;  %v4452_v38 = vrot.slane %v4451_v59, 4 }
 0x37f   :  { %v4271_v43 = vadd.f32 %v4205_v2, %v12622_v6  ;;  %v10461_v31 = vpop.f32.mrb[145].mxu1  ;;  %v4651_v13 = vmul.f32 %v4270_v55, %v10161_v57  ;;  %v4107_v62 = vadd.f32 1.0, %v6383_v49  ;;  %v12624_v11 = vmax.f32 %v10279_v1, 0.0  ;;  %v12626_v6 = vld [vmem:[#allocation35_spill] sm:$0xff] }
 0x380   :  { %v4232_v56 = vadd.f32 %v4127_v32, %v12623_v8  ;;  %v10466_v21 = vpop.f32.mrb[146].mxu1  ;;  %v4684_v63 = vrot.slane %v4597_v4, %v12599_v29  ;;  %v4598_v10 = vadd.f32 %v4484_v44, %v4363_v20  ;;  %v6385_v57 = vpop.eup %6384  ;;  %v4453_v2 = vadd.f32 %v4452_v38, %v4451_v59 }
 0x381   :  { %v4652_v24 = vmul.f32 %v4271_v43, %v10167_v5  ;;  %v4233_v35 = vadd.f32 %v4129_v51, %v12624_v11  ;;  %v10472_v7 = vpop.f32.mrb[147].mxu1  ;;  %6390 = vlog2.f32 %v4107_v62  ;;  %v4461_v58 = vrot.slane %v4460_v46, 4 }
 0x382   :  { %v10474_v42 = vpop.f32.mrb[152].mxu0  ;;  %v10477_v48 = vmul.f32 %v4232_v56, %v10184_v0  ;;  %v4163_v1 = vmul.f32 0.6931472, %v6385_v57  ;;  %v10485_v51 = vmul.f32 %v4684_v63, %v10374_v28  ;;  %v10488_v43 = vmul.f32 %v4684_v63, %v10388_v36  ;;  %v12631_v57 = vld [vmem:[#allocation152_spill] sm:$0xff] }
 0x383   :  { %v10479_v16 = vpop.f32.mrb[153].mxu0  ;;  %v10482_v5 = vmul.f32 %v4233_v35, %v10191_v61  ;;  %v3837_v0 = vmax.f32 %v10342_v27, 0.0  ;;  %v10493_v32 = vmul.f32 %v4684_v63, %v4651_v13  ;;  %v4688_v59 = vrot.slane %v4598_v10, %v12599_v29  ;;  %v6387_v61 = vpop.eup %6386 }
 0x384   :  { %v10490_v55 = vpop.f32.mrb[154].mxu0  ;;  %v4462_v20 = vadd.f32 %v4461_v58, %v4460_v46  ;;  %v12627_v4 = vmax.f32 %v12626_v6, 0.0  ;;  %v4795_v28 = vmul.f32 0.5, %v10485_v51  ;;  %v4813_v36 = vmul.f32 0.5, %v10488_v43  ;;  %v6389_v56 = vpop.eup %6388 }
 0x385   :  { %12625 = vst [vmem:[#allocation169_spill] sm:$0xff] %v10493_v32  ;;  %v10496_v49 = vpop.f32.mrb[155].mxu0  ;;  %v4454_v8 = vrot.slane %v4453_v2, 2  ;;  %v4165_v62 = vmul.f32 0.6931472, %v6387_v61  ;;  %v4831_v27 = vmul.f32 0.5, %v10493_v32  ;;  %v10504_v13 = vmul.f32 %v4688_v59, %v10381_v41 }
 0x386   :  { %v4250_v44 = vadd.f32 %v4163_v1, %v12627_v4  ;;  %v10507_v46 = vmul.f32 %v4688_v59, %v10396_v34  ;;  %v10509_v38 = vpop.f32.mrb[148].mxu1  ;;  %v4199_v35 = vmul.f32 0.6931472, %v6389_v56  ;;  %6392 = vtanh.f32 %v4795_v28  ;;  %v12634_v4 = vld [vmem:[#allocation80_spill] sm:$0xff] }
 0x387   :  { %12628 = vst [vmem:[#allocation92_spill] sm:$0xff] %v10504_v13  ;;  %v10514_v63 = vmul.f32 %v4688_v59, %v4652_v24  ;;  %v10516_v10 = vpop.f32.mrb[149].mxu1  ;;  %v12632_v58 = vmax.f32 %v12631_v57, 0.0  ;;  %6394 = vtanh.f32 %v4813_v36  ;;  %v4796_v41 = vmul.f32 0.5, %v10504_v13  ;;  %v12635_v59 = vld [vmem:[#allocation167_spill] sm:$0xff] }
 0x388   :  { %12629 = vst [vmem:[#allocation170_spill] sm:$0xff] %v10507_v46  ;;  %v10512_v11 = vmul.f32 %v4250_v44, %v10224_v18  ;;  %v4814_v34 = vmul.f32 0.5, %v10507_v46  ;;  %v10522_v61 = vpop.f32.mrb[150].mxu1  ;;  %v12633_v6 = vmax.f32 %v10309_v53, 0.0  ;;  %v4360_v44 = vadd.f32 %v12591_v3, %v12634_v4 }
 0x389   :  { %12630 = vst [vmem:[#allocation49_spill] sm:$0xff] %v10514_v63  ;;  %v4251_v1 = vadd.f32 %v4165_v62, %v12632_v58  ;;  %v4455_v24 = vadd.f32 %v4454_v8, %v4453_v2  ;;  %v4361_v28 = vadd.f32 %v12591_v3, %v12635_v59  ;;  %v10530_v56 = vpop.f32.mrb[151].mxu1  ;;  %6396 = vtanh.f32 %v4831_v27  ;;  %v12639_v8 = vld [vmem:[#allocation74_spill] sm:$0xff] }
 0x38a   :  { %v4268_v18 = vadd.f32 %v4199_v35, %v12633_v6  ;;  %12636 = vst [vmem:[#allocation87_spill] sm:$0xff] %v10530_v56  ;;  %v10532_v62 = vpop.f32.mrb[156].mxu0  ;;  %v4832_v57 = vmul.f32 0.5, %v10514_v63  ;;  %v4463_v58 = vrot.slane %v4462_v20, 2  ;;  %6398 = vtanh.f32 %v4796_v41  ;;  %v12640_v6 = vld [vmem:[#allocation51_spill] sm:$0xff]  ;;  %v12643_v63 = vld [vmem:[#allocation76_spill] sm:$0xff] }
 0x38b   :  { %12637 = vst [vmem:[#allocation50_spill] sm:$0xff] %v10532_v62  ;;  %v10535_v36 = vmul.f32 %v4251_v1, %v10246_v60  ;;  %v10538_v53 = vpop.f32.mrb[157].mxu0  ;;  %v4456_v2 = vrot.slane %v4455_v24, 1  ;;  %v10543_v4 = vadd.f32 %v12640_v6, %v12639_v8  ;;  %v6391_v32 = vpop.eup %6390  ;;  %6400 = vtanh.f32 %v4814_v34  ;;  %v12642_v1 = vld [vmem:[#allocation75_spill] sm:$0xff]  ;;  %v12644_v3 = vld [vmem:[#allocation90_spill] sm:$0xff] }
 0x38c   :  { %12638 = vst [vmem:[#allocation47_spill] sm:$0xff] %v10538_v53  ;;  %v4649_v35 = vmul.f32 %v4268_v18, %v10275_v54  ;;  %v10545_v59 = vpop.f32.mrb[158].mxu0  ;;  %v4464_v60 = vadd.f32 %v4463_v58, %v4462_v20  ;;  %v10549_v27 = vadd.f32 %v12640_v6, %v12642_v1  ;;  %v10553_v46 = vadd.f32 %v12644_v3, %v12643_v63  ;;  %v12647_v58 = vld [vmem:[#allocation78_spill] sm:$0xff]  ;;  %v10567_v63 = vpop.f32.mrb[152].mxu1 }
 0x38d   :  { %12641 = vst [vmem:[#allocation85_spill] sm:$0xff] %v10545_v59  ;;  %v10555_v54 = vpop.f32.mrb[159].mxu0  ;;  %v4201_v41 = vmul.f32 0.6931472, %v6391_v32  ;;  %v4457_v18 = vadd.f32 %v4456_v2, %v4455_v24  ;;  %v10559_v8 = vadd.f32 %v12644_v3, %v10366_v23  ;;  %v12646_v59 = vld [vmem:[#allocation44_spill] sm:$0xff]  ;;  %6402 = vtanh.f32 %v4832_v57  ;;  %12648 = vst [vmem:[#allocation83_spill] sm:$0xff] %v10567_v63 }
 0x38e   :  { %12645 = vst [vmem:[#allocation48_spill] sm:$0xff] %v10555_v54  ;;  %v4900_v13 = vmul.f32 0.5, %v12646_v59  ;;  %v4465_v20 = vrot.slane %v4464_v60, 1  ;;  %v10564_v34 = vadd.f32 %v12640_v6, %v10371_v22  ;;  %v4918_v1 = vmul.f32 0.5, %v12647_v58  ;;  %v12649_v24 = vld [vmem:[#allocation14_spill] sm:$0xff]  ;;  %v10571_v23 = vpop.f32.mrb[153].mxu1 }
 0x38f   :  { %v4269_v53 = vadd.f32 %v4201_v41, %v3837_v0  ;;  %v4595_v54 = vadd.f32 %v4457_v18, %v4360_v44  ;;  %v5331_v2 = vmul.f32 %v12649_v24, %v10407_v30  ;;  %12650 = vst [vmem:[#allocation86_spill] sm:$0xff] %v10571_v23  ;;  %v10575_v57 = vadd.f32 %v12640_v6, %v10378_v15  ;;  %v12651_v22 = vld [vmem:[#allocation17_spill] sm:$0xff]  ;;  %v10579_v58 = vpop.f32.mrb[154].mxu1  ;;  %v12652_v44 = vld [vmem:[#allocation66_spill] sm:$0xff] }
 0x390   :  { %v4954_v32 = vadd.f32 0.5, %v4900_v13  ;;  %v4466_v62 = vadd.f32 %v4465_v20, %v4464_v60  ;;  %v4972_v59 = vadd.f32 0.5, %v4918_v1  ;;  %v5349_v56 = vmul.f32 %v12651_v22, %v10430_v33  ;;  %v6393_v63 = vpop.eup %6392  ;;  %v12653_v41 = vld [vmem:[#allocation73_spill] sm:$0xff]  ;;  %v10585_v60 = vpop.f32.mrb[155].mxu1  ;;  %v12655_v1 = vld [vmem:[#allocation88_spill] sm:$0xff] }
 0x391   :  { %v4650_v0 = vmul.f32 %v4269_v53, %v10313_v45  ;;  %v4676_v13 = vrot.slane %v4595_v54, %v12599_v29  ;;  %v4936_v18 = vmul.f32 0.5, %v12653_v41  ;;  %12654 = vst [vmem:[#allocation77_spill] sm:$0xff] %v10585_v60  ;;  %v6395_v20 = vpop.eup %6394  ;;  %v4903_v15 = vmul.f32 0.5, %v6393_v63 }
 0x392   :  { %v5008_v30 = vmul.f32 %v4954_v32, %v12652_v44  ;;  %v4596_v24 = vadd.f32 %v4466_v62, %v4361_v28  ;;  %v5026_v6 = vmul.f32 %v4972_v59, %v12655_v1  ;;  %v5385_v23 = vpack.c.bf16 %v5349_v56, %v5331_v2  ;;  %v12657_v28 = vld [vmem:[#allocation117_spill] sm:$0xff]  ;;  %v12658_v56 = vld [vmem:[#allocation124_spill] sm:$0xff] }
 0x393   :  { %v4921_v33 = vmul.f32 0.5, %v6395_v20  ;;  %v10589_v22 = vmul.f32 %v4676_v13, %v10477_v48  ;;  %v10592_v45 = vmul.f32 %v4676_v13, %v10512_v11  ;;  %v10594_v53 = vmul.f32 %v4676_v13, %v4649_v35  ;;  %v10596_v54 = vpop.eup %6396 }
 0x394   :  { %v4680_v32 = vrot.slane %v4596_v24, %v12599_v29  ;;  %v10601_v63 = vadd.f32 %v12644_v3, %v10385_v52  ;;  %v5332_v62 = vmul.f32 %v12657_v28, %v5008_v30  ;;  %v5350_v2 = vmul.f32 %v12658_v56, %v5026_v6  ;;  %v10605_v59 = vpop.eup %6398  ;;  %v12663_v24 = vld [vmem:[#allocation116_spill] sm:$0xff] }
 0x395   :  { %12656 = vst [vmem:[#allocation79_spill] sm:$0xff] %v10594_v53  ;;  %v4957_v48 = vadd.f32 0.5, %v4903_v15  ;;  %v4793_v11 = vmul.f32 0.5, %v10589_v22  ;;  %v4811_v35 = vmul.f32 0.5, %v10592_v45  ;;  %v10611_v13 = vadd.f32 %v12644_v3, %v10391_v9  ;;  %v10613_v44 = vpop.eup %6400  ;;  %v12667_v56 = vld [vmem:[#allocation36_spill] sm:$0xff] }
 0x396   :  { %v4975_v41 = vadd.f32 0.5, %v4921_v33  ;;  %v10616_v52 = vmul.f32 %v4680_v32, %v10482_v5  ;;  %v10619_v30 = vmul.f32 %v4680_v32, %v10535_v36  ;;  %v10621_v6 = vmul.f32 %v4680_v32, %v4650_v0  ;;  %v10623_v20 = vpop.f32.mrb[156].mxu1 }
 0x397   :  { %12662 = vst [vmem:[#allocation135_spill] sm:$0xff] %v10623_v20  ;;  %6404 = vtanh.f32 %v4793_v11  ;;  %v5386_v15 = vpack.c.bf16 %v5350_v2, %v5332_v62  ;;  %v10627_v1 = vadd.f32 %v12663_v24, %v10393_v39  ;;  %v4990_v9 = vadd.f32 0.5, %v4936_v18  ;;  %v10629_v28 = vpop.f32.mrb[157].mxu1  ;;  %v10631_v33 = vpop.eup %6402  ;;  %v12666_v39 = vld [vmem:[#allocation145_spill] sm:$0xff]  ;;  %v12701_v20 = vld [vmem:[#allocation16_spill] sm:$0xff] }
 0x398   :  { %12659 = vst [vmem:[#allocation81_spill] sm:$0xff] %v10616_v52  ;;  %12660 = vst [vmem:[#allocation82_spill] sm:$0xff] %v10619_v30  ;;  %6406 = vtanh.f32 %v4811_v35  ;;  %v4794_v5 = vmul.f32 0.5, %v10616_v52  ;;  %v4812_v36 = vmul.f32 0.5, %v10619_v30  ;;  %v10637_v0 = vadd.f32 %v12663_v24, %v10399_v50  ;;  %v10639_v32 = vpop.f32.mrb[158].mxu1 }
 0x399   :  { %12661 = vst [vmem:[#allocation133_spill] sm:$0xff] %v10621_v6  ;;  %12664 = vst [vmem:[#allocation138_spill] sm:$0xff] %v10629_v28  ;;  %v10642_v62 = vmul.f32 0.5, %v10594_v53  ;;  %5493 = vmatprep.subr.bf16.mxu1 %v5386_v15  ;;  %v5044_v18 = vmul.f32 %v4990_v9, %v12666_v39  ;;  %v10647_v2 = vadd.f32 %v12667_v56, %v10403_v12  ;;  %v10653_v35 = vpop.f32.mrb[159].mxu1  ;;  %v4830_v15 = vmul.f32 0.5, %v10621_v6  ;;  %v12670_v9 = vld [vmem:[#allocation165_spill] sm:$0xff] }
 0x39a   :  { %12665 = vst [vmem:[#allocation139_spill] sm:$0xff] %v10639_v32  ;;  %v10651_v11 = vadd.f32 %v12667_v56, %v10413_v17  ;;  %12668 = vst [vmem:[#allocation89_spill] sm:$0xff] %v10653_v35  ;;  %v10655_v50 = vpop.f32.mrb[160].mxu0  ;;  %v10658_v30 = vmul.f32 %v4957_v48, %v10485_v51  ;;  %v10661_v53 = vmul.f32 %v4975_v41, %v10488_v43  ;;  %5494 = vmatpush1.bf16.msra.mxu1 %v5385_v23  ;;  %v12672_v17 = vld [vmem:[#allocation18_spill] sm:$0xff] }
 0x39b   :  { %12669 = vst [vmem:[#allocation91_spill] sm:$0xff] %v10655_v50  ;;  %v4935_v12 = vmul.f32 0.5, %v12670_v9  ;;  %v10665_v39 = vpop.f32.mrb[161].mxu0  ;;  %6408 = vtanh.f32 %v4794_v5  ;;  %v5368_v52 = vmul.f32 %v12672_v17, %v5044_v18  ;;  %v3860_v35 = vand.u32 2147483647, %v10647_v2 }
 0x39c   :  { %12671 = vst [vmem:[#allocation144_spill] sm:$0xff] %v10665_v39  ;;  %v10671_v50 = vadd.f32 %v12663_v24, %v10421_v14  ;;  %v10673_v51 = vpop.f32.mrb[162].mxu0  ;;  %6410 = vtanh.f32 %v4812_v36  ;;  %v3861_v43 = vand.u32 2147483647, %v10651_v11  ;;  %v10678_v23 = vadd.f32 %v12663_v24, %v10426_v25  ;;  %v12676_v25 = vld [vmem:[#allocation67_spill] sm:$0xff] }
 0x39d   :  { %12673 = vst [vmem:[#allocation146_spill] sm:$0xff] %v10673_v51  ;;  %v4989_v48 = vadd.f32 0.5, %v4935_v12  ;;  %v10680_v41 = vpop.f32.mrb[163].mxu0  ;;  %v5404_v5 = vpack.c.bf16 %v5368_v52, %v5368_v52  ;;  %v3914_v18 = vsub.f32 0.0, %v3860_v35  ;;  %v10684_v9 = vadd.f32 %v12667_v56, %v10435_v19  ;;  %v12675_v12 = vld [vmem:[#allocation110_spill] sm:$0xff] }
 0x39e   :  { %12674 = vst [vmem:[#allocation136_spill] sm:$0xff] %v10680_v41  ;;  %v10688_v14 = vadd.f32 %v12667_v56, %v10437_v47  ;;  %v3915_v17 = vsub.f32 0.0, %v3861_v43  ;;  %v10694_v24 = vadd.f32 %v12676_v25, %v10439_v37  ;;  %v10696_v41 = vpop.f32.mrb[160].mxu1  ;;  %6412 = vtanh.f32 %v4830_v15 }
 0x39f   :  { %v5043_v6 = vmul.f32 %v4989_v48, %v12675_v12  ;;  %12677 = vst [vmem:[#allocation137_spill] sm:$0xff] %v10696_v41  ;;  %6040 = vmatprep.subr.msk.bf16.mxu1 %vm135_vm0, %v5404_v5  ;;  %v3976_v19 = vmul.f32 1.442695, %v3914_v18  ;;  %v3858_v52 = vand.u32 2147483647, %v10684_v9  ;;  %v10702_v47 = vadd.f32 %v12676_v25, %v10443_v26  ;;  %v12678_v48 = vld [vmem:[#allocation15_spill] sm:$0xff] }
 0x3a0   :  { %v3978_v43 = vmul.f32 1.442695, %v3915_v17  ;;  %v3859_v37 = vand.u32 2147483647, %v10688_v14  ;;  %v10707_v36 = vpop.f32.mrb[161].mxu1  ;;  %v4307_v60 = vadd.f32 %v12701_v20, %v10474_v42 }
 0x3a1   :  { %v5367_v12 = vmul.f32 %v12678_v48, %v5043_v6  ;;  %12679 = vst [vmem:[#allocation141_spill] sm:$0xff] %v10707_v36  ;;  %v6405_v41 = vpop.eup %6404  ;;  %6414 = vpow2.f32 %v3976_v19  ;;  %v3912_v5 = vsub.f32 0.0, %v3858_v52  ;;  %v3878_v18 = vand.u32 2147483647, %v10694_v24  ;;  %v10711_v56 = vpop.f32.mrb[162].mxu1 }
 0x3a2   :  { %12680 = vst [vmem:[#allocation143_spill] sm:$0xff] %v10711_v56  ;;  %v10713_v26 = vpop.f32.mrb[164].mxu0  ;;  %v6407_v51 = vpop.eup %6406  ;;  %v4901_v35 = vmul.f32 0.5, %v6405_v41  ;;  %6416 = vpow2.f32 %v3978_v43  ;;  %v3913_v6 = vsub.f32 0.0, %v3859_v37  ;;  %v3879_v52 = vand.u32 2147483647, %v10702_v47 }
 0x3a3   :  { %12681 = vst [vmem:[#allocation147_spill] sm:$0xff] %v10713_v26  ;;  %v5403_v17 = vpack.c.bf16 %v5367_v12, %v5367_v12  ;;  %v10715_v48 = vpop.f32.mrb[163].mxu1  ;;  %v10717_v39 = vpop.f32.mrb[165].mxu0  ;;  %v4919_v36 = vmul.f32 0.5, %v6407_v51  ;;  %v3972_v19 = vmul.f32 1.442695, %v3912_v5 }
 0x3a4   :  { %12682 = vst [vmem:[#allocation148_spill] sm:$0xff] %v10715_v48  ;;  %12683 = vst [vmem:[#allocation159_spill] sm:$0xff] %v10717_v39  ;;  %v3932_v3 = vsub.f32 0.0, %v3878_v18  ;;  %v10724_v26 = vld [vmem:[%s12041_s1 + $0x58] sm:$0xff]   ;;  %v3974_v43 = vmul.f32 1.442695, %v3913_v6 }
 0x3a5   :  { %v5440_v15 = vsel %vm135_vm0, %v5403_v17, 0  ;;  %12684 = vst [vmem:[#allocation160_spill] sm:$0xff] %v10724_v26  ;;  %v12685_v12 = vld [vmem:[#allocation166_spill] sm:$0xff]  ;;  %v12686_v37 = vld [vmem:[#allocation68_spill] sm:$0xff]  ;;  %v10731_v39 = vpop.f32.mrb[166].mxu0  ;;  %v10733_v51 = vpop.eup %6408  ;;  %6418 = vpow2.f32 %v3972_v19  ;;  %v3933_v17 = vsub.f32 0.0, %v3879_v52 }
 0x3a6   :  { %v10729_v48 = vadd.f32 %v12686_v37, %v12685_v12  ;;  %12687 = vst [vmem:[#allocation161_spill] sm:$0xff] %v10731_v39  ;;  %12688 = vst [vmem:[#allocation162_spill] sm:$0xff] %v10733_v51  ;;  %5496 = vmatpush1.bf16.msra.mxu1 %v5440_v15  ;;  %v4012_v18 = vmul.f32 1.442695, %v3932_v3  ;;  %v10736_v56 = vpop.f32.mrb[167].mxu0  ;;  %v10738_v32 = vpop.eup %6410  ;;  %v10740_v41 = vadd.f32 0.5, %v4901_v35  ;;  %6420 = vpow2.f32 %v3974_v43 }
 0x3a7   :  { %12689 = vst [vmem:[#allocation163_spill] sm:$0xff] %v10736_v56  ;;  %12690 = vst [vmem:[#allocation164_spill] sm:$0xff] %v10738_v32  ;;  %v10744_v39 = vpop.f32.mrb[164].mxu1  ;;  %v10746_v28 = vadd.f32 0.5, %v4919_v36  ;;  %v4014_v15 = vmul.f32 1.442695, %v3933_v17  ;;  %v10758_v43 = vadd.f32 %v12676_v25, %v10457_v40  ;;  %v10762_v36 = vadd.f32 %v12676_v25, %v10461_v31 }
 0x3a8   :  { %v3896_v12 = vand.u32 2147483647, %v10729_v48  ;;  %12691 = vst [vmem:[#allocation121_spill] sm:$0xff] %v10744_v39  ;;  %6422 = vpow2.f32 %v4012_v18  ;;  %v12692_v19 = vld [vmem:[#allocation168_spill] sm:$0xff]  ;;  %v10752_v52 = vpop.f32.mrb[165].mxu1  ;;  %v10766_v18 = vadd.f32 %v12686_v37, %v10466_v21  ;;  %v12696_v5 = vmov 0  }
 0x3a9   :  { %v10750_v3 = vadd.f32 %v12686_v37, %v12692_v19  ;;  %12693 = vst [vmem:[#allocation131_spill] sm:$0xff] %v10752_v52  ;;  %6041 = vmatmul.mubr.msk.bf16.vlgmr.msra.gmra.mrb[196].mxu1 %vm2843_vm3, %v10724_v26  ;;  %v10768_v17 = vpop.f32.mrb[166].mxu1  ;;  %v10770_v19 = vpop.eup %6412  ;;  %6424 = vpow2.f32 %v4014_v15  ;;  %v10784_v15 = vadd.f32 %v12686_v37, %v10472_v7  ;;  %v3877_v56 = vand.u32 2147483647, %v10762_v36 }
 0x3aa   :  { %v3950_v35 = vsub.f32 0.0, %v3896_v12  ;;  %12694 = vst [vmem:[#allocation140_spill] sm:$0xff] %v10768_v17  ;;  %12695 = vst [vmem:[#allocation3_spill] sm:$0xff] %v10770_v19  ;;  %5611 = vmatprep.mubr.bf16.mxu1 %v12696_v5  ;;  %v10776_v52 = vpop.f32.mrb[167].mxu1  ;;  %v10778_v31 = vpop.f32.mrb[168].mxu0 }
 0x3ab   :  { %v3897_v40 = vand.u32 2147483647, %v10750_v3  ;;  %12697 = vst [vmem:[#allocation2_spill] sm:$0xff] %v10776_v52  ;;  %12698 = vst [vmem:[#allocation24_spill] sm:$0xff] %v10778_v31  ;;  %v3876_v17 = vand.u32 2147483647, %v10758_v43  ;;  %v6415_v6 = vpop.eup %6414 }
 0x3ac   :  { %v4048_v25 = vmul.f32 1.442695, %v3950_v35  ;;  %v3894_v5 = vand.u32 2147483647, %v10766_v18  ;;  %v6417_v52 = vpop.eup %6416  ;;  %v4076_v26 = vadd.f32 1.0, %v6415_v6  ;;  %v10790_v31 = vpop.f32.mrb[169].mxu0 }
 0x3ad   :  { %v3951_v39 = vsub.f32 0.0, %v3897_v40  ;;  %v3930_v35 = vsub.f32 0.0, %v3876_v17  ;;  %12699 = vst [vmem:[#allocation5_spill] sm:$0xff] %v10790_v31  ;;  %v4077_v19 = vadd.f32 1.0, %v6417_v52  ;;  %v3931_v7 = vsub.f32 0.0, %v3877_v56  ;;  %v10792_v51 = vpop.f32.mrb[170].mxu0 }
 0x3ae   :  { %6426 = vpow2.f32 %v4048_v25  ;;  %v3948_v37 = vsub.f32 0.0, %v3894_v5  ;;  %12700 = vst [vmem:[#allocation4_spill] sm:$0xff] %v10792_v51  ;;  %v3895_v12 = vand.u32 2147483647, %v10784_v15  ;;  %v10797_v6 = vpop.f32.mrb[171].mxu0  ;;  %v10799_v25 = vpop.f32.mrb[168].mxu1  ;;  %v4308_v56 = vadd.f32 %v12701_v20, %v10479_v16 }
 0x3af   :  { %v4050_v32 = vmul.f32 1.442695, %v3951_v39  ;;  %6428 = vlog2.f32 %v4076_v26  ;;  %v4008_v40 = vmul.f32 1.442695, %v3930_v35  ;;  %12702 = vst [vmem:[#allocation26_spill] sm:$0xff] %v10797_v6  ;;  %12703 = vst [vmem:[#allocation23_spill] sm:$0xff] %v10799_v25  ;;  %v6419_v17 = vpop.eup %6418  ;;  %v4384_v51 = vmul.f32 %v4307_v60, %v10543_v4 }
 0x3b0   :  { %6430 = vlog2.f32 %v4077_v19  ;;  %v4010_v21 = vmul.f32 1.442695, %v3931_v7  ;;  %v4044_v52 = vmul.f32 1.442695, %v3948_v37  ;;  %v10803_v39 = vpop.f32.mrb[169].mxu1  ;;  %v6421_v26 = vpop.eup %6420  ;;  %v4074_v5 = vadd.f32 1.0, %v6419_v17 }
 0x3b1   :  { %6432 = vpow2.f32 %v4050_v32  ;;  %v3949_v35 = vsub.f32 0.0, %v3895_v12  ;;  %v10806_v42 = vpop.f32.mrb[170].mxu1  ;;  %v4075_v31 = vadd.f32 1.0, %v6421_v26  ;;  %v4385_v19 = vmul.f32 %v4308_v56, %v10549_v27  ;;  %v12705_v37 = vld [vmem:[#allocation98_spill] sm:$0xff] }
 0x3b2   :  { %12704 = vst [vmem:[#allocation11_spill] sm:$0xff] %v10806_v42  ;;  %v6423_v6 = vpop.eup %6422  ;;  %6434 = vpow2.f32 %v4008_v40  ;;  %v4325_v7 = vadd.f32 %v12705_v37, %v10490_v55  ;;  %v10811_v25 = vpop.f32.mrb[171].mxu1  ;;  %v4326_v60 = vadd.f32 %v12705_v37, %v10496_v49  ;;  %v4305_v56 = vadd.f32 %v12701_v20, %v10509_v38 }
 0x3b3   :  { %12706 = vst [vmem:[#allocation10_spill] sm:$0xff] %v10811_v25  ;;  %v10813_v16 = vpop.f32.mrb[172].mxu0  ;;  %6436 = vlog2.f32 %v4074_v5  ;;  %v4094_v17 = vadd.f32 1.0, %v6423_v6  ;;  %v4046_v32 = vmul.f32 1.442695, %v3949_v35  ;;  %v6425_v42 = vpop.eup %6424  ;;  %v4306_v55 = vadd.f32 %v12701_v20, %v10516_v10 }
 0x3b4   :  { %12707 = vst [vmem:[#allocation25_spill] sm:$0xff] %v10813_v16  ;;  %v10817_v12 = vpop.f32.mrb[173].mxu0  ;;  %6438 = vlog2.f32 %v4075_v31  ;;  %v4402_v40 = vmul.f32 %v4325_v7, %v10553_v46  ;;  %v4095_v6 = vadd.f32 1.0, %v6425_v42  ;;  %v4403_v5 = vmul.f32 %v4326_v60, %v10559_v8 }
 0x3b5   :  { %12708 = vst [vmem:[#allocation32_spill] sm:$0xff] %v10817_v12  ;;  %v10824_v26 = vpop.f32.mrb[174].mxu0  ;;  %6440 = vlog2.f32 %v4094_v17  ;;  %v4323_v49 = vadd.f32 %v12705_v37, %v10522_v61  ;;  %v4382_v7 = vmul.f32 %v4305_v56, %v10564_v34  ;;  %v4383_v38 = vmul.f32 %v4306_v55, %v10575_v57  ;;  %v12711_v17 = vld [vmem:[#allocation87_spill] sm:$0xff]  ;;  %v12713_v61 = vld [vmem:[#allocation50_spill] sm:$0xff] }
 0x3b6   :  { %12709 = vst [vmem:[#allocation31_spill] sm:$0xff] %v10824_v26  ;;  %v10829_v35 = vpop.f32.mrb[175].mxu0  ;;  %6442 = vpow2.f32 %v4010_v21  ;;  %v4503_v31 = vadd.f32 %v4402_v40, %v4384_v51  ;;  %v4512_v10 = vadd.f32 %v4403_v5, %v4385_v19  ;;  %v4324_v42 = vadd.f32 %v12705_v37, %v12711_v17  ;;  %v10836_v60 = vpop.f32.mrb[172].mxu1  ;;  %v12715_v51 = vld [vmem:[#allocation47_spill] sm:$0xff] }
 0x3b7   :  { %12710 = vst [vmem:[#allocation7_spill] sm:$0xff] %v10829_v35  ;;  %6444 = vlog2.f32 %v4095_v6  ;;  %v4400_v26 = vmul.f32 %v4323_v49, %v10601_v63  ;;  %12712 = vst [vmem:[#allocation6_spill] sm:$0xff] %v10836_v60  ;;  %v12714_v35 = vld [vmem:[#allocation64_spill] sm:$0xff]  ;;  %v10842_v56 = vpop.f32.mrb[173].mxu1 }
 0x3b8   :  { %v6427_v12 = vpop.eup %6426  ;;  %6446 = vpow2.f32 %v4044_v52  ;;  %v4343_v21 = vadd.f32 %v12714_v35, %v12713_v61  ;;  %v4344_v40 = vadd.f32 %v12714_v35, %v12715_v51  ;;  %12716 = vst [vmem:[#allocation9_spill] sm:$0xff] %v10842_v56  ;;  %v4401_v5 = vmul.f32 %v4324_v42, %v10611_v13  ;;  %v10848_v49 = vpop.f32.mrb[174].mxu1 }
 0x3b9   :  { %v4112_v16 = vadd.f32 1.0, %v6427_v12  ;;  %v6429_v55 = vpop.eup %6428  ;;  %6448 = vpow2.f32 %v4046_v32  ;;  %v10845_v6 = vadd.f32 %v4400_v26, %v4382_v7  ;;  %12717 = vst [vmem:[#allocation53_spill] sm:$0xff] %v10848_v49  ;;  %v10852_v51 = vpop.f32.mrb[175].mxu1  ;;  %v4904_v32 = vmul.f32 0.5, %v10605_v59 }
 0x3ba   :  { %v6431_v12 = vpop.eup %6430  ;;  %v4139_v52 = vmul.f32 0.6931472, %v6429_v55  ;;  %v4420_v17 = vmul.f32 %v4343_v21, %v10627_v1  ;;  %v4421_v61 = vmul.f32 %v4344_v40, %v10637_v0  ;;  %12718 = vst [vmem:[#allocation8_spill] sm:$0xff] %v10852_v51  ;;  %v10854_v25 = vadd.f32 %v4401_v5, %v4383_v38  ;;  %v10858_v7 = vpop.f32.mrb[176].mxu0 }
 0x3bb   :  { %6450 = vlog2.f32 %v4112_v16  ;;  %v6433_v56 = vpop.eup %6432  ;;  %v4141_v60 = vmul.f32 0.6931472, %v6431_v12  ;;  %v4922_v26 = vmul.f32 0.5, %v10613_v44  ;;  %12719 = vst [vmem:[#allocation13_spill] sm:$0xff] %v10858_v7  ;;  %v12720_v55 = vmax.f32 %v10647_v2, 0.0  ;;  %v10864_v51 = vpop.f32.mrb[177].mxu0 }
 0x3bc   :  { %v6435_v42 = vpop.eup %6434  ;;  %v4113_v19 = vadd.f32 1.0, %v6433_v56  ;;  %v4504_v21 = vsel %vm4431_vm4, %v4420_v17, 0.0  ;;  %v4513_v40 = vsel %vm4431_vm4, %v4421_v61, 0.0  ;;  %v12721_v38 = vmax.f32 %v10651_v11, 0.0  ;;  %v10868_v37 = vpop.f32.mrb[178].mxu0 }
 0x3bd   :  { %v4238_v16 = vadd.f32 %v4139_v52, %v12720_v55  ;;  %v6437_v12 = vpop.eup %6436  ;;  %v4092_v59 = vadd.f32 1.0, %v6435_v42  ;;  %v4505_v49 = vadd.f32 %v4504_v21, %v4503_v31  ;;  %v4514_v44 = vadd.f32 %v4513_v40, %v4512_v10  ;;  %12722 = vst [vmem:[#allocation12_spill] sm:$0xff] %v10868_v37  ;;  %v10873_v17 = vpop.f32.mrb[179].mxu0 }
 0x3be   :  { %v4239_v5 = vadd.f32 %v4141_v60, %v12721_v38  ;;  %v6439_v7 = vpop.eup %6438  ;;  %v4135_v56 = vmul.f32 0.6931472, %v6437_v12  ;;  %6452 = vlog2.f32 %v4113_v19  ;;  %v4958_v52 = vadd.f32 0.5, %v4904_v32  ;;  %12723 = vst [vmem:[#allocation55_spill] sm:$0xff] %v10873_v17  ;;  %v10878_v31 = vpop.f32.mrb[176].mxu1 }
 0x3bf   :  { %v10871_v2 = vmul.f32 %v4238_v16, %v10543_v4  ;;  %v6441_v61 = vpop.eup %6440  ;;  %v4137_v11 = vmul.f32 0.6931472, %v6439_v7  ;;  %6454 = vlog2.f32 %v4092_v59  ;;  %v4506_v60 = vrot.slane %v4505_v49, 4  ;;  %12724 = vst [vmem:[#allocation52_spill] sm:$0xff] %v10878_v31  ;;  %v10882_v19 = vpop.f32.mrb[177].mxu1  ;;  %v12728_v7 = vld [vmem:[#allocation92_spill] sm:$0xff] }
 0x3c0   :  { %v10876_v55 = vmul.f32 %v4239_v5, %v10549_v27  ;;  %v6443_v10 = vpop.eup %6442  ;;  %v12725_v42 = vmax.f32 %v10684_v9, 0.0  ;;  %v4175_v4 = vmul.f32 0.6931472, %v6441_v61  ;;  %v4515_v16 = vrot.slane %v4514_v44, 4  ;;  %12726 = vst [vmem:[#allocation54_spill] sm:$0xff] %v10882_v19  ;;  %v10887_v17 = vpop.f32.mrb[178].mxu1 }
 0x3c1   :  { %v4976_v40 = vadd.f32 0.5, %v4922_v26  ;;  %v6445_v32 = vpop.eup %6444  ;;  %v12727_v12 = vmax.f32 %v10688_v14, 0.0  ;;  %v4093_v27 = vadd.f32 1.0, %v6443_v10  ;;  %v4507_v5 = vadd.f32 %v4506_v60, %v4505_v49  ;;  %12729 = vst [vmem:[#allocation61_spill] sm:$0xff] %v10887_v17 }
 0x3c2   :  { %v4236_v21 = vadd.f32 %v4135_v56, %v12725_v42  ;;  %v5012_v59 = vmul.f32 %v4958_v52, %v12728_v7  ;;  %v6447_v31 = vpop.eup %6446  ;;  %v12730_v9 = vmax.f32 %v10694_v24, 0.0  ;;  %v4177_v26 = vmul.f32 0.6931472, %v6445_v32  ;;  %v10894_v42 = vpop.f32.mrb[179].mxu1  ;;  %v12739_v7 = vld [vmem:[#allocation69_spill] sm:$0xff] }
 0x3c3   :  { %v4237_v38 = vadd.f32 %v4137_v11, %v12727_v12  ;;  %v4516_v61 = vadd.f32 %v4515_v16, %v4514_v44  ;;  %12731 = vst [vmem:[#allocation28_spill] sm:$0xff] %v10894_v42  ;;  %v6449_v19 = vpop.eup %6448  ;;  %6456 = vlog2.f32 %v4093_v27  ;;  %v4110_v49 = vadd.f32 1.0, %v6447_v31  ;;  %v10899_v11 = vpop.f32.mrb[180].mxu0  ;;  %v12736_v12 = vld [vmem:[#allocation19_spill] sm:$0xff] }
 0x3c4   :  { %v10890_v37 = vmul.f32 %v4236_v21, %v10564_v34  ;;  %v4256_v56 = vadd.f32 %v4175_v4, %v12730_v9  ;;  %v4508_v52 = vrot.slane %v4507_v5, 2  ;;  %12732 = vst [vmem:[#allocation30_spill] sm:$0xff] %v10899_v11  ;;  %v12733_v10 = vmax.f32 %v10702_v47, 0.0  ;;  %v12734_v4 = vld [vmem:[#allocation170_spill] sm:$0xff]  ;;  %v10905_v16 = vpop.f32.mrb[181].mxu0 }
 0x3c5   :  { %v10897_v14 = vmul.f32 %v4237_v38, %v10575_v57  ;;  %v6451_v60 = vpop.eup %6450  ;;  %v4111_v21 = vadd.f32 1.0, %v6449_v19  ;;  %v5030_v44 = vmul.f32 %v4976_v40, %v12734_v4  ;;  %12735 = vst [vmem:[#allocation60_spill] sm:$0xff] %v10905_v16  ;;  %6458 = vlog2.f32 %v4110_v49  ;;  %v10908_v31 = vpop.f32.mrb[182].mxu0  ;;  %v12740_v9 = vld [vmem:[#allocation94_spill] sm:$0xff] }
 0x3c6   :  { %v4637_v34 = vmul.f32 %v4256_v56, %v10553_v46  ;;  %v4257_v24 = vadd.f32 %v4177_v26, %v12733_v10  ;;  %v4211_v32 = vmul.f32 0.6931472, %v6451_v60  ;;  %v4509_v57 = vadd.f32 %v4508_v52, %v4507_v5  ;;  %12737 = vst [vmem:[#allocation27_spill] sm:$0xff] %v10908_v31  ;;  %v12738_v46 = vld [vmem:[#allocation85_spill] sm:$0xff]  ;;  %v10916_v56 = vpop.f32.mrb[183].mxu0  ;;  %v10922_v60 = vpop.f32.mrb[180].mxu1 }
 0x3c7   :  { %v5336_v38 = vmul.f32 %v12736_v12, %v5012_v59  ;;  %6460 = vlog2.f32 %v4111_v21  ;;  %v4366_v47 = vadd.f32 %v12739_v7, %v12738_v46  ;;  %v5354_v19 = vmul.f32 %v12740_v9, %v5030_v44  ;;  %12741 = vst [vmem:[#allocation29_spill] sm:$0xff] %v10916_v56  ;;  %v12743_v59 = vld [vmem:[#allocation20_spill] sm:$0xff]  ;;  %12744 = vst [vmem:[#allocation34_spill] sm:$0xff] %v10922_v60  ;;  %v12746_v44 = vld [vmem:[#allocation83_spill] sm:$0xff]  ;;  %v10929_v46 = vpop.f32.mrb[181].mxu1 }
 0x3c8   :  { %v10911_v27 = vmul.f32 %v4257_v24, %v10559_v8  ;;  %v12742_v40 = vmax.f32 %v10729_v48, 0.0  ;;  %v4510_v49 = vrot.slane %v4509_v57, 1  ;;  %v4517_v5 = vrot.slane %v4516_v61, 2  ;;  %v6453_v8 = vpop.eup %6452  ;;  %v12745_v24 = vld [vmem:[#allocation99_spill] sm:$0xff]  ;;  %12747 = vst [vmem:[#allocation33_spill] sm:$0xff] %v10929_v46  ;;  %v12751_v31 = vld [vmem:[#allocation86_spill] sm:$0xff] }
 0x3c9   :  { %v5335_v52 = vmul.f32 %v12743_v59, %v10658_v30  ;;  %v5390_v10 = vpack.c.bf16 %v5354_v19, %v5336_v38  ;;  %v5353_v21 = vmul.f32 %v12745_v24, %v10661_v53  ;;  %v4940_v4 = vmul.f32 0.5, %v10631_v33  ;;  %v6455_v48 = vpop.eup %6454  ;;  %v10932_v59 = vpop.f32.mrb[182].mxu1  ;;  %v12843_v11 = vld [vmem:[#allocation26_spill] sm:$0xff] }
 0x3ca   :  { %v4274_v26 = vadd.f32 %v4211_v32, %v12742_v40  ;;  %v4341_v12 = vadd.f32 %v12714_v35, %v12746_v44  ;;  %v4213_v9 = vmul.f32 0.6931472, %v6453_v8  ;;  %v4511_v40 = vadd.f32 %v4510_v49, %v4509_v57  ;;  %12748 = vst [vmem:[#allocation57_spill] sm:$0xff] %v10932_v59  ;;  %v10935_v33 = vpop.f32.mrb[183].mxu1  ;;  %v10941_v57 = vpop.f32.mrb[184].mxu0  ;;  %v12754_v49 = vld [vmem:[#allocation48_spill] sm:$0xff] }
 0x3cb   :  { %v4518_v30 = vadd.f32 %v4517_v5, %v4516_v61  ;;  %v4171_v60 = vmul.f32 0.6931472, %v6455_v48  ;;  %5579 = vmatprep.subr.bf16.mxu1 %v5390_v10  ;;  %v5389_v38 = vpack.c.bf16 %v5353_v21, %v5335_v52  ;;  %v4994_v19 = vadd.f32 0.5, %v4940_v4  ;;  %12749 = vst [vmem:[#allocation59_spill] sm:$0xff] %v10935_v33  ;;  %12752 = vst [vmem:[#allocation56_spill] sm:$0xff] %v10941_v57  ;;  %v12755_v52 = vld [vmem:[#allocation49_spill] sm:$0xff] }
 0x3cc   :  { %v4655_v32 = vmul.f32 %v4274_v26, %v10627_v1  ;;  %v4418_v53 = vmul.f32 %v4341_v12, %v10671_v50  ;;  %v12750_v24 = vmax.f32 %v10750_v3, 0.0  ;;  %v4601_v46 = vadd.f32 %v4511_v40, %v4366_v47  ;;  %v10949_v3 = vpop.f32.mrb[185].mxu0  ;;  %v12836_v33 = vld [vmem:[#allocation68_spill] sm:$0xff] }
 0x3cd   :  { %v4519_v56 = vrot.slane %v4518_v30, 1  ;;  %v4342_v1 = vadd.f32 %v12714_v35, %v12751_v31  ;;  %v12753_v61 = vmax.f32 %v10758_v43, 0.0  ;;  %v4367_v5 = vadd.f32 %v12739_v7, %v12754_v49  ;;  %5580 = vmatpush1.bf16.msra.mxu1 %v5389_v38  ;;  %12756 = vst [vmem:[#allocation58_spill] sm:$0xff] %v10949_v3  ;;  %v6457_v47 = vpop.eup %6456  ;;  %v10954_v43 = vpop.f32.mrb[186].mxu0 }
 0x3ce   :  { %v4275_v44 = vadd.f32 %v4213_v9, %v12750_v24  ;;  %v5048_v8 = vmul.f32 %v4994_v19, %v12755_v52  ;;  %v4486_v10 = vsel %vm4431_vm4, %v4418_v53, 0.0  ;;  %v4700_v31 = vrot.slane %v4601_v46, %v12599_v29  ;;  %12757 = vst [vmem:[#allocation63_spill] sm:$0xff] %v10954_v43  ;;  %v12758_v9 = vld [vmem:[#allocation95_spill] sm:$0xff]  ;;  %v10961_v19 = vpop.f32.mrb[187].mxu0 }
 0x3cf   :  { %v4254_v26 = vadd.f32 %v4171_v60, %v12753_v61  ;;  %v4520_v4 = vadd.f32 %v4519_v56, %v4518_v30  ;;  %v4487_v12 = vadd.f32 %v4486_v10, %v10845_v6  ;;  %v4173_v48 = vmul.f32 0.6931472, %v6457_v47  ;;  %12759 = vst [vmem:[#allocation101_spill] sm:$0xff] %v10961_v19  ;;  %v6459_v53 = vpop.eup %6458  ;;  %v10970_v30 = vpop.f32.mrb[184].mxu1  ;;  %v12831_v43 = vld [vmem:[#allocation67_spill] sm:$0xff] }
 0x3d0   :  { %v4656_v21 = vmul.f32 %v4275_v44, %v10637_v0  ;;  %v5372_v40 = vmul.f32 %v12758_v9, %v5048_v8  ;;  %v4419_v38 = vmul.f32 %v4342_v1, %v10678_v23  ;;  %v10964_v0 = vmul.f32 %v4700_v31, %v10871_v2  ;;  %12761 = vst [vmem:[#allocation100_spill] sm:$0xff] %v10970_v30  ;;  %v10974_v49 = vpop.f32.mrb[185].mxu1 }
 0x3d1   :  { %v10957_v60 = vmul.f32 %v4254_v26, %v10601_v63  ;;  %v10966_v46 = vmul.f32 %v4700_v31, %v4637_v34  ;;  %v10968_v56 = vmul.f32 %v4700_v31, %v4655_v32  ;;  %v4602_v6 = vadd.f32 %v4520_v4, %v4367_v5  ;;  %v6461_v63 = vpop.eup %6460  ;;  %12763 = vst [vmem:[#allocation103_spill] sm:$0xff] %v10974_v49  ;;  %v10979_v8 = vpop.f32.mrb[186].mxu1  ;;  %v12817_v49 = vld [vmem:[#allocation148_spill] sm:$0xff] }
 0x3d2   :  { %v12762_v24 = vmax.f32 %v10762_v36, 0.0  ;;  %v4207_v61 = vmul.f32 0.6931472, %v6459_v53  ;;  %v5408_v26 = vpack.c.bf16 %v5372_v40, %v5372_v40  ;;  %v4488_v1 = vrot.slane %v4487_v12, 4  ;;  %12764 = vst [vmem:[#allocation62_spill] sm:$0xff] %v10979_v8  ;;  %v10988_v4 = vpop.f32.mrb[187].mxu1 }
 0x3d3   :  { %12760 = vst [vmem:[#allocation104_spill] sm:$0xff] %v10968_v56  ;;  %v4209_v52 = vmul.f32 0.6931472, %v6461_v63  ;;  %v4799_v2 = vmul.f32 0.5, %v10964_v0  ;;  %v4817_v34 = vmul.f32 0.5, %v10966_v46  ;;  %v4835_v32 = vmul.f32 0.5, %v10968_v56 }
 0x3d4   :  { %v4255_v44 = vadd.f32 %v4173_v48, %v12762_v24  ;;  %v12765_v36 = vmax.f32 %v10766_v18, 0.0  ;;  %v4704_v47 = vrot.slane %v4602_v6, %v12599_v29  ;;  %6044 = vmatprep.subr.msk.bf16.mxu1 %vm135_vm0, %v5408_v26  ;;  %v4489_v31 = vadd.f32 %v4488_v1, %v4487_v12  ;;  %12766 = vst [vmem:[#allocation113_spill] sm:$0xff] %v10988_v4  ;;  %v12774_v1 = vld [vmem:[#allocation169_spill] sm:$0xff]  ;;  %v12847_v56 = vld [vmem:[#allocation98_spill] sm:$0xff] }
 0x3d5   :  { %v12767_v48 = vmax.f32 %v10784_v15, 0.0  ;;  %6462 = vtanh.f32 %v4799_v2  ;;  %v4495_v40 = vsel %vm4431_vm4, %v4419_v38, 0.0  ;;  %v4939_v53 = vmul.f32 0.5, %v10596_v54 }
 0x3d6   :  { %v10982_v5 = vmul.f32 %v4255_v44, %v10611_v13  ;;  %v4272_v10 = vadd.f32 %v4207_v61, %v12765_v36  ;;  %v10994_v13 = vpop.f32.mrb[188].mxu0  ;;  %6464 = vtanh.f32 %v4817_v34  ;;  %v11000_v6 = vmul.f32 %v4704_v47, %v10876_v55  ;;  %v11026_v26 = vpop.f32.mrb[188].mxu1  ;;  %v12776_v36 = vld [vmem:[#allocation77_spill] sm:$0xff] }
 0x3d7   :  { %v4273_v9 = vadd.f32 %v4209_v52, %v12767_v48  ;;  %12768 = vst [vmem:[#allocation112_spill] sm:$0xff] %v10994_v13  ;;  %v11003_v12 = vmul.f32 %v4704_v47, %v10911_v27  ;;  %v11005_v63 = vpop.f32.mrb[189].mxu0  ;;  %6466 = vtanh.f32 %v10642_v62  ;;  %v11011_v54 = vmul.f32 %v4704_v47, %v4656_v21  ;;  %12773 = vst [vmem:[#allocation152_spill] sm:$0xff] %v11026_v26  ;;  %v11030_v2 = vpop.f32.mrb[189].mxu1  ;;  %v12779_v48 = vld [vmem:[#allocation162_spill] sm:$0xff] }
 0x3d8   :  { %v10997_v18 = vmul.f32 %v4272_v10, %v10671_v50  ;;  %12769 = vst [vmem:[#allocation107_spill] sm:$0xff] %v11005_v63  ;;  %v4496_v38 = vadd.f32 %v4495_v40, %v10854_v25  ;;  %v11014_v50 = vpop.f32.mrb[190].mxu0  ;;  %v5009_v55 = vmul.f32 %v10740_v41, %v10589_v22  ;;  %v4800_v24 = vmul.f32 0.5, %v11000_v6  ;;  %12775 = vst [vmem:[#allocation80_spill] sm:$0xff] %v11030_v2  ;;  %v12778_v10 = vld [vmem:[#allocation51_spill] sm:$0xff]  ;;  %v12781_v40 = vld [vmem:[#allocation97_spill] sm:$0xff] }
 0x3d9   :  { %v11009_v15 = vmul.f32 %v4273_v9, %v10678_v23  ;;  %12770 = vst [vmem:[#allocation111_spill] sm:$0xff] %v11011_v54  ;;  %12771 = vst [vmem:[#allocation122_spill] sm:$0xff] %v11014_v50  ;;  %v4490_v27 = vrot.slane %v4489_v31, 2  ;;  %v4993_v44 = vadd.f32 0.5, %v4939_v53  ;;  %v11019_v61 = vpop.f32.mrb[191].mxu0  ;;  %v5027_v62 = vmul.f32 %v10746_v28, %v10592_v45  ;;  %v12777_v28 = vld [vmem:[#allocation135_spill] sm:$0xff] }
 0x3da   :  { %12772 = vst [vmem:[#allocation35_spill] sm:$0xff] %v11019_v61  ;;  %v4818_v23 = vmul.f32 0.5, %v11003_v12  ;;  %v4497_v21 = vrot.slane %v4496_v38, 4  ;;  %v4364_v25 = vadd.f32 %v12739_v7, %v10579_v58  ;;  %6468 = vtanh.f32 %v4835_v32  ;;  %v11039_v9 = vpop.f32.mrb[190].mxu1  ;;  %v12782_v53 = vld [vmem:[#allocation164_spill] sm:$0xff]  ;;  %v12790_v50 = vld [vmem:[#allocation81_spill] sm:$0xff] }
 0x3db   :  { %v4836_v22 = vmul.f32 0.5, %v11011_v54  ;;  %v4491_v41 = vadd.f32 %v4490_v27, %v4489_v31  ;;  %v5047_v52 = vmul.f32 %v4993_v44, %v12774_v1  ;;  %v4365_v45 = vadd.f32 %v12739_v7, %v12776_v36  ;;  %12780 = vst [vmem:[#allocation167_spill] sm:$0xff] %v11039_v9  ;;  %v11043_v44 = vpop.f32.mrb[191].mxu1 }
 0x3dc   :  { %v4498_v34 = vadd.f32 %v4497_v21, %v4496_v38  ;;  %v11036_v47 = vadd.f32 %v12778_v10, %v12777_v28  ;;  %v4902_v58 = vmul.f32 0.5, %v12779_v48  ;;  %6470 = vtanh.f32 %v4800_v24  ;;  %12783 = vst [vmem:[#allocation74_spill] sm:$0xff] %v11043_v44  ;;  %v12784_v21 = vld [vmem:[#allocation138_spill] sm:$0xff]  ;;  %v11049_v28 = vpop.f32.mrb[192].mxu0  ;;  %v12786_v24 = vld [vmem:[#allocation96_spill] sm:$0xff] }
 0x3dd   :  { %v4492_v32 = vrot.slane %v4491_v41, 1  ;;  %v5371_v31 = vmul.f32 %v12781_v40, %v5047_v52  ;;  %v4920_v27 = vmul.f32 0.5, %v12782_v53  ;;  %6472 = vtanh.f32 %v4818_v23  ;;  %12785 = vst [vmem:[#allocation75_spill] sm:$0xff] %v11049_v28  ;;  %v11052_v61 = vpop.f32.mrb[193].mxu0  ;;  %v12788_v53 = vld [vmem:[#allocation139_spill] sm:$0xff]  ;;  %v12789_v44 = vld [vmem:[#allocation90_spill] sm:$0xff] }
 0x3de   :  { %v4499_v38 = vrot.slane %v4498_v34, 2  ;;  %v11047_v1 = vadd.f32 %v12778_v10, %v12784_v21  ;;  %v4956_v36 = vadd.f32 0.5, %v4902_v58  ;;  %v5333_v26 = vmul.f32 %v12786_v24, %v5009_v55  ;;  %12787 = vst [vmem:[#allocation76_spill] sm:$0xff] %v11052_v61  ;;  %v12791_v21 = vld [vmem:[#allocation22_spill] sm:$0xff]  ;;  %v11060_v58 = vpop.f32.mrb[194].mxu0  ;;  %v12795_v61 = vld [vmem:[#allocation105_spill] sm:$0xff] }
 0x3df   :  { %v4493_v48 = vadd.f32 %v4492_v32, %v4491_v41  ;;  %v5407_v2 = vpack.c.bf16 %v5371_v31, %v5371_v31  ;;  %v4974_v9 = vadd.f32 0.5, %v4920_v27  ;;  %v6463_v52 = vpop.eup %6462  ;;  %v11056_v23 = vadd.f32 %v12789_v44, %v12788_v53  ;;  %12792 = vst [vmem:[#allocation44_spill] sm:$0xff] %v11060_v58  ;;  %v12793_v55 = vld [vmem:[#allocation82_spill] sm:$0xff]  ;;  %v11064_v24 = vpop.f32.mrb[195].mxu0 }
 0x3e0   :  { %v4500_v40 = vadd.f32 %v4499_v38, %v4498_v34  ;;  %v5010_v63 = vmul.f32 %v4956_v36, %v12790_v50  ;;  %v5351_v13 = vmul.f32 %v12791_v21, %v5027_v62  ;;  %v6465_v28 = vpop.eup %6464  ;;  %v4907_v41 = vmul.f32 0.5, %v6463_v52  ;;  %12794 = vst [vmem:[#allocation78_spill] sm:$0xff] %v11064_v24  ;;  %v11067_v36 = vpop.f32.mrb[192].mxu1  ;;  %v12797_v52 = vld [vmem:[#allocation21_spill] sm:$0xff] }
 0x3e1   :  { %v4599_v32 = vadd.f32 %v4493_v48, %v4364_v25  ;;  %v5452_v31 = vsel %vm135_vm0, %v5407_v2, 0  ;;  %v5028_v27 = vmul.f32 %v4974_v9, %v12793_v55  ;;  %v6467_v34 = vpop.eup %6466  ;;  %v4925_v38 = vmul.f32 0.5, %v6465_v28  ;;  %12796 = vst [vmem:[#allocation14_spill] sm:$0xff] %v11067_v36  ;;  %v12798_v48 = vld [vmem:[#allocation3_spill] sm:$0xff]  ;;  %v11072_v21 = vpop.f32.mrb[193].mxu1  ;;  %v12800_v55 = vld [vmem:[#allocation89_spill] sm:$0xff] }
 0x3e2   :  { %5582 = vmatpush1.bf16.msra.mxu1 %v5452_v31  ;;  %v4501_v53 = vrot.slane %v4500_v40, 1  ;;  %v5334_v4 = vmul.f32 %v12795_v61, %v5010_v63  ;;  %v5387_v50 = vpack.c.bf16 %v5351_v13, %v5333_v26  ;;  %6474 = vtanh.f32 %v4836_v22  ;;  %12799 = vst [vmem:[#allocation17_spill] sm:$0xff] %v11072_v21  ;;  %v12801_v31 = vld [vmem:[#allocation91_spill] sm:$0xff]  ;;  %v12802_v13 = vld [vmem:[#allocation144_spill] sm:$0xff]  ;;  %v11086_v26 = vpop.f32.mrb[194].mxu1 }
 0x3e3   :  { %v4692_v62 = vrot.slane %v4599_v32, %v12599_v29  ;;  %v5352_v25 = vmul.f32 %v12797_v52, %v5028_v27  ;;  %v4938_v2 = vmul.f32 0.5, %v12798_v48  ;;  %v11076_v28 = vadd.f32 %v12789_v44, %v12800_v55  ;;  %12803 = vst [vmem:[#allocation66_spill] sm:$0xff] %v11086_v26  ;;  %v12806_v52 = vld [vmem:[#allocation160_spill] sm:$0xff]  ;;  %v11101_v48 = vpop.f32.mrb[195].mxu1 }
 0x3e4   :  { %v4502_v9 = vadd.f32 %v4501_v53, %v4500_v40  ;;  %v11080_v63 = vadd.f32 %v12778_v10, %v12801_v31  ;;  %v11084_v61 = vadd.f32 %v12778_v10, %v12802_v13  ;;  %v11088_v22 = vpop.eup %6468  ;;  %v4961_v32 = vadd.f32 0.5, %v4907_v41  ;;  %12807 = vst [vmem:[#allocation117_spill] sm:$0xff] %v11101_v48  ;;  %v11104_v41 = vpop.f32.mrb[196].mxu0 }
 0x3e5   :  { %12804 = vst [vmem:[#allocation73_spill] sm:$0xff] %v11088_v22  ;;  %v11091_v27 = vmul.f32 %v4692_v62, %v10890_v37  ;;  %v11094_v40 = vmul.f32 %v4692_v62, %v10957_v60  ;;  %v11097_v53 = vmul.f32 %v4692_v62, %v10997_v18  ;;  %6045 = vmatmul.mubr.msk.bf16.vlgmr.msra.gmra.mrb[200].mxu1 %vm2843_vm3, %v12806_v52  ;;  %v4979_v55 = vadd.f32 0.5, %v4925_v38  ;;  %v12810_v62 = vld [vmem:[#allocation146_spill] sm:$0xff]  ;;  %v11114_v48 = vpop.f32.mrb[197].mxu0 }
 0x3e6   :  { %v4600_v31 = vadd.f32 %v4502_v9, %v4365_v45  ;;  %v5388_v13 = vpack.c.bf16 %v5352_v25, %v5334_v4  ;;  %v4992_v26 = vadd.f32 0.5, %v4938_v2  ;;  %v12808_v21 = vmov 0   ;;  %12809 = vst [vmem:[#allocation124_spill] sm:$0xff] %v11104_v41  ;;  %v11106_v37 = vpop.eup %6470  ;;  %12811 = vst [vmem:[#allocation145_spill] sm:$0xff] %v11114_v48  ;;  %v12812_v25 = vld [vmem:[#allocation133_spill] sm:$0xff]  ;;  %v12813_v9 = vld [vmem:[#allocation136_spill] sm:$0xff] }
 0x3e7   :  { %12805 = vst [vmem:[#allocation88_spill] sm:$0xff] %v11097_v53  ;;  %5697 = vmatprep.mubr.bf16.mxu1 %v12808_v21  ;;  %v4797_v60 = vmul.f32 0.5, %v11091_v27  ;;  %v4815_v18 = vmul.f32 0.5, %v11094_v40  ;;  %v11112_v36 = vadd.f32 %v12789_v44, %v12810_v62  ;;  %v4937_v24 = vmul.f32 0.5, %v6467_v34  ;;  %v11116_v45 = vpop.eup %6472  ;;  %v11125_v58 = vpop.f32.mrb[198].mxu0  ;;  %v12815_v62 = vld [vmem:[#allocation143_spill] sm:$0xff] }
 0x3e8   :  { %v4833_v4 = vmul.f32 0.5, %v11097_v53  ;;  %v4696_v38 = vrot.slane %v4600_v31, %v12599_v29  ;;  %5536 = vmatprep.subr.bf16.mxu0 %v5388_v13  ;;  %v5046_v2 = vmul.f32 %v4992_v26, %v12812_v25  ;;  %v11123_v41 = vadd.f32 %v12789_v44, %v12813_v9  ;;  %12814 = vst [vmem:[#allocation165_spill] sm:$0xff] %v11125_v58  ;;  %v12816_v48 = vld [vmem:[#allocation36_spill] sm:$0xff]  ;;  %v11135_v31 = vpop.f32.mrb[199].mxu0  ;;  %v12823_v9 = vld [vmem:[#allocation79_spill] sm:$0xff]  ;;  %v12828_v53 = vld [vmem:[#allocation161_spill] sm:$0xff] }
 0x3e9   :  { %6476 = vtanh.f32 %v4797_v60  ;;  %5537 = vmatpush1.bf16.msra.mxu0 %v5387_v50  ;;  %v4991_v34 = vadd.f32 0.5, %v4937_v24  ;;  %v11129_v8 = vadd.f32 %v12816_v48, %v12815_v62  ;;  %v11133_v30 = vadd.f32 %v12816_v48, %v12817_v49  ;;  %12818 = vst [vmem:[#allocation18_spill] sm:$0xff] %v11135_v31  ;;  %v12822_v49 = vld [vmem:[#allocation37_spill] sm:$0xff]  ;;  %v12825_v31 = vld [vmem:[#allocation116_spill] sm:$0xff] }
 0x3ea   :  { %6478 = vtanh.f32 %v4815_v18  ;;  %v11138_v26 = vmul.f32 %v4696_v38, %v10897_v14  ;;  %v11141_v13 = vmul.f32 %v4696_v38, %v10982_v5  ;;  %v11144_v50 = vmul.f32 %v4696_v38, %v11009_v15  ;;  %v12824_v14 = vld [vmem:[#allocation137_spill] sm:$0xff]  ;;  %v12827_v38 = vld [vmem:[#allocation38_spill] sm:$0xff] }
 0x3eb   :  { %v11147_v24 = vmul.f32 %v4961_v32, %v10964_v0  ;;  %v11150_v60 = vmul.f32 %v4979_v55, %v10966_v46  ;;  %v5370_v25 = vmul.f32 %v12822_v49, %v5046_v2  ;;  %v5045_v62 = vmul.f32 %v4991_v34, %v12823_v9  ;;  %v12826_v5 = vld [vmem:[#allocation141_spill] sm:$0xff] }
 0x3ec   :  { %12819 = vst [vmem:[#allocation110_spill] sm:$0xff] %v11138_v26  ;;  %12820 = vst [vmem:[#allocation15_spill] sm:$0xff] %v11141_v13  ;;  %v4798_v18 = vmul.f32 0.5, %v11138_v26  ;;  %v11157_v58 = vadd.f32 %v12825_v31, %v12824_v14  ;;  %v11161_v15 = vadd.f32 %v12825_v31, %v12826_v5  ;;  %v3862_v0 = vand.u32 2147483647, %v11129_v8  ;;  %v11164_v32 = vpop.eup %6474 }
 0x3ed   :  { %12821 = vst [vmem:[#allocation166_spill] sm:$0xff] %v11144_v50  ;;  %v4816_v46 = vmul.f32 0.5, %v11141_v13  ;;  %v5406_v55 = vpack.c.bf16 %v5370_v25, %v5370_v25  ;;  %v5369_v2 = vmul.f32 %v12827_v38, %v5045_v62  ;;  %v3863_v34 = vand.u32 2147483647, %v11133_v30  ;;  %v12829_v62 = vld [vmem:[#allocation163_spill] sm:$0xff]  ;;  %v12830_v38 = vld [vmem:[#allocation121_spill] sm:$0xff] }
 0x3ee   :  { %6480 = vtanh.f32 %v4833_v4  ;;  %v4834_v49 = vmul.f32 0.5, %v11144_v50  ;;  %v3916_v14 = vsub.f32 0.0, %v3862_v0  ;;  %v11175_v57 = vadd.f32 %v12816_v48, %v12828_v53  ;;  %v12832_v53 = vld [vmem:[#allocation147_spill] sm:$0xff]  ;;  %v12835_v50 = vld [vmem:[#allocation140_spill] sm:$0xff] }
 0x3ef   :  { %6042 = vmatprep.subr.msk.bf16.mxu0 %vm135_vm0, %v5406_v55  ;;  %v5405_v5 = vpack.c.bf16 %v5369_v2, %v5369_v2  ;;  %v3917_v3 = vsub.f32 0.0, %v3863_v34  ;;  %6482 = vtanh.f32 %v4798_v18  ;;  %v11179_v4 = vadd.f32 %v12816_v48, %v12829_v62  ;;  %v12833_v34 = vld [vmem:[#allocation159_spill] sm:$0xff] }
 0x3f0   :  { %v3980_v25 = vmul.f32 1.442695, %v3916_v14  ;;  %v11183_v9 = vadd.f32 %v12831_v43, %v12830_v38  ;;  %6484 = vtanh.f32 %v4816_v46  ;;  %v3864_v2 = vand.u32 2147483647, %v11175_v57 }
 0x3f1   :  { %v5446_v0 = vsel %vm135_vm0, %v5405_v5, 0  ;;  %v3982_v55 = vmul.f32 1.442695, %v3917_v3  ;;  %v11189_v18 = vadd.f32 %v12825_v31, %v12832_v53  ;;  %v11193_v14 = vadd.f32 %v12825_v31, %v12833_v34  ;;  %v12834_v3 = vld [vmem:[#allocation131_spill] sm:$0xff]  ;;  %v12837_v31 = vld [vmem:[#allocation2_spill] sm:$0xff] }
 0x3f2   :  { %5539 = vmatpush1.bf16.msra.mxu0 %v5446_v0  ;;  %6486 = vpow2.f32 %v3980_v25  ;;  %v3865_v62 = vand.u32 2147483647, %v11179_v4  ;;  %v3918_v46 = vsub.f32 0.0, %v3864_v2  ;;  %v3880_v5 = vand.u32 2147483647, %v11183_v9 }
 0x3f3   :  { %v6477_v38 = vpop.eup %6476  ;;  %6488 = vpow2.f32 %v3982_v55  ;;  %v11199_v19 = vadd.f32 %v12831_v43, %v12834_v3  ;;  %v11203_v48 = vadd.f32 %v12836_v33, %v12835_v50  ;;  %v11210_v59 = vadd.f32 %v12836_v33, %v12837_v31 }
 0x3f4   :  { %v6479_v25 = vpop.eup %6478  ;;  %v4905_v0 = vmul.f32 0.5, %v6477_v38  ;;  %6490 = vtanh.f32 %v4834_v49  ;;  %v3919_v53 = vsub.f32 0.0, %v3865_v62  ;;  %v3984_v2 = vmul.f32 1.442695, %v3918_v46 }
 0x3f5   :  { %6043 = vmatmul.mubr.msk.bf16.vlgmr.msra.gmra.mrb[200].mxu0 %vm2843_vm3, %v12806_v52  ;;  %v3934_v34 = vsub.f32 0.0, %v3880_v5  ;;  %v3881_v62 = vand.u32 2147483647, %v11199_v19  ;;  %v11216_v50 = vmul.f32 0.5, %v6479_v25  ;;  %v3898_v46 = vand.u32 2147483647, %v11203_v48 }
 0x3f6   :  { %v3986_v38 = vmul.f32 1.442695, %v3919_v53  ;;  %5654 = vmatprep.mubr.bf16.mxu0 %v12808_v21  ;;  %6492 = vpow2.f32 %v3984_v2  ;;  %v11221_v55 = vadd.f32 0.5, %v4905_v0  ;;  %v3899_v21 = vand.u32 2147483647, %v11210_v59 }
 0x3f7   :  { %v4016_v52 = vmul.f32 1.442695, %v3934_v34  ;;  %v3935_v53 = vsub.f32 0.0, %v3881_v62  ;;  %v3952_v3 = vsub.f32 0.0, %v3898_v46  ;;  %v12839_v34 = vld [vmem:[#allocation24_spill] sm:$0xff] }
 0x3f8   :  { %v11219_v5 = vpop.eup %6480  ;;  %6494 = vpow2.f32 %v3986_v38  ;;  %v11230_v16 = vadd.f32 %v12831_v43, %v12839_v34  ;;  %v12841_v38 = vld [vmem:[#allocation4_spill] sm:$0xff]  ;;  %v3953_v31 = vsub.f32 0.0, %v3899_v21 }
 0x3f9   :  { %12838 = vst [vmem:[#allocation168_spill] sm:$0xff] %v11219_v5  ;;  %6496 = vpow2.f32 %v4016_v52  ;;  %v11226_v25 = vpop.eup %6482  ;;  %v4018_v2 = vmul.f32 1.442695, %v3935_v53  ;;  %v12840_v5 = vld [vmem:[#allocation5_spill] sm:$0xff]  ;;  %v11238_v62 = vadd.f32 %v12836_v33, %v12841_v38  ;;  %v4052_v46 = vmul.f32 1.442695, %v3952_v3 }
 0x3fa   :  { %v11234_v0 = vadd.f32 %v12831_v43, %v12840_v5  ;;  %v11240_v52 = vpop.eup %6484  ;;  %v11245_v53 = vadd.f32 %v12836_v33, %v12843_v11  ;;  %v3882_v5 = vand.u32 2147483647, %v11230_v16  ;;  %v12844_v43 = vld [vmem:[#allocation23_spill] sm:$0xff]  ;;  %v4054_v3 = vmul.f32 1.442695, %v3953_v31 }
 0x3fb   :  { %12842 = vst [vmem:[#allocation87_spill] sm:$0xff] %v11240_v52  ;;  %6498 = vpow2.f32 %v4018_v2  ;;  %v4309_v38 = vadd.f32 %v12701_v20, %v12844_v43  ;;  %v3900_v2 = vand.u32 2147483647, %v11238_v62 }
 0x3fc   :  { %v6487_v34 = vpop.eup %6486  ;;  %6500 = vpow2.f32 %v4052_v46  ;;  %v3883_v49 = vand.u32 2147483647, %v11234_v0  ;;  %v3936_v11 = vsub.f32 0.0, %v3882_v5  ;;  %v3901_v43 = vand.u32 2147483647, %v11245_v53 }
 0x3fd   :  { %v6489_v44 = vpop.eup %6488  ;;  %v4078_v17 = vadd.f32 1.0, %v6487_v34  ;;  %v3954_v46 = vsub.f32 0.0, %v3900_v2  ;;  %v4386_v31 = vmul.f32 %v4309_v38, %v11036_v47  ;;  %v4310_v5 = vadd.f32 %v12701_v20, %v10803_v39  ;;  %v12848_v2 = vld [vmem:[#allocation10_spill] sm:$0xff] }
 0x3fe   :  { %v11252_v21 = vpop.eup %6490  ;;  %v4079_v10 = vadd.f32 1.0, %v6489_v44  ;;  %v3937_v42 = vsub.f32 0.0, %v3883_v49  ;;  %v4020_v34 = vmul.f32 1.442695, %v3936_v11  ;;  %v3955_v44 = vsub.f32 0.0, %v3901_v43  ;;  %v12846_v49 = vld [vmem:[#allocation11_spill] sm:$0xff] }
 0x3ff   :  { %12845 = vst [vmem:[#allocation50_spill] sm:$0xff] %v11252_v21  ;;  %6502 = vlog2.f32 %v4078_v17  ;;  %v4056_v17 = vmul.f32 1.442695, %v3954_v46  ;;  %v4327_v22 = vadd.f32 %v12847_v56, %v12846_v49  ;;  %v4387_v38 = vmul.f32 %v4310_v5, %v11047_v1  ;;  %v12851_v49 = vld [vmem:[#allocation31_spill] sm:$0xff] }
 0x400   :  { %6504 = vlog2.f32 %v4079_v10  ;;  %v6493_v13 = vpop.eup %6492  ;;  %v4022_v21 = vmul.f32 1.442695, %v3937_v42  ;;  %v4058_v11 = vmul.f32 1.442695, %v3955_v44  ;;  %v4328_v39 = vadd.f32 %v12847_v56, %v12848_v2 }
 0x401   :  { %6506 = vpow2.f32 %v4054_v3  ;;  %v4080_v26 = vadd.f32 1.0, %v6493_v13  ;;  %v4404_v42 = vmul.f32 %v4327_v22, %v11056_v23  ;;  %v12849_v13 = vld [vmem:[#allocation25_spill] sm:$0xff] }
 0x402   :  { %v6495_v33 = vpop.eup %6494  ;;  %6508 = vpow2.f32 %v4020_v34  ;;  %v4311_v43 = vadd.f32 %v12701_v20, %v12849_v13  ;;  %v12850_v34 = vld [vmem:[#allocation32_spill] sm:$0xff] }
 0x403   :  { %v6497_v52 = vpop.eup %6496  ;;  %v4081_v10 = vadd.f32 1.0, %v6495_v33  ;;  %6510 = vpow2.f32 %v4022_v21  ;;  %v4312_v46 = vadd.f32 %v12701_v20, %v12850_v34  ;;  %v4329_v33 = vadd.f32 %v12847_v56, %v12851_v49 }
 0x404   :  { %6512 = vlog2.f32 %v4080_v26  ;;  %v4096_v3 = vadd.f32 1.0, %v6497_v52  ;;  %v4521_v44 = vadd.f32 %v4404_v42, %v4386_v31  ;;  %v4405_v26 = vmul.f32 %v4328_v39, %v11076_v28  ;;  %v12852_v52 = vld [vmem:[#allocation7_spill] sm:$0xff]  ;;  %v12854_v39 = vld [vmem:[#allocation9_spill] sm:$0xff] }
 0x405   :  { %6514 = vlog2.f32 %v4081_v10  ;;  %v6499_v21 = vpop.eup %6498  ;;  %v4330_v22 = vadd.f32 %v12847_v56, %v12852_v52  ;;  %v4388_v10 = vmul.f32 %v4311_v43, %v11080_v63  ;;  %v4389_v13 = vmul.f32 %v4312_v46, %v11084_v61 }
 0x406   :  { %6516 = vlog2.f32 %v4096_v3  ;;  %v6501_v5 = vpop.eup %6500  ;;  %v4097_v2 = vadd.f32 1.0, %v6499_v21  ;;  %v4530_v34 = vadd.f32 %v4405_v26, %v4387_v38  ;;  %v4406_v49 = vmul.f32 %v4329_v33, %v11112_v36  ;;  %v12853_v3 = vld [vmem:[#allocation6_spill] sm:$0xff] }
 0x407   :  { %6518 = vpow2.f32 %v4056_v17  ;;  %v4114_v54 = vadd.f32 1.0, %v6501_v5  ;;  %v4407_v31 = vmul.f32 %v4330_v22, %v11123_v41  ;;  %v4345_v42 = vadd.f32 %v12714_v35, %v12853_v3 }
 0x408   :  { %6520 = vpow2.f32 %v4058_v11  ;;  %v4346_v21 = vadd.f32 %v12714_v35, %v12854_v39  ;;  %v4539_v46 = vadd.f32 %v4406_v49, %v4388_v10  ;;  %v12856_v39 = vld [vmem:[#allocation53_spill] sm:$0xff] }
 0x409   :  { %v6503_v20 = vpop.eup %6502  ;;  %6522 = vlog2.f32 %v4097_v2  ;;  %v11285_v26 = vadd.f32 %v4407_v31, %v4389_v13  ;;  %v4422_v33 = vmul.f32 %v4345_v42, %v11157_v58  ;;  %v12855_v2 = vmax.f32 %v11129_v8, 0.0 }
 0x40a   :  { %v6505_v17 = vpop.eup %6504  ;;  %v4143_v52 = vmul.f32 0.6931472, %v6503_v20  ;;  %6524 = vlog2.f32 %v4114_v54  ;;  %v4423_v22 = vmul.f32 %v4346_v21, %v11161_v15  ;;  %v11293_v20 = vadd.f32 %v12739_v7, %v12856_v39  ;;  %v12857_v54 = vld [vmem:[#allocation13_spill] sm:$0xff] }
 0x40b   :  { %v6507_v11 = vpop.eup %6506  ;;  %v4145_v38 = vmul.f32 0.6931472, %v6505_v17  ;;  %v4347_v10 = vadd.f32 %v12714_v35, %v12857_v54  ;;  %v12858_v13 = vmax.f32 %v11133_v30, 0.0  ;;  %v4522_v42 = vsel %vm4431_vm4, %v4422_v33, 0.0 }
 0x40c   :  { %v6509_v5 = vpop.eup %6508  ;;  %v4240_v3 = vadd.f32 %v4143_v52, %v12855_v2  ;;  %v4115_v56 = vadd.f32 1.0, %v6507_v11  ;;  %v4531_v21 = vsel %vm4431_vm4, %v4423_v22, 0.0  ;;  %v4523_v11 = vadd.f32 %v4522_v42, %v4521_v44 }
 0x40d   :  { %v6511_v49 = vpop.eup %6510  ;;  %v4241_v31 = vadd.f32 %v4145_v38, %v12858_v13  ;;  %v4098_v17 = vadd.f32 1.0, %v6509_v5  ;;  %v4532_v30 = vadd.f32 %v4531_v21, %v4530_v34  ;;  %v4424_v22 = vmul.f32 %v4347_v10, %v11189_v18 }
 0x40e   :  { %v6513_v43 = vpop.eup %6512  ;;  %v11302_v8 = vmul.f32 %v4240_v3, %v11036_v47  ;;  %6526 = vlog2.f32 %v4115_v56  ;;  %v4099_v52 = vadd.f32 1.0, %v6511_v49  ;;  %v4524_v33 = vrot.slane %v4523_v11, 4 }
 0x40f   :  { %v6515_v2 = vpop.eup %6514  ;;  %v11305_v39 = vmul.f32 %v4241_v31, %v11047_v1  ;;  %v4147_v54 = vmul.f32 0.6931472, %v6513_v43  ;;  %6528 = vlog2.f32 %v4098_v17  ;;  %v12859_v47 = vmax.f32 %v11175_v57, 0.0 }
 0x410   :  { %v6517_v38 = vpop.eup %6516  ;;  %v4149_v5 = vmul.f32 0.6931472, %v6515_v2  ;;  %6530 = vlog2.f32 %v4099_v52  ;;  %v4533_v49 = vrot.slane %v4532_v30, 4  ;;  %v4348_v44 = vadd.f32 %v12714_v35, %v10864_v51 }
 0x411   :  { %v6519_v13 = vpop.eup %6518  ;;  %v4242_v3 = vadd.f32 %v4147_v54, %v12859_v47  ;;  %v4179_v56 = vmul.f32 0.6931472, %v6517_v38  ;;  %v12860_v43 = vmax.f32 %v11179_v4, 0.0  ;;  %v4525_v17 = vadd.f32 %v4524_v33, %v4523_v11 }
 0x412   :  { %v6521_v1 = vpop.eup %6520  ;;  %v4116_v34 = vadd.f32 1.0, %v6519_v13  ;;  %v4540_v42 = vsel %vm4431_vm4, %v4424_v22, 0.0  ;;  %v12861_v57 = vmax.f32 %v11183_v9, 0.0  ;;  %v4534_v54 = vadd.f32 %v4533_v49, %v4532_v30 }
 0x413   :  { %v4243_v31 = vadd.f32 %v4149_v5, %v12860_v43  ;;  %v6523_v21 = vpop.eup %6522  ;;  %v11316_v10 = vmul.f32 %v4242_v3, %v11080_v63  ;;  %v4117_v2 = vadd.f32 1.0, %v6521_v1  ;;  %v4526_v4 = vrot.slane %v4525_v17, 2 }
 0x414   :  { %v4258_v52 = vadd.f32 %v4179_v56, %v12861_v57  ;;  %v6525_v38 = vpop.eup %6524  ;;  %v4181_v47 = vmul.f32 0.6931472, %v6523_v21  ;;  %6532 = vlog2.f32 %v4116_v34  ;;  %v4535_v33 = vrot.slane %v4534_v54, 2 }
 0x415   :  { %v11321_v51 = vmul.f32 %v4243_v31, %v11084_v61  ;;  %v4215_v5 = vmul.f32 0.6931472, %v6525_v38  ;;  %6534 = vlog2.f32 %v4117_v2  ;;  %v12862_v63 = vmax.f32 %v11199_v19, 0.0  ;;  %v12864_v61 = vld [vmem:[#allocation8_spill] sm:$0xff] }
 0x416   :  { %v4639_v11 = vmul.f32 %v4258_v52, %v11056_v23  ;;  %v4527_v13 = vadd.f32 %v4526_v4, %v4525_v17  ;;  %v4541_v9 = vadd.f32 %v4540_v42, %v4539_v46  ;;  %v4425_v3 = vmul.f32 %v4348_v44, %v11193_v14 }
 0x417   :  { %v4259_v22 = vadd.f32 %v4181_v47, %v12862_v63  ;;  %v12863_v30 = vmax.f32 %v11203_v48, 0.0  ;;  %v4369_v49 = vadd.f32 %v12739_v7, %v12864_v61  ;;  %v4536_v1 = vadd.f32 %v4535_v33, %v4534_v54 }
 0x418   :  { %v4908_v43 = vmul.f32 0.5, %v11106_v37  ;;  %v6527_v23 = vpop.eup %6526  ;;  %v4528_v34 = vrot.slane %v4527_v13, 1  ;;  %v4542_v21 = vrot.slane %v4541_v9, 4  ;;  %v4549_v19 = vsel %vm4431_vm4, %v4425_v3, 0.0 }
 0x419   :  { %v4276_v56 = vadd.f32 %v4215_v5, %v12863_v30  ;;  %v4640_v31 = vmul.f32 %v4259_v22, %v11076_v28  ;;  %v6529_v17 = vpop.eup %6528  ;;  %v4217_v44 = vmul.f32 0.6931472, %v6527_v23  ;;  %v4537_v42 = vrot.slane %v4536_v1, 1 }
 0x41a   :  { %v4550_v48 = vadd.f32 %v4549_v19, %v11285_v26  ;;  %v6531_v57 = vpop.eup %6530  ;;  %v4183_v52 = vmul.f32 0.6931472, %v6529_v17  ;;  %v4529_v2 = vadd.f32 %v4528_v34, %v4527_v13  ;;  %v4543_v54 = vadd.f32 %v4542_v21, %v4541_v9 }
 0x41b   :  { %v4657_v46 = vmul.f32 %v4276_v56, %v11157_v58  ;;  %v4926_v37 = vmul.f32 0.5, %v11116_v45  ;;  %v12865_v38 = vmax.f32 %v11210_v59, 0.0  ;;  %v4185_v47 = vmul.f32 0.6931472, %v6531_v57  ;;  %v12871_v57 = vld [vmem:[#allocation12_spill] sm:$0xff] }
 0x41c   :  { %v4538_v4 = vadd.f32 %v4537_v42, %v4536_v1  ;;  %v4551_v5 = vrot.slane %v4550_v48, 4  ;;  %v12866_v33 = vmax.f32 %v11230_v16, 0.0  ;;  %v4603_v58 = vadd.f32 %v4529_v2, %v11293_v20 }
 0x41d   :  { %v4277_v28 = vadd.f32 %v4217_v44, %v12865_v38  ;;  %v4544_v22 = vrot.slane %v4543_v54, 2  ;;  %v4962_v3 = vadd.f32 0.5, %v4908_v43  ;;  %v12867_v13 = vmax.f32 %v11234_v0, 0.0 }
 0x41e   :  { %v4260_v63 = vadd.f32 %v4183_v52, %v12866_v33  ;;  %v4604_v30 = vadd.f32 %v4538_v4, %v4369_v49  ;;  %v4552_v45 = vadd.f32 %v4551_v5, %v4550_v48  ;;  %v6533_v56 = vpop.eup %6532  ;;  %v4708_v61 = vrot.slane %v4603_v58, %v12599_v29  ;;  %v12874_v4 = vld [vmem:[#allocation45_spill] sm:$0xff] }
 0x41f   :  { %v4658_v26 = vmul.f32 %v4277_v28, %v11161_v15  ;;  %v4261_v9 = vadd.f32 %v4185_v47, %v12867_v13  ;;  %v4545_v1 = vadd.f32 %v4544_v22, %v4543_v54  ;;  %v4980_v23 = vadd.f32 0.5, %v4926_v37  ;;  %v6535_v16 = vpop.eup %6534  ;;  %v12872_v37 = vld [vmem:[#allocation39_spill] sm:$0xff]  ;;  %v12873_v28 = vld [vmem:[#allocation40_spill] sm:$0xff] }
 0x420   :  { %v4641_v59 = vmul.f32 %v4260_v63, %v11112_v36  ;;  %v4219_v20 = vmul.f32 0.6931472, %v6533_v56  ;;  %v4712_v43 = vrot.slane %v4604_v30, %v12599_v29  ;;  %v5016_v15 = vmul.f32 %v4962_v3, %v11000_v6 }
 0x421   :  { %v11348_v34 = vmul.f32 %v4261_v9, %v11123_v41  ;;  %v4221_v0 = vmul.f32 0.6931472, %v6535_v16  ;;  %v11353_v49 = vmul.f32 %v4708_v61, %v11302_v8  ;;  %v11355_v21 = vmul.f32 %v4708_v61, %v4639_v11  ;;  %v12879_v16 = vld [vmem:[#allocation73_spill] sm:$0xff] }
 0x422   :  { %v11357_v36 = vmul.f32 %v4708_v61, %v4657_v46  ;;  %v12869_v19 = vmax.f32 %v11238_v62, 0.0  ;;  %v11362_v44 = vmul.f32 %v4712_v43, %v11305_v39  ;;  %v11364_v41 = vmul.f32 %v4712_v43, %v4640_v31 }
 0x423   :  { %v11366_v42 = vmul.f32 %v4712_v43, %v4658_v26  ;;  %v4977_v6 = vadd.f32 0.5, %v11216_v50  ;;  %v12870_v48 = vmax.f32 %v11245_v53, 0.0  ;;  %v4801_v11 = vmul.f32 0.5, %v11353_v49 }
 0x424   :  { %12868 = vst [vmem:[#allocation64_spill] sm:$0xff] %v11357_v36  ;;  %v4278_v17 = vadd.f32 %v4219_v20, %v12869_v19  ;;  %v4819_v46 = vmul.f32 0.5, %v11355_v21  ;;  %v11375_v62 = vmul.f32 %v11221_v55, %v11091_v27  ;;  %v4837_v31 = vmul.f32 0.5, %v11357_v36 }
 0x425   :  { %v4279_v8 = vadd.f32 %v4221_v0, %v12870_v48  ;;  %v4370_v52 = vadd.f32 %v12739_v7, %v12871_v57  ;;  %6536 = vtanh.f32 %v4801_v11  ;;  %v4546_v53 = vrot.slane %v4545_v1, 1 }
 0x426   :  { %v4659_v39 = vmul.f32 %v4278_v17, %v11189_v18  ;;  %v5034_v2 = vmul.f32 %v4980_v23, %v11003_v12  ;;  %6538 = vtanh.f32 %v4819_v46  ;;  %v4802_v54 = vmul.f32 0.5, %v11362_v44  ;;  %v12875_v12 = vld [vmem:[#allocation41_spill] sm:$0xff] }
 0x427   :  { %v11382_v50 = vmul.f32 %v4279_v8, %v11193_v14  ;;  %v5340_v27 = vmul.f32 %v12872_v37, %v5016_v15  ;;  %v4553_v55 = vrot.slane %v4552_v45, 2  ;;  %v4820_v18 = vmul.f32 0.5, %v11364_v41 }
 0x428   :  { %v4547_v38 = vadd.f32 %v4546_v53, %v4545_v1  ;;  %v5358_v47 = vmul.f32 %v12873_v28, %v5034_v2  ;;  %v5339_v5 = vmul.f32 %v12874_v4, %v11147_v24  ;;  %v11392_v14 = vmul.f32 %v4977_v6, %v11094_v40  ;;  %v12876_v40 = vld [vmem:[#allocation55_spill] sm:$0xff]  ;;  %v12881_v6 = vld [vmem:[#allocation42_spill] sm:$0xff] }
 0x429   :  { %v4554_v33 = vadd.f32 %v4553_v55, %v4552_v45  ;;  %v5357_v63 = vmul.f32 %v12875_v12, %v11150_v60  ;;  %v4944_v58 = vmul.f32 0.5, %v11164_v32  ;;  %6540 = vtanh.f32 %v4837_v31  ;;  %v12877_v32 = vld [vmem:[#allocation111_spill] sm:$0xff] }
 0x42a   :  { %v4838_v22 = vmul.f32 0.5, %v11366_v42  ;;  %v4605_v3 = vadd.f32 %v4547_v38, %v4370_v52  ;;  %v5394_v26 = vpack.c.bf16 %v5358_v47, %v5340_v27  ;;  %6542 = vtanh.f32 %v4802_v54  ;;  %v12878_v1 = vld [vmem:[#allocation87_spill] sm:$0xff]  ;;  %v12882_v52 = vld [vmem:[#allocation110_spill] sm:$0xff]  ;;  %v12885_v38 = vld [vmem:[#allocation104_spill] sm:$0xff] }
 0x42b   :  { %v4555_v13 = vrot.slane %v4554_v33, 1  ;;  %v5393_v9 = vpack.c.bf16 %v5357_v63, %v5339_v5  ;;  %v4998_v30 = vadd.f32 0.5, %v4944_v58  ;;  %6544 = vtanh.f32 %v4820_v18  ;;  %v12883_v54 = vld [vmem:[#allocation15_spill] sm:$0xff]  ;;  %v12890_v58 = vld [vmem:[#allocation52_spill] sm:$0xff] }
 0x42c   :  { %v4716_v24 = vrot.slane %v4605_v3, %v12599_v29  ;;  %5665 = vmatprep.subr.bf16.mxu1 %v5394_v26  ;;  %v4371_v45 = vadd.f32 %v12739_v7, %v12876_v40  ;;  %v4906_v60 = vmul.f32 0.5, %v11226_v25  ;;  %v4924_v23 = vmul.f32 0.5, %v12878_v1  ;;  %v12884_v55 = vld [vmem:[#allocation43_spill] sm:$0xff] }
 0x42d   :  { %v4556_v56 = vadd.f32 %v4555_v13, %v4554_v33  ;;  %5666 = vmatpush1.bf16.msra.mxu1 %v5393_v9  ;;  %v5052_v61 = vmul.f32 %v4998_v30, %v12877_v32  ;;  %v4943_v20 = vmul.f32 0.5, %v12879_v16  ;;  %v12891_v3 = vld [vmem:[#allocation51_spill] sm:$0xff]  ;;  %v12892_v13 = vld [vmem:[#allocation46_spill] sm:$0xff] }
 0x42e   :  { %v11406_v43 = vmul.f32 %v4716_v24, %v11316_v10  ;;  %v11408_v15 = vmul.f32 %v4716_v24, %v4641_v59  ;;  %v11410_v0 = vmul.f32 %v4716_v24, %v4659_v39  ;;  %v4960_v19 = vadd.f32 0.5, %v4906_v60  ;;  %v12893_v24 = vld [vmem:[#allocation71_spill] sm:$0xff]  ;;  %v12896_v32 = vld [vmem:[#allocation90_spill] sm:$0xff] }
 0x42f   :  { %v4606_v17 = vadd.f32 %v4556_v56, %v4371_v45  ;;  %v5376_v48 = vmul.f32 %v12881_v6, %v5052_v61  ;;  %v4978_v25 = vadd.f32 0.5, %v4924_v23  ;;  %v4997_v8 = vadd.f32 0.5, %v4943_v20  ;;  %v6537_v11 = vpop.eup %6536  ;;  %v12895_v56 = vld [vmem:[#allocation61_spill] sm:$0xff]  ;;  %v12897_v20 = vld [vmem:[#allocation72_spill] sm:$0xff]  ;;  %v12898_v6 = vld [vmem:[#allocation102_spill] sm:$0xff] }
 0x430   :  { %12880 = vst [vmem:[#allocation47_spill] sm:$0xff] %v11410_v0  ;;  %v4803_v46 = vmul.f32 0.5, %v11406_v43  ;;  %v4821_v31 = vmul.f32 0.5, %v11408_v15  ;;  %v4839_v57 = vmul.f32 0.5, %v11410_v0  ;;  %v5014_v10 = vmul.f32 %v4960_v19, %v12882_v52  ;;  %v6539_v53 = vpop.eup %6538 }
 0x431   :  { %v4909_v59 = vmul.f32 0.5, %v6537_v11  ;;  %v4720_v39 = vrot.slane %v4606_v17, %v12599_v29  ;;  %v5412_v2 = vpack.c.bf16 %v5376_v48, %v5376_v48  ;;  %v5032_v37 = vmul.f32 %v4978_v25, %v12883_v54  ;;  %v12899_v25 = vld [vmem:[#allocation50_spill] sm:$0xff]  ;;  %v12900_v11 = vld [vmem:[#allocation28_spill] sm:$0xff] }
 0x432   :  { %v4927_v27 = vmul.f32 0.5, %v6539_v53  ;;  %6546 = vtanh.f32 %v4803_v46  ;;  %v5338_v18 = vmul.f32 %v12884_v55, %v5014_v10  ;;  %v5051_v28 = vmul.f32 %v4997_v8, %v12885_v38  ;;  %v12903_v10 = vld [vmem:[#allocation168_spill] sm:$0xff]  ;;  %v12908_v38 = vld [vmem:[#allocation166_spill] sm:$0xff] }
 0x433   :  { %v4963_v47 = vadd.f32 0.5, %v4909_v59  ;;  %6548 = vtanh.f32 %v4821_v31  ;;  %v11422_v4 = vmul.f32 %v4720_v39, %v11321_v51  ;;  %v11425_v5 = vmul.f32 %v4720_v39, %v11348_v34  ;;  %6048 = vmatprep.subr.msk.bf16.mxu1 %vm135_vm0, %v5412_v2  ;;  %v11428_v33 = vpop.eup %6540  ;;  %v12901_v31 = vld [vmem:[#allocation30_spill] sm:$0xff]  ;;  %v12904_v59 = vld [vmem:[#allocation27_spill] sm:$0xff]  ;;  %v12905_v2 = vld [vmem:[#allocation57_spill] sm:$0xff] }
 0x434   :  { %12888 = vst [vmem:[#allocation19_spill] sm:$0xff] %v11428_v33  ;;  %v4981_v12 = vadd.f32 0.5, %v4927_v27  ;;  %v11431_v63 = vmul.f32 %v4720_v39, %v11382_v50  ;;  %v11435_v26 = vadd.f32 %v12891_v3, %v12890_v58  ;;  %v5356_v9 = vmul.f32 %v12892_v13, %v5032_v37  ;;  %v11438_v30 = vpop.eup %6542  ;;  %v12894_v50 = vld [vmem:[#allocation54_spill] sm:$0xff]  ;;  %v12906_v54 = vld [vmem:[#allocation36_spill] sm:$0xff]  ;;  %v12907_v27 = vld [vmem:[#allocation59_spill] sm:$0xff] }
 0x435   :  { %12886 = vst [vmem:[#allocation92_spill] sm:$0xff] %v11422_v4  ;;  %12887 = vst [vmem:[#allocation170_spill] sm:$0xff] %v11425_v5  ;;  %6550 = vtanh.f32 %v4838_v22  ;;  %v4804_v51 = vmul.f32 0.5, %v11422_v4  ;;  %v4822_v34 = vmul.f32 0.5, %v11425_v5  ;;  %v5375_v40 = vmul.f32 %v12893_v24, %v5051_v28  ;;  %v11443_v45 = vpop.eup %6544  ;;  %v12913_v24 = vld [vmem:[#allocation116_spill] sm:$0xff]  ;;  %v12943_v5 = vld [vmem:[#allocation78_spill] sm:$0xff] }
 0x436   :  { %12889 = vst [vmem:[#allocation85_spill] sm:$0xff] %v11431_v63  ;;  %6552 = vtanh.f32 %v4839_v57  ;;  %v11447_v60 = vadd.f32 %v12891_v3, %v12894_v50  ;;  %v11451_v61 = vadd.f32 %v12896_v32, %v12895_v56  ;;  %v5392_v1 = vpack.c.bf16 %v5356_v9, %v5338_v18  ;;  %v12902_v57 = vld [vmem:[#allocation60_spill] sm:$0xff]  ;;  %v12914_v50 = vld [vmem:[#allocation33_spill] sm:$0xff] }
 0x437   :  { %v11454_v22 = vmul.f32 %v4963_v47, %v11353_v49  ;;  %v4840_v23 = vmul.f32 0.5, %v11431_v63  ;;  %v5411_v16 = vpack.c.bf16 %v5375_v40, %v5375_v40  ;;  %v5337_v19 = vmul.f32 %v12897_v20, %v11375_v62  ;;  %v12909_v47 = vld [vmem:[#allocation29_spill] sm:$0xff]  ;;  %v12916_v20 = vld [vmem:[#allocation120_spill] sm:$0xff] }
 0x438   :  { %v11460_v17 = vmul.f32 %v4981_v12, %v11355_v21  ;;  %6554 = vtanh.f32 %v4804_v51  ;;  %5622 = vmatprep.subr.bf16.mxu0 %v5392_v1  ;;  %v5355_v48 = vmul.f32 %v12898_v6, %v11392_v14  ;;  %v4942_v8 = vmul.f32 0.5, %v12899_v25  ;;  %v11503_v51 = vld [vmem:[%s12041_s1 + $0x58] sm:$0xff]   ;;  %v12915_v1 = vld [vmem:[#allocation56_spill] sm:$0xff] }
 0x439   :  { %6556 = vtanh.f32 %v4822_v34  ;;  %v5464_v49 = vsel %vm135_vm0, %v5411_v16, 0  ;;  %v11468_v46 = vadd.f32 %v12896_v32, %v12900_v11  ;;  %v11472_v62 = vadd.f32 %v12891_v3, %v12901_v31  ;;  %12911 = vst [vmem:[#allocation69_spill] sm:$0xff] %v11503_v51  ;;  %v12912_v34 = vld [vmem:[#allocation34_spill] sm:$0xff]  ;;  %v12917_v6 = vld [vmem:[#allocation88_spill] sm:$0xff] }
 0x43a   :  { %5668 = vmatpush1.bf16.msra.mxu1 %v5464_v49  ;;  %v5391_v21 = vpack.c.bf16 %v5355_v48, %v5337_v19  ;;  %v11476_v52 = vadd.f32 %v12891_v3, %v12902_v57  ;;  %v4996_v14 = vadd.f32 0.5, %v4942_v8  ;;  %v4941_v53 = vmul.f32 0.5, %v12903_v10  ;;  %v12910_v3 = vld [vmem:[#allocation63_spill] sm:$0xff]  ;;  %v12941_v33 = vld [vmem:[#allocation76_spill] sm:$0xff] }
 0x43b   :  { %6558 = vtanh.f32 %v4840_v23  ;;  %v11481_v39 = vadd.f32 %v12896_v32, %v12904_v59  ;;  %v11485_v37 = vadd.f32 %v12906_v54, %v12905_v2  ;;  %v11489_v55 = vadd.f32 %v12906_v54, %v12907_v27  ;;  %v12921_v59 = vld [vmem:[#allocation127_spill] sm:$0xff] }
 0x43c   :  { %v6547_v18 = vpop.eup %6546  ;;  %5623 = vmatpush1.bf16.msra.mxu0 %v5391_v21  ;;  %v5050_v28 = vmul.f32 %v4996_v14, %v12908_v38  ;;  %v11494_v12 = vadd.f32 %v12896_v32, %v12909_v47  ;;  %v4995_v58 = vadd.f32 0.5, %v4941_v53  ;;  %v11498_v13 = vadd.f32 %v12906_v54, %v12910_v3  ;;  %v12919_v21 = vld [vmem:[#allocation58_spill] sm:$0xff]  ;;  %v12933_v27 = vld [vmem:[#allocation35_spill] sm:$0xff] }
 0x43d   :  { %v6549_v9 = vpop.eup %6548  ;;  %6049 = vmatmul.mubr.msk.bf16.vlgmr.msra.gmra.mrb[204].mxu1 %vm2843_vm3, %v11503_v51  ;;  %v11509_v40 = vadd.f32 %v12913_v24, %v12912_v34  ;;  %v11513_v56 = vadd.f32 %v12913_v24, %v12914_v50  ;;  %v3866_v32 = vand.u32 2147483647, %v11485_v37  ;;  %v11518_v23 = vadd.f32 %v12913_v24, %v12915_v1  ;;  %v12924_v1 = vld [vmem:[#allocation67_spill] sm:$0xff] }
 0x43e   :  { %v4911_v16 = vmul.f32 0.5, %v6547_v18  ;;  %v5374_v19 = vmul.f32 %v12916_v20, %v5050_v28  ;;  %v5049_v48 = vmul.f32 %v4995_v58, %v12917_v6  ;;  %v3867_v25 = vand.u32 2147483647, %v11489_v55  ;;  %v12922_v58 = vld [vmem:[#allocation101_spill] sm:$0xff] }
 0x43f   :  { %v12918_v8 = vmov 0   ;;  %v11524_v49 = vpop.eup %6550  ;;  %v4929_v11 = vmul.f32 0.5, %v6549_v9  ;;  %v3920_v31 = vsub.f32 0.0, %v3866_v32  ;;  %v11528_v57 = vadd.f32 %v12913_v24, %v12919_v21  ;;  %v12923_v32 = vld [vmem:[#allocation100_spill] sm:$0xff] }
 0x440   :  { %5783 = vmatprep.mubr.bf16.mxu1 %v12918_v8  ;;  %v3868_v14 = vand.u32 2147483647, %v11498_v13  ;;  %v11531_v10 = vpop.eup %6552  ;;  %v5410_v53 = vpack.c.bf16 %v5374_v19, %v5374_v19  ;;  %v5373_v2 = vmul.f32 %v12921_v59, %v5049_v48  ;;  %v3921_v18 = vsub.f32 0.0, %v3867_v25 }
 0x441   :  { %12920 = vst [vmem:[#allocation94_spill] sm:$0xff] %v11531_v10  ;;  %v3988_v38 = vmul.f32 1.442695, %v3920_v31  ;;  %v11538_v3 = vadd.f32 %v12906_v54, %v12922_v58  ;;  %v4965_v34 = vadd.f32 0.5, %v4911_v16  ;;  %v11545_v20 = vadd.f32 %v12924_v1, %v12923_v32  ;;  %v12931_v32 = vld [vmem:[#allocation107_spill] sm:$0xff] }
 0x442   :  { %v3922_v47 = vsub.f32 0.0, %v3868_v14  ;;  %v11540_v9 = vpop.eup %6554  ;;  %6046 = vmatprep.subr.msk.bf16.mxu0 %vm135_vm0, %v5410_v53  ;;  %v5409_v24 = vpack.c.bf16 %v5373_v2, %v5373_v2  ;;  %v3990_v50 = vmul.f32 1.442695, %v3921_v18  ;;  %v4983_v6 = vadd.f32 0.5, %v4929_v11  ;;  %v12926_v53 = vld [vmem:[#allocation103_spill] sm:$0xff]  ;;  %v12927_v11 = vld [vmem:[#allocation62_spill] sm:$0xff] }
 0x443   :  { %v11547_v19 = vpop.eup %6556  ;;  %6560 = vpow2.f32 %v3988_v38  ;;  %v3869_v25 = vand.u32 2147483647, %v11538_v3  ;;  %v3884_v31 = vand.u32 2147483647, %v11545_v20  ;;  %v11557_v59 = vadd.f32 %v12924_v1, %v12926_v53  ;;  %v12928_v2 = vld [vmem:[#allocation68_spill] sm:$0xff] }
 0x444   :  { %v3992_v48 = vmul.f32 1.442695, %v3922_v47  ;;  %v5458_v54 = vsel %vm135_vm0, %v5409_v24, 0  ;;  %6562 = vpow2.f32 %v3990_v50  ;;  %v11561_v18 = vadd.f32 %v12928_v2, %v12927_v11  ;;  %v12929_v47 = vld [vmem:[#allocation113_spill] sm:$0xff]  ;;  %v12930_v24 = vld [vmem:[#allocation112_spill] sm:$0xff] }
 0x445   :  { %v11553_v21 = vpop.eup %6558  ;;  %5625 = vmatpush1.bf16.msra.mxu0 %v5458_v54  ;;  %v3923_v14 = vsub.f32 0.0, %v3869_v25  ;;  %v3938_v38 = vsub.f32 0.0, %v3884_v31  ;;  %v11565_v58 = vadd.f32 %v12928_v2, %v12929_v47  ;;  %v11569_v50 = vadd.f32 %v12924_v1, %v12930_v24 }
 0x446   :  { %12925 = vst [vmem:[#allocation20_spill] sm:$0xff] %v11553_v21  ;;  %6564 = vpow2.f32 %v3992_v48  ;;  %v11573_v48 = vadd.f32 %v12924_v1, %v12931_v32  ;;  %v11576_v25 = vmul.f32 %v4965_v34, %v11406_v43  ;;  %v11579_v54 = vmul.f32 %v4983_v6, %v11408_v15 }
 0x447   :  { %v3994_v53 = vmul.f32 1.442695, %v3923_v14  ;;  %v3885_v31 = vand.u32 2147483647, %v11557_v59  ;;  %v4024_v24 = vmul.f32 1.442695, %v3938_v38 }
 0x448   :  { %6047 = vmatmul.mubr.msk.bf16.vlgmr.msra.gmra.mrb[204].mxu0 %vm2843_vm3, %v11503_v51  ;;  %v3902_v1 = vand.u32 2147483647, %v11561_v18  ;;  %v3903_v43 = vand.u32 2147483647, %v11565_v58  ;;  %v3886_v15 = vand.u32 2147483647, %v11569_v50  ;;  %v11598_v51 = vadd.f32 %v12928_v2, %v12933_v27 }
 0x449   :  { %6566 = vpow2.f32 %v3994_v53  ;;  %v3939_v32 = vsub.f32 0.0, %v3885_v31  ;;  %5740 = vmatprep.mubr.bf16.mxu0 %v12918_v8  ;;  %v3887_v14 = vand.u32 2147483647, %v11573_v48  ;;  %v12932_v38 = vld [vmem:[#allocation122_spill] sm:$0xff]  ;;  %v12934_v8 = vld [vmem:[#allocation152_spill] sm:$0xff] }
 0x44a   :  { %6568 = vpow2.f32 %v4024_v24  ;;  %v3956_v6 = vsub.f32 0.0, %v3902_v1  ;;  %v3957_v16 = vsub.f32 0.0, %v3903_v43  ;;  %v3940_v47 = vsub.f32 0.0, %v3886_v15  ;;  %v12935_v24 = vld [vmem:[#allocation16_spill] sm:$0xff] }
 0x44b   :  { %v4026_v11 = vmul.f32 1.442695, %v3939_v32  ;;  %v11594_v28 = vadd.f32 %v12928_v2, %v12932_v38  ;;  %v3941_v31 = vsub.f32 0.0, %v3887_v14  ;;  %v4313_v0 = vadd.f32 %v12935_v24, %v12934_v8 }
 0x44c   :  { %v4060_v53 = vmul.f32 1.442695, %v3956_v6  ;;  %v4062_v43 = vmul.f32 1.442695, %v3957_v16  ;;  %v4028_v38 = vmul.f32 1.442695, %v3940_v47 }
 0x44d   :  { %v6561_v34 = vpop.eup %6560  ;;  %6570 = vpow2.f32 %v4026_v11  ;;  %v3904_v6 = vand.u32 2147483647, %v11594_v28  ;;  %v4030_v27 = vmul.f32 1.442695, %v3941_v31  ;;  %v3905_v2 = vand.u32 2147483647, %v11598_v51 }
 0x44e   :  { %v6563_v15 = vpop.eup %6562  ;;  %v4082_v63 = vadd.f32 1.0, %v6561_v34  ;;  %6572 = vpow2.f32 %v4060_v53  ;;  %v4390_v1 = vmul.f32 %v4313_v0, %v11435_v26  ;;  %v12936_v16 = vld [vmem:[#allocation80_spill] sm:$0xff]  ;;  %v12937_v53 = vld [vmem:[#allocation167_spill] sm:$0xff]  ;;  %v12938_v47 = vld [vmem:[#allocation98_spill] sm:$0xff] }
 0x44f   :  { %v4083_v36 = vadd.f32 1.0, %v6563_v15  ;;  %6574 = vpow2.f32 %v4062_v43  ;;  %v3958_v11 = vsub.f32 0.0, %v3904_v6  ;;  %v3959_v32 = vsub.f32 0.0, %v3905_v2  ;;  %v12939_v15 = vld [vmem:[#allocation74_spill] sm:$0xff]  ;;  %v12940_v43 = vld [vmem:[#allocation75_spill] sm:$0xff] }
 0x450   :  { %v6565_v14 = vpop.eup %6564  ;;  %6576 = vlog2.f32 %v4082_v63  ;;  %v4314_v34 = vadd.f32 %v12935_v24, %v12936_v16  ;;  %v4331_v10 = vadd.f32 %v12938_v47, %v12937_v53  ;;  %v4332_v31 = vadd.f32 %v12938_v47, %v12939_v15 }
 0x451   :  { %v4084_v8 = vadd.f32 1.0, %v6565_v14  ;;  %6578 = vlog2.f32 %v4083_v36  ;;  %v4064_v21 = vmul.f32 1.442695, %v3958_v11  ;;  %v4315_v63 = vadd.f32 %v12935_v24, %v12940_v43 }
 0x452   :  { %v4066_v6 = vmul.f32 1.442695, %v3959_v32  ;;  %v4391_v36 = vmul.f32 %v4314_v34, %v11447_v60  ;;  %v4408_v0 = vmul.f32 %v4331_v10, %v11451_v61  ;;  %v4409_v53 = vmul.f32 %v4332_v31, %v11468_v46  ;;  %v12942_v32 = vld [vmem:[#allocation44_spill] sm:$0xff]  ;;  %v12944_v31 = vld [vmem:[#allocation14_spill] sm:$0xff] }
 0x453   :  { %6580 = vlog2.f32 %v4084_v8  ;;  %v6567_v14 = vpop.eup %6566  ;;  %v4392_v8 = vmul.f32 %v4315_v63, %v11472_v62  ;;  %v4316_v43 = vadd.f32 %v12935_v24, %v12941_v33  ;;  %v4333_v34 = vadd.f32 %v12938_v47, %v12942_v32 }
 0x454   :  { %6582 = vpow2.f32 %v4028_v38  ;;  %v6569_v2 = vpop.eup %6568  ;;  %v4085_v16 = vadd.f32 1.0, %v6567_v14  ;;  %v4557_v15 = vadd.f32 %v4408_v0, %v4390_v1  ;;  %v4566_v38 = vadd.f32 %v4409_v53, %v4391_v36 }
 0x455   :  { %6584 = vpow2.f32 %v4030_v27  ;;  %v4100_v11 = vadd.f32 1.0, %v6569_v2  ;;  %v4334_v10 = vadd.f32 %v12938_v47, %v12943_v5  ;;  %v4393_v27 = vmul.f32 %v4316_v43, %v11476_v52 }
 0x456   :  { %6586 = vpow2.f32 %v4064_v21  ;;  %v4349_v63 = vadd.f32 %v12714_v35, %v12944_v31  ;;  %v12945_v21 = vld [vmem:[#allocation17_spill] sm:$0xff]  ;;  %v4410_v24 = vmul.f32 %v4333_v34, %v11481_v39 }
 0x457   :  { %6588 = vlog2.f32 %v4085_v16  ;;  %v6571_v14 = vpop.eup %6570  ;;  %v4350_v1 = vadd.f32 %v12714_v35, %v12945_v21  ;;  %v4411_v36 = vmul.f32 %v4334_v10, %v11494_v12 }
 0x458   :  { %6590 = vlog2.f32 %v4100_v11  ;;  %v6573_v0 = vpop.eup %6572  ;;  %v4101_v33 = vadd.f32 1.0, %v6571_v14  ;;  %v4426_v47 = vmul.f32 %v4349_v63, %v11509_v40  ;;  %v4575_v32 = vadd.f32 %v4410_v24, %v4392_v8 }
 0x459   :  { %6592 = vpow2.f32 %v4066_v6  ;;  %v6575_v2 = vpop.eup %6574  ;;  %v4118_v16 = vadd.f32 1.0, %v6573_v0  ;;  %v4427_v53 = vmul.f32 %v4350_v1, %v11513_v56  ;;  %v11635_v31 = vadd.f32 %v4411_v36, %v4393_v27  ;;  %v12947_v27 = vld [vmem:[#allocation124_spill] sm:$0xff] }
 0x45a   :  { %v6577_v11 = vpop.eup %6576  ;;  %6594 = vlog2.f32 %v4101_v33  ;;  %v4119_v43 = vadd.f32 1.0, %v6575_v2  ;;  %v4558_v34 = vsel %vm4431_vm4, %v4426_v47, 0.0  ;;  %v12946_v1 = vmax.f32 %v11485_v37, 0.0 }
 0x45b   :  { %v6579_v14 = vpop.eup %6578  ;;  %v4151_v6 = vmul.f32 0.6931472, %v6577_v11  ;;  %6596 = vlog2.f32 %v4118_v16  ;;  %v4567_v10 = vsel %vm4431_vm4, %v4427_v53, 0.0  ;;  %v4559_v5 = vadd.f32 %v4558_v34, %v4557_v15 }
 0x45c   :  { %v4153_v0 = vmul.f32 0.6931472, %v6579_v14  ;;  %6598 = vlog2.f32 %v4119_v43  ;;  %v4568_v63 = vadd.f32 %v4567_v10, %v4566_v38  ;;  %v3833_v8 = vmax.f32 %v11573_v48, 0.0 }
 0x45d   :  { %v6581_v21 = vpop.eup %6580  ;;  %v4244_v33 = vadd.f32 %v4151_v6, %v12946_v1  ;;  %v4351_v24 = vadd.f32 %v12714_v35, %v12947_v27  ;;  %v12948_v16 = vmax.f32 %v11489_v55, 0.0  ;;  %v4560_v11 = vrot.slane %v4559_v5, 4 }
 0x45e   :  { %v6583_v4 = vpop.eup %6582  ;;  %v4155_v2 = vmul.f32 0.6931472, %v6581_v21  ;;  %v4569_v14 = vrot.slane %v4568_v63, 4  ;;  %v12949_v37 = vmax.f32 %v11498_v13, 0.0  ;;  %v3851_v48 = vmax.f32 %v11598_v51, 0.0 }
 0x45f   :  { %v6585_v36 = vpop.eup %6584  ;;  %v4245_v47 = vadd.f32 %v4153_v0, %v12948_v16  ;;  %v4102_v53 = vadd.f32 1.0, %v6583_v4  ;;  %v11647_v15 = vmul.f32 %v4244_v33, %v11435_v26  ;;  %v4428_v34 = vmul.f32 %v4351_v24, %v11518_v23 }
 0x460   :  { %v6587_v43 = vpop.eup %6586  ;;  %v4246_v38 = vadd.f32 %v4155_v2, %v12949_v37  ;;  %v4103_v6 = vadd.f32 1.0, %v6585_v36  ;;  %v4561_v0 = vadd.f32 %v4560_v11, %v4559_v5  ;;  %v4570_v26 = vadd.f32 %v4569_v14, %v4568_v63  ;;  %v12953_v14 = vld [vmem:[#allocation145_spill] sm:$0xff] }
 0x461   :  { %v6589_v10 = vpop.eup %6588  ;;  %v11653_v21 = vmul.f32 %v4245_v47, %v11447_v60  ;;  %6600 = vlog2.f32 %v4102_v53  ;;  %v4120_v55 = vadd.f32 1.0, %v6587_v43  ;;  %v4576_v24 = vsel %vm4431_vm4, %v4428_v34, 0.0  ;;  %v12952_v43 = vld [vmem:[#allocation66_spill] sm:$0xff] }
 0x462   :  { %v6591_v4 = vpop.eup %6590  ;;  %v11656_v1 = vmul.f32 %v4246_v38, %v11472_v62  ;;  %v4157_v27 = vmul.f32 0.6931472, %v6589_v10  ;;  %6602 = vlog2.f32 %v4103_v6  ;;  %v4562_v2 = vrot.slane %v4561_v0, 2 }
 0x463   :  { %v6593_v33 = vpop.eup %6592  ;;  %v4187_v13 = vmul.f32 0.6931472, %v6591_v4  ;;  %6604 = vlog2.f32 %v4120_v55  ;;  %v12950_v36 = vmax.f32 %v11538_v3, 0.0  ;;  %v4571_v47 = vrot.slane %v4570_v26, 2 }
 0x464   :  { %v4121_v16 = vadd.f32 1.0, %v6593_v33  ;;  %v4577_v53 = vadd.f32 %v4576_v24, %v4575_v32  ;;  %v6595_v5 = vpop.eup %6594  ;;  %v12951_v11 = vmax.f32 %v11545_v20, 0.0  ;;  %v4372_v37 = vadd.f32 %v12739_v7, %v12952_v43 }
 0x465   :  { %v4247_v60 = vadd.f32 %v4157_v27, %v12950_v36  ;;  %v4563_v63 = vadd.f32 %v4562_v2, %v4561_v0  ;;  %v4352_v38 = vadd.f32 %v12714_v35, %v12953_v14  ;;  %v6597_v6 = vpop.eup %6596  ;;  %v4189_v3 = vmul.f32 0.6931472, %v6595_v5 }
 0x466   :  { %v4262_v62 = vadd.f32 %v4187_v13, %v12951_v11  ;;  %6606 = vlog2.f32 %v4121_v16  ;;  %v4572_v10 = vadd.f32 %v4571_v47, %v4570_v26  ;;  %v6599_v55 = vpop.eup %6598  ;;  %v4223_v4 = vmul.f32 0.6931472, %v6597_v6 }
 0x467   :  { %v11668_v34 = vmul.f32 %v4247_v60, %v11476_v52  ;;  %v4564_v20 = vrot.slane %v4563_v63, 1  ;;  %v4578_v27 = vrot.slane %v4577_v53, 4  ;;  %v12954_v33 = vmax.f32 %v11557_v59, 0.0  ;;  %v12956_v60 = vld [vmem:[#allocation117_spill] sm:$0xff] }
 0x468   :  { %v4643_v32 = vmul.f32 %v4262_v62, %v11451_v61  ;;  %v4225_v0 = vmul.f32 0.6931472, %v6599_v55  ;;  %v4573_v2 = vrot.slane %v4572_v10, 1  ;;  %v4429_v35 = vmul.f32 %v4352_v38, %v11528_v57 }
 0x469   :  { %v4263_v13 = vadd.f32 %v4189_v3, %v12954_v33  ;;  %v12955_v24 = vmax.f32 %v11561_v18, 0.0  ;;  %v4565_v36 = vadd.f32 %v4564_v20, %v4563_v63  ;;  %v4373_v26 = vadd.f32 %v12739_v7, %v12956_v60 }
 0x46a   :  { %v4579_v16 = vadd.f32 %v4578_v27, %v4577_v53  ;;  %v12957_v47 = vmax.f32 %v11565_v58, 0.0  ;;  %v4574_v11 = vadd.f32 %v4573_v2, %v4572_v10  ;;  %v4585_v59 = vsel %vm4431_vm4, %v4429_v35, 0.0 }
 0x46b   :  { %v4280_v52 = vadd.f32 %v4223_v4, %v12955_v24  ;;  %v4644_v61 = vmul.f32 %v4263_v13, %v11468_v46  ;;  %v6601_v62 = vpop.eup %6600  ;;  %v4607_v14 = vadd.f32 %v4565_v36, %v4372_v37  ;;  %v4586_v18 = vadd.f32 %v4585_v59, %v11635_v31 }
 0x46c   :  { %v4281_v5 = vadd.f32 %v4225_v0, %v12957_v47  ;;  %v4580_v38 = vrot.slane %v4579_v16, 2  ;;  %v6603_v63 = vpop.eup %6602  ;;  %v4191_v3 = vmul.f32 0.6931472, %v6601_v62  ;;  %v3850_v53 = vmax.f32 %v11594_v28, 0.0 }
 0x46d   :  { %v4661_v43 = vmul.f32 %v4280_v52, %v11509_v40  ;;  %v4608_v46 = vadd.f32 %v4574_v11, %v4373_v26  ;;  %v6605_v55 = vpop.eup %6604  ;;  %v4193_v58 = vmul.f32 0.6931472, %v6603_v63  ;;  %v4724_v10 = vrot.slane %v4607_v14, %v12599_v29 }
 0x46e   :  { %v4662_v6 = vmul.f32 %v4281_v5, %v11513_v56  ;;  %v4587_v4 = vrot.slane %v4586_v18, 4  ;;  %v4910_v20 = vmul.f32 0.5, %v11438_v30  ;;  %v12958_v40 = vmax.f32 %v11569_v50, 0.0 }
 0x46f   :  { %v4227_v27 = vmul.f32 0.6931472, %v6605_v55  ;;  %v4728_v31 = vrot.slane %v4608_v46, %v12599_v29  ;;  %v4581_v33 = vadd.f32 %v4580_v38, %v4579_v16  ;;  %v4265_v56 = vadd.f32 %v4193_v58, %v3833_v8  ;;  %v12963_v46 = vld [vmem:[#allocation125_spill] sm:$0xff] }
 0x470   :  { %v4264_v37 = vadd.f32 %v4191_v3, %v12958_v40  ;;  %v11694_v28 = vmul.f32 %v4724_v10, %v11647_v15  ;;  %v11696_v13 = vmul.f32 %v4724_v10, %v4643_v32  ;;  %v11698_v0 = vmul.f32 %v4724_v10, %v4661_v43  ;;  %v6607_v2 = vpop.eup %6606  ;;  %v12962_v3 = vld [vmem:[#allocation130_spill] sm:$0xff] }
 0x471   :  { %v4282_v35 = vadd.f32 %v4227_v27, %v3850_v53  ;;  %v11702_v50 = vmul.f32 %v4728_v31, %v11653_v21  ;;  %v11704_v24 = vmul.f32 %v4728_v31, %v4644_v61  ;;  %v11707_v52 = vmul.f32 %v4265_v56, %v11494_v12  ;;  %v12960_v12 = vld [vmem:[#allocation18_spill] sm:$0xff]  ;;  %v12965_v27 = vld [vmem:[#allocation84_spill] sm:$0xff] }
 0x472   :  { %v4645_v30 = vmul.f32 %v4264_v37, %v11481_v39  ;;  %v4229_v8 = vmul.f32 0.6931472, %v6607_v2  ;;  %v4928_v15 = vmul.f32 0.5, %v11443_v45  ;;  %v4805_v36 = vmul.f32 0.5, %v11694_v28  ;;  %v12959_v39 = vld [vmem:[#allocation165_spill] sm:$0xff] }
 0x473   :  { %v4663_v32 = vmul.f32 %v4282_v35, %v11518_v23  ;;  %v11713_v60 = vmul.f32 %v4728_v31, %v4662_v6  ;;  %v4374_v21 = vadd.f32 %v12739_v7, %v12959_v39  ;;  %v4806_v16 = vmul.f32 0.5, %v11702_v50 }
 0x474   :  { %v4283_v26 = vadd.f32 %v4229_v8, %v3851_v48  ;;  %v4588_v61 = vadd.f32 %v4587_v4, %v4586_v18  ;;  %v4375_v47 = vadd.f32 %v12739_v7, %v12960_v12  ;;  %v4823_v51 = vmul.f32 0.5, %v11696_v13  ;;  %v12961_v18 = vld [vmem:[#allocation128_spill] sm:$0xff]  ;;  %v12964_v4 = vld [vmem:[#allocation129_spill] sm:$0xff]  ;;  %v12972_v12 = vld [vmem:[#allocation170_spill] sm:$0xff] }
 0x475   :  { %v4824_v45 = vmul.f32 0.5, %v11704_v24  ;;  %v4582_v5 = vrot.slane %v4581_v33, 1  ;;  %v4964_v23 = vadd.f32 0.5, %v4910_v20  ;;  %v4841_v59 = vmul.f32 0.5, %v11698_v0 }
 0x476   :  { %v4664_v11 = vmul.f32 %v4283_v26, %v11528_v57  ;;  %v4589_v62 = vrot.slane %v4588_v61, 2  ;;  %v4982_v43 = vadd.f32 0.5, %v4928_v15  ;;  %6608 = vtanh.f32 %v4805_v36  ;;  %v12969_v26 = vld [vmem:[#allocation106_spill] sm:$0xff] }
 0x477   :  { %v4583_v14 = vadd.f32 %v4582_v5, %v4581_v33  ;;  %v5018_v38 = vmul.f32 %v4964_v23, %v11362_v44  ;;  %v5341_v63 = vmul.f32 %v12961_v18, %v11454_v22  ;;  %6610 = vtanh.f32 %v4806_v16  ;;  %v12974_v5 = vld [vmem:[#allocation70_spill] sm:$0xff] }
 0x478   :  { %v4590_v7 = vadd.f32 %v4589_v62, %v4588_v61  ;;  %v5036_v6 = vmul.f32 %v4982_v43, %v11364_v41  ;;  %v5359_v53 = vmul.f32 %v12962_v3, %v11460_v17  ;;  %6612 = vtanh.f32 %v4824_v45  ;;  %v12973_v45 = vld [vmem:[#allocation109_spill] sm:$0xff]  ;;  %v12975_v43 = vld [vmem:[#allocation142_spill] sm:$0xff] }
 0x479   :  { %v4609_v57 = vadd.f32 %v4583_v14, %v4374_v21  ;;  %v5342_v55 = vmul.f32 %v12963_v46, %v5018_v38  ;;  %v4946_v58 = vmul.f32 0.5, %v11524_v49  ;;  %v4912_v40 = vmul.f32 0.5, %v11540_v9  ;;  %v12966_v49 = vld [vmem:[#allocation132_spill] sm:$0xff]  ;;  %v12976_v38 = vld [vmem:[#allocation19_spill] sm:$0xff] }
 0x47a   :  { %v4591_v10 = vrot.slane %v4590_v7, 1  ;;  %v5360_v20 = vmul.f32 %v12964_v4, %v5036_v6  ;;  %v5395_v44 = vpack.c.bf16 %v5359_v53, %v5341_v63  ;;  %v4930_v41 = vmul.f32 0.5, %v11547_v19  ;;  %v12977_v63 = vld [vmem:[#allocation119_spill] sm:$0xff] }
 0x47b   :  { %v4732_v22 = vrot.slane %v4609_v57, %v12599_v29  ;;  %v5000_v37 = vadd.f32 0.5, %v4946_v58  ;;  %v11738_v17 = vmul.f32 %v12965_v27, %v11576_v25  ;;  %v4966_v56 = vadd.f32 0.5, %v4912_v40  ;;  %v12967_v25 = vld [vmem:[#allocation92_spill] sm:$0xff]  ;;  %v12982_v27 = vld [vmem:[#allocation94_spill] sm:$0xff] }
 0x47c   :  { %v4592_v31 = vadd.f32 %v4591_v10, %v4590_v7  ;;  %v5396_v33 = vpack.c.bf16 %v5360_v20, %v5342_v55  ;;  %v5361_v2 = vmul.f32 %v12966_v49, %v11579_v54  ;;  %v4984_v15 = vadd.f32 0.5, %v4930_v41  ;;  %v12968_v54 = vld [vmem:[#allocation108_spill] sm:$0xff]  ;;  %v12978_v7 = vld [vmem:[#allocation123_spill] sm:$0xff]  ;;  %v12979_v10 = vld [vmem:[#allocation126_spill] sm:$0xff]  ;;  %v11780_v20 = vpop.f32.mrb[196].mxu1 }
 0x47d   :  { %v11743_v35 = vmul.f32 %v4732_v22, %v11656_v1  ;;  %v11745_v48 = vmul.f32 %v4732_v22, %v4645_v30  ;;  %v11747_v9 = vmul.f32 %v4732_v22, %v4663_v32  ;;  %v5054_v8 = vmul.f32 %v5000_v37, %v11366_v42  ;;  %v12970_v30 = vld [vmem:[#allocation65_spill] sm:$0xff]  ;;  %v12971_v42 = vld [vmem:[#allocation134_spill] sm:$0xff]  ;;  %v11786_v37 = vpop.f32.mrb[197].mxu1 }
 0x47e   :  { %v4610_v19 = vadd.f32 %v4592_v31, %v4375_v47  ;;  %5708 = vmatprep.subr.bf16.mxu0 %v5396_v33  ;;  %v5020_v36 = vmul.f32 %v4966_v56, %v12967_v25  ;;  %v5397_v39 = vpack.c.bf16 %v5361_v2, %v11738_v17  ;;  %6614 = vtanh.f32 %v4823_v51  ;;  %v11791_v31 = vpop.f32.mrb[198].mxu1 }
 0x47f   :  { %v4842_v21 = vmul.f32 0.5, %v11713_v60  ;;  %5709 = vmatpush1.bf16.msra.mxu0 %v5395_v44  ;;  %v5256_v1 = vadd.f32 0.5, %v12968_v54  ;;  %v11756_v16 = vadd.f32 %v12970_v30, %v12969_v26  ;;  %v5378_v61 = vmul.f32 %v12971_v42, %v5054_v8  ;;  %v11793_v2 = vpop.f32.mrb[199].mxu1  ;;  %v12983_v8 = vld [vmem:[#allocation64_spill] sm:$0xff]  ;;  %v12984_v26 = vld [vmem:[#allocation150_spill] sm:$0xff]  ;;  %v12985_v42 = vld [vmem:[#allocation85_spill] sm:$0xff] }
 0x480   :  { %v4736_v32 = vrot.slane %v4610_v19, %v12599_v29  ;;  %v5038_v47 = vmul.f32 %v4984_v15, %v12972_v12  ;;  %v11763_v23 = vadd.f32 %v12974_v5, %v12973_v45  ;;  %v6609_v51 = vpop.eup %6608  ;;  %v4807_v62 = vmul.f32 0.5, %v11743_v35  ;;  %v12986_v12 = vld [vmem:[#allocation47_spill] sm:$0xff] }
 0x481   :  { %v5344_v14 = vmul.f32 %v12975_v43, %v5020_v36  ;;  %v4945_v18 = vmul.f32 0.5, %v12976_v38  ;;  %v5292_v6 = vmul.f32 %v12978_v7, %v12977_v63  ;;  %v6611_v3 = vpop.eup %6610  ;;  %6616 = vtanh.f32 %v4841_v59  ;;  %v12988_v38 = vld [vmem:[#allocation114_spill] sm:$0xff]  ;;  %v12989_v7 = vld [vmem:[#allocation151_spill] sm:$0xff] }
 0x482   :  { %v4825_v29 = vmul.f32 0.5, %v11745_v48  ;;  %v11772_v53 = vmul.f32 %v4736_v32, %v11668_v34  ;;  %v11775_v57 = vmul.f32 %v4736_v32, %v11707_v52  ;;  %v6613_v46 = vpop.eup %6612  ;;  %6618 = vtanh.f32 %v4842_v21  ;;  %v12980_v34 = vld [vmem:[#allocation149_spill] sm:$0xff] }
 0x483   :  { %v11777_v55 = vmul.f32 %v4736_v32, %v4664_v11  ;;  %v5414_v58 = vpack.c.bf16 %v5378_v61, %v5378_v61  ;;  %v5310_v4 = vmul.f32 %v5256_v1, %v12979_v10  ;;  %v4843_v44 = vmul.f32 0.5, %v11747_v9  ;;  %v12981_v11 = vld [vmem:[#allocation20_spill] sm:$0xff] }
 0x484   :  { %v4808_v59 = vmul.f32 0.5, %v11772_v53  ;;  %v4826_v40 = vmul.f32 0.5, %v11775_v57  ;;  %v5362_v22 = vmul.f32 %v12980_v34, %v5038_v47  ;;  %6620 = vtanh.f32 %v4807_v62 }
 0x485   :  { %6050 = vmatprep.subr.msk.bf16.mxu0 %vm135_vm0, %v5414_v58  ;;  %v4999_v52 = vadd.f32 0.5, %v4945_v18  ;;  %v4948_v41 = vmul.f32 0.5, %v12981_v11  ;;  %v4947_v17 = vmul.f32 0.5, %v12982_v27  ;;  %6622 = vtanh.f32 %v4825_v29 }
 0x486   :  { %v5398_v33 = vpack.c.bf16 %v5362_v22, %v5344_v14  ;;  %v4914_v56 = vmul.f32 0.5, %v6611_v3  ;;  %v4932_v49 = vmul.f32 0.5, %v6613_v46  ;;  %6624 = vtanh.f32 %v4808_v59  ;;  %v12987_v14 = vld [vmem:[#allocation118_spill] sm:$0xff]  ;;  %v12990_v3 = vld [vmem:[#allocation93_spill] sm:$0xff] }
 0x487   :  { %v5053_v19 = vmul.f32 %v4999_v52, %v12983_v8  ;;  %v5002_v15 = vadd.f32 0.5, %v4948_v41  ;;  %v5001_v25 = vadd.f32 0.5, %v4947_v17  ;;  %6626 = vtanh.f32 %v4826_v40  ;;  %v12991_v17 = vld [vmem:[#allocation154_spill] sm:$0xff]  ;;  %v12993_v8 = vld [vmem:[#allocation153_spill] sm:$0xff] }
 0x488   :  { %5751 = vmatprep.subr.bf16.mxu1 %v5398_v33  ;;  %v4968_v36 = vadd.f32 0.5, %v4914_v56  ;;  %v4986_v21 = vadd.f32 0.5, %v4932_v49  ;;  %v5075_v54 = vmul.f32 0.5, %v11756_v16  ;;  %v6615_v1 = vpop.eup %6614  ;;  %v5093_v45 = vmul.f32 0.5, %v11763_v23 }
 0x489   :  { %5752 = vmatpush1.bf16.msra.mxu1 %v5397_v39  ;;  %v5377_v32 = vmul.f32 %v12984_v26, %v5053_v19  ;;  %v5056_v61 = vmul.f32 %v5002_v15, %v12985_v42  ;;  %v5055_v47 = vmul.f32 %v5001_v25, %v12986_v12  ;;  %v11805_v18 = vadd.f32 %v12988_v38, %v12987_v14  ;;  %v12994_v25 = vld [vmem:[#allocation69_spill] sm:$0xff]  ;;  %v12995_v26 = vld [vmem:[#allocation155_spill] sm:$0xff] }
 0x48a   :  { %v5022_v62 = vmul.f32 %v4968_v36, %v11702_v50  ;;  %v5040_v43 = vmul.f32 %v4986_v21, %v11704_v24  ;;  %6628 = vtanh.f32 %v5075_v54  ;;  %v4913_v58 = vmul.f32 0.5, %v6609_v51 }
 0x48b   :  { %v5413_v63 = vpack.c.bf16 %v5377_v32, %v5377_v32  ;;  %v5380_v39 = vmul.f32 %v12989_v7, %v5056_v61  ;;  %v5379_v29 = vmul.f32 %v12990_v3, %v5055_v47  ;;  %6630 = vtanh.f32 %v5093_v45  ;;  %v11809_v46 = vpop.eup %6616  ;;  %v12998_v45 = vld [vmem:[#allocation158_spill] sm:$0xff] }
 0x48c   :  { %v4931_v10 = vmul.f32 0.5, %v6615_v1  ;;  %v5346_v59 = vmul.f32 %v5292_v6, %v5022_v62  ;;  %v5364_v40 = vmul.f32 %v5310_v4, %v5040_v43  ;;  %v6619_v50 = vpop.eup %6618  ;;  %v4844_v24 = vmul.f32 0.5, %v11777_v55  ;;  %v12992_v4 = vld [vmem:[#allocation156_spill] sm:$0xff] }
 0x48d   :  { %v5470_v34 = vsel %vm135_vm0, %v5413_v63, 0  ;;  %v5416_v22 = vpack.c.bf16 %v5380_v39, %v5380_v39  ;;  %v5415_v52 = vpack.c.bf16 %v5379_v29, %v5379_v29  ;;  %v5112_v41 = vmul.f32 0.5, %v11805_v18 }
 0x48e   :  { %5711 = vmatpush1.bf16.msra.mxu0 %v5470_v34  ;;  %v5400_v11 = vpack.c.bf16 %v5364_v40, %v5346_v59  ;;  %v6621_v27 = vpop.eup %6620  ;;  %6632 = vtanh.f32 %v4843_v44  ;;  %v11818_v6 = vadd.f32 %v12970_v30, %v12991_v17  ;;  %v11822_v33 = vadd.f32 %v12974_v5, %v12992_v4  ;;  %v11865_v4 = vpop.permute.xlu1 %5428 }
 0x48f   :  { %6052 = vmatprep.subr.msk.bf16.mxu1 %vm135_vm0, %v5416_v22  ;;  %v5476_v51 = vsel %vm135_vm0, %v5415_v52, 0  ;;  %v6623_v56 = vpop.eup %6622  ;;  %v4967_v49 = vadd.f32 0.5, %v4913_v58  ;;  %6634 = vtanh.f32 %v5112_v41  ;;  %v11826_v44 = vadd.f32 %v12970_v30, %v12993_v8  ;;  %v12996_v30 = vld [vmem:[#allocation115_spill] sm:$0xff] }
 0x490   :  { %5754 = vmatpush1.bf16.msra.mxu1 %v5476_v51  ;;  %5794 = vmatprep.subr.bf16.mxu0 %v5400_v11  ;;  %v6625_v19 = vpop.eup %6624  ;;  %v4985_v15 = vadd.f32 0.5, %v4931_v10  ;;  %6636 = vtanh.f32 %v4844_v24  ;;  %v5078_v36 = vmul.f32 0.5, %v11818_v6  ;;  %v5096_v21 = vmul.f32 0.5, %v11822_v33  ;;  %v11854_v24 = vpop.permute.xlu0 %5423  ;;  %v12999_v11 = vld [vmem:[#allocation157_spill] sm:$0xff] }
 0x491   :  { %6051 = vmatmul.mubr.msk.bf16.vlgmr.msra.gmra.mrb[208].mxu0 %vm2843_vm3, %v12994_v25  ;;  %v6627_v54 = vpop.eup %6626  ;;  %v4915_v1 = vmul.f32 0.5, %v6621_v27  ;;  %v11834_v32 = vadd.f32 %v12974_v5, %v12995_v26  ;;  %v5077_v42 = vmul.f32 0.5, %v11826_v44  ;;  %v11839_v61 = vadd.f32 %v12988_v38, %v12996_v30 }
 0x492   :  { %v12997_v12 = vmov 0   ;;  %v4950_v47 = vmul.f32 0.5, %v6619_v50  ;;  %6638 = vtanh.f32 %v5078_v36  ;;  %v11846_v62 = vadd.f32 %v12988_v38, %v12998_v45 }
 0x493   :  { %5826 = vmatprep.mubr.bf16.mxu0 %v12997_v12  ;;  %6053 = vmatmul.mubr.msk.bf16.vlgmr.msra.gmra.mrb[208].mxu1 %vm2843_vm3, %v12994_v25  ;;  %6640 = vtanh.f32 %v5096_v21  ;;  %v5095_v5 = vmul.f32 0.5, %v11834_v32  ;;  %v5111_v14 = vmul.f32 0.5, %v11839_v61  ;;  %v5021_v7 = vmul.f32 %v4967_v49, %v11694_v28 }
 0x494   :  { %v6629_v43 = vpop.eup %6628  ;;  %5869 = vmatprep.mubr.bf16.mxu1 %v12997_v12  ;;  %v5039_v39 = vmul.f32 %v4985_v15, %v11696_v13  ;;  %6642 = vtanh.f32 %v5077_v42  ;;  %v4933_v29 = vmul.f32 0.5, %v6623_v56  ;;  %v4969_v58 = vadd.f32 0.5, %v4915_v1 }
 0x495   :  { %v6631_v63 = vpop.eup %6630  ;;  %v5183_v3 = vmul.f32 0.5, %v6629_v43  ;;  %6644 = vtanh.f32 %v5095_v5  ;;  %v5004_v40 = vadd.f32 0.5, %v4950_v47  ;;  %v5114_v50 = vmul.f32 0.5, %v11846_v62 }
 0x496   :  { %v5201_v10 = vmul.f32 0.5, %v6631_v63  ;;  %6646 = vtanh.f32 %v5111_v14  ;;  %v4916_v22 = vmul.f32 0.5, %v6625_v19  ;;  %v4934_v52 = vmul.f32 0.5, %v6627_v54 }
 0x497   :  { %v5237_v59 = vadd.f32 0.5, %v5183_v3  ;;  %v11858_v28 = vadd.f32 %v12988_v38, %v12999_v11  ;;  %6648 = vtanh.f32 %v5114_v50  ;;  %v5528_v27 = vadd.f32 %v11780_v20, %v11854_v24 }
 0x498   :  { %v5255_v34 = vadd.f32 0.5, %v5201_v10  ;;  %v6633_v13 = vpop.eup %6632  ;;  %v5530_v51 = vadd.f32 %v11786_v37, %v11854_v24  ;;  %v4987_v56 = vadd.f32 0.5, %v4933_v29  ;;  %v4949_v8 = vmul.f32 0.5, %v11809_v46 }
 0x499   :  { %v5291_v41 = vmul.f32 %v5237_v59, %v11756_v16  ;;  %v6635_v17 = vpop.eup %6634  ;;  %v5113_v38 = vmul.f32 0.5, %v11858_v28  ;;  %5880 = vst [vmem:[%s12043_s3] sm:$0xff] %v5528_v27  ;;  %v5532_v20 = vadd.f32 %v11791_v31, %v11865_v4  ;;  %v4970_v46 = vadd.f32 0.5, %v4916_v22 }
 0x49a   :  { %v5309_v49 = vmul.f32 %v5255_v34, %v11763_v23  ;;  %v6637_v19 = vpop.eup %6636  ;;  %v5220_v16 = vmul.f32 0.5, %v6635_v17  ;;  %5881 = vst [vmem:[%s12043_s3 + $0x8] sm:$0xff] %v5530_v51  ;;  %v5534_v23 = vadd.f32 %v11793_v2, %v11865_v4  ;;  %v4988_v36 = vadd.f32 0.5, %v4934_v52 }
 0x49b   :  { %v5345_v15 = vmul.f32 %v5291_v41, %v5021_v7  ;;  %6650 = vtanh.f32 %v5113_v38  ;;  %v5058_v54 = vmul.f32 %v5004_v40, %v11713_v60  ;;  %5898 = vst [vmem:[%s12043_s3 + $0x90] sm:$0x1] %v5532_v20  ;;  %v5023_v26 = vmul.f32 %v4969_v58, %v11743_v35 }
 0x49c   :  { %v5363_v37 = vmul.f32 %v5309_v49, %v5039_v39  ;;  %v6639_v21 = vpop.eup %6638  ;;  %v5274_v1 = vadd.f32 0.5, %v5220_v16  ;;  %5899 = vst [vmem:[%s12043_s3 + $0x98] sm:$0x1] %v5534_v23  ;;  %v4952_v30 = vmul.f32 0.5, %v6637_v19  ;;  %v5041_v47 = vmul.f32 %v4987_v56, %v11745_v48 }
 0x49d   :  { %v6641_v31 = vpop.eup %6640  ;;  %v5186_v42 = vmul.f32 0.5, %v6639_v21  ;;  %v5003_v43 = vadd.f32 0.5, %v4949_v8  ;;  %v5024_v14 = vmul.f32 %v4970_v46, %v11772_v53  ;;  %v5042_v63 = vmul.f32 %v4988_v36, %v11775_v57 }
 0x49e   :  { %v5399_v2 = vpack.c.bf16 %v5363_v37, %v5345_v15  ;;  %v6643_v12 = vpop.eup %6642  ;;  %v5328_v60 = vmul.f32 %v5274_v1, %v11805_v18  ;;  %v5204_v45 = vmul.f32 0.5, %v6641_v31  ;;  %v4951_v10 = vmul.f32 0.5, %v6633_v13 }
 0x49f   :  { %v6645_v5 = vpop.eup %6644  ;;  %v5240_v7 = vadd.f32 0.5, %v5186_v42  ;;  %v5185_v39 = vmul.f32 0.5, %v6643_v12  ;;  %v5006_v18 = vadd.f32 0.5, %v4952_v30  ;;  %v5057_v53 = vmul.f32 %v5003_v43, %v11698_v0 }
 0x4a0   :  { %5795 = vmatpush1.bf16.msra.mxu0 %v5399_v2  ;;  %v6647_v3 = vpop.eup %6646  ;;  %v5382_v35 = vmul.f32 %v5328_v60, %v5058_v54  ;;  %v5258_v29 = vadd.f32 0.5, %v5204_v45  ;;  %v5203_v58 = vmul.f32 0.5, %v6645_v5  ;;  %v5005_v51 = vadd.f32 0.5, %v4951_v10 }
 0x4a1   :  { %v5294_v59 = vmul.f32 %v5240_v7, %v11818_v6  ;;  %v5239_v48 = vadd.f32 0.5, %v5185_v39  ;;  %v5219_v40 = vmul.f32 0.5, %v6647_v3  ;;  %v6649_v50 = vpop.eup %6648 }
 0x4a2   :  { %v5418_v34 = vpack.c.bf16 %v5382_v35, %v5382_v35  ;;  %v5312_v22 = vmul.f32 %v5258_v29, %v11822_v33  ;;  %v5257_v52 = vadd.f32 0.5, %v5203_v58  ;;  %v5222_v27 = vmul.f32 0.5, %v6649_v50 }
 0x4a3   :  { %v5348_v57 = vmul.f32 %v5294_v59, %v5024_v14  ;;  %v5293_v11 = vmul.f32 %v5239_v48, %v11826_v44  ;;  %v5273_v41 = vadd.f32 0.5, %v5219_v40  ;;  %v5060_v33 = vmul.f32 %v5006_v18, %v11777_v55 }
 0x4a4   :  { %6054 = vmatprep.subr.msk.bf16.mxu0 %vm135_vm0, %v5418_v34  ;;  %v5366_v13 = vmul.f32 %v5312_v22, %v5042_v63  ;;  %v5311_v6 = vmul.f32 %v5257_v52, %v11834_v32  ;;  %v5276_v8 = vadd.f32 0.5, %v5222_v27  ;;  %v5059_v20 = vmul.f32 %v5005_v51, %v11747_v9  ;;  %v6658_v9 = vld [vmem:[%s12041_s1 + $0x58] sm:$0xff]  }
 0x4a5   :  { %v6651_v17 = vpop.eup %6650  ;;  %v5347_v56 = vmul.f32 %v5293_v11, %v5023_v26  ;;  %v5327_v49 = vmul.f32 %v5273_v41, %v11839_v61 }
 0x4a6   :  { %v5402_v38 = vpack.c.bf16 %v5366_v13, %v5348_v57  ;;  %v5365_v0 = vmul.f32 %v5311_v6, %v5041_v47  ;;  %v5221_v19 = vmul.f32 0.5, %v6651_v17  ;;  %v5330_v44 = vmul.f32 %v5276_v8, %v11846_v62 }
 0x4a7   :  { %v5381_v15 = vmul.f32 %v5327_v49, %v5057_v53 }
 0x4a8   :  { %5837 = vmatprep.subr.bf16.mxu1 %v5402_v38  ;;  %v5401_v16 = vpack.c.bf16 %v5365_v0, %v5347_v56  ;;  %v5275_v23 = vadd.f32 0.5, %v5221_v19  ;;  %v5384_v37 = vmul.f32 %v5330_v44, %v5060_v33 }
 0x4a9   :  { %v5417_v32 = vpack.c.bf16 %v5381_v15, %v5381_v15 }
 0x4aa   :  { %5838 = vmatpush1.bf16.msra.mxu1 %v5401_v16  ;;  %v5329_v46 = vmul.f32 %v5275_v23, %v11858_v28  ;;  %v5420_v55 = vpack.c.bf16 %v5384_v37, %v5384_v37 }
 0x4ab   :  { %v5482_v61 = vsel %vm135_vm0, %v5417_v32, 0 }
 0x4ac   :  { %5797 = vmatpush1.bf16.msra.mxu0 %v5482_v61  ;;  %v5383_v36 = vmul.f32 %v5329_v46, %v5059_v20  ;;  %6056 = vmatprep.subr.msk.bf16.mxu1 %vm135_vm0, %v5420_v55 }
 0x4ae   :  { %v5419_v21 = vpack.c.bf16 %v5383_v36, %v5383_v36 }
 0x4af   :  { %6055 = vmatmul.mubr.msk.bf16.vlgmr.msra.gmra.mrb[212].mxu0 %vm2843_vm3, %v12994_v25 }
 0x4b0   :  { %v5488_v62 = vsel %vm135_vm0, %v5419_v21, 0 }
 0x4b1   :  { %5840 = vmatpush1.bf16.msra.mxu1 %v5488_v62 }
 0x4b4   :  { %6057 = vmatmul.mubr.msk.bf16.vlgmr.msra.gmra.mrb[212].mxu1 %vm2843_vm3, %v6658_v9 }
 0x4b8   :  { %v5613_v28 = vpop.f32.mrb[200].mxu1 }
 0x4b9   :  { %v5614_v54 = vadd.f32 %v5613_v28, %v11854_v24  ;;  %v5615_v1 = vpop.f32.mrb[201].mxu1 }
 0x4ba   :  { %v5616_v31 = vadd.f32 %v5615_v1, %v11854_v24  ;;  %v5617_v26 = vpop.f32.mrb[202].mxu1 }
 0x4bb   :  { %5884 = vst [vmem:[%s12043_s3 + $0x20] sm:$0xff] %v5614_v54  ;;  %v5618_v25 = vadd.f32 %v5617_v26, %v11865_v4  ;;  %v5619_v2 = vpop.f32.mrb[203].mxu1 }
 0x4bc   :  { %5885 = vst [vmem:[%s12043_s3 + $0x28] sm:$0xff] %v5616_v31  ;;  %v5620_v42 = vadd.f32 %v5619_v2, %v11865_v4 }
 0x4bd   :  { %5902 = vst [vmem:[%s12043_s3 + $0xb0] sm:$0x1] %v5618_v25 }
 0x4be   :  { %5903 = vst [vmem:[%s12043_s3 + $0xb8] sm:$0x1] %v5620_v42 }
 0x4c8   :  { %v5570_v30 = vpop.f32.mrb[200].mxu0 }
 0x4c9   :  { %v5571_v12 = vadd.f32 %v5570_v30, %v11854_v24  ;;  %v5572_v47 = vpop.f32.mrb[201].mxu0 }
 0x4ca   :  { %v5573_v60 = vadd.f32 %v5572_v47, %v11854_v24  ;;  %v5574_v45 = vpop.f32.mrb[202].mxu0 }
 0x4cb   :  { %5882 = vst [vmem:[%s12043_s3 + $0x10] sm:$0xff] %v5571_v12  ;;  %v5575_v43 = vadd.f32 %v5574_v45, %v11865_v4  ;;  %v5576_v5 = vpop.f32.mrb[203].mxu0 }
 0x4cc   :  { %5883 = vst [vmem:[%s12043_s3 + $0x18] sm:$0xff] %v5573_v60  ;;  %v5577_v14 = vadd.f32 %v5576_v5, %v11865_v4 }
 0x4cd   :  { %5900 = vst [vmem:[%s12043_s3 + $0xa0] sm:$0x1] %v5575_v43 }
 0x4ce   :  { %5901 = vst [vmem:[%s12043_s3 + $0xa8] sm:$0x1] %v5577_v14 }
 0x510   :  { %v5699_v63 = vpop.f32.mrb[204].mxu1 }
 0x511   :  { %v5700_v7 = vadd.f32 %v5699_v63, %v11854_v24  ;;  %v5701_v39 = vpop.f32.mrb[205].mxu1 }
 0x512   :  { %v5702_v3 = vadd.f32 %v5701_v39, %v11854_v24  ;;  %v5703_v35 = vpop.f32.mrb[206].mxu1 }
 0x513   :  { %5888 = vst [vmem:[%s12043_s3 + $0x40] sm:$0xff] %v5700_v7  ;;  %v5704_v29 = vadd.f32 %v5703_v35, %v11865_v4  ;;  %v5705_v58 = vpop.f32.mrb[207].mxu1 }
 0x514   :  { %5889 = vst [vmem:[%s12043_s3 + $0x48] sm:$0xff] %v5702_v3  ;;  %v5706_v10 = vadd.f32 %v5705_v58, %v11865_v4 }
 0x515   :  { %5906 = vst [vmem:[%s12043_s3 + $0xd0] sm:$0x1] %v5704_v29 }
 0x516   :  { %5907 = vst [vmem:[%s12043_s3 + $0xd8] sm:$0x1] %v5706_v10 }
 0x51b   :  { %v5656_v59 = vpop.f32.mrb[204].mxu0 }
 0x51c   :  { %v5657_v48 = vadd.f32 %v5656_v59, %v11854_v24  ;;  %v5658_v40 = vpop.f32.mrb[205].mxu0 }
 0x51d   :  { %v5659_v18 = vadd.f32 %v5658_v40, %v11854_v24  ;;  %v5660_v50 = vpop.f32.mrb[206].mxu0 }
 0x51e   :  { %5886 = vst [vmem:[%s12043_s3 + $0x30] sm:$0xff] %v5657_v48  ;;  %v5661_v34 = vadd.f32 %v5660_v50, %v11865_v4  ;;  %v5662_v22 = vpop.f32.mrb[207].mxu0 }
 0x51f   :  { %5887 = vst [vmem:[%s12043_s3 + $0x38] sm:$0xff] %v5659_v18  ;;  %v5663_v52 = vadd.f32 %v5662_v22, %v11865_v4 }
 0x520   :  { %5904 = vst [vmem:[%s12043_s3 + $0xc0] sm:$0x1] %v5661_v34 }
 0x521   :  { %5905 = vst [vmem:[%s12043_s3 + $0xc8] sm:$0x1] %v5663_v52 }
 0x564   :  { %v5742_v53 = vpop.f32.mrb[208].mxu0 }
 0x565   :  { %v5743_v57 = vadd.f32 %v5742_v53, %v11854_v24  ;;  %v5744_v11 = vpop.f32.mrb[209].mxu0 }
 0x566   :  { %v5745_v41 = vadd.f32 %v5744_v11, %v11854_v24  ;;  %v5746_v27 = vpop.f32.mrb[210].mxu0  ;;  %v5785_v13 = vpop.f32.mrb[208].mxu1 }
 0x567   :  { %5890 = vst [vmem:[%s12043_s3 + $0x50] sm:$0xff] %v5743_v57  ;;  %v5747_v6 = vadd.f32 %v5746_v27, %v11865_v4  ;;  %v5748_v51 = vpop.f32.mrb[211].mxu0  ;;  %v5786_v17 = vadd.f32 %v5785_v13, %v11854_v24  ;;  %v5787_v56 = vpop.f32.mrb[209].mxu1 }
 0x568   :  { %5891 = vst [vmem:[%s12043_s3 + $0x58] sm:$0xff] %v5745_v41  ;;  %v5749_v49 = vadd.f32 %v5748_v51, %v11865_v4  ;;  %v5788_v33 = vadd.f32 %v5787_v56, %v11854_v24  ;;  %v5789_v8 = vpop.f32.mrb[210].mxu1 }
 0x569   :  { %5908 = vst [vmem:[%s12043_s3 + $0xe0] sm:$0x1] %v5747_v6  ;;  %5892 = vst [vmem:[%s12043_s3 + $0x60] sm:$0xff] %v5786_v17  ;;  %v5790_v38 = vadd.f32 %v5789_v8, %v11865_v4  ;;  %v5791_v0 = vpop.f32.mrb[211].mxu1 }
 0x56a   :  { %5909 = vst [vmem:[%s12043_s3 + $0xe8] sm:$0x1] %v5749_v49  ;;  %5893 = vst [vmem:[%s12043_s3 + $0x68] sm:$0xff] %v5788_v33  ;;  %v5792_v19 = vadd.f32 %v5791_v0, %v11865_v4 }
 0x56b   :  { %5910 = vst [vmem:[%s12043_s3 + $0xf0] sm:$0x1] %v5790_v38 }
 0x56c   :  { %5911 = vst [vmem:[%s12043_s3 + $0xf8] sm:$0x1] %v5792_v19 }
 0x582   :  { %v5828_v15 = vpop.f32.mrb[212].mxu0 }
 0x583   :  { %v5829_v44 = vadd.f32 %v5828_v15, %v11854_v24  ;;  %v5830_v16 = vpop.f32.mrb[213].mxu0 }
 0x584   :  { %v5831_v20 = vadd.f32 %v5830_v16, %v11854_v24  ;;  %v5832_v23 = vpop.f32.mrb[214].mxu0 }
 0x585   :  { %5894 = vst [vmem:[%s12043_s3 + $0x70] sm:$0xff] %v5829_v44  ;;  %v5833_v32 = vadd.f32 %v5832_v23, %v11865_v4  ;;  %v5834_v37 = vpop.f32.mrb[215].mxu0 }
 0x586   :  { %5895 = vst [vmem:[%s12043_s3 + $0x78] sm:$0xff] %v5831_v20  ;;  %v5835_v46 = vadd.f32 %v5834_v37, %v11865_v4 }
 0x587   :  { %5912 = vst [vmem:[%s12043_s3 + $0x100] sm:$0x1] %v5833_v32  ;;  %v5871_v61 = vpop.f32.mrb[212].mxu1 }
 0x588   :  { %5913 = vst [vmem:[%s12043_s3 + $0x108] sm:$0x1] %v5835_v46  ;;  %v5872_v55 = vadd.f32 %v5871_v61, %v11854_v24  ;;  %v5873_v36 = vpop.f32.mrb[213].mxu1 }
 0x589   :  { %v5874_v21 = vadd.f32 %v5873_v36, %v11854_v24  ;;  %v5875_v62 = vpop.f32.mrb[214].mxu1 }
 0x58a   :  { %5896 = vst [vmem:[%s12043_s3 + $0x80] sm:$0xff] %v5872_v55  ;;  %v5876_v9 = vadd.f32 %v5875_v62, %v11865_v4  ;;  %v5877_v28 = vpop.f32.mrb[215].mxu1 }
 0x58b   :  { %5897 = vst [vmem:[%s12043_s3 + $0x88] sm:$0xff] %v5874_v21  ;;  %v5878_v54 = vadd.f32 %v5877_v28, %v11865_v4 }
 0x58c   :  { %5914 = vst [vmem:[%s12043_s3 + $0x110] sm:$0x1] %v5876_v9 }
 0x58d   :  { %5915 = vst [vmem:[%s12043_s3 + $0x118] sm:$0x1] %v5878_v54 }

</bundles_post_ra>
